<compile_context>
chip_gen: v5e
topology: v5e:2x2
jax: 0.10.0
libtpu: 0.0.40
codegen_flags: <defaults>
</compile_context>

<pallas_src>
import functools
import math

import jax
import jax.numpy as jnp
from jax.experimental import pallas as pl
from jax.experimental.pallas import tpu as pltpu

EPS = 1e-6
# Explicit scoped-VMEM budget: larger than the 16-32 MiB defaults, still safe on
# v7x (64 MiB physical) and comfortable on v5e/v6e (128 MiB physical).
VMEM_LIMIT_BYTES = 48 * 1024 * 1024


def _compiler_params(dimension_semantics):
    return pltpu.CompilerParams(
        dimension_semantics=dimension_semantics,
        vmem_limit_bytes=VMEM_LIMIT_BYTES,
    )


def _row_spec(row_tile, d):
    return pl.BlockSpec((row_tile, d), lambda i: (i, 0))


def _const_spec(shape):
    # Constant block index: tile is fetched once and revisited across the row grid.
    # TODO(synk): for very large d_model, single-buffer these (pl.Buffered(1)) and/or
    # tile the N / K dims as extra "arbitrary" grid axes so weight tiles stay small
    # enough for v7x's 64 MiB VMEM.
    zeros = (0,) * len(shape)
    return pl.BlockSpec(shape, lambda i: zeros)


# ---------------------------------------------------------------------------
# Kernels
# ---------------------------------------------------------------------------

def _layernorm_torch(h, gamma, beta):
    """LayerNorm exactly as the PyTorch module: unbiased std (N-1), eps added to std."""
    d = h.shape[-1]
    mean = jnp.mean(h, axis=-1, keepdims=True)
    diff = h - mean
    var_unbiased = jnp.sum(diff * diff, axis=-1, keepdims=True) * (1.0 / (d - 1))
    inv = pl.reciprocal(jnp.sqrt(var_unbiased) + EPS, approx=True)   # EUP slot
    return gamma * diff * inv + beta


def _add_pe_kernel(x_ref, pe_ref, o_ref):
    # x block (1, ts, D); pe block (ts, D); broadcast add in f32.
    o_ref[...] = (x_ref[...].astype(jnp.float32)
                  + pe_ref[...].astype(jnp.float32)).astype(o_ref.dtype)


def _qkv_kernel(x_ref, wq_ref, wk_ref, wv_ref, q_ref, k_ref, v_ref):
    # Matmul operands stay in their stored dtype (bf16 on the fast path), f32 accum.
    x = x_ref[...]
    q_ref[...] = jnp.dot(x, wq_ref[...],
                         preferred_element_type=jnp.float32).astype(q_ref.dtype)
    k_ref[...] = jnp.dot(x, wk_ref[...],
                         preferred_element_type=jnp.float32).astype(k_ref.dtype)
    v_ref[...] = jnp.dot(x, wv_ref[...],
                         preferred_element_type=jnp.float32).astype(v_ref.dtype)


def _attention_kernel(q_ref, k_ref, v_ref, o_ref, *, n_heads, inv_scale):
    # Blocks: q (1, tq, D); k, v (1, S, D); out (1, tq, D).  Non-causal encoder attn.
    # TODO(synk): attention-prob dropout is identity here (inference mode).
    q = q_ref[0]
    k = k_ref[0]
    v = v_ref[0]
    hd = q.shape[-1] // n_heads
    outs = []
    for h in range(n_heads):                      # heads = contiguous chunks of D
        qh = q[:, h * hd:(h + 1) * hd]
        kh = k[:, h * hd:(h + 1) * hd]
        vh = v[:, h * hd:(h + 1) * hd]
        s = jax.lax.dot_general(qh, kh, (((1,), (1,)), ((), ())),
                                preferred_element_type=jnp.float32) * inv_scale
        m = jnp.max(s, axis=-1, keepdims=True)
        p = jnp.exp(s - m)
        denom = jnp.sum(p, axis=-1, keepdims=True)
        p = p * pl.reciprocal(denom, approx=True)   # EUP slot
        outs.append(jnp.dot(p.astype(vh.dtype), vh,
                            preferred_element_type=jnp.float32))
    o_ref[0] = jnp.concatenate(outs, axis=-1).astype(o_ref.dtype)


def _attn_out_residual_ln_kernel(a_ref, x_ref, wo_ref, g_ref, b_ref, o_ref):
    proj = jnp.dot(a_ref[...], wo_ref[...], preferred_element_type=jnp.float32)
    h = x_ref[...].astype(jnp.float32) + proj       # dropout == identity (eval)
    o_ref[...] = _layernorm_torch(h, g_ref[...], b_ref[...]).astype(o_ref.dtype)


def _ffn_residual_ln_kernel(x_ref, w1_ref, b1_ref, w2_ref, b2_ref, g_ref, bt_ref, o_ref):
    x = x_ref[...]
    h1 = jnp.dot(x, w1_ref[...], preferred_element_type=jnp.float32) + b1_ref[...]
    h1 = jnp.maximum(h1, 0.0).astype(w2_ref.dtype)   # ReLU, back to matmul dtype
    y = jnp.dot(h1, w2_ref[...], preferred_element_type=jnp.float32) + b2_ref[...]
    h = x.astype(jnp.float32) + y                    # dropout == identity (eval)
    o_ref[...] = _layernorm_torch(h, g_ref[...], bt_ref[...]).astype(o_ref.dtype)


# ---------------------------------------------------------------------------
# pallas_call wrappers
# ---------------------------------------------------------------------------

def add_positional_encoding(x, pe, *, seq_tile):
    B, S, D = x.shape
    seq_tile = min(seq_tile, S)
    x_spec = pl.BlockSpec((1, seq_tile, D), lambda b, i: (b, i, 0))
    return pl.pallas_call(
        _add_pe_kernel,
        out_shape=jax.ShapeDtypeStruct((B, S, D), x.dtype),
        grid_spec=pltpu.PrefetchScalarGridSpec(
            num_scalar_prefetch=0,
            grid=(B, pl.cdiv(S, seq_tile)),
            in_specs=[x_spec, pl.BlockSpec((seq_tile, D), lambda b, i: (i, 0))],
            out_specs=x_spec,
        ),
        compiler_params=_compiler_params(("parallel", "parallel")),
    )(x, pe)


def qkv_projection(x2, wq_t, wk_t, wv_t, *, row_tile):
    rows, D = x2.shape
    out = jax.ShapeDtypeStruct((rows, D), x2.dtype)
    w_spec = _const_spec((D, D))
    return pl.pallas_call(
        _qkv_kernel,
        out_shape=(out, out, out),
        grid_spec=pltpu.PrefetchScalarGridSpec(
            num_scalar_prefetch=0,
            grid=(pl.cdiv(rows, row_tile),),
            in_specs=[_row_spec(row_tile, D), w_spec, w_spec, w_spec],
            out_specs=(_row_spec(row_tile, D),) * 3,
        ),
        compiler_params=_compiler_params(("parallel",)),
    )(x2, wq_t, wk_t, wv_t)


def multihead_attention(q, k, v, *, n_heads, scale, q_tile):
    B, S, D = q.shape
    q_tile = min(q_tile, S)
    q_spec = pl.BlockSpec((1, q_tile, D), lambda b, i: (b, i, 0))
    kv_spec = pl.BlockSpec((1, S, D), lambda b, i: (b, 0, 0))
    kernel = functools.partial(_attention_kernel, n_heads=n_heads,
                               inv_scale=1.0 / scale)
    # TODO(synk): for long sequences, stream K/V tiles with an online softmax
    # (flash-style) instead of holding the full (S, D) K/V block per batch.
    return pl.pallas_call(
        kernel,
        out_shape=jax.ShapeDtypeStruct((B, S, D), q.dtype),
        grid_spec=pltpu.PrefetchScalarGridSpec(
            num_scalar_prefetch=0,
            grid=(B, pl.cdiv(S, q_tile)),
            in_specs=[q_spec, kv_spec, kv_spec],
            out_specs=q_spec,
        ),
        compiler_params=_compiler_params(("parallel", "parallel")),
    )(q, k, v)


def attn_out_residual_layernorm(attn2, xres2, wo_t, gamma, beta, *, row_tile):
    rows, D = attn2.shape
    return pl.pallas_call(
        _attn_out_residual_ln_kernel,
        out_shape=jax.ShapeDtypeStruct((rows, D), xres2.dtype),
        grid_spec=pltpu.PrefetchScalarGridSpec(
            num_scalar_prefetch=0,
            grid=(pl.cdiv(rows, row_tile),),
            in_specs=[_row_spec(row_tile, D), _row_spec(row_tile, D),
                      _const_spec((D, D)), _const_spec((1, D)), _const_spec((1, D))],
            out_specs=_row_spec(row_tile, D),
        ),
        compiler_params=_compiler_params(("parallel",)),
    )(attn2, xres2, wo_t, gamma, beta)


def ffn_residual_layernorm(x2, w1_t, b1, w2_t, b2, gamma, beta, *, row_tile):
    rows, D = x2.shape
    H = w1_t.shape[1]
    return pl.pallas_call(
        _ffn_residual_ln_kernel,
        out_shape=jax.ShapeDtypeStruct((rows, D), x2.dtype),
        grid_spec=pltpu.PrefetchScalarGridSpec(
            num_scalar_prefetch=0,
            grid=(pl.cdiv(rows, row_tile),),
            in_specs=[_row_spec(row_tile, D),
                      _const_spec((D, H)), _const_spec((1, H)),
                      _const_spec((H, D)), _const_spec((1, D)),
                      _const_spec((1, D)), _const_spec((1, D))],
            out_specs=_row_spec(row_tile, D),
        ),
        compiler_params=_compiler_params(("parallel",)),
    )(x2, w1_t, b1, w2_t, b2, gamma, beta)


# ---------------------------------------------------------------------------
# Full Encoder forward
# ---------------------------------------------------------------------------

def positional_encodings(seq_len, d_model):
    """Mirrors positional_encodings_like(): even channels sin, odd channels cos."""
    pos = jnp.arange(seq_len, dtype=jnp.float32)[:, None]               # (S, 1)
    ch = jnp.arange(d_model)
    exponent = (ch - (ch % 2)).astype(jnp.float32) / float(d_model)     # (D,)
    angles = pos / jnp.power(10000.0, exponent)[None, :]                # (S, D)
    return jnp.where((ch % 2) == 0, jnp.sin(angles), jnp.cos(angles))   # f32


def encoder_forward(x, params, *, n_heads, row_tile=512, seq_tile=128):
    """Pallas forward of Encoder (eval: dropout == identity, mask treated as None)."""
    B, S, D = x.shape
    assert D % n_heads == 0
    rows = B * S
    row_tile = min(row_tile, rows)
    seq_tile = min(seq_tile, S)
    scale = math.sqrt(D)     # torch: Attention(d_key=d_model) -> scale = sqrt(d_model)

    pe = positional_encodings(S, D)
    x = add_positional_encoding(x, pe, seq_tile=seq_tile)
    # TODO(synk): Encoder.forward references an undefined `mask`; treated as None.
    # TODO(synk): dropout is inference-mode identity; training-mode dropout would
    # use pltpu.prng_seed / pltpu.prng_random_bits.

    for lp in params["layers"]:
        x2 = x.reshape(rows, D)
        q2, k2, v2 = qkv_projection(x2, lp["wq_t"], lp["wk_t"], lp["wv_t"],
                                    row_tile=row_tile)
        attn = multihead_attention(q2.reshape(B, S, D), k2.reshape(B, S, D),
                                   v2.reshape(B, S, D),
                                   n_heads=n_heads, scale=scale, q_tile=seq_tile)
        x2 = attn_out_residual_layernorm(attn.reshape(rows, D), x2, lp["wo_t"],
                                         lp["ln1_g"], lp["ln1_b"], row_tile=row_tile)
        x2 = ffn_residual_layernorm(x2, lp["w1_t"], lp["b1"], lp["w2_t"], lp["b2"],
                                    lp["ln2_g"], lp["ln2_b"], row_tile=row_tile)
        x = x2.reshape(B, S, D)
    return x


# ---------------------------------------------------------------------------
# Pure-JAX reference (same precision policy as the kernels)
# ---------------------------------------------------------------------------

def _ref_layernorm(h, gamma, beta):
    d = h.shape[-1]
    mean = jnp.mean(h, axis=-1, keepdims=True)
    diff = h - mean
    std = jnp.sqrt(jnp.sum(diff * diff, axis=-1, keepdims=True) / (d - 1))
    return gamma * diff / (std + EPS) + beta


def reference_encoder(x, params, *, n_heads):
    f32 = jnp.float32
    B, S, D = x.shape
    hd = D // n_heads
    inv_scale = 1.0 / math.sqrt(D)
    dt = x.dtype

    pe = positional_encodings(S, D)
    x = (x.astype(f32) + pe[None]).astype(dt)

    for lp in params["layers"]:
        x2 = x.reshape(B * S, D)
        q = jnp.dot(x2, lp["wq_t"], preferred_element_type=f32).astype(dt)
        k = jnp.dot(x2, lp["wk_t"], preferred_element_type=f32).astype(dt)
        v = jnp.dot(x2, lp["wv_t"], preferred_element_type=f32).astype(dt)
        qh = q.reshape(B, S, n_heads, hd).transpose(0, 2, 1, 3)
        kh = k.reshape(B, S, n_heads, hd).transpose(0, 2, 1, 3)
        vh = v.reshape(B, S, n_heads, hd).transpose(0, 2, 1, 3)
        s = jnp.einsum("bhqd,bhkd->bhqk", qh, kh,
                       preferred_element_type=f32) * inv_scale
        p = jax.nn.softmax(s, axis=-1)
        o = jnp.einsum("bhqk,bhkd->bhqd", p.astype(dt), vh,
                       preferred_element_type=f32).astype(dt)
        o = o.transpose(0, 2, 1, 3).reshape(B * S, D)
        proj = jnp.dot(o, lp["wo_t"], preferred_element_type=f32)
        x2 = _ref_layernorm(x2.astype(f32) + proj,
                            lp["ln1_g"], lp["ln1_b"]).astype(dt)
        h1 = jnp.dot(x2, lp["w1_t"], preferred_element_type=f32) + lp["b1"]
        h1 = jnp.maximum(h1, 0.0).astype(dt)
        y = jnp.dot(h1, lp["w2_t"], preferred_element_type=f32) + lp["b2"]
        x2 = _ref_layernorm(x2.astype(f32) + y,
                            lp["ln2_g"], lp["ln2_b"]).astype(dt)
        x = x2.reshape(B, S, D)
    return x


# ---------------------------------------------------------------------------
# Demo / self-test
# ---------------------------------------------------------------------------

def _make_params(key, d_model, d_hidden, n_layers):
    layers = []
    for i in range(n_layers):
        ks = jax.random.split(jax.random.fold_in(key, i), 10)

        def lin(k, n_in, n_out):    # stored pre-transposed as W^T: (in, out)
            return jax.random.normal(k, (n_in, n_out), jnp.float32) / math.sqrt(n_in)

        layers.append(dict(
            wq_t=lin(ks[0], d_model, d_model),
            wk_t=lin(ks[1], d_model, d_model),
            wv_t=lin(ks[2], d_model, d_model),
            wo_t=lin(ks[3], d_model, d_model),
            w1_t=lin(ks[4], d_model, d_hidden),
            b1=0.1 * jax.random.normal(ks[5], (1, d_hidden), jnp.float32),
            w2_t=lin(ks[6], d_hidden, d_model),
            b2=0.1 * jax.random.normal(ks[7], (1, d_model), jnp.float32),
            ln1_g=1.0 + 0.1 * jax.random.normal(ks[8], (1, d_model), jnp.float32),
            ln1_b=jnp.zeros((1, d_model), jnp.float32),
            ln2_g=1.0 + 0.1 * jax.random.normal(ks[9], (1, d_model), jnp.float32),
            ln2_b=jnp.zeros((1, d_model), jnp.float32),
        ))
    return {"layers": layers}


def _cast_matmul_params(params, dtype):
    mm = ("wq_t", "wk_t", "wv_t", "wo_t", "w1_t", "w2_t")
    return {"layers": [{k: (v.astype(dtype) if k in mm else v) for k, v in lp.items()}
                       for lp in params["layers"]]}


def _rel_l2(a, b):
    a = a.astype(jnp.float32)
    b = b.astype(jnp.float32)
    return jnp.sqrt(jnp.sum((a - b) ** 2) / (jnp.sum(b ** 2) + 1e-30))


if __name__ == "__main__":
    # Small but lane-dense shapes: d_model / d_hidden are multiples of 128 so every
    # HBM-facing block is lane-dense; row/seq tiles give multi-step parallel grids.
    B, S, D_MODEL, D_HIDDEN, N_HEADS, N_LAYERS = 2, 64, 256, 512, 4, 2
    ROW_TILE, SEQ_TILE = 64, 32     # rows = B*S = 128 -> 2 row-tiles; S/32 = 2 q-tiles

    key = jax.random.PRNGKey(0)
    kx, kp = jax.random.split(key)
    x_f32 = jax.random.normal(kx, (B, S, D_MODEL), jnp.float32)
    params_f32 = _make_params(kp, D_MODEL, D_HIDDEN, N_LAYERS)

    fwd = jax.jit(functools.partial(encoder_forward, n_heads=N_HEADS,
                                    row_tile=ROW_TILE, seq_tile=SEQ_TILE))
    ref_fn = jax.jit(functools.partial(reference_encoder, n_heads=N_HEADS))

    # 1) f32 run: checks the torch semantics (approx-reciprocal / matmul-precision noise only).
    out_f32 = jax.block_until_ready(fwd(x_f32, params_f32))
    ref_f32 = jax.block_until_ready(ref_fn(x_f32, params_f32))
    err32 = float(_rel_l2(out_f32, ref_f32))
    assert out_f32.shape == (B, S, D_MODEL)
    assert err32 < 3e-2, f"f32 relative L2 error too large: {err32}"

    # 2) bf16 fast path (MXU-native operands), checked against a bf16-matched reference.
    x_bf16 = x_f32.astype(jnp.bfloat16)
    params_bf16 = _cast_matmul_params(params_f32, jnp.bfloat16)
    out_bf16 = jax.block_until_ready(fwd(x_bf16, params_bf16))
    ref_bf16 = jax.block_until_ready(ref_fn(x_bf16, params_bf16))
    err16 = float(_rel_l2(out_bf16, ref_bf16))
    assert out_bf16.dtype == jnp.bfloat16
    assert err16 < 7e-2, f"bf16 relative L2 error too large: {err16}"

    print("KERNEL_OK")
</pallas_src>

<mosaic_0001>
module attributes {stable_mosaic.version = 11 : i64} {
  func.func @_add_pe_kernel(%arg0: i32, %arg1: i32, %arg2: memref<1x32x256xf32, #tpu.memory_space<vmem>>, %arg3: memref<32x256xf32, #tpu.memory_space<vmem>>, %arg4: memref<1x32x256xf32, #tpu.memory_space<vmem>>) attributes {dimension_semantics = [#tpu.dimension_semantics<parallel>, #tpu.dimension_semantics<parallel>], iteration_bounds = array<i64: 2, 2>, scalar_prefetch = 0 : i64, scratch_operands = 0 : i64, tpu.core_type = #tpu.core_type<tc>, window_params = [{transform_indices = @transform_0, window_bounds = array<i64: 1, 32, 256>}, {transform_indices = @transform_1, window_bounds = array<i64: 32, 256>}, {transform_indices = @transform_2, window_bounds = array<i64: 1, 32, 256>}]} {
    %c0 = arith.constant 0 : index
    %c0_0 = arith.constant 0 : index
    %c0_1 = arith.constant 0 : index
    %0 = vector.load %arg2[%c0, %c0_0, %c0_1] : memref<1x32x256xf32, #tpu.memory_space<vmem>>, vector<1x32x256xf32>
    %c0_2 = arith.constant 0 : index
    %c0_3 = arith.constant 0 : index
    %1 = vector.load %arg3[%c0_2, %c0_3] : memref<32x256xf32, #tpu.memory_space<vmem>>, vector<32x256xf32>
    %2 = vector.shape_cast %1 : vector<32x256xf32> to vector<1x32x256xf32>
    %3 = arith.addf %0, %2 : vector<1x32x256xf32>
    %c0_4 = arith.constant 0 : index
    %c0_5 = arith.constant 0 : index
    %c0_6 = arith.constant 0 : index
    %4 = vector.load %arg4[%c0_4, %c0_5, %c0_6] : memref<1x32x256xf32, #tpu.memory_space<vmem>>, vector<1x32x256xf32>
    tpu.vector_store %arg4[%c0_4, %c0_5, %c0_6], %3 {strides = array<i32>} : memref<1x32x256xf32, #tpu.memory_space<vmem>>, vector<1x32x256xf32>,
    return
  }
  func.func @transform_0(%arg0: i32, %arg1: i32) -> (i32, i32, i32) {
    %c0_i32 = arith.constant 0 : i32
    %c0_i32_0 = arith.constant 0 : i32
    return %arg0, %arg1, %c0_i32 : i32, i32, i32
  }
  func.func @transform_1(%arg0: i32, %arg1: i32) -> (i32, i32) {
    %c0_i32 = arith.constant 0 : i32
    %c0_i32_0 = arith.constant 0 : i32
    return %arg1, %c0_i32 : i32, i32
  }
  func.func @transform_2(%arg0: i32, %arg1: i32) -> (i32, i32, i32) {
    %c0_i32 = arith.constant 0 : i32
    %c0_i32_0 = arith.constant 0 : i32
    return %arg0, %arg1, %c0_i32 : i32, i32, i32
  }
}

module attributes {stable_mosaic.version = 11 : i64} {
  func.func @_qkv_kernel(%arg0: i32, %arg1: memref<64x256xf32, #tpu.memory_space<vmem>>, %arg2: memref<256x256xf32, #tpu.memory_space<vmem>>, %arg3: memref<256x256xf32, #tpu.memory_space<vmem>>, %arg4: memref<256x256xf32, #tpu.memory_space<vmem>>, %arg5: memref<64x256xf32, #tpu.memory_space<vmem>>, %arg6: memref<64x256xf32, #tpu.memory_space<vmem>>, %arg7: memref<64x256xf32, #tpu.memory_space<vmem>>) attributes {dimension_semantics = [#tpu.dimension_semantics<parallel>], iteration_bounds = array<i64: 2>, scalar_prefetch = 0 : i64, scratch_operands = 0 : i64, tpu.core_type = #tpu.core_type<tc>, window_params = [{transform_indices = @transform_0, window_bounds = array<i64: 64, 256>}, {pipeline_mode = #tpu.pipeline_mode<synchronous>, transform_indices = @transform_1, window_bounds = array<i64: 256, 256>}, {pipeline_mode = #tpu.pipeline_mode<synchronous>, transform_indices = @transform_2, window_bounds = array<i64: 256, 256>}, {pipeline_mode = #tpu.pipeline_mode<synchronous>, transform_indices = @transform_3, window_bounds = array<i64: 256, 256>}, {transform_indices = @transform_4, window_bounds = array<i64: 64, 256>}, {transform_indices = @transform_5, window_bounds = array<i64: 64, 256>}, {transform_indices = @transform_6, window_bounds = array<i64: 64, 256>}]} {
    %c0 = arith.constant 0 : index
    %c0_0 = arith.constant 0 : index
    %0 = vector.load %arg1[%c0, %c0_0] : memref<64x256xf32, #tpu.memory_space<vmem>>, vector<64x256xf32>
    %c0_1 = arith.constant 0 : index
    %c0_2 = arith.constant 0 : index
    %1 = vector.load %arg2[%c0_1, %c0_2] : memref<256x256xf32, #tpu.memory_space<vmem>>, vector<256x256xf32>
    %cst = arith.constant dense<0.000000e+00> : vector<64x256xf32>
    %2 = tpu.matmul %0, %1, %cst {dimension_numbers = #tpu.dot_dimension_numbers<[1], [0], [0], [1], [0, 0, 1, 1], [], []>} : vector<64x256xf32>, vector<256x256xf32>, vector<64x256xf32> -> vector<64x256xf32>
    %c0_3 = arith.constant 0 : index
    %c0_4 = arith.constant 0 : index
    %3 = vector.load %arg5[%c0_3, %c0_4] : memref<64x256xf32, #tpu.memory_space<vmem>>, vector<64x256xf32>
    tpu.vector_store %arg5[%c0_3, %c0_4], %2 {strides = array<i32>} : memref<64x256xf32, #tpu.memory_space<vmem>>, vector<64x256xf32>,
    %c0_5 = arith.constant 0 : index
    %c0_6 = arith.constant 0 : index
    %4 = vector.load %arg3[%c0_5, %c0_6] : memref<256x256xf32, #tpu.memory_space<vmem>>, vector<256x256xf32>
    %cst_7 = arith.constant dense<0.000000e+00> : vector<64x256xf32>
    %5 = tpu.matmul %0, %4, %cst_7 {dimension_numbers = #tpu.dot_dimension_numbers<[1], [0], [0], [1], [0, 0, 1, 1], [], []>} : vector<64x256xf32>, vector<256x256xf32>, vector<64x256xf32> -> vector<64x256xf32>
    %c0_8 = arith.constant 0 : index
    %c0_9 = arith.constant 0 : index
    %6 = vector.load %arg6[%c0_8, %c0_9] : memref<64x256xf32, #tpu.memory_space<vmem>>, vector<64x256xf32>
    tpu.vector_store %arg6[%c0_8, %c0_9], %5 {strides = array<i32>} : memref<64x256xf32, #tpu.memory_space<vmem>>, vector<64x256xf32>,
    %c0_10 = arith.constant 0 : index
    %c0_11 = arith.constant 0 : index
    %7 = vector.load %arg4[%c0_10, %c0_11] : memref<256x256xf32, #tpu.memory_space<vmem>>, vector<256x256xf32>
    %cst_12 = arith.constant dense<0.000000e+00> : vector<64x256xf32>
    %8 = tpu.matmul %0, %7, %cst_12 {dimension_numbers = #tpu.dot_dimension_numbers<[1], [0], [0], [1], [0, 0, 1, 1], [], []>} : vector<64x256xf32>, vector<256x256xf32>, vector<64x256xf32> -> vector<64x256xf32>
    %c0_13 = arith.constant 0 : index
    %c0_14 = arith.constant 0 : index
    %9 = vector.load %arg7[%c0_13, %c0_14] : memref<64x256xf32, #tpu.memory_space<vmem>>, vector<64x256xf32>
    tpu.vector_store %arg7[%c0_13, %c0_14], %8 {strides = array<i32>} : memref<64x256xf32, #tpu.memory_space<vmem>>, vector<64x256xf32>,
    return
  }
  func.func @transform_0(%arg0: i32) -> (i32, i32) {
    %c0_i32 = arith.constant 0 : i32
    %c0_i32_0 = arith.constant 0 : i32
    return %arg0, %c0_i32 : i32, i32
  }
  func.func @transform_1(%arg0: i32) -> (i32, i32) {
    %c0_i32 = arith.constant 0 : i32
    %c0_i32_0 = arith.constant 0 : i32
    %c0_i32_1 = arith.constant 0 : i32
    return %c0_i32, %c0_i32_0 : i32, i32
  }
  func.func @transform_2(%arg0: i32) -> (i32, i32) {
    %c0_i32 = arith.constant 0 : i32
    %c0_i32_0 = arith.constant 0 : i32
    %c0_i32_1 = arith.constant 0 : i32
    return %c0_i32, %c0_i32_0 : i32, i32
  }
  func.func @transform_3(%arg0: i32) -> (i32, i32) {
    %c0_i32 = arith.constant 0 : i32
    %c0_i32_0 = arith.constant 0 : i32
    %c0_i32_1 = arith.constant 0 : i32
    return %c0_i32, %c0_i32_0 : i32, i32
  }
  func.func @transform_4(%arg0: i32) -> (i32, i32) {
    %c0_i32 = arith.constant 0 : i32
    %c0_i32_0 = arith.constant 0 : i32
    return %arg0, %c0_i32 : i32, i32
  }
  func.func @transform_5(%arg0: i32) -> (i32, i32) {
    %c0_i32 = arith.constant 0 : i32
    %c0_i32_0 = arith.constant 0 : i32
    return %arg0, %c0_i32 : i32, i32
  }
  func.func @transform_6(%arg0: i32) -> (i32, i32) {
    %c0_i32 = arith.constant 0 : i32
    %c0_i32_0 = arith.constant 0 : i32
    return %arg0, %c0_i32 : i32, i32
  }
}

module attributes {stable_mosaic.version = 11 : i64} {
  func.func @_attention_kernel(%arg0: i32, %arg1: i32, %arg2: memref<1x32x256xf32, #tpu.memory_space<vmem>>, %arg3: memref<1x64x256xf32, #tpu.memory_space<vmem>>, %arg4: memref<1x64x256xf32, #tpu.memory_space<vmem>>, %arg5: memref<1x32x256xf32, #tpu.memory_space<vmem>>) attributes {dimension_semantics = [#tpu.dimension_semantics<parallel>, #tpu.dimension_semantics<parallel>], iteration_bounds = array<i64: 2, 2>, scalar_prefetch = 0 : i64, scratch_operands = 0 : i64, tpu.core_type = #tpu.core_type<tc>, window_params = [{transform_indices = @transform_0, window_bounds = array<i64: 1, 32, 256>}, {transform_indices = @transform_1, window_bounds = array<i64: 1, 64, 256>}, {transform_indices = @transform_2, window_bounds = array<i64: 1, 64, 256>}, {transform_indices = @transform_3, window_bounds = array<i64: 1, 32, 256>}]} {
    %c0 = arith.constant 0 : index
    %c0_0 = arith.constant 0 : index
    %c0_1 = arith.constant 0 : index
    %0 = vector.load %arg2[%c0, %c0_0, %c0_1] : memref<1x32x256xf32, #tpu.memory_space<vmem>>, vector<1x32x256xf32>
    %1 = vector.shape_cast %0 : vector<1x32x256xf32> to vector<32x256xf32>
    %c0_2 = arith.constant 0 : index
    %c0_3 = arith.constant 0 : index
    %c0_4 = arith.constant 0 : index
    %2 = vector.load %arg3[%c0_2, %c0_3, %c0_4] : memref<1x64x256xf32, #tpu.memory_space<vmem>>, vector<1x64x256xf32>
    %3 = vector.shape_cast %2 : vector<1x64x256xf32> to vector<64x256xf32>
    %c0_5 = arith.constant 0 : index
    %c0_6 = arith.constant 0 : index
    %c0_7 = arith.constant 0 : index
    %4 = vector.load %arg4[%c0_5, %c0_6, %c0_7] : memref<1x64x256xf32, #tpu.memory_space<vmem>>, vector<1x64x256xf32>
    %5 = vector.shape_cast %4 : vector<1x64x256xf32> to vector<64x256xf32>
    %6 = vector.extract_strided_slice %1 {offsets = [0, 0], sizes = [32, 64], strides = [1, 1]} : vector<32x256xf32> to vector<32x64xf32>
    %7 = vector.extract_strided_slice %3 {offsets = [0, 0], sizes = [64, 64], strides = [1, 1]} : vector<64x256xf32> to vector<64x64xf32>
    %8 = vector.extract_strided_slice %5 {offsets = [0, 0], sizes = [64, 64], strides = [1, 1]} : vector<64x256xf32> to vector<64x64xf32>
    %cst = arith.constant dense<0.000000e+00> : vector<32x64xf32>
    %9 = tpu.matmul %6, %7, %cst {dimension_numbers = #tpu.dot_dimension_numbers<[1], [1], [0], [0], [0, 0, 1, 0], [], []>} : vector<32x64xf32>, vector<64x64xf32>, vector<32x64xf32> -> vector<32x64xf32>
    %cst_8 = arith.constant 6.250000e-02 : f32
    %10 = vector.broadcast %cst_8 : f32 to vector<32x64xf32>
    %11 = arith.mulf %9, %10 : vector<32x64xf32>
    %cst_9 = arith.constant dense<0xFF800000> : vector<32xf32>
    %12 = vector.multi_reduction <maximumf>, %11, %cst_9 [1] : vector<32x64xf32> to vector<32xf32>
    %13 = vector.shape_cast %12 : vector<32xf32> to vector<32x1xf32>
    %14 = vector.broadcast %13 : vector<32x1xf32> to vector<32x64xf32>
    %15 = arith.subf %11, %14 : vector<32x64xf32>
    %16 = math.exp %15 : vector<32x64xf32>
    %cst_10 = arith.constant dense<0.000000e+00> : vector<32xf32>
    %17 = vector.multi_reduction <add>, %16, %cst_10 [1] : vector<32x64xf32> to vector<32xf32>
    %18 = vector.shape_cast %17 : vector<32xf32> to vector<32x1xf32>
    %19 = tpu.reciprocal %18 {approx = true} : vector<32x1xf32> -> vector<32x1xf32>
    %20 = vector.broadcast %19 : vector<32x1xf32> to vector<32x64xf32>
    %21 = arith.mulf %16, %20 : vector<32x64xf32>
    %cst_11 = arith.constant dense<0.000000e+00> : vector<32x64xf32>
    %22 = tpu.matmul %21, %8, %cst_11 {dimension_numbers = #tpu.dot_dimension_numbers<[1], [0], [0], [1], [0, 0, 1, 1], [], []>} : vector<32x64xf32>, vector<64x64xf32>, vector<32x64xf32> -> vector<32x64xf32>
    %23 = vector.extract_strided_slice %1 {offsets = [0, 64], sizes = [32, 64], strides = [1, 1]} : vector<32x256xf32> to vector<32x64xf32>
    %24 = vector.extract_strided_slice %3 {offsets = [0, 64], sizes = [64, 64], strides = [1, 1]} : vector<64x256xf32> to vector<64x64xf32>
    %25 = vector.extract_strided_slice %5 {offsets = [0, 64], sizes = [64, 64], strides = [1, 1]} : vector<64x256xf32> to vector<64x64xf32>
    %cst_12 = arith.constant dense<0.000000e+00> : vector<32x64xf32>
    %26 = tpu.matmul %23, %24, %cst_12 {dimension_numbers = #tpu.dot_dimension_numbers<[1], [1], [0], [0], [0, 0, 1, 0], [], []>} : vector<32x64xf32>, vector<64x64xf32>, vector<32x64xf32> -> vector<32x64xf32>
    %cst_13 = arith.constant 6.250000e-02 : f32
    %27 = vector.broadcast %cst_13 : f32 to vector<32x64xf32>
    %28 = arith.mulf %26, %27 : vector<32x64xf32>
    %cst_14 = arith.constant dense<0xFF800000> : vector<32xf32>
    %29 = vector.multi_reduction <maximumf>, %28, %cst_14 [1] : vector<32x64xf32> to vector<32xf32>
    %30 = vector.shape_cast %29 : vector<32xf32> to vector<32x1xf32>
    %31 = vector.broadcast %30 : vector<32x1xf32> to vector<32x64xf32>
    %32 = arith.subf %28, %31 : vector<32x64xf32>
    %33 = math.exp %32 : vector<32x64xf32>
    %cst_15 = arith.constant dense<0.000000e+00> : vector<32xf32>
    %34 = vector.multi_reduction <add>, %33, %cst_15 [1] : vector<32x64xf32> to vector<32xf32>
    %35 = vector.shape_cast %34 : vector<32xf32> to vector<32x1xf32>
    %36 = tpu.reciprocal %35 {approx = true} : vector<32x1xf32> -> vector<32x1xf32>
    %37 = vector.broadcast %36 : vector<32x1xf32> to vector<32x64xf32>
    %38 = arith.mulf %33, %37 : vector<32x64xf32>
    %cst_16 = arith.constant dense<0.000000e+00> : vector<32x64xf32>
    %39 = tpu.matmul %38, %25, %cst_16 {dimension_numbers = #tpu.dot_dimension_numbers<[1], [0], [0], [1], [0, 0, 1, 1], [], []>} : vector<32x64xf32>, vector<64x64xf32>, vector<32x64xf32> -> vector<32x64xf32>
    %40 = vector.extract_strided_slice %1 {offsets = [0, 128], sizes = [32, 64], strides = [1, 1]} : vector<32x256xf32> to vector<32x64xf32>
    %41 = vector.extract_strided_slice %3 {offsets = [0, 128], sizes = [64, 64], strides = [1, 1]} : vector<64x256xf32> to vector<64x64xf32>
    %42 = vector.extract_strided_slice %5 {offsets = [0, 128], sizes = [64, 64], strides = [1, 1]} : vector<64x256xf32> to vector<64x64xf32>
    %cst_17 = arith.constant dense<0.000000e+00> : vector<32x64xf32>
    %43 = tpu.matmul %40, %41, %cst_17 {dimension_numbers = #tpu.dot_dimension_numbers<[1], [1], [0], [0], [0, 0, 1, 0], [], []>} : vector<32x64xf32>, vector<64x64xf32>, vector<32x64xf32> -> vector<32x64xf32>
    %cst_18 = arith.constant 6.250000e-02 : f32
    %44 = vector.broadcast %cst_18 : f32 to vector<32x64xf32>
    %45 = arith.mulf %43, %44 : vector<32x64xf32>
    %cst_19 = arith.constant dense<0xFF800000> : vector<32xf32>
    %46 = vector.multi_reduction <maximumf>, %45, %cst_19 [1] : vector<32x64xf32> to vector<32xf32>
    %47 = vector.shape_cast %46 : vector<32xf32> to vector<32x1xf32>
    %48 = vector.broadcast %47 : vector<32x1xf32> to vector<32x64xf32>
    %49 = arith.subf %45, %48 : vector<32x64xf32>
    %50 = math.exp %49 : vector<32x64xf32>
    %cst_20 = arith.constant dense<0.000000e+00> : vector<32xf32>
    %51 = vector.multi_reduction <add>, %50, %cst_20 [1] : vector<32x64xf32> to vector<32xf32>
    %52 = vector.shape_cast %51 : vector<32xf32> to vector<32x1xf32>
    %53 = tpu.reciprocal %52 {approx = true} : vector<32x1xf32> -> vector<32x1xf32>
    %54 = vector.broadcast %53 : vector<32x1xf32> to vector<32x64xf32>
    %55 = arith.mulf %50, %54 : vector<32x64xf32>
    %cst_21 = arith.constant dense<0.000000e+00> : vector<32x64xf32>
    %56 = tpu.matmul %55, %42, %cst_21 {dimension_numbers = #tpu.dot_dimension_numbers<[1], [0], [0], [1], [0, 0, 1, 1], [], []>} : vector<32x64xf32>, vector<64x64xf32>, vector<32x64xf32> -> vector<32x64xf32>
    %57 = vector.extract_strided_slice %1 {offsets = [0, 192], sizes = [32, 64], strides = [1, 1]} : vector<32x256xf32> to vector<32x64xf32>
    %58 = vector.extract_strided_slice %3 {offsets = [0, 192], sizes = [64, 64], strides = [1, 1]} : vector<64x256xf32> to vector<64x64xf32>
    %59 = vector.extract_strided_slice %5 {offsets = [0, 192], sizes = [64, 64], strides = [1, 1]} : vector<64x256xf32> to vector<64x64xf32>
    %cst_22 = arith.constant dense<0.000000e+00> : vector<32x64xf32>
    %60 = tpu.matmul %57, %58, %cst_22 {dimension_numbers = #tpu.dot_dimension_numbers<[1], [1], [0], [0], [0, 0, 1, 0], [], []>} : vector<32x64xf32>, vector<64x64xf32>, vector<32x64xf32> -> vector<32x64xf32>
    %cst_23 = arith.constant 6.250000e-02 : f32
    %61 = vector.broadcast %cst_23 : f32 to vector<32x64xf32>
    %62 = arith.mulf %60, %61 : vector<32x64xf32>
    %cst_24 = arith.constant dense<0xFF800000> : vector<32xf32>
    %63 = vector.multi_reduction <maximumf>, %62, %cst_24 [1] : vector<32x64xf32> to vector<32xf32>
    %64 = vector.shape_cast %63 : vector<32xf32> to vector<32x1xf32>
    %65 = vector.broadcast %64 : vector<32x1xf32> to vector<32x64xf32>
    %66 = arith.subf %62, %65 : vector<32x64xf32>
    %67 = math.exp %66 : vector<32x64xf32>
    %cst_25 = arith.constant dense<0.000000e+00> : vector<32xf32>
    %68 = vector.multi_reduction <add>, %67, %cst_25 [1] : vector<32x64xf32> to vector<32xf32>
    %69 = vector.shape_cast %68 : vector<32xf32> to vector<32x1xf32>
    %70 = tpu.reciprocal %69 {approx = true} : vector<32x1xf32> -> vector<32x1xf32>
    %71 = vector.broadcast %70 : vector<32x1xf32> to vector<32x64xf32>
    %72 = arith.mulf %67, %71 : vector<32x64xf32>
    %cst_26 = arith.constant dense<0.000000e+00> : vector<32x64xf32>
    %73 = tpu.matmul %72, %59, %cst_26 {dimension_numbers = #tpu.dot_dimension_numbers<[1], [0], [0], [1], [0, 0, 1, 1], [], []>} : vector<32x64xf32>, vector<64x64xf32>, vector<32x64xf32> -> vector<32x64xf32>
    %74 = tpu.concatenate %22, %39, %56, %73 in 1 : vector<32x64xf32>, vector<32x64xf32>, vector<32x64xf32>, vector<32x64xf32> -> vector<32x256xf32>
    %c0_27 = arith.constant 0 : index
    %c0_28 = arith.constant 0 : index
    %c0_29 = arith.constant 0 : index
    %75 = vector.load %arg5[%c0_27, %c0_28, %c0_29] : memref<1x32x256xf32, #tpu.memory_space<vmem>>, vector<1x32x256xf32>
    %76 = vector.shape_cast %75 : vector<1x32x256xf32> to vector<32x256xf32>
    %77 = vector.shape_cast %74 : vector<32x256xf32> to vector<1x32x256xf32>
    tpu.vector_store %arg5[%c0_27, %c0_28, %c0_29], %77 {strides = array<i32>} : memref<1x32x256xf32, #tpu.memory_space<vmem>>, vector<1x32x256xf32>,
    return
  }
  func.func @transform_0(%arg0: i32, %arg1: i32) -> (i32, i32, i32) {
    %c0_i32 = arith.constant 0 : i32
    %c0_i32_0 = arith.constant 0 : i32
    return %arg0, %arg1, %c0_i32 : i32, i32, i32
  }
  func.func @transform_1(%arg0: i32, %arg1: i32) -> (i32, i32, i32) {
    %c0_i32 = arith.constant 0 : i32
    %c0_i32_0 = arith.constant 0 : i32
    %c0_i32_1 = arith.constant 0 : i32
    return %arg0, %c0_i32, %c0_i32_0 : i32, i32, i32
  }
  func.func @transform_2(%arg0: i32, %arg1: i32) -> (i32, i32, i32) {
    %c0_i32 = arith.constant 0 : i32
    %c0_i32_0 = arith.constant 0 : i32
    %c0_i32_1 = arith.constant 0 : i32
    return %arg0, %c0_i32, %c0_i32_0 : i32, i32, i32
  }
  func.func @transform_3(%arg0: i32, %arg1: i32) -> (i32, i32, i32) {
    %c0_i32 = arith.constant 0 : i32
    %c0_i32_0 = arith.constant 0 : i32
    return %arg0, %arg1, %c0_i32 : i32, i32, i32
  }
}

module attributes {stable_mosaic.version = 11 : i64} {
  func.func @_attn_out_residual_ln_kernel(%arg0: i32, %arg1: memref<64x256xf32, #tpu.memory_space<vmem>>, %arg2: memref<64x256xf32, #tpu.memory_space<vmem>>, %arg3: memref<256x256xf32, #tpu.memory_space<vmem>>, %arg4: memref<1x256xf32, #tpu.memory_space<vmem>>, %arg5: memref<1x256xf32, #tpu.memory_space<vmem>>, %arg6: memref<64x256xf32, #tpu.memory_space<vmem>>) attributes {dimension_semantics = [#tpu.dimension_semantics<parallel>], iteration_bounds = array<i64: 2>, scalar_prefetch = 0 : i64, scratch_operands = 0 : i64, tpu.core_type = #tpu.core_type<tc>, window_params = [{transform_indices = @transform_0, window_bounds = array<i64: 64, 256>}, {transform_indices = @transform_1, window_bounds = array<i64: 64, 256>}, {pipeline_mode = #tpu.pipeline_mode<synchronous>, transform_indices = @transform_2, window_bounds = array<i64: 256, 256>}, {pipeline_mode = #tpu.pipeline_mode<synchronous>, transform_indices = @transform_3, window_bounds = array<i64: 1, 256>}, {pipeline_mode = #tpu.pipeline_mode<synchronous>, transform_indices = @transform_4, window_bounds = array<i64: 1, 256>}, {transform_indices = @transform_5, window_bounds = array<i64: 64, 256>}]} {
    %c0 = arith.constant 0 : index
    %c0_0 = arith.constant 0 : index
    %0 = vector.load %arg1[%c0, %c0_0] : memref<64x256xf32, #tpu.memory_space<vmem>>, vector<64x256xf32>
    %c0_1 = arith.constant 0 : index
    %c0_2 = arith.constant 0 : index
    %1 = vector.load %arg3[%c0_1, %c0_2] : memref<256x256xf32, #tpu.memory_space<vmem>>, vector<256x256xf32>
    %cst = arith.constant dense<0.000000e+00> : vector<64x256xf32>
    %2 = tpu.matmul %0, %1, %cst {dimension_numbers = #tpu.dot_dimension_numbers<[1], [0], [0], [1], [0, 0, 1, 1], [], []>} : vector<64x256xf32>, vector<256x256xf32>, vector<64x256xf32> -> vector<64x256xf32>
    %c0_3 = arith.constant 0 : index
    %c0_4 = arith.constant 0 : index
    %3 = vector.load %arg2[%c0_3, %c0_4] : memref<64x256xf32, #tpu.memory_space<vmem>>, vector<64x256xf32>
    %4 = arith.addf %3, %2 : vector<64x256xf32>
    %c0_5 = arith.constant 0 : index
    %c0_6 = arith.constant 0 : index
    %5 = vector.load %arg4[%c0_5, %c0_6] : memref<1x256xf32, #tpu.memory_space<vmem>>, vector<1x256xf32>
    %c0_7 = arith.constant 0 : index
    %c0_8 = arith.constant 0 : index
    %6 = vector.load %arg5[%c0_7, %c0_8] : memref<1x256xf32, #tpu.memory_space<vmem>>, vector<1x256xf32>
    %cst_9 = arith.constant dense<0.000000e+00> : vector<64xf32>
    %7 = vector.multi_reduction <add>, %4, %cst_9 [1] : vector<64x256xf32> to vector<64xf32>
    %8 = vector.shape_cast %7 : vector<64xf32> to vector<64x1xf32>
    %cst_10 = arith.constant 2.560000e+02 : f32
    %9 = vector.broadcast %cst_10 : f32 to vector<64x1xf32>
    %10 = arith.divf %8, %9 : vector<64x1xf32>
    %11 = vector.broadcast %10 : vector<64x1xf32> to vector<64x256xf32>
    %12 = arith.subf %4, %11 : vector<64x256xf32>
    %13 = arith.mulf %12, %12 : vector<64x256xf32>
    %cst_11 = arith.constant dense<0.000000e+00> : vector<64xf32>
    %14 = vector.multi_reduction <add>, %13, %cst_11 [1] : vector<64x256xf32> to vector<64xf32>
    %15 = vector.shape_cast %14 : vector<64xf32> to vector<64x1xf32>
    %cst_12 = arith.constant 0.00392156886 : f32
    %16 = vector.broadcast %cst_12 : f32 to vector<64x1xf32>
    %17 = arith.mulf %15, %16 : vector<64x1xf32>
    %18 = math.sqrt %17 : vector<64x1xf32>
    %cst_13 = arith.constant 9.99999997E-7 : f32
    %19 = vector.broadcast %cst_13 : f32 to vector<64x1xf32>
    %20 = arith.addf %18, %19 : vector<64x1xf32>
    %21 = tpu.reciprocal %20 {approx = true} : vector<64x1xf32> -> vector<64x1xf32>
    %22 = vector.broadcast %5 : vector<1x256xf32> to vector<64x256xf32>
    %23 = arith.mulf %22, %12 : vector<64x256xf32>
    %24 = vector.broadcast %21 : vector<64x1xf32> to vector<64x256xf32>
    %25 = arith.mulf %23, %24 : vector<64x256xf32>
    %26 = vector.broadcast %6 : vector<1x256xf32> to vector<64x256xf32>
    %27 = arith.addf %25, %26 : vector<64x256xf32>
    %c0_14 = arith.constant 0 : index
    %c0_15 = arith.constant 0 : index
    %28 = vector.load %arg6[%c0_14, %c0_15] : memref<64x256xf32, #tpu.memory_space<vmem>>, vector<64x256xf32>
    tpu.vector_store %arg6[%c0_14, %c0_15], %27 {strides = array<i32>} : memref<64x256xf32, #tpu.memory_space<vmem>>, vector<64x256xf32>,
    return
  }
  func.func @transform_0(%arg0: i32) -> (i32, i32) {
    %c0_i32 = arith.constant 0 : i32
    %c0_i32_0 = arith.constant 0 : i32
    return %arg0, %c0_i32 : i32, i32
  }
  func.func @transform_1(%arg0: i32) -> (i32, i32) {
    %c0_i32 = arith.constant 0 : i32
    %c0_i32_0 = arith.constant 0 : i32
    return %arg0, %c0_i32 : i32, i32
  }
  func.func @transform_2(%arg0: i32) -> (i32, i32) {
    %c0_i32 = arith.constant 0 : i32
    %c0_i32_0 = arith.constant 0 : i32
    %c0_i32_1 = arith.constant 0 : i32
    return %c0_i32, %c0_i32_0 : i32, i32
  }
  func.func @transform_3(%arg0: i32) -> (i32, i32) {
    %c0_i32 = arith.constant 0 : i32
    %c0_i32_0 = arith.constant 0 : i32
    %c0_i32_1 = arith.constant 0 : i32
    return %c0_i32, %c0_i32_0 : i32, i32
  }
  func.func @transform_4(%arg0: i32) -> (i32, i32) {
    %c0_i32 = arith.constant 0 : i32
    %c0_i32_0 = arith.constant 0 : i32
    %c0_i32_1 = arith.constant 0 : i32
    return %c0_i32, %c0_i32_0 : i32, i32
  }
  func.func @transform_5(%arg0: i32) -> (i32, i32) {
    %c0_i32 = arith.constant 0 : i32
    %c0_i32_0 = arith.constant 0 : i32
    return %arg0, %c0_i32 : i32, i32
  }
}

module attributes {stable_mosaic.version = 11 : i64} {
  func.func @_ffn_residual_ln_kernel(%arg0: i32, %arg1: memref<64x256xf32, #tpu.memory_space<vmem>>, %arg2: memref<256x512xf32, #tpu.memory_space<vmem>>, %arg3: memref<1x512xf32, #tpu.memory_space<vmem>>, %arg4: memref<512x256xf32, #tpu.memory_space<vmem>>, %arg5: memref<1x256xf32, #tpu.memory_space<vmem>>, %arg6: memref<1x256xf32, #tpu.memory_space<vmem>>, %arg7: memref<1x256xf32, #tpu.memory_space<vmem>>, %arg8: memref<64x256xf32, #tpu.memory_space<vmem>>) attributes {dimension_semantics = [#tpu.dimension_semantics<parallel>], iteration_bounds = array<i64: 2>, scalar_prefetch = 0 : i64, scratch_operands = 0 : i64, tpu.core_type = #tpu.core_type<tc>, window_params = [{transform_indices = @transform_0, window_bounds = array<i64: 64, 256>}, {pipeline_mode = #tpu.pipeline_mode<synchronous>, transform_indices = @transform_1, window_bounds = array<i64: 256, 512>}, {pipeline_mode = #tpu.pipeline_mode<synchronous>, transform_indices = @transform_2, window_bounds = array<i64: 1, 512>}, {pipeline_mode = #tpu.pipeline_mode<synchronous>, transform_indices = @transform_3, window_bounds = array<i64: 512, 256>}, {pipeline_mode = #tpu.pipeline_mode<synchronous>, transform_indices = @transform_4, window_bounds = array<i64: 1, 256>}, {pipeline_mode = #tpu.pipeline_mode<synchronous>, transform_indices = @transform_5, window_bounds = array<i64: 1, 256>}, {pipeline_mode = #tpu.pipeline_mode<synchronous>, transform_indices = @transform_6, window_bounds = array<i64: 1, 256>}, {transform_indices = @transform_7, window_bounds = array<i64: 64, 256>}]} {
    %c0 = arith.constant 0 : index
    %c0_0 = arith.constant 0 : index
    %0 = vector.load %arg1[%c0, %c0_0] : memref<64x256xf32, #tpu.memory_space<vmem>>, vector<64x256xf32>
    %c0_1 = arith.constant 0 : index
    %c0_2 = arith.constant 0 : index
    %1 = vector.load %arg2[%c0_1, %c0_2] : memref<256x512xf32, #tpu.memory_space<vmem>>, vector<256x512xf32>
    %cst = arith.constant dense<0.000000e+00> : vector<64x512xf32>
    %2 = tpu.matmul %0, %1, %cst {dimension_numbers = #tpu.dot_dimension_numbers<[1], [0], [0], [1], [0, 0, 1, 1], [], []>} : vector<64x256xf32>, vector<256x512xf32>, vector<64x512xf32> -> vector<64x512xf32>
    %c0_3 = arith.constant 0 : index
    %c0_4 = arith.constant 0 : index
    %3 = vector.load %arg3[%c0_3, %c0_4] : memref<1x512xf32, #tpu.memory_space<vmem>>, vector<1x512xf32>
    %4 = vector.broadcast %3 : vector<1x512xf32> to vector<64x512xf32>
    %5 = arith.addf %2, %4 : vector<64x512xf32>
    %cst_5 = arith.constant 0.000000e+00 : f32
    %6 = vector.broadcast %cst_5 : f32 to vector<64x512xf32>
    %7 = arith.maximumf %5, %6 : vector<64x512xf32>
    %c0_6 = arith.constant 0 : index
    %c0_7 = arith.constant 0 : index
    %8 = vector.load %arg4[%c0_6, %c0_7] : memref<512x256xf32, #tpu.memory_space<vmem>>, vector<512x256xf32>
    %cst_8 = arith.constant dense<0.000000e+00> : vector<64x256xf32>
    %9 = tpu.matmul %7, %8, %cst_8 {dimension_numbers = #tpu.dot_dimension_numbers<[1], [0], [0], [1], [0, 0, 1, 1], [], []>} : vector<64x512xf32>, vector<512x256xf32>, vector<64x256xf32> -> vector<64x256xf32>
    %c0_9 = arith.constant 0 : index
    %c0_10 = arith.constant 0 : index
    %10 = vector.load %arg5[%c0_9, %c0_10] : memref<1x256xf32, #tpu.memory_space<vmem>>, vector<1x256xf32>
    %11 = vector.broadcast %10 : vector<1x256xf32> to vector<64x256xf32>
    %12 = arith.addf %9, %11 : vector<64x256xf32>
    %13 = arith.addf %0, %12 : vector<64x256xf32>
    %c0_11 = arith.constant 0 : index
    %c0_12 = arith.constant 0 : index
    %14 = vector.load %arg6[%c0_11, %c0_12] : memref<1x256xf32, #tpu.memory_space<vmem>>, vector<1x256xf32>
    %c0_13 = arith.constant 0 : index
    %c0_14 = arith.constant 0 : index
    %15 = vector.load %arg7[%c0_13, %c0_14] : memref<1x256xf32, #tpu.memory_space<vmem>>, vector<1x256xf32>
    %cst_15 = arith.constant dense<0.000000e+00> : vector<64xf32>
    %16 = vector.multi_reduction <add>, %13, %cst_15 [1] : vector<64x256xf32> to vector<64xf32>
    %17 = vector.shape_cast %16 : vector<64xf32> to vector<64x1xf32>
    %cst_16 = arith.constant 2.560000e+02 : f32
    %18 = vector.broadcast %cst_16 : f32 to vector<64x1xf32>
    %19 = arith.divf %17, %18 : vector<64x1xf32>
    %20 = vector.broadcast %19 : vector<64x1xf32> to vector<64x256xf32>
    %21 = arith.subf %13, %20 : vector<64x256xf32>
    %22 = arith.mulf %21, %21 : vector<64x256xf32>
    %cst_17 = arith.constant dense<0.000000e+00> : vector<64xf32>
    %23 = vector.multi_reduction <add>, %22, %cst_17 [1] : vector<64x256xf32> to vector<64xf32>
    %24 = vector.shape_cast %23 : vector<64xf32> to vector<64x1xf32>
    %cst_18 = arith.constant 0.00392156886 : f32
    %25 = vector.broadcast %cst_18 : f32 to vector<64x1xf32>
    %26 = arith.mulf %24, %25 : vector<64x1xf32>
    %27 = math.sqrt %26 : vector<64x1xf32>
    %cst_19 = arith.constant 9.99999997E-7 : f32
    %28 = vector.broadcast %cst_19 : f32 to vector<64x1xf32>
    %29 = arith.addf %27, %28 : vector<64x1xf32>
    %30 = tpu.reciprocal %29 {approx = true} : vector<64x1xf32> -> vector<64x1xf32>
    %31 = vector.broadcast %14 : vector<1x256xf32> to vector<64x256xf32>
    %32 = arith.mulf %31, %21 : vector<64x256xf32>
    %33 = vector.broadcast %30 : vector<64x1xf32> to vector<64x256xf32>
    %34 = arith.mulf %32, %33 : vector<64x256xf32>
    %35 = vector.broadcast %15 : vector<1x256xf32> to vector<64x256xf32>
    %36 = arith.addf %34, %35 : vector<64x256xf32>
    %c0_20 = arith.constant 0 : index
    %c0_21 = arith.constant 0 : index
    %37 = vector.load %arg8[%c0_20, %c0_21] : memref<64x256xf32, #tpu.memory_space<vmem>>, vector<64x256xf32>
    tpu.vector_store %arg8[%c0_20, %c0_21], %36 {strides = array<i32>} : memref<64x256xf32, #tpu.memory_space<vmem>>, vector<64x256xf32>,
    return
  }
  func.func @transform_0(%arg0: i32) -> (i32, i32) {
    %c0_i32 = arith.constant 0 : i32
    %c0_i32_0 = arith.constant 0 : i32
    return %arg0, %c0_i32 : i32, i32
  }
  func.func @transform_1(%arg0: i32) -> (i32, i32) {
    %c0_i32 = arith.constant 0 : i32
    %c0_i32_0 = arith.constant 0 : i32
    %c0_i32_1 = arith.constant 0 : i32
    return %c0_i32, %c0_i32_0 : i32, i32
  }
  func.func @transform_2(%arg0: i32) -> (i32, i32) {
    %c0_i32 = arith.constant 0 : i32
    %c0_i32_0 = arith.constant 0 : i32
    %c0_i32_1 = arith.constant 0 : i32
    return %c0_i32, %c0_i32_0 : i32, i32
  }
  func.func @transform_3(%arg0: i32) -> (i32, i32) {
    %c0_i32 = arith.constant 0 : i32
    %c0_i32_0 = arith.constant 0 : i32
    %c0_i32_1 = arith.constant 0 : i32
    return %c0_i32, %c0_i32_0 : i32, i32
  }
  func.func @transform_4(%arg0: i32) -> (i32, i32) {
    %c0_i32 = arith.constant 0 : i32
    %c0_i32_0 = arith.constant 0 : i32
    %c0_i32_1 = arith.constant 0 : i32
    return %c0_i32, %c0_i32_0 : i32, i32
  }
  func.func @transform_5(%arg0: i32) -> (i32, i32) {
    %c0_i32 = arith.constant 0 : i32
    %c0_i32_0 = arith.constant 0 : i32
    %c0_i32_1 = arith.constant 0 : i32
    return %c0_i32, %c0_i32_0 : i32, i32
  }
  func.func @transform_6(%arg0: i32) -> (i32, i32) {
    %c0_i32 = arith.constant 0 : i32
    %c0_i32_0 = arith.constant 0 : i32
    %c0_i32_1 = arith.constant 0 : i32
    return %c0_i32, %c0_i32_0 : i32, i32
  }
  func.func @transform_7(%arg0: i32) -> (i32, i32) {
    %c0_i32 = arith.constant 0 : i32
    %c0_i32_0 = arith.constant 0 : i32
    return %arg0, %c0_i32 : i32, i32
  }
}

module attributes {stable_mosaic.version = 11 : i64} {
  func.func @_ffn_residual_ln_kernel(%arg0: i32, %arg1: memref<64x256xf32, #tpu.memory_space<vmem>>, %arg2: memref<256x512xf32, #tpu.memory_space<vmem>>, %arg3: memref<1x512xf32, #tpu.memory_space<vmem>>, %arg4: memref<512x256xf32, #tpu.memory_space<vmem>>, %arg5: memref<1x256xf32, #tpu.memory_space<vmem>>, %arg6: memref<1x256xf32, #tpu.memory_space<vmem>>, %arg7: memref<1x256xf32, #tpu.memory_space<vmem>>, %arg8: memref<64x256xf32, #tpu.memory_space<vmem>>) attributes {dimension_semantics = [#tpu.dimension_semantics<parallel>], iteration_bounds = array<i64: 2>, scalar_prefetch = 0 : i64, scratch_operands = 0 : i64, tpu.core_type = #tpu.core_type<tc>, window_params = [{transform_indices = @transform_0, window_bounds = array<i64: 64, 256>}, {pipeline_mode = #tpu.pipeline_mode<synchronous>, transform_indices = @transform_1, window_bounds = array<i64: 256, 512>}, {pipeline_mode = #tpu.pipeline_mode<synchronous>, transform_indices = @transform_2, window_bounds = array<i64: 1, 512>}, {pipeline_mode = #tpu.pipeline_mode<synchronous>, transform_indices = @transform_3, window_bounds = array<i64: 512, 256>}, {pipeline_mode = #tpu.pipeline_mode<synchronous>, transform_indices = @transform_4, window_bounds = array<i64: 1, 256>}, {pipeline_mode = #tpu.pipeline_mode<synchronous>, transform_indices = @transform_5, window_bounds = array<i64: 1, 256>}, {pipeline_mode = #tpu.pipeline_mode<synchronous>, transform_indices = @transform_6, window_bounds = array<i64: 1, 256>}, {transform_indices = @transform_7, window_bounds = array<i64: 64, 256>}]} {
    %c0 = arith.constant 0 : index
    %c0_0 = arith.constant 0 : index
    %0 = vector.load %arg1[%c0, %c0_0] : memref<64x256xf32, #tpu.memory_space<vmem>>, vector<64x256xf32>
    %c0_1 = arith.constant 0 : index
    %c0_2 = arith.constant 0 : index
    %1 = vector.load %arg2[%c0_1, %c0_2] : memref<256x512xf32, #tpu.memory_space<vmem>>, vector<256x512xf32>
    %cst = arith.constant dense<0.000000e+00> : vector<64x512xf32>
    %2 = tpu.matmul %0, %1, %cst {dimension_numbers = #tpu.dot_dimension_numbers<[1], [0], [0], [1], [0, 0, 1, 1], [], []>} : vector<64x256xf32>, vector<256x512xf32>, vector<64x512xf32> -> vector<64x512xf32>
    %c0_3 = arith.constant 0 : index
    %c0_4 = arith.constant 0 : index
    %3 = vector.load %arg3[%c0_3, %c0_4] : memref<1x512xf32, #tpu.memory_space<vmem>>, vector<1x512xf32>
    %4 = vector.broadcast %3 : vector<1x512xf32> to vector<64x512xf32>
    %5 = arith.addf %2, %4 : vector<64x512xf32>
    %cst_5 = arith.constant 0.000000e+00 : f32
    %6 = vector.broadcast %cst_5 : f32 to vector<64x512xf32>
    %7 = arith.maximumf %5, %6 : vector<64x512xf32>
    %c0_6 = arith.constant 0 : index
    %c0_7 = arith.constant 0 : index
    %8 = vector.load %arg4[%c0_6, %c0_7] : memref<512x256xf32, #tpu.memory_space<vmem>>, vector<512x256xf32>
    %cst_8 = arith.constant dense<0.000000e+00> : vector<64x256xf32>
    %9 = tpu.matmul %7, %8, %cst_8 {dimension_numbers = #tpu.dot_dimension_numbers<[1], [0], [0], [1], [0, 0, 1, 1], [], []>} : vector<64x512xf32>, vector<512x256xf32>, vector<64x256xf32> -> vector<64x256xf32>
    %c0_9 = arith.constant 0 : index
    %c0_10 = arith.constant 0 : index
    %10 = vector.load %arg5[%c0_9, %c0_10] : memref<1x256xf32, #tpu.memory_space<vmem>>, vector<1x256xf32>
    %11 = vector.broadcast %10 : vector<1x256xf32> to vector<64x256xf32>
    %12 = arith.addf %9, %11 : vector<64x256xf32>
    %13 = arith.addf %0, %12 : vector<64x256xf32>
    %c0_11 = arith.constant 0 : index
    %c0_12 = arith.constant 0 : index
    %14 = vector.load %arg6[%c0_11, %c0_12] : memref<1x256xf32, #tpu.memory_space<vmem>>, vector<1x256xf32>
    %c0_13 = arith.constant 0 : index
    %c0_14 = arith.constant 0 : index
    %15 = vector.load %arg7[%c0_13, %c0_14] : memref<1x256xf32, #tpu.memory_space<vmem>>, vector<1x256xf32>
    %cst_15 = arith.constant dense<0.000000e+00> : vector<64xf32>
    %16 = vector.multi_reduction <add>, %13, %cst_15 [1] : vector<64x256xf32> to vector<64xf32>
    %17 = vector.shape_cast %16 : vector<64xf32> to vector<64x1xf32>
    %cst_16 = arith.constant 2.560000e+02 : f32
    %18 = vector.broadcast %cst_16 : f32 to vector<64x1xf32>
    %19 = arith.divf %17, %18 : vector<64x1xf32>
    %20 = vector.broadcast %19 : vector<64x1xf32> to vector<64x256xf32>
    %21 = arith.subf %13, %20 : vector<64x256xf32>
    %22 = arith.mulf %21, %21 : vector<64x256xf32>
    %cst_17 = arith.constant dense<0.000000e+00> : vector<64xf32>
    %23 = vector.multi_reduction <add>, %22, %cst_17 [1] : vector<64x256xf32> to vector<64xf32>
    %24 = vector.shape_cast %23 : vector<64xf32> to vector<64x1xf32>
    %cst_18 = arith.constant 0.00392156886 : f32
    %25 = vector.broadcast %cst_18 : f32 to vector<64x1xf32>
    %26 = arith.mulf %24, %25 : vector<64x1xf32>
    %27 = math.sqrt %26 : vector<64x1xf32>
    %cst_19 = arith.constant 9.99999997E-7 : f32
    %28 = vector.broadcast %cst_19 : f32 to vector<64x1xf32>
    %29 = arith.addf %27, %28 : vector<64x1xf32>
    %30 = tpu.reciprocal %29 {approx = true} : vector<64x1xf32> -> vector<64x1xf32>
    %31 = vector.broadcast %14 : vector<1x256xf32> to vector<64x256xf32>
    %32 = arith.mulf %31, %21 : vector<64x256xf32>
    %33 = vector.broadcast %30 : vector<64x1xf32> to vector<64x256xf32>
    %34 = arith.mulf %32, %33 : vector<64x256xf32>
    %35 = vector.broadcast %15 : vector<1x256xf32> to vector<64x256xf32>
    %36 = arith.addf %34, %35 : vector<64x256xf32>
    %c0_20 = arith.constant 0 : index
    %c0_21 = arith.constant 0 : index
    %37 = vector.load %arg8[%c0_20, %c0_21] : memref<64x256xf32, #tpu.memory_space<vmem>>, vector<64x256xf32>
    tpu.vector_store %arg8[%c0_20, %c0_21], %36 {strides = array<i32>} : memref<64x256xf32, #tpu.memory_space<vmem>>, vector<64x256xf32>,
    return
  }
  func.func @transform_0(%arg0: i32) -> (i32, i32) {
    %c0_i32 = arith.constant 0 : i32
    %c0_i32_0 = arith.constant 0 : i32
    return %arg0, %c0_i32 : i32, i32
  }
  func.func @transform_1(%arg0: i32) -> (i32, i32) {
    %c0_i32 = arith.constant 0 : i32
    %c0_i32_0 = arith.constant 0 : i32
    %c0_i32_1 = arith.constant 0 : i32
    return %c0_i32, %c0_i32_0 : i32, i32
  }
  func.func @transform_2(%arg0: i32) -> (i32, i32) {
    %c0_i32 = arith.constant 0 : i32
    %c0_i32_0 = arith.constant 0 : i32
    %c0_i32_1 = arith.constant 0 : i32
    return %c0_i32, %c0_i32_0 : i32, i32
  }
  func.func @transform_3(%arg0: i32) -> (i32, i32) {
    %c0_i32 = arith.constant 0 : i32
    %c0_i32_0 = arith.constant 0 : i32
    %c0_i32_1 = arith.constant 0 : i32
    return %c0_i32, %c0_i32_0 : i32, i32
  }
  func.func @transform_4(%arg0: i32) -> (i32, i32) {
    %c0_i32 = arith.constant 0 : i32
    %c0_i32_0 = arith.constant 0 : i32
    %c0_i32_1 = arith.constant 0 : i32
    return %c0_i32, %c0_i32_0 : i32, i32
  }
  func.func @transform_5(%arg0: i32) -> (i32, i32) {
    %c0_i32 = arith.constant 0 : i32
    %c0_i32_0 = arith.constant 0 : i32
    %c0_i32_1 = arith.constant 0 : i32
    return %c0_i32, %c0_i32_0 : i32, i32
  }
  func.func @transform_6(%arg0: i32) -> (i32, i32) {
    %c0_i32 = arith.constant 0 : i32
    %c0_i32_0 = arith.constant 0 : i32
    %c0_i32_1 = arith.constant 0 : i32
    return %c0_i32, %c0_i32_0 : i32, i32
  }
  func.func @transform_7(%arg0: i32) -> (i32, i32) {
    %c0_i32 = arith.constant 0 : i32
    %c0_i32_0 = arith.constant 0 : i32
    return %arg0, %c0_i32 : i32, i32
  }
}

</mosaic_0001>

<bundles_post_ra>
// kernel: encoder_forward.9
= control target key start
LH: loop header
LB: loop body
LE: loop exit
PB: predicated region body
PF: predicated region fallthrough
CT: control target
= control target key end

     0   :  { %7 = vsyncpa [#allocation3], 0  ;;  %s707_s0 = inlined_call_operand.hbm [shape: f32[2,64,256], index: 0, kind: input, shape index: {}]   ;;  %s708_s1 = inlined_call_operand.vmem [shape: f32[64,256], index: 1, kind: input, shape index: {}]   ;;  %s709_s2 = inlined_call_operand.vmem [shape: f32[2,64,256], index: 2, kind: output, shape index: {}]  }
   0x1   :  { %9 = vsyncpa [#allocation3 + $0x1], 0  ;;  %s580_s9 = smov 0   ;;  %s582_s10 = smov 0  }
   0x2   :  { %s584_s11 = smov 0   ;;  %s586_s12 = smov 0  }
   0x3   :  { %s588_s13 = smov 0   ;;  %s590_s14 = smov 0  }
   0x4   :  { %s592_s15 = smov 0   ;;  %s594_s16 = smov 0  }
   0x5 LB: > { %s370_s17 = sadd.s32 4294967295, %s561_s16   ;;  %s24_s18 = sadd.s32 1, %s553_s14  ;;  %s561_s16 = sphi %s594_s16, %s15_s16   ;;  %s557_s15 = sphi %s592_s15, %s718_s15   ;;  %s553_s14 = sphi %s590_s14, %s717_s14   ;;  %s549_s13 = sphi %s588_s13, %s716_s13   ;;  %s545_s12 = sphi %s586_s12, %s715_s12   ;;  %s541_s11 = sphi %s584_s11, %s714_s11   ;;  %s537_s10 = sphi %s582_s10, %s713_s10   ;;  %s533_s9 = sphi %s580_s9, %s712_s9  }
   0x6   : > { %p25_p0 = scmp.ge.s32.totalorder %s24_s18, 2  ;;  %s27_s19 = sadd.s32 1, %s557_s15 }
   0x7   : > { %s36_s20 = sadd.s32 1, %s541_s11  ;;  %p43_p1 = scmp.ne.s32.totalorder %s541_s11, %s537_s10 }
   0x8   : > { %s720_s18 = smov (%p25_p0, %s24_s18), 0  ;;  %s722_s19 = smov (!%p25_p0, %s27_s19), %s557_s15 }
   0x9   : > { %s32_s21 = ssub.s32 %s553_s14, %s720_s18  ;;  %p44_p2 = scmp.eq.s32.totalorder %s561_s16, 0 }
   0xa   : > { %p29_p3 = scmp.ge.s32.totalorder %s722_s19, 2  ;;  %p49_p4 = scmp.ne.s32.totalorder %s537_s10, %s533_s9 }
   0xb   : > { %p631_p5 = por %p44_p2, %p43_p1  ;;  %p50_p6 = scmp.eq.s32.totalorder %s370_s17, 0 }
   0xc   : > { %s724_s19 = smov (%p29_p3, %s722_s19), 0  ;;  %p398_p8 = scmp.lt.s32.totalorder %s561_s16, 4 }
   0xd   : > { %p637_p7 = por %p50_p6, %p49_p4  ;;  %s31_s24 = ssub.s32 %s557_s15, %s724_s19 }
   0xe   : > { %s33_s25 = sor.u32 %s32_s21, %s31_s24  ;;  %s127_s26 = sand.u32 1, %s541_s11  }
   0xf   : > { %p34_p9 = scmp.eq.s32.totalorder %s33_s25, 0  ;;  %s374_s27 = sshll.u32 %s127_s26, 6 }
  0x10   : > { %s390_s28 = sshll.u32 %s553_s14, 3  ;;  %s377_s30 = sshll.u32 %s557_s15, 4 }
  0x11   : > { %s647_s29 = scalar_select %p34_p9, %s541_s11, %s36_s20  }
  0x12   : > { %s137_s3 = sadd.s32 %s390_s28, %s377_s30  ;;  %s131_s4 = scalar_lea.vmem [#allocation2], %s374_s27 }
  0x13   : > { %s142_s5 = sshll.u32 %s131_s4, 4  ;;  %s378_s6 = sshll.u32 %s137_s3, 3  ;;  %s143_s5 = int_to_ptr.vmem [resolvable:$true] %s142_s5 }
  0x14   : > { %s139_s9 = scalar_lea.hbm %s707_s0, %s378_s6  ;;  %p395_p10 = pnand %p398_p8, %p631_p5 }
  0x15   : > { %s140_s17 = sshll.u32 %s139_s9, 4  ;;  %p379_p11 = scmp.ge.s32.totalorder %s561_s16, 1  ;;  %s141_s17 = int_to_ptr.hbm [resolvable:$true] %s140_s17 }
  0x16   : > { %s128_s21 = scalar_lea.sflag [#allocation3], %s127_s26  ;;  %s563_s20 = smov 256  }
  0x17   : > { %s564_s24 = smov 16   ;;  %p160_p12 = scmp.lt.s32.totalorder %s561_s16, 5 }
  0x18   : > { %397 = dma.hbm_to_vmem [thread:$0]  (!%p395_p10), %s141_s17, 1024, %s143_s5, %s128_s21, %s563_s20, %s563_s20, %s564_s24  }
  0x19   : > { %p161_p13 = pnand %p379_p11, %p160_p12 }
  0x1a   : > { %s166_s25 = sand.u32 (!%p161_p13), 1, %s537_s10  }
  0x1b   : > { %164 = sbr.rel (%p161_p13) target bundleno = 50 (0x32), region = 28  ;;  %s380_s27 = sshll.u32 (!%p161_p13), %s166_s25, 6 }
  0x1c   : > { %s167_s28 = scalar_lea.sflag (!%p161_p13), [#allocation3], %s166_s25  ;;  %s660_s30 = scalar_lea.vmem (!%p161_p13), [#allocation2], %s380_s27 }
  0x20   : > { %528 = dma.done.wait (%p637_p7), %s167_s28, 1024  }
  0x21   : > { %530 = vsyncadd (%p637_p7), %s167_s28, 4294966272  ;;  %s381_s22 = sshll.u32 %s545_s12, 2  ;;  %p212_p0 = scmp.lt.s32.totalorder %s549_s13, 1  ;;  %v222_v0 = vld [vmem:[%s660_s30] sm:$0xff]  ;;  %v223_v2 = vld [vmem:[%s660_s30 + $0x8] sm:$0xff] }
  0x22   : > { %p205_p1 = scmp.lt.s32.totalorder %s381_s22, 7  ;;  %v224_v5 = vld [vmem:[%s660_s30 + $0x10] sm:$0xff]  ;;  %v225_v9 = vld [vmem:[%s660_s30 + $0x18] sm:$0xff]  ;;  %v226_v11 = vld [vmem:[%s660_s30 + $0x20] sm:$0xff] }
  0x23   : > { %s726_s13 = smov (!%p212_p0, %s549_s13), 1  ;;  %v227_v14 = vld [vmem:[%s660_s30 + $0x28] sm:$0xff]  ;;  %v228_v18 = vld [vmem:[%s660_s30 + $0x30] sm:$0xff]  ;;  %v229_v20 = vld [vmem:[%s660_s30 + $0x38] sm:$0xff] }
  0x24   : > { %s728_s22 = smov (!%p205_p1, %s381_s22), 7  ;;  %s386_s26 = sshll.u32 %s726_s13, 4 }
  0x25   : > { %s391_s3 = sshll.u32 %s728_s22, 4  ;;  %s385_s4 = sshll.u32 %s728_s22, 1 }
  0x26   : > { %s209_s23 = scalar_lea.vmem %s708_s1, %s391_s3  ;;  %s218_s7 = sadd.s32 %s386_s26, %s385_s4 }
  0x27   : > { %s387_s8 = sshll.u32 %s218_s7, 3  ;;  %v230_v1 = vld [vmem:[%s209_s23] sm:$0xff]  ;;  %v231_v4 = vld [vmem:[%s209_s23 + $0x8] sm:$0xff]  ;;  %v232_v6 = vld [vmem:[%s209_s23 + $0x10] sm:$0xff] }
  0x28   : > { %s220_s17 = scalar_lea.vmem %s709_s2, %s387_s8  ;;  %v238_v3 = vadd.f32 %v230_v1, %v222_v0  ;;  %v239_v7 = vadd.f32 %v231_v4, %v223_v2  ;;  %v240_v8 = vadd.f32 %v232_v6, %v224_v5  ;;  %v233_v10 = vld [vmem:[%s209_s23 + $0x18] sm:$0xff]  ;;  %v234_v13 = vld [vmem:[%s209_s23 + $0x20] sm:$0xff]  ;;  %v235_v15 = vld [vmem:[%s209_s23 + $0x28] sm:$0xff] }
  0x29   : > { %v241_v12 = vadd.f32 %v233_v10, %v225_v9  ;;  %v242_v16 = vadd.f32 %v234_v13, %v226_v11  ;;  %v243_v17 = vadd.f32 %v235_v15, %v227_v14  ;;  %v236_v19 = vld [vmem:[%s209_s23 + $0x30] sm:$0xff]  ;;  %v237_v22 = vld [vmem:[%s209_s23 + $0x38] sm:$0xff] }
  0x2a   : > { %246 = vst [vmem:[%s220_s17] sm:$0xff] %v238_v3  ;;  %v244_v21 = vadd.f32 %v236_v19, %v228_v18  ;;  %v245_v23 = vadd.f32 %v237_v22, %v229_v20 }
  0x2b   : > { %247 = vst [vmem:[%s220_s17 + $0x8] sm:$0xff] %v239_v7 }
  0x2c   : > { %248 = vst [vmem:[%s220_s17 + $0x10] sm:$0xff] %v240_v8 }
  0x2d   : > { %249 = vst [vmem:[%s220_s17 + $0x18] sm:$0xff] %v241_v12 }
  0x2e   : > { %250 = vst [vmem:[%s220_s17 + $0x20] sm:$0xff] %v242_v16 }
  0x2f   : > { %251 = vst [vmem:[%s220_s17 + $0x28] sm:$0xff] %v243_v17 }
  0x30   : > { %252 = vst [vmem:[%s220_s17 + $0x30] sm:$0xff] %v244_v21 }
  0x31   : > { %253 = vst [vmem:[%s220_s17 + $0x38] sm:$0xff] %v245_v23 }
  0x32 PF: > { %s15_s16 = sadd.s32 1, %s561_s16   ;;  %s712_s9 = smov %s537_s10 }
  0x33   : > { %p12_p2 = scmp.ge.s32.totalorder %s15_s16, 6   ;;  %s713_s10 = smov %s541_s11 }
  0x34   : > { %s714_s11 = smov %s647_s29  ;;  %s715_s12 = smov %s553_s14 }
  0x35   : > { %s716_s13 = smov %s557_s15  ;;  %s717_s14 = smov %s720_s18 }
  0x36   : > { %s718_s15 = smov %s724_s19  ;;  %14 = sbr.rel (!%p12_p2) target bundleno = 5 (0x5), region = 71 }
  0x3b   :  { %286 = vsyncpa [#allocation3], 1 }
  0x3c   :  { %288 = vsyncpa [#allocation3 + $0x1], 1 }

// kernel: encoder_forward.10
= control target key start
LH: loop header
LB: loop body
LE: loop exit
PB: predicated region body
PF: predicated region fallthrough
CT: control target
= control target key end

     0   :  { %12 = vsyncpa [#allocation3], 0  ;;  %s1736_s0 = inlined_call_operand.vmem [shape: f32[128,256], index: 0, kind: input, shape index: {}]   ;;  %s1737_s1 = inlined_call_operand.hbm [shape: f32[256,256], index: 1, kind: input, shape index: {}]   ;;  %s1738_s2 = inlined_call_operand.hbm [shape: f32[256,256], index: 2, kind: input, shape index: {}]   ;;  %s1739_s3 = inlined_call_operand.hbm [shape: f32[256,256], index: 3, kind: input, shape index: {}]   ;;  %s1740_s4 = inlined_call_operand.vmem [shape: f32[128,256], index: 4, kind: output, shape index: {0}]   ;;  %s1741_s5 = inlined_call_operand.vmem [shape: f32[128,256], index: 5, kind: output, shape index: {1}]   ;;  %s1742_s6 = inlined_call_operand.vmem [shape: f32[128,256], index: 6, kind: output, shape index: {2}]  }
   0x1   :  { %13 = vsyncpa [#allocation5], 0  ;;  %s1466_s21 = smov 0  }
   0x2 LB: > { %s1250_s22 = sadd.s32 4294967295, %s1424_s21   ;;  %p1252_p0 = scmp.ge.s32.totalorder %s1424_s21, 1  ;;  %s1424_s21 = sphi %s1466_s21, %s19_s21  }
   0x3   : > { %p191_p1 = scmp.lt.s32.totalorder %s1424_s21, 3  ;;  %p1476_p2 = scmp.eq.s32.totalorder %s1250_s22, 0 }
   0x4   : > { %s216_s26 = sshll.u32 %s1738_s2, 4  ;;  %s202_s30 = sshll.u32 %s1737_s1, 4  ;;  %s217_s26 = int_to_ptr.hbm [resolvable:$true] %s216_s26  ;;  %s203_s30 = int_to_ptr.hbm [resolvable:$true] %s202_s30 }
   0x5   : > { %p1483_p3 = pnand %p1252_p0, %p191_p1  ;;  %s1426_s7 = smov [#allocation4]  }
   0x6   : > { %s218_s8 = sshll.u32 %s1426_s7, 4  ;;  %s1427_s9 = smov [#allocation2]   ;;  %s219_s8 = int_to_ptr.vmem [resolvable:$true] %s218_s8 }
   0x7   : > { %p1291_p4 = pneg %p1483_p3  ;;  %s204_s10 = sshll.u32 %s1427_s9, 4  ;;  %s205_s10 = int_to_ptr.vmem [resolvable:$true] %s204_s10 }
   0x8   : > { %s230_s13 = sshll.u32 %s1739_s3, 4  ;;  %s1428_s14 = smov 256   ;;  %s231_s13 = int_to_ptr.hbm [resolvable:$true] %s230_s13 }
   0x9   : > { %p1292_p5 = pnand %p1476_p2, %p1291_p4  ;;  %s1429_s15 = smov 16  }
   0xa   : > { %s1430_s16 = smov [#allocation6]   ;;  %258 = sbr.rel (%p1483_p3) target bundleno = 370 (0x172), region = 36 }
   0xb   : > { %1297 = dma.hbm_to_vmem [thread:$0]  (!%p1292_p5), %s217_s26, 8192, %s219_s8, [#allocation5], %s1428_s14, %s1428_s14, %s1429_s15  }
   0xc   : > { %1294 = dma.hbm_to_vmem [thread:$0]  (!%p1292_p5), %s203_s30, 8192, %s205_s10, [#allocation3], %s1428_s14, %s1428_s14, %s1429_s15  }
   0xd   : > { %s232_s17 = sshll.u32 %s1430_s16, 4  ;;  %s233_s17 = int_to_ptr.vmem [resolvable:$true] %s232_s17 }
   0xe   : > { %1300 = dma.hbm_to_vmem [thread:$0]  (!%p1292_p5), %s231_s13, 8192, %s233_s17, [#allocation5], %s1428_s14, %s1428_s14, %s1429_s15  }
   0xf   : > { %1415 = dma.done.wait (%p1476_p2), [#allocation3], 8192  }
  0x10   : > { %1417 = vsyncadd (%p1476_p2), [#allocation3], 4294959104 }
  0x11   : > { %1419 = dma.done.wait (%p1476_p2), [#allocation5], 16384  }
  0x12   : > { %1421 = vsyncadd (%p1476_p2), [#allocation5], 4294950912  ;;  %v388_v0 = vld [vmem:[#allocation2 + $0xf8] sm:$0xff]  ;;  %v386_v2 = vld [vmem:[#allocation2 + $0xe8] sm:$0xff]  ;;  %s1509_s18 = sshll.u32 %s1250_s22, 3 }
  0x13   : > { %v420_v1 = vld [vmem:[#allocation2 + $0x1f8] sm:$0xff]  ;;  %503 = vmatpush.msra.mxu2 %v388_v0  ;;  %v418_v3 = vld [vmem:[#allocation2 + $0x1e8] sm:$0xff]  ;;  %v387_v6 = vld [vmem:[#allocation2 + $0xf0] sm:$0xff]  ;;  %p314_p6 = scmp.lt.s32.totalorder %s1509_s18, 15 }
  0x14   : > { %544 = vmatpush.msra.mxu3 %v420_v1  ;;  %v384_v4 = vld [vmem:[#allocation2 + $0xd8] sm:$0xff]  ;;  %v419_v7 = vld [vmem:[#allocation2 + $0x1f0] sm:$0xff]  ;;  %v385_v8 = vld [vmem:[#allocation2 + $0xe0] sm:$0xff]  ;;  %421 = vmatpush.msra.mxu0 %v387_v6 }
  0x15   : > { %v416_v5 = vld [vmem:[#allocation2 + $0x1d8] sm:$0xff]  ;;  %504 = vmatpush.msra.mxu2 %v386_v2  ;;  %v417_v9 = vld [vmem:[#allocation2 + $0x1e0] sm:$0xff]  ;;  %462 = vmatpush.msra.mxu1 %v419_v7  ;;  %v382_v10 = vld [vmem:[#allocation2 + $0xc8] sm:$0xff]  ;;  %s1746_s18 = smov (!%p314_p6, %s1509_s18), 15 }
  0x16   : > { %545 = vmatpush.msra.mxu3 %v418_v3  ;;  %v414_v11 = vld [vmem:[#allocation2 + $0x1c8] sm:$0xff]  ;;  %v383_v12 = vld [vmem:[#allocation2 + $0xd0] sm:$0xff]  ;;  %422 = vmatpush.msra.mxu0 %v385_v8  ;;  %v380_v14 = vld [vmem:[#allocation2 + $0xb8] sm:$0xff]  ;;  %s1515_s19 = sshll.u32 %s1746_s18, 4 }
  0x17   : > { %505 = vmatpush.msra.mxu2 %v384_v4  ;;  %v415_v13 = vld [vmem:[#allocation2 + $0x1d0] sm:$0xff]  ;;  %463 = vmatpush.msra.mxu1 %v417_v9  ;;  %v412_v15 = vld [vmem:[#allocation2 + $0x1b8] sm:$0xff]  ;;  %v381_v16 = vld [vmem:[#allocation2 + $0xc0] sm:$0xff]  ;;  %s1521_s23 = scalar_lea.vmem %s1736_s0, %s1515_s19  ;;  %s1641_s26 = scalar_lea.vmem %s1740_s4, %s1515_s19 }
  0x18   : > { %546 = vmatpush.msra.mxu3 %v416_v5  ;;  %v413_v17 = vld [vmem:[#allocation2 + $0x1c0] sm:$0xff]  ;;  %423 = vmatpush.msra.mxu0 %v383_v12  ;;  %v378_v18 = vld [vmem:[#allocation2 + $0xa8] sm:$0xff]  ;;  %v379_v20 = vld [vmem:[#allocation2 + $0xb0] sm:$0xff]  ;;  %s1693_s29 = scalar_lea.vmem %s1741_s5, %s1515_s19  ;;  %s1715_s8 = scalar_lea.vmem %s1742_s6, %s1515_s19 }
  0x19   : > { %506 = vmatpush.msra.mxu2 %v382_v10  ;;  %464 = vmatpush.msra.mxu1 %v415_v13  ;;  %v410_v19 = vld [vmem:[#allocation2 + $0x1a8] sm:$0xff]  ;;  %v411_v21 = vld [vmem:[#allocation2 + $0x1b0] sm:$0xff]  ;;  %v376_v22 = vld [vmem:[#allocation2 + $0x98] sm:$0xff] }
  0x1a   : > { %547 = vmatpush.msra.mxu3 %v414_v11  ;;  %424 = vmatpush.msra.mxu0 %v381_v16  ;;  %v408_v23 = vld [vmem:[#allocation2 + $0x198] sm:$0xff]  ;;  %v377_v24 = vld [vmem:[#allocation2 + $0xa0] sm:$0xff]  ;;  %v374_v26 = vld [vmem:[#allocation2 + $0x88] sm:$0xff] }
  0x1b   : > { %507 = vmatpush.msra.mxu2 %v380_v14  ;;  %465 = vmatpush.msra.mxu1 %v413_v17  ;;  %v409_v25 = vld [vmem:[#allocation2 + $0x1a0] sm:$0xff]  ;;  %v406_v27 = vld [vmem:[#allocation2 + $0x188] sm:$0xff]  ;;  %v375_v28 = vld [vmem:[#allocation2 + $0x90] sm:$0xff] }
  0x1c   : > { %548 = vmatpush.msra.mxu3 %v412_v15  ;;  %425 = vmatpush.msra.mxu0 %v379_v20  ;;  %v407_v29 = vld [vmem:[#allocation2 + $0x190] sm:$0xff]  ;;  %v372_v30 = vld [vmem:[#allocation2 + $0x78] sm:$0xff]  ;;  %v373_v32 = vld [vmem:[#allocation2 + $0x80] sm:$0xff] }
  0x1d   : > { %508 = vmatpush.msra.mxu2 %v378_v18  ;;  %466 = vmatpush.msra.mxu1 %v411_v21  ;;  %v404_v31 = vld [vmem:[#allocation2 + $0x178] sm:$0xff]  ;;  %v405_v33 = vld [vmem:[#allocation2 + $0x180] sm:$0xff]  ;;  %v370_v34 = vld [vmem:[#allocation2 + $0x68] sm:$0xff] }
  0x1e   : > { %549 = vmatpush.msra.mxu3 %v410_v19  ;;  %426 = vmatpush.msra.mxu0 %v377_v24  ;;  %v402_v35 = vld [vmem:[#allocation2 + $0x168] sm:$0xff]  ;;  %v371_v36 = vld [vmem:[#allocation2 + $0x70] sm:$0xff]  ;;  %v368_v38 = vld [vmem:[#allocation2 + $0x58] sm:$0xff] }
  0x1f   : > { %509 = vmatpush.msra.mxu2 %v376_v22  ;;  %467 = vmatpush.msra.mxu1 %v409_v25  ;;  %v403_v37 = vld [vmem:[#allocation2 + $0x170] sm:$0xff]  ;;  %v400_v39 = vld [vmem:[#allocation2 + $0x158] sm:$0xff]  ;;  %v369_v40 = vld [vmem:[#allocation2 + $0x60] sm:$0xff] }
  0x20   : > { %550 = vmatpush.msra.mxu3 %v408_v23  ;;  %427 = vmatpush.msra.mxu0 %v375_v28  ;;  %v401_v41 = vld [vmem:[#allocation2 + $0x160] sm:$0xff]  ;;  %v366_v42 = vld [vmem:[#allocation2 + $0x48] sm:$0xff]  ;;  %v367_v44 = vld [vmem:[#allocation2 + $0x50] sm:$0xff] }
  0x21   : > { %510 = vmatpush.msra.mxu2 %v374_v26  ;;  %468 = vmatpush.msra.mxu1 %v407_v29  ;;  %v398_v43 = vld [vmem:[#allocation2 + $0x148] sm:$0xff]  ;;  %v399_v45 = vld [vmem:[#allocation2 + $0x150] sm:$0xff]  ;;  %v364_v46 = vld [vmem:[#allocation2 + $0x38] sm:$0xff] }
  0x22   : > { %551 = vmatpush.msra.mxu3 %v406_v27  ;;  %428 = vmatpush.msra.mxu0 %v373_v32  ;;  %v396_v47 = vld [vmem:[#allocation2 + $0x138] sm:$0xff]  ;;  %v365_v48 = vld [vmem:[#allocation2 + $0x40] sm:$0xff]  ;;  %v362_v50 = vld [vmem:[#allocation2 + $0x28] sm:$0xff] }
  0x23   : > { %511 = vmatpush.msra.mxu2 %v372_v30  ;;  %469 = vmatpush.msra.mxu1 %v405_v33  ;;  %v397_v49 = vld [vmem:[#allocation2 + $0x140] sm:$0xff]  ;;  %v394_v51 = vld [vmem:[#allocation2 + $0x128] sm:$0xff]  ;;  %v363_v52 = vld [vmem:[#allocation2 + $0x30] sm:$0xff] }
  0x24   : > { %552 = vmatpush.msra.mxu3 %v404_v31  ;;  %429 = vmatpush.msra.mxu0 %v371_v36  ;;  %v395_v53 = vld [vmem:[#allocation2 + $0x130] sm:$0xff]  ;;  %v360_v54 = vld [vmem:[#allocation2 + $0x18] sm:$0xff]  ;;  %v361_v56 = vld [vmem:[#allocation2 + $0x20] sm:$0xff] }
  0x25   : > { %512 = vmatpush.msra.mxu2 %v370_v34  ;;  %470 = vmatpush.msra.mxu1 %v403_v37  ;;  %v392_v55 = vld [vmem:[#allocation2 + $0x118] sm:$0xff]  ;;  %v393_v57 = vld [vmem:[#allocation2 + $0x120] sm:$0xff]  ;;  %v358_v58 = vld [vmem:[#allocation2 + $0x8] sm:$0xff] }
  0x26   : > { %553 = vmatpush.msra.mxu3 %v402_v35  ;;  %430 = vmatpush.msra.mxu0 %v369_v40  ;;  %v390_v59 = vld [vmem:[#allocation2 + $0x108] sm:$0xff]  ;;  %v1524_v60 = vld [vmem:[%s1521_s23] sm:$0xff]  ;;  %v632_v62 = vld [vmem:[#allocation4 + $0xf8] sm:$0xff] }
  0x27   : > { %513 = vmatpush.msra.mxu2 %v368_v38  ;;  %471 = vmatpush.msra.mxu1 %v401_v41  ;;  %v1527_v61 = vld [vmem:[%s1521_s23 + $0x8] sm:$0xff]  ;;  %v664_v63 = vld [vmem:[#allocation4 + $0x1f8] sm:$0xff]  ;;  %v359_v0 = vld [vmem:[#allocation2 + $0x10] sm:$0xff] }
  0x28   : > { %554 = vmatpush.msra.mxu3 %v400_v39  ;;  %431 = vmatpush.msra.mxu0 %v367_v44  ;;  %v391_v1 = vld [vmem:[#allocation2 + $0x110] sm:$0xff]  ;;  %v630_v2 = vld [vmem:[#allocation4 + $0xe8] sm:$0xff]  ;;  %v357_v4 = vld [vmem:[#allocation2] sm:$0xff] }
  0x29   : > { %514 = vmatpush.msra.mxu2 %v366_v42  ;;  %472 = vmatpush.msra.mxu1 %v399_v45  ;;  %v662_v3 = vld [vmem:[#allocation4 + $0x1e8] sm:$0xff]  ;;  %v389_v5 = vld [vmem:[#allocation2 + $0x100] sm:$0xff]  ;;  %v631_v6 = vld [vmem:[#allocation4 + $0xf0] sm:$0xff] }
  0x2a   : > { %555 = vmatpush.msra.mxu3 %v398_v43  ;;  %432 = vmatpush.msra.mxu0 %v365_v48  ;;  %v663_v7 = vld [vmem:[#allocation4 + $0x1f0] sm:$0xff]  ;;  %v628_v8 = vld [vmem:[#allocation4 + $0xd8] sm:$0xff]  ;;  %v629_v12 = vld [vmem:[#allocation4 + $0xe0] sm:$0xff] }
  0x2b   : > { %515 = vmatpush.msra.mxu2 %v364_v46  ;;  %473 = vmatpush.msra.mxu1 %v397_v49  ;;  %v660_v9 = vld [vmem:[#allocation4 + $0x1d8] sm:$0xff]  ;;  %v1534_v10 = vld [vmem:[%s1521_s23 + $0x10] sm:$0xff]  ;;  %v661_v13 = vld [vmem:[#allocation4 + $0x1e0] sm:$0xff] }
  0x2c   : > { %556 = vmatpush.msra.mxu3 %v396_v47  ;;  %433 = vmatpush.msra.mxu0 %v363_v52  ;;  %v1537_v11 = vld [vmem:[%s1521_s23 + $0x18] sm:$0xff]  ;;  %v626_v14 = vld [vmem:[#allocation4 + $0xc8] sm:$0xff]  ;;  %v627_v16 = vld [vmem:[#allocation4 + $0xd0] sm:$0xff] }
  0x2d   : > { %516 = vmatpush.msra.mxu2 %v362_v50  ;;  %474 = vmatpush.msra.mxu1 %v395_v53  ;;  %v658_v15 = vld [vmem:[#allocation4 + $0x1c8] sm:$0xff]  ;;  %v659_v17 = vld [vmem:[#allocation4 + $0x1d0] sm:$0xff]  ;;  %v624_v18 = vld [vmem:[#allocation4 + $0xb8] sm:$0xff] }
  0x2e   : > { %557 = vmatpush.msra.mxu3 %v394_v51  ;;  %434 = vmatpush.msra.mxu0 %v361_v56  ;;  %v656_v19 = vld [vmem:[#allocation4 + $0x1b8] sm:$0xff]  ;;  %v625_v20 = vld [vmem:[#allocation4 + $0xc0] sm:$0xff]  ;;  %v622_v22 = vld [vmem:[#allocation4 + $0xa8] sm:$0xff] }
  0x2f   : > { %517 = vmatpush.msra.mxu2 %v360_v54  ;;  %475 = vmatpush.msra.mxu1 %v393_v57  ;;  %v657_v21 = vld [vmem:[#allocation4 + $0x1c0] sm:$0xff]  ;;  %v654_v23 = vld [vmem:[#allocation4 + $0x1a8] sm:$0xff]  ;;  %v623_v26 = vld [vmem:[#allocation4 + $0xb0] sm:$0xff] }
  0x30   : > { %558 = vmatpush.msra.mxu3 %v392_v55  ;;  %435 = vmatpush.msra.mxu0 %v359_v0  ;;  %v1544_v24 = vld [vmem:[%s1521_s23 + $0x20] sm:$0xff]  ;;  %v1547_v25 = vld [vmem:[%s1521_s23 + $0x28] sm:$0xff]  ;;  %v655_v27 = vld [vmem:[#allocation4 + $0x1b0] sm:$0xff] }
  0x31   : > { %518 = vmatpush.msra.mxu2 %v358_v58  ;;  %476 = vmatpush.msra.mxu1 %v391_v1  ;;  %v620_v28 = vld [vmem:[#allocation4 + $0x98] sm:$0xff]  ;;  %v621_v30 = vld [vmem:[#allocation4 + $0xa0] sm:$0xff]  ;;  %v618_v32 = vld [vmem:[#allocation4 + $0x88] sm:$0xff] }
  0x32   : > { %559 = vmatpush.msra.mxu3 %v390_v59  ;;  %519 = vmatmul.f32.vlgmr.msra.gmra.mxu2 %v1524_v60  ;;  %v652_v29 = vld [vmem:[#allocation4 + $0x198] sm:$0xff]  ;;  %v653_v31 = vld [vmem:[#allocation4 + $0x1a0] sm:$0xff]  ;;  %v650_v33 = vld [vmem:[#allocation4 + $0x188] sm:$0xff] }
  0x33   : > { %560 = vmatmul.f32.vlgmr.msra.gmra.mxu3 %v1527_v61  ;;  %747 = vmatpush.msrb.mxu2 %v632_v62  ;;  %v619_v34 = vld [vmem:[#allocation4 + $0x90] sm:$0xff]  ;;  %v616_v36 = vld [vmem:[#allocation4 + $0x78] sm:$0xff]  ;;  %v617_v40 = vld [vmem:[#allocation4 + $0x80] sm:$0xff] }
  0x34   : > { %788 = vmatpush.msrb.mxu3 %v664_v63  ;;  %436 = vmatpush.msra.mxu0 %v357_v4  ;;  %v651_v35 = vld [vmem:[#allocation4 + $0x190] sm:$0xff]  ;;  %v648_v37 = vld [vmem:[#allocation4 + $0x178] sm:$0xff]  ;;  %v649_v41 = vld [vmem:[#allocation4 + $0x180] sm:$0xff] }
  0x35   : > { %748 = vmatpush.msrb.mxu2 %v630_v2  ;;  %477 = vmatpush.msra.mxu1 %v389_v5  ;;  %v1554_v38 = vld [vmem:[%s1521_s23 + $0x30] sm:$0xff]  ;;  %v1557_v39 = vld [vmem:[%s1521_s23 + $0x38] sm:$0xff]  ;;  %v614_v42 = vld [vmem:[#allocation4 + $0x68] sm:$0xff] }
  0x36   : > { %789 = vmatpush.msrb.mxu3 %v662_v3  ;;  %437 = vmatmul.f32.vlgmr.msra.gmra.mxu0 %v1524_v60  ;;  %v646_v43 = vld [vmem:[#allocation4 + $0x168] sm:$0xff]  ;;  %v615_v44 = vld [vmem:[#allocation4 + $0x70] sm:$0xff]  ;;  %v612_v46 = vld [vmem:[#allocation4 + $0x58] sm:$0xff] }
  0x37   : > { %478 = vmatmul.f32.vlgmr.msra.gmra.mxu1 %v1527_v61  ;;  %665 = vmatpush.msrb.mxu0 %v631_v6  ;;  %v647_v45 = vld [vmem:[#allocation4 + $0x170] sm:$0xff]  ;;  %v644_v47 = vld [vmem:[#allocation4 + $0x158] sm:$0xff]  ;;  %v613_v48 = vld [vmem:[#allocation4 + $0x60] sm:$0xff] }
  0x38   : > { %706 = vmatpush.msrb.mxu1 %v663_v7  ;;  %749 = vmatpush.msrb.mxu2 %v628_v8  ;;  %v645_v49 = vld [vmem:[#allocation4 + $0x160] sm:$0xff]  ;;  %v610_v50 = vld [vmem:[#allocation4 + $0x48] sm:$0xff]  ;;  %v611_v54 = vld [vmem:[#allocation4 + $0x50] sm:$0xff] }
  0x39   : > { %790 = vmatpush.msrb.mxu3 %v660_v9  ;;  %666 = vmatpush.msrb.mxu0 %v629_v12  ;;  %v642_v51 = vld [vmem:[#allocation4 + $0x148] sm:$0xff]  ;;  %v1564_v52 = vld [vmem:[%s1521_s23 + $0x40] sm:$0xff]  ;;  %v643_v55 = vld [vmem:[#allocation4 + $0x150] sm:$0xff] }
  0x3a   : > { %522 = vmatmul.f32.gmra.mxu2 %v1534_v10  ;;  %707 = vmatpush.msrb.mxu1 %v661_v13  ;;  %v1567_v53 = vld [vmem:[%s1521_s23 + $0x48] sm:$0xff]  ;;  %v608_v56 = vld [vmem:[#allocation4 + $0x38] sm:$0xff]  ;;  %v609_v58 = vld [vmem:[#allocation4 + $0x40] sm:$0xff] }
  0x3b   : > { %563 = vmatmul.f32.gmra.mxu3 %v1537_v11  ;;  %750 = vmatpush.msrb.mxu2 %v626_v14  ;;  %v640_v57 = vld [vmem:[#allocation4 + $0x138] sm:$0xff]  ;;  %v641_v59 = vld [vmem:[#allocation4 + $0x140] sm:$0xff]  ;;  %v606_v62 = vld [vmem:[#allocation4 + $0x28] sm:$0xff] }
  0x3c   : > { %791 = vmatpush.msrb.mxu3 %v658_v15  ;;  %667 = vmatpush.msrb.mxu0 %v627_v16  ;;  %v638_v63 = vld [vmem:[#allocation4 + $0x128] sm:$0xff]  ;;  %v607_v0 = vld [vmem:[#allocation4 + $0x30] sm:$0xff]  ;;  %v604_v2 = vld [vmem:[#allocation4 + $0x18] sm:$0xff] }
  0x3d   : > { %708 = vmatpush.msrb.mxu1 %v659_v17  ;;  %751 = vmatpush.msrb.mxu2 %v624_v18  ;;  %v639_v1 = vld [vmem:[#allocation4 + $0x130] sm:$0xff]  ;;  %v636_v3 = vld [vmem:[#allocation4 + $0x118] sm:$0xff]  ;;  %v605_v6 = vld [vmem:[#allocation4 + $0x20] sm:$0xff] }
  0x3e   : > { %792 = vmatpush.msrb.mxu3 %v656_v19  ;;  %440 = vmatmul.f32.gmra.mxu0 %v1534_v10  ;;  %v1574_v4 = vld [vmem:[%s1521_s23 + $0x50] sm:$0xff]  ;;  %v1577_v5 = vld [vmem:[%s1521_s23 + $0x58] sm:$0xff]  ;;  %v637_v7 = vld [vmem:[#allocation4 + $0x120] sm:$0xff] }
  0x3f   : > { %481 = vmatmul.f32.gmra.mxu1 %v1537_v11  ;;  %668 = vmatpush.msrb.mxu0 %v625_v20  ;;  %v602_v8 = vld [vmem:[#allocation4 + $0x8] sm:$0xff]  ;;  %v603_v12 = vld [vmem:[#allocation4 + $0x10] sm:$0xff]  ;;  %v876_v14 = vld [vmem:[#allocation6 + $0xf8] sm:$0xff] }
  0x40   : > { %709 = vmatpush.msrb.mxu1 %v657_v21  ;;  %752 = vmatpush.msrb.mxu2 %v622_v22  ;;  %v634_v9 = vld [vmem:[#allocation4 + $0x108] sm:$0xff]  ;;  %v635_v13 = vld [vmem:[#allocation4 + $0x110] sm:$0xff]  ;;  %v908_v15 = vld [vmem:[#allocation6 + $0x1f8] sm:$0xff] }
  0x41   : > { %793 = vmatpush.msrb.mxu3 %v654_v23  ;;  %669 = vmatpush.msrb.mxu0 %v623_v26  ;;  %v601_v16 = vld [vmem:[#allocation4] sm:$0xff]  ;;  %v874_v18 = vld [vmem:[#allocation6 + $0xe8] sm:$0xff]  ;;  %v875_v22 = vld [vmem:[#allocation6 + $0xf0] sm:$0xff] }
  0x42   : > { %525 = vmatmul.f32.gmra.mxu2 %v1544_v24  ;;  %710 = vmatpush.msrb.mxu1 %v655_v27  ;;  %v633_v17 = vld [vmem:[#allocation4 + $0x100] sm:$0xff]  ;;  %v906_v19 = vld [vmem:[#allocation6 + $0x1e8] sm:$0xff]  ;;  %v907_v23 = vld [vmem:[#allocation6 + $0x1f0] sm:$0xff] }
  0x43   : > { %566 = vmatmul.f32.gmra.mxu3 %v1547_v25  ;;  %753 = vmatpush.msrb.mxu2 %v620_v28  ;;  %v1584_v20 = vld [vmem:[%s1521_s23 + $0x60] sm:$0xff]  ;;  %v1587_v21 = vld [vmem:[%s1521_s23 + $0x68] sm:$0xff]  ;;  %v872_v26 = vld [vmem:[#allocation6 + $0xd8] sm:$0xff] }
  0x44   : > { %794 = vmatpush.msrb.mxu3 %v652_v29  ;;  %670 = vmatpush.msrb.mxu0 %v621_v30  ;;  %v904_v27 = vld [vmem:[#allocation6 + $0x1d8] sm:$0xff]  ;;  %v873_v28 = vld [vmem:[#allocation6 + $0xe0] sm:$0xff]  ;;  %v870_v30 = vld [vmem:[#allocation6 + $0xc8] sm:$0xff] }
  0x45   : > { %711 = vmatpush.msrb.mxu1 %v653_v31  ;;  %754 = vmatpush.msrb.mxu2 %v618_v32  ;;  %v905_v29 = vld [vmem:[#allocation6 + $0x1e0] sm:$0xff]  ;;  %v902_v31 = vld [vmem:[#allocation6 + $0x1c8] sm:$0xff]  ;;  %v871_v32 = vld [vmem:[#allocation6 + $0xd0] sm:$0xff] }
  0x46   : > { %795 = vmatpush.msrb.mxu3 %v650_v33  ;;  %443 = vmatmul.f32.gmra.mxu0 %v1544_v24  ;;  %v903_v33 = vld [vmem:[#allocation6 + $0x1d0] sm:$0xff] }
  0x47   : > { %484 = vmatmul.f32.gmra.mxu1 %v1547_v25  ;;  %671 = vmatpush.msrb.mxu0 %v619_v34  ;;  %v868_v34 = vld [vmem:[#allocation6 + $0xb8] sm:$0xff] }
  0x48   : > { %712 = vmatpush.msrb.mxu1 %v651_v35  ;;  %755 = vmatpush.msrb.mxu2 %v616_v36  ;;  %v900_v35 = vld [vmem:[#allocation6 + $0x1b8] sm:$0xff]  ;;  %v1594_v36 = vld [vmem:[%s1521_s23 + $0x70] sm:$0xff] }
  0x49   : > { %796 = vmatpush.msrb.mxu3 %v648_v37  ;;  %672 = vmatpush.msrb.mxu0 %v617_v40  ;;  %v1597_v37 = vld [vmem:[%s1521_s23 + $0x78] sm:$0xff]  ;;  %v869_v40 = vld [vmem:[#allocation6 + $0xc0] sm:$0xff] }
  0x4a   : > { %528 = vmatmul.f32.gmra.mxu2 %v1554_v38  ;;  %713 = vmatpush.msrb.mxu1 %v649_v41  ;;  %v901_v41 = vld [vmem:[#allocation6 + $0x1c0] sm:$0xff] }
  0x4b   : > { %569 = vmatmul.f32.gmra.mxu3 %v1557_v39  ;;  %756 = vmatpush.msrb.mxu2 %v614_v42  ;;  %v866_v42 = vld [vmem:[#allocation6 + $0xa8] sm:$0xff] }
  0x4c   : > { %797 = vmatpush.msrb.mxu3 %v646_v43  ;;  %673 = vmatpush.msrb.mxu0 %v615_v44  ;;  %v898_v43 = vld [vmem:[#allocation6 + $0x1a8] sm:$0xff]  ;;  %v867_v44 = vld [vmem:[#allocation6 + $0xb0] sm:$0xff] }
  0x4d   : > { %714 = vmatpush.msrb.mxu1 %v647_v45  ;;  %757 = vmatpush.msrb.mxu2 %v612_v46  ;;  %v899_v45 = vld [vmem:[#allocation6 + $0x1b0] sm:$0xff]  ;;  %v864_v46 = vld [vmem:[#allocation6 + $0x98] sm:$0xff] }
  0x4e   : > { %798 = vmatpush.msrb.mxu3 %v644_v47  ;;  %446 = vmatmul.f32.gmra.mxu0 %v1554_v38  ;;  %v896_v47 = vld [vmem:[#allocation6 + $0x198] sm:$0xff] }
  0x4f   : > { %487 = vmatmul.f32.gmra.mxu1 %v1557_v39  ;;  %674 = vmatpush.msrb.mxu0 %v613_v48  ;;  %v865_v48 = vld [vmem:[#allocation6 + $0xa0] sm:$0xff] }
  0x50   : > { %715 = vmatpush.msrb.mxu1 %v645_v49  ;;  %758 = vmatpush.msrb.mxu2 %v610_v50  ;;  %v897_v49 = vld [vmem:[#allocation6 + $0x1a0] sm:$0xff]  ;;  %v862_v50 = vld [vmem:[#allocation6 + $0x88] sm:$0xff] }
  0x51   : > { %799 = vmatpush.msrb.mxu3 %v642_v51  ;;  %675 = vmatpush.msrb.mxu0 %v611_v54  ;;  %v894_v51 = vld [vmem:[#allocation6 + $0x188] sm:$0xff]  ;;  %v863_v54 = vld [vmem:[#allocation6 + $0x90] sm:$0xff] }
  0x52   : > { %531 = vmatmul.f32.gmra.mxu2 %v1564_v52  ;;  %716 = vmatpush.msrb.mxu1 %v643_v55  ;;  %v895_v55 = vld [vmem:[#allocation6 + $0x190] sm:$0xff] }
  0x53   : > { %572 = vmatmul.f32.gmra.mxu3 %v1567_v53  ;;  %759 = vmatpush.msrb.mxu2 %v608_v56  ;;  %v860_v56 = vld [vmem:[#allocation6 + $0x78] sm:$0xff] }
  0x54   : > { %800 = vmatpush.msrb.mxu3 %v640_v57  ;;  %676 = vmatpush.msrb.mxu0 %v609_v58  ;;  %v892_v57 = vld [vmem:[#allocation6 + $0x178] sm:$0xff]  ;;  %v861_v58 = vld [vmem:[#allocation6 + $0x80] sm:$0xff] }
  0x55   : > { %717 = vmatpush.msrb.mxu1 %v641_v59  ;;  %760 = vmatpush.msrb.mxu2 %v606_v62  ;;  %v893_v59 = vld [vmem:[#allocation6 + $0x180] sm:$0xff]  ;;  %v858_v62 = vld [vmem:[#allocation6 + $0x68] sm:$0xff] }
  0x56   : > { %801 = vmatpush.msrb.mxu3 %v638_v63  ;;  %449 = vmatmul.f32.gmra.mxu0 %v1564_v52  ;;  %v890_v63 = vld [vmem:[#allocation6 + $0x168] sm:$0xff] }
  0x57   : > { %490 = vmatmul.f32.gmra.mxu1 %v1567_v53  ;;  %677 = vmatpush.msrb.mxu0 %v607_v0  ;;  %v859_v0 = vld [vmem:[#allocation6 + $0x70] sm:$0xff] }
  0x58   : > { %718 = vmatpush.msrb.mxu1 %v639_v1  ;;  %761 = vmatpush.msrb.mxu2 %v604_v2  ;;  %v891_v1 = vld [vmem:[#allocation6 + $0x170] sm:$0xff]  ;;  %v856_v2 = vld [vmem:[#allocation6 + $0x58] sm:$0xff] }
  0x59   : > { %802 = vmatpush.msrb.mxu3 %v636_v3  ;;  %678 = vmatpush.msrb.mxu0 %v605_v6  ;;  %v888_v3 = vld [vmem:[#allocation6 + $0x158] sm:$0xff]  ;;  %v857_v6 = vld [vmem:[#allocation6 + $0x60] sm:$0xff] }
  0x5a   : > { %534 = vmatmul.f32.gmra.mxu2 %v1574_v4  ;;  %719 = vmatpush.msrb.mxu1 %v637_v7  ;;  %v889_v7 = vld [vmem:[#allocation6 + $0x160] sm:$0xff] }
  0x5b   : > { %575 = vmatmul.f32.gmra.mxu3 %v1577_v5  ;;  %762 = vmatpush.msrb.mxu2 %v602_v8  ;;  %v854_v8 = vld [vmem:[#allocation6 + $0x48] sm:$0xff] }
  0x5c   : > { %803 = vmatpush.msrb.mxu3 %v634_v9  ;;  %679 = vmatpush.msrb.mxu0 %v603_v12  ;;  %v886_v9 = vld [vmem:[#allocation6 + $0x148] sm:$0xff]  ;;  %v855_v12 = vld [vmem:[#allocation6 + $0x50] sm:$0xff] }
  0x5d   : > { %720 = vmatpush.msrb.mxu1 %v635_v13  ;;  %991 = vmatpush.msra.mxu2 %v876_v14  ;;  %v887_v13 = vld [vmem:[#allocation6 + $0x150] sm:$0xff]  ;;  %v852_v14 = vld [vmem:[#allocation6 + $0x38] sm:$0xff] }
  0x5e   : > { %1032 = vmatpush.msra.mxu3 %v908_v15  ;;  %452 = vmatmul.f32.gmra.mxu0 %v1574_v4  ;;  %v884_v15 = vld [vmem:[#allocation6 + $0x138] sm:$0xff] }
  0x5f   : > { %493 = vmatmul.f32.gmra.mxu1 %v1577_v5  ;;  %680 = vmatpush.msrb.mxu0 %v601_v16  ;;  %v853_v16 = vld [vmem:[#allocation6 + $0x40] sm:$0xff] }
  0x60   : > { %721 = vmatpush.msrb.mxu1 %v633_v17  ;;  %992 = vmatpush.msra.mxu2 %v874_v18  ;;  %v885_v17 = vld [vmem:[#allocation6 + $0x140] sm:$0xff]  ;;  %v850_v18 = vld [vmem:[#allocation6 + $0x28] sm:$0xff] }
  0x61   : > { %1033 = vmatpush.msra.mxu3 %v906_v19  ;;  %909 = vmatpush.msra.mxu0 %v875_v22  ;;  %v882_v19 = vld [vmem:[#allocation6 + $0x128] sm:$0xff]  ;;  %v851_v22 = vld [vmem:[#allocation6 + $0x30] sm:$0xff] }
  0x62   : > { %537 = vmatmul.f32.gmra.mxu2 %v1584_v20  ;;  %950 = vmatpush.msra.mxu1 %v907_v23  ;;  %v883_v23 = vld [vmem:[#allocation6 + $0x130] sm:$0xff] }
  0x63   : > { %578 = vmatmul.f32.gmra.mxu3 %v1587_v21  ;;  %993 = vmatpush.msra.mxu2 %v872_v26  ;;  %v848_v26 = vld [vmem:[#allocation6 + $0x18] sm:$0xff] }
  0x64   : > { %1034 = vmatpush.msra.mxu3 %v904_v27  ;;  %910 = vmatpush.msra.mxu0 %v873_v28  ;;  %v880_v27 = vld [vmem:[#allocation6 + $0x118] sm:$0xff]  ;;  %v849_v28 = vld [vmem:[#allocation6 + $0x20] sm:$0xff] }
  0x65   : > { %951 = vmatpush.msra.mxu1 %v905_v29  ;;  %994 = vmatpush.msra.mxu2 %v870_v30  ;;  %v881_v29 = vld [vmem:[#allocation6 + $0x120] sm:$0xff]  ;;  %v846_v30 = vld [vmem:[#allocation6 + $0x8] sm:$0xff] }
  0x66   : > { %1035 = vmatpush.msra.mxu3 %v902_v31  ;;  %455 = vmatmul.f32.gmra.mxu0 %v1584_v20  ;;  %v878_v31 = vld [vmem:[#allocation6 + $0x108] sm:$0xff] }
  0x67   : > { %496 = vmatmul.f32.gmra.mxu1 %v1587_v21  ;;  %911 = vmatpush.msra.mxu0 %v871_v32  ;;  %v847_v32 = vld [vmem:[#allocation6 + $0x10] sm:$0xff] }
  0x68   : > { %952 = vmatpush.msra.mxu1 %v903_v33  ;;  %995 = vmatpush.msra.mxu2 %v868_v34  ;;  %v879_v33 = vld [vmem:[#allocation6 + $0x110] sm:$0xff]  ;;  %v845_v34 = vld [vmem:[#allocation6] sm:$0xff] }
  0x69   : > { %1036 = vmatpush.msra.mxu3 %v900_v35  ;;  %912 = vmatpush.msra.mxu0 %v869_v40  ;;  %v877_v35 = vld [vmem:[#allocation6 + $0x100] sm:$0xff] }
  0x6a   : > { %540 = vmatmul.f32.gmra.mxu2 %v1594_v36  ;;  %953 = vmatpush.msra.mxu1 %v901_v41 }
  0x6b   : > { %581 = vmatmul.f32.gmra.mxu3 %v1597_v37  ;;  %996 = vmatpush.msra.mxu2 %v866_v42 }
  0x6c   : > { %1037 = vmatpush.msra.mxu3 %v898_v43  ;;  %913 = vmatpush.msra.mxu0 %v867_v44 }
  0x6d   : > { %954 = vmatpush.msra.mxu1 %v899_v45  ;;  %997 = vmatpush.msra.mxu2 %v864_v46 }
  0x6e   : > { %1038 = vmatpush.msra.mxu3 %v896_v47  ;;  %458 = vmatmul.f32.gmra.mxu0 %v1594_v36 }
  0x6f   : > { %499 = vmatmul.f32.gmra.mxu1 %v1597_v37  ;;  %914 = vmatpush.msra.mxu0 %v865_v48 }
  0x70   : > { %955 = vmatpush.msra.mxu1 %v897_v49  ;;  %998 = vmatpush.msra.mxu2 %v862_v50 }
  0x71   : > { %1039 = vmatpush.msra.mxu3 %v894_v51  ;;  %915 = vmatpush.msra.mxu0 %v863_v54 }
  0x72   : > { %763 = vmatmul.f32.vlgmr.msrb.gmra.mxu2 %v1524_v60  ;;  %956 = vmatpush.msra.mxu1 %v895_v55 }
  0x73   : > { %804 = vmatmul.f32.vlgmr.msrb.gmra.mxu3 %v1527_v61  ;;  %999 = vmatpush.msra.mxu2 %v860_v56 }
  0x74   : > { %1040 = vmatpush.msra.mxu3 %v892_v57  ;;  %916 = vmatpush.msra.mxu0 %v861_v58 }
  0x75   : > { %957 = vmatpush.msra.mxu1 %v893_v59  ;;  %1000 = vmatpush.msra.mxu2 %v858_v62 }
  0x76   : > { %1041 = vmatpush.msra.mxu3 %v890_v63  ;;  %681 = vmatmul.f32.vlgmr.msrb.gmra.mxu0 %v1524_v60 }
  0x77   : > { %722 = vmatmul.f32.vlgmr.msrb.gmra.mxu1 %v1527_v61  ;;  %917 = vmatpush.msra.mxu0 %v859_v0 }
  0x78   : > { %958 = vmatpush.msra.mxu1 %v891_v1  ;;  %1001 = vmatpush.msra.mxu2 %v856_v2 }
  0x79   : > { %1042 = vmatpush.msra.mxu3 %v888_v3  ;;  %918 = vmatpush.msra.mxu0 %v857_v6 }
  0x7a   : > { %766 = vmatmul.f32.gmra.mxu2 %v1534_v10  ;;  %959 = vmatpush.msra.mxu1 %v889_v7 }
  0x7b   : > { %807 = vmatmul.f32.gmra.mxu3 %v1537_v11  ;;  %1002 = vmatpush.msra.mxu2 %v854_v8 }
  0x7c   : > { %1043 = vmatpush.msra.mxu3 %v886_v9  ;;  %919 = vmatpush.msra.mxu0 %v855_v12 }
  0x7d   : > { %960 = vmatpush.msra.mxu1 %v887_v13  ;;  %1003 = vmatpush.msra.mxu2 %v852_v14 }
  0x7e   : > { %684 = vmatmul.f32.gmra.mxu0 %v1534_v10  ;;  %1044 = vmatpush.msra.mxu3 %v884_v15 }
  0x7f   : > { %725 = vmatmul.f32.gmra.mxu1 %v1537_v11  ;;  %920 = vmatpush.msra.mxu0 %v853_v16 }
  0x80   : > { %961 = vmatpush.msra.mxu1 %v885_v17  ;;  %1004 = vmatpush.msra.mxu2 %v850_v18 }
  0x81   : > { %1045 = vmatpush.msra.mxu3 %v882_v19  ;;  %921 = vmatpush.msra.mxu0 %v851_v22 }
  0x82   : > { %769 = vmatmul.f32.gmra.mxu2 %v1544_v24  ;;  %962 = vmatpush.msra.mxu1 %v883_v23 }
  0x83   : > { %810 = vmatmul.f32.gmra.mxu3 %v1547_v25  ;;  %1005 = vmatpush.msra.mxu2 %v848_v26 }
  0x84   : > { %1046 = vmatpush.msra.mxu3 %v880_v27  ;;  %922 = vmatpush.msra.mxu0 %v849_v28 }
  0x85   : > { %963 = vmatpush.msra.mxu1 %v881_v29  ;;  %1006 = vmatpush.msra.mxu2 %v846_v30 }
  0x86   : > { %687 = vmatmul.f32.gmra.mxu0 %v1544_v24  ;;  %1047 = vmatpush.msra.mxu3 %v878_v31 }
  0x87   : > { %728 = vmatmul.f32.gmra.mxu1 %v1547_v25  ;;  %923 = vmatpush.msra.mxu0 %v847_v32 }
  0x88   : > { %964 = vmatpush.msra.mxu1 %v879_v33 }
  0x89   : > { %924 = vmatpush.msra.mxu0 %v845_v34 }
  0x8a   : > { %772 = vmatmul.f32.gmra.mxu2 %v1554_v38  ;;  %965 = vmatpush.msra.mxu1 %v877_v35 }
  0x8b   : > { %813 = vmatmul.f32.gmra.mxu3 %v1557_v39 }
  0x8e   : > { %690 = vmatmul.f32.gmra.mxu0 %v1554_v38 }
  0x8f   : > { %731 = vmatmul.f32.gmra.mxu1 %v1557_v39 }
  0x92   : > { %775 = vmatmul.f32.gmra.mxu2 %v1564_v52 }
  0x93   : > { %816 = vmatmul.f32.gmra.mxu3 %v1567_v53 }
  0x96   : > { %693 = vmatmul.f32.gmra.mxu0 %v1564_v52 }
  0x97   : > { %734 = vmatmul.f32.gmra.mxu1 %v1567_v53 }
  0x9a   : > { %778 = vmatmul.f32.gmra.mxu2 %v1574_v4 }
  0x9b   : > { %819 = vmatmul.f32.gmra.mxu3 %v1577_v5 }
  0x9e   : > { %696 = vmatmul.f32.gmra.mxu0 %v1574_v4 }
  0x9f   : > { %737 = vmatmul.f32.gmra.mxu1 %v1577_v5 }
  0xa2   : > { %781 = vmatmul.f32.gmra.mxu2 %v1584_v20 }
  0xa3   : > { %822 = vmatmul.f32.gmra.mxu3 %v1587_v21 }
  0xa6   : > { %699 = vmatmul.f32.gmra.mxu0 %v1584_v20 }
  0xa7   : > { %740 = vmatmul.f32.gmra.mxu1 %v1587_v21 }
  0xaa   : > { %784 = vmatmul.f32.gmra.mxu2 %v1594_v36 }
  0xab   : > { %825 = vmatmul.f32.gmra.mxu3 %v1597_v37 }
  0xae   : > { %702 = vmatmul.f32.gmra.mxu0 %v1594_v36 }
  0xaf   : > { %743 = vmatmul.f32.gmra.mxu1 %v1597_v37 }
  0xb2   : > { %1007 = vmatmul.f32.vlgmr.msra.gmra.mxu2 %v1524_v60 }
  0xb3   : > { %1048 = vmatmul.f32.vlgmr.msra.gmra.mxu3 %v1527_v61  ;;  %v438_v40 = vpop.f32.mrf.mxu0 }
  0xb4   : > { %v479_v41 = vpop.f32.mrf.mxu1 }
  0xb5   : > { %v480_v42 = vadd.f32 %v479_v41, %v438_v40  ;;  %v520_v43 = vpop.f32.mrf.mxu2 }
  0xb6   : > { %v561_v44 = vpop.f32.mrf.mxu3  ;;  %925 = vmatmul.f32.vlgmr.msra.gmra.mxu0 %v1524_v60 }
  0xb7   : > { %v562_v45 = vadd.f32 %v561_v44, %v520_v43  ;;  %585 = vst [vmem:[%s1641_s26] sm:$0xff] %v480_v42  ;;  %966 = vmatmul.f32.vlgmr.msra.gmra.mxu1 %v1527_v61 }
  0xb9   : > { %586 = vst [vmem:[%s1641_s26 + $0x8] sm:$0xff] %v562_v45 }
  0xba   : > { %1010 = vmatmul.f32.gmra.mxu2 %v1534_v10 }
  0xbb   : > { %1051 = vmatmul.f32.gmra.mxu3 %v1537_v11  ;;  %v441_v46 = vpop.f32.mrf.mxu0 }
  0xbc   : > { %v482_v47 = vpop.f32.mrf.mxu1 }
  0xbd   : > { %v483_v48 = vadd.f32 %v482_v47, %v441_v46  ;;  %v523_v49 = vpop.f32.mrf.mxu2 }
  0xbe   : > { %v564_v50 = vpop.f32.mrf.mxu3  ;;  %928 = vmatmul.f32.gmra.mxu0 %v1534_v10 }
  0xbf   : > { %v565_v51 = vadd.f32 %v564_v50, %v523_v49  ;;  %587 = vst [vmem:[%s1641_s26 + $0x10] sm:$0xff] %v483_v48  ;;  %969 = vmatmul.f32.gmra.mxu1 %v1537_v11 }
  0xc1   : > { %588 = vst [vmem:[%s1641_s26 + $0x18] sm:$0xff] %v565_v51 }
  0xc2   : > { %1013 = vmatmul.f32.gmra.mxu2 %v1544_v24 }
  0xc3   : > { %1054 = vmatmul.f32.gmra.mxu3 %v1547_v25  ;;  %v444_v60 = vpop.f32.mrf.mxu0 }
  0xc4   : > { %v485_v61 = vpop.f32.mrf.mxu1 }
  0xc5   : > { %v486_v54 = vadd.f32 %v485_v61, %v444_v60  ;;  %v526_v55 = vpop.f32.mrf.mxu2 }
  0xc6   : > { %v567_v56 = vpop.f32.mrf.mxu3  ;;  %931 = vmatmul.f32.gmra.mxu0 %v1544_v24 }
  0xc7   : > { %v568_v57 = vadd.f32 %v567_v56, %v526_v55  ;;  %589 = vst [vmem:[%s1641_s26 + $0x20] sm:$0xff] %v486_v54  ;;  %972 = vmatmul.f32.gmra.mxu1 %v1547_v25 }
  0xc9   : > { %590 = vst [vmem:[%s1641_s26 + $0x28] sm:$0xff] %v568_v57 }
  0xca   : > { %1016 = vmatmul.f32.gmra.mxu2 %v1554_v38 }
  0xcb   : > { %1057 = vmatmul.f32.gmra.mxu3 %v1557_v39  ;;  %v447_v10 = vpop.f32.mrf.mxu0 }
  0xcc   : > { %v488_v11 = vpop.f32.mrf.mxu1 }
  0xcd   : > { %v489_v58 = vadd.f32 %v488_v11, %v447_v10  ;;  %v529_v59 = vpop.f32.mrf.mxu2 }
  0xce   : > { %v570_v62 = vpop.f32.mrf.mxu3  ;;  %934 = vmatmul.f32.gmra.mxu0 %v1554_v38 }
  0xcf   : > { %v571_v63 = vadd.f32 %v570_v62, %v529_v59  ;;  %591 = vst [vmem:[%s1641_s26 + $0x30] sm:$0xff] %v489_v58  ;;  %975 = vmatmul.f32.gmra.mxu1 %v1557_v39 }
  0xd1   : > { %592 = vst [vmem:[%s1641_s26 + $0x38] sm:$0xff] %v571_v63 }
  0xd2   : > { %1019 = vmatmul.f32.gmra.mxu2 %v1564_v52 }
  0xd3   : > { %1060 = vmatmul.f32.gmra.mxu3 %v1567_v53  ;;  %v450_v24 = vpop.f32.mrf.mxu0 }
  0xd4   : > { %v491_v25 = vpop.f32.mrf.mxu1 }
  0xd5   : > { %v492_v0 = vadd.f32 %v491_v25, %v450_v24  ;;  %v532_v1 = vpop.f32.mrf.mxu2 }
  0xd6   : > { %v573_v2 = vpop.f32.mrf.mxu3  ;;  %937 = vmatmul.f32.gmra.mxu0 %v1564_v52 }
  0xd7   : > { %v574_v3 = vadd.f32 %v573_v2, %v532_v1  ;;  %593 = vst [vmem:[%s1641_s26 + $0x40] sm:$0xff] %v492_v0  ;;  %978 = vmatmul.f32.gmra.mxu1 %v1567_v53 }
  0xd9   : > { %594 = vst [vmem:[%s1641_s26 + $0x48] sm:$0xff] %v574_v3 }
  0xda   : > { %1022 = vmatmul.f32.gmra.mxu2 %v1574_v4 }
  0xdb   : > { %1063 = vmatmul.f32.gmra.mxu3 %v1577_v5  ;;  %v453_v38 = vpop.f32.mrf.mxu0 }
  0xdc   : > { %v494_v39 = vpop.f32.mrf.mxu1 }
  0xdd   : > { %v495_v6 = vadd.f32 %v494_v39, %v453_v38  ;;  %v535_v7 = vpop.f32.mrf.mxu2 }
  0xde   : > { %v576_v8 = vpop.f32.mrf.mxu3  ;;  %940 = vmatmul.f32.gmra.mxu0 %v1574_v4 }
  0xdf   : > { %v577_v9 = vadd.f32 %v576_v8, %v535_v7  ;;  %595 = vst [vmem:[%s1641_s26 + $0x50] sm:$0xff] %v495_v6  ;;  %981 = vmatmul.f32.gmra.mxu1 %v1577_v5 }
  0xe1   : > { %596 = vst [vmem:[%s1641_s26 + $0x58] sm:$0xff] %v577_v9 }
  0xe2   : > { %1025 = vmatmul.f32.gmra.mxu2 %v1584_v20 }
  0xe3   : > { %1066 = vmatmul.f32.gmra.mxu3 %v1587_v21  ;;  %v456_v52 = vpop.f32.mrf.mxu0 }
  0xe4   : > { %v497_v53 = vpop.f32.mrf.mxu1 }
  0xe5   : > { %v498_v12 = vadd.f32 %v497_v53, %v456_v52  ;;  %v538_v13 = vpop.f32.mrf.mxu2 }
  0xe6   : > { %v579_v14 = vpop.f32.mrf.mxu3  ;;  %943 = vmatmul.f32.gmra.mxu0 %v1584_v20 }
  0xe7   : > { %v580_v15 = vadd.f32 %v579_v14, %v538_v13  ;;  %597 = vst [vmem:[%s1641_s26 + $0x60] sm:$0xff] %v498_v12  ;;  %984 = vmatmul.f32.gmra.mxu1 %v1587_v21 }
  0xe9   : > { %598 = vst [vmem:[%s1641_s26 + $0x68] sm:$0xff] %v580_v15 }
  0xea   : > { %1028 = vmatmul.f32.gmra.mxu2 %v1594_v36 }
  0xeb   : > { %1069 = vmatmul.f32.gmra.mxu3 %v1597_v37  ;;  %v459_v4 = vpop.f32.mrf.mxu0 }
  0xec   : > { %v500_v5 = vpop.f32.mrf.mxu1 }
  0xed   : > { %v501_v16 = vadd.f32 %v500_v5, %v459_v4  ;;  %v541_v17 = vpop.f32.mrf.mxu2 }
  0xee   : > { %v582_v18 = vpop.f32.mrf.mxu3  ;;  %946 = vmatmul.f32.gmra.mxu0 %v1594_v36 }
  0xef   : > { %v583_v19 = vadd.f32 %v582_v18, %v541_v17  ;;  %599 = vst [vmem:[%s1641_s26 + $0x70] sm:$0xff] %v501_v16  ;;  %987 = vmatmul.f32.gmra.mxu1 %v1597_v37 }
  0xf1   : > { %600 = vst [vmem:[%s1641_s26 + $0x78] sm:$0xff] %v583_v19 }
  0xf3   : > { %v682_v20 = vpop.f32.mrf.mxu0 }
  0xf4   : > { %v723_v21 = vpop.f32.mrf.mxu1 }
  0xf5   : > { %v724_v22 = vadd.f32 %v723_v21, %v682_v20  ;;  %v764_v23 = vpop.f32.mrf.mxu2 }
  0xf6   : > { %v805_v26 = vpop.f32.mrf.mxu3 }
  0xf7   : > { %v806_v27 = vadd.f32 %v805_v26, %v764_v23  ;;  %829 = vst [vmem:[%s1693_s29] sm:$0xff] %v724_v22 }
  0xf9   : > { %830 = vst [vmem:[%s1693_s29 + $0x8] sm:$0xff] %v806_v27 }
  0xfb   : > { %v685_v36 = vpop.f32.mrf.mxu0 }
  0xfc   : > { %v726_v37 = vpop.f32.mrf.mxu1 }
  0xfd   : > { %v727_v28 = vadd.f32 %v726_v37, %v685_v36  ;;  %v767_v29 = vpop.f32.mrf.mxu2 }
  0xfe   : > { %v808_v30 = vpop.f32.mrf.mxu3 }
  0xff   : > { %v809_v31 = vadd.f32 %v808_v30, %v767_v29  ;;  %831 = vst [vmem:[%s1693_s29 + $0x10] sm:$0xff] %v727_v28 }
 0x101   : > { %832 = vst [vmem:[%s1693_s29 + $0x18] sm:$0xff] %v809_v31 }
 0x103   : > { %v688_v32 = vpop.f32.mrf.mxu0 }
 0x104   : > { %v729_v33 = vpop.f32.mrf.mxu1 }
 0x105   : > { %v730_v34 = vadd.f32 %v729_v33, %v688_v32  ;;  %v770_v35 = vpop.f32.mrf.mxu2 }
 0x106   : > { %v811_v40 = vpop.f32.mrf.mxu3 }
 0x107   : > { %v812_v41 = vadd.f32 %v811_v40, %v770_v35  ;;  %833 = vst [vmem:[%s1693_s29 + $0x20] sm:$0xff] %v730_v34 }
 0x109   : > { %834 = vst [vmem:[%s1693_s29 + $0x28] sm:$0xff] %v812_v41 }
 0x10b   : > { %v691_v42 = vpop.f32.mrf.mxu0 }
 0x10c   : > { %v732_v43 = vpop.f32.mrf.mxu1 }
 0x10d   : > { %v733_v44 = vadd.f32 %v732_v43, %v691_v42  ;;  %v773_v45 = vpop.f32.mrf.mxu2 }
 0x10e   : > { %v814_v46 = vpop.f32.mrf.mxu3 }
 0x10f   : > { %v815_v47 = vadd.f32 %v814_v46, %v773_v45  ;;  %835 = vst [vmem:[%s1693_s29 + $0x30] sm:$0xff] %v733_v44 }
 0x111   : > { %836 = vst [vmem:[%s1693_s29 + $0x38] sm:$0xff] %v815_v47 }
 0x113   : > { %v694_v48 = vpop.f32.mrf.mxu0 }
 0x114   : > { %v735_v49 = vpop.f32.mrf.mxu1 }
 0x115   : > { %v736_v50 = vadd.f32 %v735_v49, %v694_v48  ;;  %v776_v51 = vpop.f32.mrf.mxu2 }
 0x116   : > { %v817_v60 = vpop.f32.mrf.mxu3 }
 0x117   : > { %v818_v61 = vadd.f32 %v817_v60, %v776_v51  ;;  %837 = vst [vmem:[%s1693_s29 + $0x40] sm:$0xff] %v736_v50 }
 0x119   : > { %838 = vst [vmem:[%s1693_s29 + $0x48] sm:$0xff] %v818_v61 }
 0x11b   : > { %v697_v54 = vpop.f32.mrf.mxu0 }
 0x11c   : > { %v738_v55 = vpop.f32.mrf.mxu1 }
 0x11d   : > { %v739_v56 = vadd.f32 %v738_v55, %v697_v54  ;;  %v779_v57 = vpop.f32.mrf.mxu2 }
 0x11e   : > { %v820_v10 = vpop.f32.mrf.mxu3 }
 0x11f   : > { %v821_v11 = vadd.f32 %v820_v10, %v779_v57  ;;  %839 = vst [vmem:[%s1693_s29 + $0x50] sm:$0xff] %v739_v56 }
 0x121   : > { %840 = vst [vmem:[%s1693_s29 + $0x58] sm:$0xff] %v821_v11 }
 0x123   : > { %v700_v58 = vpop.f32.mrf.mxu0 }
 0x124   : > { %v741_v59 = vpop.f32.mrf.mxu1 }
 0x125   : > { %v742_v62 = vadd.f32 %v741_v59, %v700_v58  ;;  %v782_v63 = vpop.f32.mrf.mxu2 }
 0x126   : > { %v823_v24 = vpop.f32.mrf.mxu3 }
 0x127   : > { %v824_v25 = vadd.f32 %v823_v24, %v782_v63  ;;  %841 = vst [vmem:[%s1693_s29 + $0x60] sm:$0xff] %v742_v62 }
 0x129   : > { %842 = vst [vmem:[%s1693_s29 + $0x68] sm:$0xff] %v824_v25 }
 0x12b   : > { %v703_v0 = vpop.f32.mrf.mxu0 }
 0x12c   : > { %v744_v1 = vpop.f32.mrf.mxu1 }
 0x12d   : > { %v745_v2 = vadd.f32 %v744_v1, %v703_v0  ;;  %v785_v3 = vpop.f32.mrf.mxu2 }
 0x12e   : > { %v826_v38 = vpop.f32.mrf.mxu3 }
 0x12f   : > { %v827_v39 = vadd.f32 %v826_v38, %v785_v3  ;;  %843 = vst [vmem:[%s1693_s29 + $0x70] sm:$0xff] %v745_v2 }
 0x131   : > { %844 = vst [vmem:[%s1693_s29 + $0x78] sm:$0xff] %v827_v39 }
 0x133   : > { %v926_v6 = vpop.f32.mrf.mxu0 }
 0x134   : > { %v967_v7 = vpop.f32.mrf.mxu1 }
 0x135   : > { %v968_v8 = vadd.f32 %v967_v7, %v926_v6  ;;  %v1008_v9 = vpop.f32.mrf.mxu2 }
 0x136   : > { %v1049_v52 = vpop.f32.mrf.mxu3 }
 0x137   : > { %v1050_v53 = vadd.f32 %v1049_v52, %v1008_v9  ;;  %1073 = vst [vmem:[%s1715_s8] sm:$0xff] %v968_v8 }
 0x139   : > { %1074 = vst [vmem:[%s1715_s8 + $0x8] sm:$0xff] %v1050_v53 }
 0x13b   : > { %v929_v12 = vpop.f32.mrf.mxu0 }
 0x13c   : > { %v970_v13 = vpop.f32.mrf.mxu1 }
 0x13d   : > { %v971_v14 = vadd.f32 %v970_v13, %v929_v12  ;;  %v1011_v15 = vpop.f32.mrf.mxu2 }
 0x13e   : > { %v1052_v4 = vpop.f32.mrf.mxu3 }
 0x13f   : > { %v1053_v5 = vadd.f32 %v1052_v4, %v1011_v15  ;;  %1075 = vst [vmem:[%s1715_s8 + $0x10] sm:$0xff] %v971_v14 }
 0x141   : > { %1076 = vst [vmem:[%s1715_s8 + $0x18] sm:$0xff] %v1053_v5 }
 0x143   : > { %v932_v16 = vpop.f32.mrf.mxu0 }
 0x144   : > { %v973_v17 = vpop.f32.mrf.mxu1 }
 0x145   : > { %v974_v18 = vadd.f32 %v973_v17, %v932_v16  ;;  %v1014_v19 = vpop.f32.mrf.mxu2 }
 0x146   : > { %v1055_v20 = vpop.f32.mrf.mxu3 }
 0x147   : > { %v1056_v21 = vadd.f32 %v1055_v20, %v1014_v19  ;;  %1077 = vst [vmem:[%s1715_s8 + $0x20] sm:$0xff] %v974_v18 }
 0x149   : > { %1078 = vst [vmem:[%s1715_s8 + $0x28] sm:$0xff] %v1056_v21 }
 0x14b   : > { %v935_v22 = vpop.f32.mrf.mxu0 }
 0x14c   : > { %v976_v23 = vpop.f32.mrf.mxu1 }
 0x14d   : > { %v977_v26 = vadd.f32 %v976_v23, %v935_v22  ;;  %v1017_v27 = vpop.f32.mrf.mxu2 }
 0x14e   : > { %v1058_v36 = vpop.f32.mrf.mxu3 }
 0x14f   : > { %v1059_v37 = vadd.f32 %v1058_v36, %v1017_v27  ;;  %1079 = vst [vmem:[%s1715_s8 + $0x30] sm:$0xff] %v977_v26 }
 0x151   : > { %1080 = vst [vmem:[%s1715_s8 + $0x38] sm:$0xff] %v1059_v37 }
 0x153   : > { %v938_v28 = vpop.f32.mrf.mxu0 }
 0x154   : > { %v979_v29 = vpop.f32.mrf.mxu1 }
 0x155   : > { %v980_v30 = vadd.f32 %v979_v29, %v938_v28  ;;  %v1020_v31 = vpop.f32.mrf.mxu2 }
 0x156   : > { %v1061_v32 = vpop.f32.mrf.mxu3 }
 0x157   : > { %v1062_v33 = vadd.f32 %v1061_v32, %v1020_v31  ;;  %1081 = vst [vmem:[%s1715_s8 + $0x40] sm:$0xff] %v980_v30 }
 0x159   : > { %1082 = vst [vmem:[%s1715_s8 + $0x48] sm:$0xff] %v1062_v33 }
 0x15b   : > { %v941_v34 = vpop.f32.mrf.mxu0 }
 0x15c   : > { %v982_v35 = vpop.f32.mrf.mxu1 }
 0x15d   : > { %v983_v40 = vadd.f32 %v982_v35, %v941_v34  ;;  %v1023_v41 = vpop.f32.mrf.mxu2 }
 0x15e   : > { %v1064_v42 = vpop.f32.mrf.mxu3 }
 0x15f   : > { %v1065_v43 = vadd.f32 %v1064_v42, %v1023_v41  ;;  %1083 = vst [vmem:[%s1715_s8 + $0x50] sm:$0xff] %v983_v40 }
 0x161   : > { %1084 = vst [vmem:[%s1715_s8 + $0x58] sm:$0xff] %v1065_v43 }
 0x163   : > { %v944_v44 = vpop.f32.mrf.mxu0 }
 0x164   : > { %v985_v45 = vpop.f32.mrf.mxu1 }
 0x165   : > { %v986_v46 = vadd.f32 %v985_v45, %v944_v44  ;;  %v1026_v47 = vpop.f32.mrf.mxu2 }
 0x166   : > { %v1067_v48 = vpop.f32.mrf.mxu3 }
 0x167   : > { %v1068_v49 = vadd.f32 %v1067_v48, %v1026_v47  ;;  %1085 = vst [vmem:[%s1715_s8 + $0x60] sm:$0xff] %v986_v46 }
 0x169   : > { %1086 = vst [vmem:[%s1715_s8 + $0x68] sm:$0xff] %v1068_v49 }
 0x16b   : > { %v947_v50 = vpop.f32.mrf.mxu0 }
 0x16c   : > { %v988_v51 = vpop.f32.mrf.mxu1 }
 0x16d   : > { %v989_v60 = vadd.f32 %v988_v51, %v947_v50  ;;  %v1029_v61 = vpop.f32.mrf.mxu2 }
 0x16e   : > { %v1070_v54 = vpop.f32.mrf.mxu3 }
 0x16f   : > { %v1071_v55 = vadd.f32 %v1070_v54, %v1029_v61  ;;  %1087 = vst [vmem:[%s1715_s8 + $0x70] sm:$0xff] %v989_v60 }
 0x171   : > { %1088 = vst [vmem:[%s1715_s8 + $0x78] sm:$0xff] %v1071_v55 }
 0x172 PF: > { %s19_s21 = sadd.s32 1, %s1424_s21  }
 0x173   : > { %p16_p7 = scmp.ge.s32.totalorder %s19_s21, 4  }
 0x175   :  { %18 = sbr.rel (!%p16_p7) target bundleno = 2 (0x2), region = 103 }
 0x17a   :  { %1151 = vsyncpa [#allocation3], 1 }
 0x17b   :  { %1153 = vsyncpa [#allocation3 + $0x1], 1 }
 0x17c   :  { %1154 = vsyncpa [#allocation5], 1 }

// kernel: encoder_forward.11
= control target key start
LH: loop header
LB: loop body
LE: loop exit
PB: predicated region body
PF: predicated region fallthrough
CT: control target
= control target key end

     0   :  { %s1478_s12 = smov 0   ;;  %s1480_s13 = smov 0   ;;  %s1955_s0 = inlined_call_operand.vmem [shape: f32[2,64,256], index: 0, kind: input, shape index: {}]   ;;  %s1956_s1 = inlined_call_operand.vmem [shape: f32[2,64,256], index: 1, kind: input, shape index: {}]   ;;  %s1957_s2 = inlined_call_operand.vmem [shape: f32[2,64,256], index: 2, kind: input, shape index: {}]   ;;  %s1958_s3 = inlined_call_operand.vmem [shape: f32[2,64,256], index: 3, kind: output, shape index: {}]  }
   0x1   :  { %s1482_s14 = smov 0   ;;  %s1484_s15 = smov 0  }
   0x2   :  { %s1486_s16 = smov 0  }
   0x3 LB: > { %s22_s17 = sadd.s32 1, %s1447_s14  ;;  %s25_s18 = sadd.s32 1, %s1451_s15  ;;  %s1455_s16 = sphi %s1486_s16, %s13_s16   ;;  %s1451_s15 = sphi %s1484_s15, %s1962_s15   ;;  %s1447_s14 = sphi %s1482_s14, %s1961_s14   ;;  %s1443_s13 = sphi %s1480_s13, %s1960_s13   ;;  %s1439_s12 = sphi %s1478_s12, %s1959_s12  }
   0x4   : > { %p23_p0 = scmp.ge.s32.totalorder %s22_s17, 2  ;;  %p1175_p1 = scmp.ge.s32.totalorder %s1455_s16, 1 }
   0x5   : > { %p179_p2 = scmp.lt.s32.totalorder %s1455_s16, 5 }
   0x6   : > { %s1964_s17 = smov (%p23_p0, %s22_s17), 0  ;;  %s1966_s18 = smov (!%p23_p0, %s25_s18), %s1451_s15 }
   0x7   : > { %p180_p3 = pnand %p1175_p1, %p179_p2  ;;  %p27_p4 = scmp.ge.s32.totalorder %s1966_s18, 2 }
   0x8   : > { %p224_p5 = scmp.lt.s32.totalorder (!%p180_p3), %s1443_s13, 1  ;;  %s1176_s19 = sshll.u32 (!%p180_p3), %s1439_s12, 2 }
   0x9   : > { %s1968_s18 = smov (%p27_p4, %s1966_s18), 0  ;;  %183 = sbr.rel (%p180_p3) target bundleno = 1261 (0x4ed), region = 32 }
   0xa   : > { %p226_p6 = scmp.lt.s32.totalorder (!%p180_p3), %s1176_s19, 7  ;;  %s1457_s27 = smov (!%p180_p3), 64  }
   0xe   : > { %s1970_s13 = smov (!%p224_p5, %s1443_s13), 1  ;;  %s1972_s19 = smov (!%p226_p6, %s1176_s19), 7  ;;  %vm295_vm0 = vcmask 523264  }
   0xf   : > { %s1254_s20 = sshll.u32 %s1970_s13, 7  ;;  %s1178_s21 = sshll.u32 %s1970_s13, 4 }
  0x10   : > { %s1517_s24 = scalar_lea.vmem %s1956_s1, %s1254_s20  ;;  %s1177_s25 = sshll.u32 %s1972_s19, 1 }
  0x11   : > { %v277_v0 = vld [vmem:[%s1517_s24 + $0x70] sm:$0xff]  ;;  %s1521_s26 = sadd.s32 %s1178_s21, %s1177_s25  ;;  %v271_v2 = vld [vmem:[%s1517_s24 + $0x40] sm:$0xff]  ;;  %v1576_v28 = vld [vmem:[%s1517_s24 + $0x78] sm:$0xff]  ;;  %s1620_s7 = scalar_lea.vmem %s1957_s2, %s1254_s20 }
  0x12   : > { %v273_v1 = vld [vmem:[%s1517_s24 + $0x50] sm:$0xff]  ;;  %1188 = vmatpush.xpose.msk.msra.mxu0 %vm295_vm0, %v277_v0  ;;  %v275_v3 = vld [vmem:[%s1517_s24 + $0x60] sm:$0xff]  ;;  %472 = vrot.lane.b32.xlu2 %v277_v0, %s1457_s27  ;;  %s1179_s28 = sshll.u32 %s1521_s26, 3  ;;  %v1583_v34 = vld [vmem:[%s1517_s24 + $0x38] sm:$0xff] }
  0x13   : > { %468 = vrot.lane.b32.xlu0 %v273_v1, %s1457_s27  ;;  %466 = vrot.lane.b32.xlu1 %v271_v2, %s1457_s27  ;;  %s1536_s4 = scalar_lea.vmem %s1955_s0, %s1179_s28  ;;  %v269_v6 = vld [vmem:[%s1517_s24 + $0x30] sm:$0xff]  ;;  %v267_v9 = vld [vmem:[%s1517_s24 + $0x20] sm:$0xff]  ;;  %s1914_s10 = scalar_lea.vmem %s1958_s3, %s1179_s28 }
  0x14   : > { %v259_v4 = vld [vmem:[%s1536_s4 + $0x20] sm:$0xff]  ;;  %v261_v7 = vld [vmem:[%s1536_s4 + $0x30] sm:$0xff]  ;;  %v1587_v35 = vld [vmem:[%s1517_s24 + $0x58] sm:$0xff] }
  0x15   : > { %v255_v5 = vld [vmem:[%s1536_s4] sm:$0xff]  ;;  %v257_v8 = vld [vmem:[%s1536_s4 + $0x10] sm:$0xff]  ;;  %v1596_v39 = vld [vmem:[%s1517_s24 + $0x68] sm:$0xff] }
  0x16   : > { %1189 = vmatpush.xpose.msk.msra.mxu0 %vm295_vm0, %v275_v3  ;;  %v265_v10 = vld [vmem:[%s1517_s24 + $0x10] sm:$0xff]  ;;  %v263_v11 = vld [vmem:[%s1517_s24] sm:$0xff]  ;;  %v272_v58 = vld [vmem:[%s1517_s24 + $0x48] sm:$0xff] }
  0x17   : > { %v1629_v62 = vld [vmem:[%s1620_s7 + $0x70] sm:$0xff]  ;;  %v1632_v63 = vld [vmem:[%s1620_s7 + $0x60] sm:$0xff]  ;;  %v268_v0 = vld [vmem:[%s1517_s24 + $0x28] sm:$0xff] }
  0x18   : > { %429 = vmatpush.msra.mxu1 %v1629_v62 }
  0x1a   : > { %1190 = vmatpush.xpose.msk.msra.mxu0 %vm295_vm0, %v273_v1  ;;  %470 = vrot.lane.b32.xlu2 %v275_v3, %s1457_s27  ;;  %v1313_v1 = vpack.i.bf16 %v1632_v63, %v1629_v62  ;;  %v1644_v3 = vld [vmem:[%s1536_s4 + $0x8] sm:$0xff] }
  0x1b   : > { %454 = vrot.lane.b32.xlu0 %v259_v4, %s1457_s27  ;;  %450 = vrot.lane.b32.xlu1 %v255_v5, %s1457_s27 }
  0x1c   : > { %430 = vmatpush.msra.mxu1 %v1632_v63 }
  0x1e   : > { %1191 = vmatpush.xpose.msk.msra.mxu0 %vm295_vm0, %v271_v2  ;;  %v289_v2 = vld [vmem:[%s1620_s7 + $0x50] sm:$0xff] }
  0x1f   : > { %431 = vmatpush.msra.mxu1 %v289_v2 }
  0x22   : > { %1192 = vmatpush.xpose.msk.msra.mxu0 %vm295_vm0, %v269_v6  ;;  %464 = vrot.lane.b32.xlu2 %v269_v6, %s1457_s27  ;;  %v266_v6 = vld [vmem:[%s1517_s24 + $0x18] sm:$0xff] }
  0x23   : > { %456 = vrot.lane.b32.xlu0 %v261_v7, %s1457_s27  ;;  %452 = vrot.lane.b32.xlu1 %v257_v8, %s1457_s27 }
  0x26   : > { %1193 = vmatpush.xpose.msk.msra.mxu0 %vm295_vm0, %v267_v9 }
  0x2a   : > { %1194 = vmatpush.xpose.msk.msra.mxu0 %vm295_vm0, %v265_v10  ;;  %462 = vrot.lane.b32.xlu2 %v267_v9, %s1457_s27  ;;  %v1665_v9 = vld [vmem:[%s1536_s4 + $0x18] sm:$0xff] }
  0x2e   : > { %1195 = vmatpush.xpose.msk.msra.mxu0 %vm295_vm0, %v263_v11 }
  0x31   : > { %1196 = vmatmul.msk.f32.vlgmr.msra.gmra.mxu0 %vm295_vm0, %v255_v5 }
  0x32   : > { %460 = vrot.lane.b32.xlu2 %v265_v10, %s1457_s27  ;;  %v1671_v10 = vld [vmem:[%s1536_s4 + $0x28] sm:$0xff] }
  0x39   : > { %1197 = vmatmul.msk.f32.gmra.mxu0 %vm295_vm0, %v257_v8  ;;  %v264_v8 = vld [vmem:[%s1517_s24 + $0x8] sm:$0xff] }
  0x3a   : > { %458 = vrot.lane.b32.xlu2 %v263_v11, %s1457_s27  ;;  %v287_v11 = vld [vmem:[%s1620_s7 + $0x40] sm:$0xff] }
  0x3b   : > { %432 = vmatpush.msra.mxu1 %v287_v11 }
  0x41   : > { %1198 = vmatmul.msk.f32.gmra.mxu0 %vm295_vm0, %v259_v4 }
  0x42   : > { %824 = vrot.lane.b32.xlu2 %v1576_v28, %s1457_s27 }
  0x49   : > { %1199 = vmatmul.msk.f32.gmra.mxu0 %vm295_vm0, %v261_v7  ;;  %v1659_v7 = vld [vmem:[%s1536_s4 + $0x38] sm:$0xff] }
  0x4a   : > { %816 = vrot.lane.b32.xlu2 %v1583_v34, %s1457_s27 }
  0x6c   : > { %v473_v12 = vpop.permute.xlu2 %472 }
  0x6d   : > { %1204 = vmatpush.xpose.msk.msra.mxu2 %vm295_vm0, %v473_v12  ;;  %v1675_v12 = vld [vmem:[%s1620_s7 + $0x30] sm:$0xff] }
  0x6e   : > { %433 = vmatpush.msra.mxu1 %v1675_v12 }
  0x74   : > { %v471_v13 = vpop.permute.xlu2 %470 }
  0x75   : > { %1205 = vmatpush.xpose.msk.msra.mxu2 %vm295_vm0, %v471_v13  ;;  %v1678_v13 = vld [vmem:[%s1620_s7 + $0x20] sm:$0xff] }
  0x76   : > { %434 = vmatpush.msra.mxu1 %v1678_v13 }
  0x7c   : > { %v465_v18 = vpop.permute.xlu2 %464 }
  0x84   : > { %v463_v22 = vpop.permute.xlu2 %462 }
  0x85   : > { %v469_v14 = vpop.permute.xlu0 %468  ;;  %v467_v15 = vpop.permute.xlu1 %466 }
  0x86   : > { %1206 = vmatpush.xpose.msk.msra.mxu2 %vm295_vm0, %v469_v14  ;;  %v1318_v14 = vpack.i.bf16 %v287_v11, %v289_v2 }
  0x8a   : > { %1207 = vmatpush.xpose.msk.msra.mxu2 %vm295_vm0, %v467_v15  ;;  %v1323_v15 = vpack.i.bf16 %v1678_v13, %v1675_v12 }
  0x8c   : > { %v461_v26 = vpop.permute.xlu2 %460 }
  0x8d   : > { %v451_v30 = vpop.permute.xlu1 %450  ;;  %v455_v37 = vpop.permute.xlu0 %454 }
  0x8e   : > { %1208 = vmatpush.xpose.msk.msra.mxu2 %vm295_vm0, %v465_v18  ;;  %v1690_v18 = vld [vmem:[%s1620_s7] sm:$0xff] }
  0x92   : > { %1209 = vmatpush.xpose.msk.msra.mxu2 %vm295_vm0, %v463_v22 }
  0x94   : > { %v459_v32 = vpop.permute.xlu2 %458 }
  0x95   : > { %v453_v36 = vpop.permute.xlu1 %452  ;;  %v457_v38 = vpop.permute.xlu0 %456 }
  0x96   : > { %1210 = vmatpush.xpose.msk.msra.mxu2 %vm295_vm0, %v461_v26 }
  0x9a   : > { %1211 = vmatpush.xpose.msk.msra.mxu2 %vm295_vm0, %v459_v32 }
  0x9c   : > { %v1626_v61 = vpop.permute.xlu2 %824 }
  0x9d   : > { %1212 = vmatmul.msk.f32.vlgmr.msra.gmra.mxu2 %vm295_vm0, %v451_v30  ;;  %1236 = vmatpush.xpose.msk.msrb.mxu0 %vm295_vm0, %v1626_v61 }
  0xa5   : > { %1213 = vmatmul.msk.f32.gmra.mxu2 %vm295_vm0, %v453_v36 }
  0xad   : > { %1214 = vmatmul.msk.f32.gmra.mxu2 %vm295_vm0, %v455_v37 }
  0xae   : > { %v349_v16 = vpop.f32.mrf.mxu0 }
  0xaf   : > { %v361_v17 = vmul.f32 0.0625, %v349_v16 }
  0xb1   : > { %v365_v19 = vsel %vm295_vm0, %v361_v17, -inf }
  0xb2   : > { %366 = vmax.xlane.f32.xlu0 %v365_v19 }
  0xb5   : > { %1215 = vmatmul.msk.f32.gmra.mxu2 %vm295_vm0, %v457_v38 }
  0xb6   : > { %v352_v20 = vpop.f32.mrf.mxu0 }
  0xb7   : > { %v362_v21 = vmul.f32 0.0625, %v352_v20 }
  0xb9   : > { %v368_v23 = vsel %vm295_vm0, %v362_v21, -inf }
  0xba   : > { %369 = vmax.xlane.f32.xlu0 %v368_v23 }
  0xbe   : > { %v355_v24 = vpop.f32.mrf.mxu0 }
  0xbf   : > { %v363_v25 = vmul.f32 0.0625, %v355_v24 }
  0xc1   : > { %v371_v27 = vsel %vm295_vm0, %v363_v25, -inf }
  0xc2   : > { %372 = vmax.xlane.f32.xlu1 %v371_v27 }
  0xc6   : > { %v358_v29 = vpop.f32.mrf.mxu0 }
  0xc7   : > { %v364_v31 = vmul.f32 0.0625, %v358_v29 }
  0xc9   : > { %v374_v33 = vsel %vm295_vm0, %v364_v31, -inf }
  0xca   : > { %375 = vmax.xlane.f32.xlu1 %v374_v33 }
  0xce   : > { %820 = vrot.lane.b32.xlu0 %v1587_v35, %s1457_s27 }
  0xe3   : > { %822 = vrot.lane.b32.xlu1 %v1596_v39, %s1457_s27 }
 0x120   : > { %v515_v16 = vpop.f32.mrf.mxu2 }
 0x121   : > { %v1710_v24 = vmul.f32 0.0625, %v515_v16 }
 0x123   : > { %v531_v26 = vsel %vm295_vm0, %v1710_v24, -inf }
 0x125   : > { %v367_v40 = vpop.xlane.xlu0 %366 }
 0x126   : > { %v377_v41 = vsub.f32 %v361_v17, %v367_v40  ;;  %v1687_v17 = vld [vmem:[%s1620_s7 + $0x10] sm:$0xff] }
 0x127   : > { %v1328_v19 = vpack.i.bf16 %v1690_v18, %v1687_v17  ;;  %435 = vmatpush.msra.mxu1 %v1687_v17 }
 0x128   : > { %v381_v42 = vmul.f32 1.442695, %v377_v41  ;;  %v518_v20 = vpop.f32.mrf.mxu2 }
 0x129   : > { %436 = vmatpush.msra.mxu1 %v1690_v18 }
 0x12a   : > { %1353 = vpow2.f32 %v381_v42 }
 0x12b   : > { %1220 = vmatpush.xpose.msk.msrb.mxu1 %vm295_vm0, %v1576_v28 }
 0x12d   : > { %v370_v43 = vpop.xlane.xlu0 %369 }
 0x12e   : > { %v378_v44 = vsub.f32 %v362_v21, %v370_v43 }
 0x12f   : > { %1221 = vmatpush.xpose.msk.msrb.mxu1 %vm295_vm0, %v1596_v39 }
 0x130   : > { %v1601_v45 = vpop.eup %1353  ;;  %v383_v46 = vmul.f32 1.442695, %v378_v44  ;;  %v521_v21 = vpop.f32.mrf.mxu2 }
 0x131   : > { %v389_v47 = vsel %vm295_vm0, %v1601_v45, 0.0  ;;  %v1705_v22 = vmul.f32 0.0625, %v521_v21 }
 0x132   : > { %1355 = vpow2.f32 %v383_v46  ;;  %390 = vadd.xlane.f32.xlu0 %v389_v47 }
 0x133   : > { %1222 = vmatpush.xpose.msk.msrb.mxu1 %vm295_vm0, %v1587_v35  ;;  %v537_v23 = vsel %vm295_vm0, %v1705_v22, -inf }
 0x135   : > { %v373_v48 = vpop.xlane.xlu1 %372 }
 0x136   : > { %v379_v49 = vsub.f32 %v363_v25, %v373_v48  ;;  %v1713_v25 = vmul.f32 0.0625, %v518_v20 }
 0x137   : > { %1223 = vmatpush.xpose.msk.msrb.mxu1 %vm295_vm0, %v272_v58 }
 0x138   : > { %v1605_v50 = vpop.eup %1355  ;;  %v385_v51 = vmul.f32 1.442695, %v379_v49  ;;  %v524_v27 = vpop.f32.mrf.mxu2  ;;  %v534_v29 = vsel %vm295_vm0, %v1713_v25, -inf }
 0x139   : > { %v392_v52 = vsel %vm295_vm0, %v1605_v50, 0.0  ;;  %v1718_v28 = vmul.f32 0.0625, %v524_v27 }
 0x13a   : > { %1357 = vpow2.f32 %v385_v51  ;;  %393 = vadd.xlane.f32.xlu2 %v392_v52 }
 0x13b   : > { %1224 = vmatpush.xpose.msk.msrb.mxu1 %vm295_vm0, %v1583_v34  ;;  %v540_v30 = vsel %vm295_vm0, %v1718_v28, -inf }
 0x13d   : > { %v376_v53 = vpop.xlane.xlu1 %375 }
 0x13e   : > { %v380_v54 = vsub.f32 %v364_v31, %v376_v53  ;;  %v817_v31 = vpop.permute.xlu2 %816 }
 0x13f   : > { %1225 = vmatpush.xpose.msk.msrb.mxu1 %vm295_vm0, %v268_v0 }
 0x140   : > { %v1609_v55 = vpop.eup %1357  ;;  %v387_v56 = vmul.f32 1.442695, %v380_v54  ;;  %v1652_v5 = vpop.permute.xlu0 %820 }
 0x141   : > { %v395_v57 = vsel %vm295_vm0, %v1609_v55, 0.0 }
 0x142   : > { %1359 = vpow2.f32 %v387_v56  ;;  %396 = vadd.xlane.f32.xlu1 %v395_v57 }
 0x143   : > { %1226 = vmatpush.xpose.msk.msrb.mxu1 %vm295_vm0, %v266_v6 }
 0x146   : > { %818 = vrot.lane.b32.xlu0 %v272_v58, %s1457_s27 }
 0x147   : > { %1227 = vmatpush.xpose.msk.msrb.mxu1 %vm295_vm0, %v264_v8 }
 0x148   : > { %v1622_v59 = vpop.eup %1359 }
 0x149   : > { %v398_v60 = vsel %vm295_vm0, %v1622_v59, 0.0 }
 0x14a   : > { %399 = vadd.xlane.f32.xlu2 %v398_v60 }
 0x14e   : > { %814 = vrot.lane.b32.xlu0 %v268_v0, %s1457_s27 }
 0x155   : > { %v1646_v4 = vpop.permute.xlu1 %822 }
 0x156   : > { %802 = vrot.lane.b32.xlu0 %v1644_v3, %s1457_s27  ;;  %1237 = vmatpush.xpose.msk.msrb.mxu0 %vm295_vm0, %v1646_v4 }
 0x15a   : > { %1238 = vmatpush.xpose.msk.msrb.mxu0 %vm295_vm0, %v1652_v5 }
 0x15b   : > { %812 = vrot.lane.b32.xlu1 %v266_v6, %s1457_s27 }
 0x15e   : > { %808 = vrot.lane.b32.xlu0 %v1659_v7, %s1457_s27 }
 0x162   : > { %810 = vrot.lane.b32.xlu2 %v264_v8, %s1457_s27 }
 0x163   : > { %804 = vrot.lane.b32.xlu1 %v1665_v9, %s1457_s27 }
 0x16a   : > { %806 = vrot.lane.b32.xlu2 %v1671_v10, %s1457_s27 }
 0x188   : > { %538 = vmax.xlane.f32.xlu0 %v537_v23 }
 0x18d   : > { %532 = vmax.xlane.f32.xlu1 %v531_v26 }
 0x193   : > { %535 = vmax.xlane.f32.xlu2 %v534_v29 }
 0x195   : > { %541 = vmax.xlane.f32.xlu1 %v540_v30 }
 0x1a5   : > { %v391_v32 = vpop.xlane.xlu0 %390 }
 0x1a6   : > { %1361 = vrcp.f32 %v391_v32 }
 0x1ab   : > { %1319 = vrot.lane.b32.xlu2 %v1318_v14, %s1457_s27 }
 0x1ac   : > { %v1362_v33 = vpop.eup %1361 }
 0x1ad   : > { %v394_v34 = vpop.xlane.xlu2 %393  ;;  %v405_v35 = vmul.f32 %v1362_v33, %v1601_v45 }
 0x1ae   : > { %1363 = vrcp.f32 %v394_v34  ;;  %1314 = vrot.lane.b32.xlu1 %v1313_v1, %s1457_s27 }
 0x1af   : > { %1200 = vmatmul.msk.f32.vlgmr.msra.gmra.mxu1 %vm295_vm0, %v405_v35 }
 0x1b0   : > { %1256 = vmatpush.xpose.msk.msra.mxu1 %vm295_vm0, %v1626_v61 }
 0x1b4   : > { %v1364_v36 = vpop.eup %1363  ;;  %1257 = vmatpush.xpose.msk.msra.mxu1 %vm295_vm0, %v1646_v4 }
 0x1b5   : > { %v397_v37 = vpop.xlane.xlu1 %396  ;;  %v406_v38 = vmul.f32 %v1364_v36, %v1605_v50 }
 0x1b6   : > { %1365 = vrcp.f32 %v397_v37 }
 0x1b7   : > { %1201 = vmatmul.msk.f32.gmra.mxu1 %vm295_vm0, %v406_v38 }
 0x1b8   : > { %1258 = vmatpush.xpose.msk.msra.mxu1 %vm295_vm0, %v1652_v5  ;;  %v819_v39 = vpop.permute.xlu0 %818 }
 0x1b9   : > { %1239 = vmatpush.xpose.msk.msrb.mxu0 %vm295_vm0, %v819_v39 }
 0x1bc   : > { %v1366_v40 = vpop.eup %1365  ;;  %1259 = vmatpush.xpose.msk.msra.mxu1 %vm295_vm0, %v819_v39 }
 0x1bd   : > { %v400_v41 = vpop.xlane.xlu2 %399  ;;  %1240 = vmatpush.xpose.msk.msrb.mxu0 %vm295_vm0, %v817_v31  ;;  %v407_v42 = vmul.f32 %v1366_v40, %v1609_v55 }
 0x1be   : > { %1367 = vrcp.f32 %v400_v41 }
 0x1bf   : > { %1202 = vmatmul.msk.f32.gmra.mxu1 %vm295_vm0, %v407_v42  ;;  %v292_v42 = vld [vmem:[%s1620_s7 + $0x68] sm:$0xff] }
 0x1c0   : > { %1260 = vmatpush.xpose.msk.msra.mxu1 %vm295_vm0, %v817_v31  ;;  %v815_v43 = vpop.permute.xlu0 %814 }
 0x1c1   : > { %1241 = vmatpush.xpose.msk.msrb.mxu0 %vm295_vm0, %v815_v43 }
 0x1c4   : > { %v1368_v44 = vpop.eup %1367  ;;  %1261 = vmatpush.xpose.msk.msra.mxu1 %vm295_vm0, %v815_v43  ;;  %v294_v43 = vld [vmem:[%s1620_s7 + $0x78] sm:$0xff] }
 0x1c5   : > { %v408_v45 = vmul.f32 %v1368_v44, %v1622_v59  ;;  %v811_v47 = vpop.permute.xlu2 %810  ;;  %v1333_v44 = vpack.i.bf16 %v292_v42, %v294_v43 }
 0x1c7   : > { %1203 = vmatmul.msk.f32.gmra.mxu1 %vm295_vm0, %v408_v45  ;;  %v284_v45 = vld [vmem:[%s1620_s7 + $0x28] sm:$0xff] }
 0x1c8   : > { %v803_v48 = vpop.permute.xlu0 %802 }
 0x1cd   : > { %v813_v46 = vpop.permute.xlu1 %812  ;;  %v807_v50 = vpop.permute.xlu2 %806 }
 0x1ce   : > { %1242 = vmatpush.xpose.msk.msrb.mxu0 %vm295_vm0, %v813_v46  ;;  %1262 = vmatpush.xpose.msk.msra.mxu1 %vm295_vm0, %v813_v46  ;;  %v286_v46 = vld [vmem:[%s1620_s7 + $0x38] sm:$0xff] }
 0x1cf   : > { %1228 = vmatmul.msk.f32.vlgmr.msrb.gmra.mxu1 %vm295_vm0, %v1644_v3 }
 0x1d0   : > { %v809_v51 = vpop.permute.xlu0 %808 }
 0x1d2   : > { %1243 = vmatpush.xpose.msk.msrb.mxu0 %vm295_vm0, %v811_v47  ;;  %1263 = vmatpush.xpose.msk.msra.mxu1 %vm295_vm0, %v811_v47  ;;  %v1343_v47 = vpack.i.bf16 %v284_v45, %v286_v46 }
 0x1d5   : > { %1244 = vmatmul.msk.f32.vlgmr.msrb.gmra.mxu0 %vm295_vm0, %v803_v48  ;;  %v805_v49 = vpop.permute.xlu1 %804 }
 0x1d7   : > { %1229 = vmatmul.msk.f32.gmra.mxu1 %vm295_vm0, %v1665_v9 }
 0x1dd   : > { %1245 = vmatmul.msk.f32.gmra.mxu0 %vm295_vm0, %v805_v49 }
 0x1df   : > { %1230 = vmatmul.msk.f32.gmra.mxu1 %vm295_vm0, %v1671_v10 }
 0x1e5   : > { %1246 = vmatmul.msk.f32.gmra.mxu0 %vm295_vm0, %v807_v50 }
 0x1e7   : > { %1231 = vmatmul.msk.f32.gmra.mxu1 %vm295_vm0, %v1659_v7 }
 0x1ef   : > { %1247 = vmatmul.msk.f32.vlgmr.msra.gmra.mxu1 %vm295_vm0, %v809_v51 }
 0x1fb   : > { %v539_v58 = vpop.xlane.xlu0 %538 }
 0x1fc   : > { %v545_v61 = vsub.f32 %v1705_v22, %v539_v58 }
 0x1fe   : > { %v551_v0 = vmul.f32 1.442695, %v545_v61 }
 0x200   : > { %v533_v57 = vpop.xlane.xlu1 %532  ;;  %1369 = vpow2.f32 %v551_v0 }
 0x201   : > { %v543_v30 = vsub.f32 %v1710_v24, %v533_v57 }
 0x203   : > { %v547_v31 = vmul.f32 1.442695, %v543_v30 }
 0x206   : > { %v1783_v8 = vpop.eup %1369  ;;  %v536_v17 = vpop.xlane.xlu2 %535 }
 0x207   : > { %v561_v11 = vsel %vm295_vm0, %v1783_v8, 0.0  ;;  %v544_v18 = vsub.f32 %v1713_v25, %v536_v17 }
 0x208   : > { %v542_v1 = vpop.xlane.xlu1 %541 }
 0x209   : > { %v546_v4 = vsub.f32 %v1718_v28, %v542_v1 }
 0x20b   : > { %v553_v6 = vmul.f32 1.442695, %v546_v4 }
 0x20d   : > { %1371 = vpow2.f32 %v553_v6 }
 0x20e   : > { %1373 = vpow2.f32 %v547_v31  ;;  %v1320_v39 = vpop.permute.xlu2 %1319 }
 0x20f   : > { %v1321_v40 = vunpack.i.l.bf16 %v1320_v39  ;;  %v1322_v41 = vunpack.i.h.bf16 %v1320_v39 }
 0x213   : > { %v1793_v20 = vpop.eup %1371 }
 0x214   : > { %v564_v23 = vsel %vm295_vm0, %v1793_v20, 0.0  ;;  %v1821_v32 = vpop.eup %1373 }
 0x215   : > { %v555_v33 = vsel %vm295_vm0, %v1821_v32, 0.0 }
 0x220   : > { %v1315_v36 = vpop.permute.xlu1 %1314 }
 0x221   : > { %v1316_v37 = vunpack.i.l.bf16 %v1315_v36  ;;  %v1317_v38 = vunpack.i.h.bf16 %v1315_v36 }
 0x223   : > { %627 = vmatpush.msra.mxu3 %v1316_v37 }
 0x225   : > { %628 = vmatpush.msra.mxu3 %v1317_v38 }
 0x227   : > { %629 = vmatpush.msra.mxu3 %v1321_v40 }
 0x229   : > { %630 = vmatpush.msra.mxu3 %v1322_v41  ;;  %v282_v41 = vld [vmem:[%s1620_s7 + $0x18] sm:$0xff] }
 0x22c   : > { %v1765_v52 = vpop.f32.mrf.mxu1 }
 0x234   : > { %v1767_v53 = vpop.f32.mrf.mxu1 }
 0x23c   : > { %v1769_v54 = vpop.f32.mrf.mxu1 }
 0x244   : > { %v1771_v55 = vpop.f32.mrf.mxu1 }
 0x24c   : > { %v701_v56 = vpop.f32.mrf.mxu1 }
 0x24d   : > { %v1791_v16 = vmul.f32 0.0625, %v701_v56 }
 0x24f   : > { %v717_v22 = vsel %vm295_vm0, %v1791_v16, -inf }
 0x252   : > { %v867_v59 = vpop.f32.mrf.mxu0 }
 0x253   : > { %v1773_v60 = vmul.f32 0.0625, %v867_v59 }
 0x254   : > { %v704_v63 = vpop.f32.mrf.mxu1 }
 0x255   : > { %v883_v62 = vsel %vm295_vm0, %v1773_v60, -inf  ;;  %v1829_v24 = vmul.f32 0.0625, %v704_v63 }
 0x256   : > { %884 = vmax.xlane.f32.xlu0 %v883_v62 }
 0x257   : > { %v720_v25 = vsel %vm295_vm0, %v1829_v24, -inf }
 0x25a   : > { %v870_v2 = vpop.f32.mrf.mxu0 }
 0x25b   : > { %v1778_v3 = vmul.f32 0.0625, %v870_v2 }
 0x25c   : > { %v707_v7 = vpop.f32.mrf.mxu1 }
 0x25d   : > { %v886_v5 = vsel %vm295_vm0, %v1778_v3, -inf  ;;  %v1803_v26 = vmul.f32 0.0625, %v707_v7 }
 0x25e   : > { %887 = vmax.xlane.f32.xlu2 %v886_v5 }
 0x25f   : > { %v723_v12 = vsel %vm295_vm0, %v1803_v26, -inf }
 0x262   : > { %v873_v9 = vpop.f32.mrf.mxu0 }
 0x263   : > { %v1785_v10 = vmul.f32 0.0625, %v873_v9  ;;  %v290_v9 = vld [vmem:[%s1620_s7 + $0x58] sm:$0xff] }
 0x264   : > { %v710_v21 = vpop.f32.mrf.mxu1 }
 0x265   : > { %v889_v14 = vsel %vm295_vm0, %v1785_v10, -inf  ;;  %v1805_v27 = vmul.f32 0.0625, %v710_v21 }
 0x266   : > { %562 = vadd.xlane.f32.xlu2 %v561_v11  ;;  %890 = vmax.xlane.f32.xlu1 %v889_v14  ;;  %v288_v14 = vld [vmem:[%s1620_s7 + $0x48] sm:$0xff] }
 0x267   : > { %v726_v13 = vsel %vm295_vm0, %v1805_v27, -inf  ;;  %v1338_v21 = vpack.i.bf16 %v288_v14, %v290_v9 }
 0x26a   : > { %1324 = vrot.lane.b32.xlu0 %v1323_v15, %s1457_s27 }
 0x26c   : > { %v876_v15 = vpop.f32.mrf.mxu1 }
 0x26d   : > { %v1815_v28 = vmul.f32 0.0625, %v876_v15 }
 0x26e   : > { %718 = vmax.xlane.f32.xlu2 %v717_v22  ;;  %565 = vadd.xlane.f32.xlu1 %v564_v23 }
 0x26f   : > { %v892_v29 = vsel %vm295_vm0, %v1815_v28, -inf }
 0x272   : > { %1329 = vrot.lane.b32.xlu0 %v1328_v19, %s1457_s27  ;;  %v549_v19 = vmul.f32 1.442695, %v544_v18 }
 0x274   : > { %1375 = vpow2.f32 %v549_v19 }
 0x276   : > { %724 = vmax.xlane.f32.xlu2 %v723_v12  ;;  %727 = vmax.xlane.f32.xlu1 %v726_v13 }
 0x27a   : > { %v1825_v34 = vpop.eup %1375 }
 0x27b   : > { %v558_v35 = vsel %vm295_vm0, %v1825_v34, 0.0 }
 0x27e   : > { %893 = vmax.xlane.f32.xlu1 %v892_v29 }
 0x29c   : > { %556 = vadd.xlane.f32.xlu0 %v555_v33 }
 0x2a4   : > { %559 = vadd.xlane.f32.xlu0 %v558_v35 }
 0x2ac   : > { %721 = vmax.xlane.f32.xlu0 %v720_v25 }
 0x2c0   : > { %1334 = vrot.lane.b32.xlu0 %v1333_v44, %s1457_s27 }
 0x2c8   : > { %1344 = vrot.lane.b32.xlu0 %v1343_v47, %s1457_s27 }
 0x2c9   : > { %v885_v48 = vpop.xlane.xlu0 %884 }
 0x2ca   : > { %v895_v49 = vsub.f32 %v1773_v60, %v885_v48 }
 0x2cc   : > { %v899_v50 = vmul.f32 1.442695, %v895_v49 }
 0x2ce   : > { %1377 = vpow2.f32 %v899_v50 }
 0x2d1   : > { %v888_v51 = vpop.xlane.xlu2 %887 }
 0x2d2   : > { %v896_v63 = vsub.f32 %v1778_v3, %v888_v51 }
 0x2d4   : > { %v1840_v56 = vpop.eup %1377  ;;  %v901_v1 = vmul.f32 1.442695, %v896_v63 }
 0x2d5   : > { %v907_v57 = vsel %vm295_vm0, %v1840_v56, 0.0 }
 0x2d6   : > { %908 = vadd.xlane.f32.xlu1 %v907_v57 }
 0x2d9   : > { %v563_v58 = vpop.xlane.xlu2 %562  ;;  %v891_v22 = vpop.xlane.xlu1 %890 }
 0x2da   : > { %v897_v51 = vsub.f32 %v1785_v10, %v891_v22 }
 0x2dc   : > { %v1325_v59 = vpop.permute.xlu0 %1324  ;;  %v903_v57 = vmul.f32 1.442695, %v897_v51 }
 0x2dd   : > { %v1326_v61 = vunpack.i.l.bf16 %v1325_v59  ;;  %v1327_v62 = vunpack.i.h.bf16 %v1325_v59 }
 0x2df   : > { %631 = vmatpush.msra.mxu3 %v1326_v61 }
 0x2e1   : > { %v719_v0 = vpop.xlane.xlu2 %718  ;;  %632 = vmatpush.msra.mxu3 %v1327_v62  ;;  %v566_v23 = vpop.xlane.xlu1 %565 }
 0x2e2   : > { %v729_v60 = vsub.f32 %v1791_v16, %v719_v0 }
 0x2e4   : > { %v733_v2 = vmul.f32 1.442695, %v729_v60  ;;  %v1330_v4 = vpop.permute.xlu0 %1329 }
 0x2e5   : > { %v1331_v5 = vunpack.i.l.bf16 %v1330_v4  ;;  %v1332_v6 = vunpack.i.h.bf16 %v1330_v4 }
 0x2e6   : > { %1379 = vpow2.f32 %v733_v2 }
 0x2e7   : > { %633 = vmatpush.msra.mxu3 %v1331_v5  ;;  %1381 = vpow2.f32 %v901_v1 }
 0x2e9   : > { %634 = vmatpush.msra.mxu3 %v1332_v6  ;;  %v728_v30 = vpop.xlane.xlu1 %727  ;;  %v725_v18 = vpop.xlane.xlu2 %724 }
 0x2ea   : > { %v732_v31 = vsub.f32 %v1805_v27, %v728_v30 }
 0x2eb   : > { %781 = vmatpush.msrb.mxu3 %v294_v43 }
 0x2ec   : > { %v1846_v7 = vpop.eup %1379  ;;  %v739_v36 = vmul.f32 1.442695, %v732_v31 }
 0x2ed   : > { %782 = vmatpush.msrb.mxu3 %v292_v42  ;;  %v741_v3 = vsel %vm295_vm0, %v1846_v7, 0.0  ;;  %v1851_v11 = vpop.eup %1381 }
 0x2ee   : > { %742 = vadd.xlane.f32.xlu2 %v741_v3  ;;  %v910_v16 = vsel %vm295_vm0, %v1851_v11, 0.0 }
 0x2ef   : > { %783 = vmatpush.msrb.mxu3 %v290_v9 }
 0x2f1   : > { %784 = vmatpush.msrb.mxu3 %v288_v14  ;;  %v894_v25 = vpop.xlane.xlu1 %893 }
 0x2f2   : > { %911 = vadd.xlane.f32.xlu0 %v910_v16  ;;  %v898_v27 = vsub.f32 %v1815_v28, %v894_v25  ;;  %v280_v28 = vld [vmem:[%s1620_s7 + $0x8] sm:$0xff] }
 0x2f3   : > { %785 = vmatpush.msrb.mxu3 %v286_v46  ;;  %v1348_v49 = vpack.i.bf16 %v280_v28, %v282_v41 }
 0x2f4   : > { %v905_v40 = vmul.f32 1.442695, %v898_v27 }
 0x2f5   : > { %786 = vmatpush.msrb.mxu3 %v284_v45 }
 0x2f7   : > { %787 = vmatpush.msrb.mxu3 %v282_v41 }
 0x2f9   : > { %788 = vmatpush.msrb.mxu3 %v280_v28 }
 0x306   : > { %1339 = vrot.lane.b32.xlu2 %v1338_v21, %s1457_s27 }
 0x30f   : > { %v557_v12 = vpop.xlane.xlu0 %556 }
 0x310   : > { %1383 = vrcp.f32 %v557_v12 }
 0x316   : > { %v1384_v13 = vpop.eup %1383 }
 0x317   : > { %v560_v15 = vpop.xlane.xlu0 %559  ;;  %v571_v29 = vmul.f32 %v1384_v13, %v1821_v32  ;;  %v731_v32 = vsub.f32 %v1803_v26, %v725_v18 }
 0x318   : > { %1385 = vrcp.f32 %v560_v15 }
 0x319   : > { %1216 = vmatmul.msk.f32.vlgmr.msra.gmra.mxu3 %vm295_vm0, %v571_v29  ;;  %1387 = vrcp.f32 %v563_v58  ;;  %v737_v39 = vmul.f32 1.442695, %v731_v32 }
 0x31e   : > { %v1386_v17 = vpop.eup %1385 }
 0x31f   : > { %v722_v19 = vpop.xlane.xlu0 %721  ;;  %v572_v33 = vmul.f32 %v1386_v17, %v1825_v34  ;;  %v1388_v38 = vpop.eup %1387 }
 0x320   : > { %v730_v35 = vsub.f32 %v1829_v24, %v722_v19  ;;  %v573_v34 = vmul.f32 %v1388_v38, %v1783_v8 }
 0x321   : > { %1217 = vmatmul.msk.f32.gmra.mxu3 %vm295_vm0, %v572_v33 }
 0x322   : > { %v735_v37 = vmul.f32 1.442695, %v730_v35 }
 0x324   : > { %1389 = vpow2.f32 %v735_v37 }
 0x325   : > { %1391 = vpow2.f32 %v739_v36 }
 0x326   : > { %1393 = vrcp.f32 %v566_v23 }
 0x327   : > { %1395 = vpow2.f32 %v737_v39 }
 0x328   : > { %1397 = vpow2.f32 %v905_v40 }
 0x329   : > { %1218 = vmatmul.msk.f32.gmra.mxu3 %vm295_vm0, %v573_v34 }
 0x32a   : > { %v1867_v24 = vpop.eup %1389 }
 0x32b   : > { %v1870_v26 = vpop.eup %1391  ;;  %v744_v42 = vsel %vm295_vm0, %v1867_v24, 0.0 }
 0x32c   : > { %v1394_v43 = vpop.eup %1393  ;;  %745 = vadd.xlane.f32.xlu1 %v744_v42  ;;  %v750_v8 = vsel %vm295_vm0, %v1870_v26, 0.0 }
 0x32d   : > { %v574_v44 = vmul.f32 %v1394_v43, %v1793_v20  ;;  %v1396_v45 = vpop.eup %1395 }
 0x32e   : > { %v1879_v46 = vpop.eup %1397  ;;  %v747_v47 = vsel %vm295_vm0, %v1396_v45, 0.0 }
 0x32f   : > { %751 = vadd.xlane.f32.xlu2 %v750_v8  ;;  %v916_v48 = vsel %vm295_vm0, %v1879_v46, 0.0 }
 0x331   : > { %1219 = vmatmul.msk.f32.gmra.mxu3 %vm295_vm0, %v574_v44 }
 0x332   : > { %v1335_v62 = vpop.permute.xlu0 %1334 }
 0x333   : > { %v1336_v63 = vunpack.i.l.bf16 %v1335_v62  ;;  %v1337_v0 = vunpack.i.h.bf16 %v1335_v62 }
 0x334   : > { %748 = vadd.xlane.f32.xlu1 %v747_v47 }
 0x335   : > { %979 = vmatpush.msrb.mxu2 %v1336_v63  ;;  %1264 = vmatpush.msra.mxu3 %v1336_v63 }
 0x337   : > { %917 = vadd.xlane.f32.xlu2 %v916_v48  ;;  %980 = vmatpush.msrb.mxu2 %v1337_v0 }
 0x338   : > { %1265 = vmatpush.msra.mxu3 %v1337_v0 }
 0x33a   : > { %v1345_v2 = vpop.permute.xlu0 %1344 }
 0x33b   : > { %v1346_v5 = vunpack.i.l.bf16 %v1345_v2  ;;  %v1347_v6 = vunpack.i.h.bf16 %v1345_v2 }
 0x349   : > { %v909_v4 = vpop.xlane.xlu1 %908 }
 0x34d   : > { %1349 = vrot.lane.b32.xlu1 %v1348_v49, %s1457_s27 }
 0x361   : > { %v743_v50 = vpop.xlane.xlu2 %742 }
 0x362   : > { %1399 = vrcp.f32 %v743_v50 }
 0x363   : > { %1401 = vpow2.f32 %v903_v57 }
 0x365   : > { %v912_v18 = vpop.xlane.xlu0 %911 }
 0x368   : > { %v1400_v20 = vpop.eup %1399 }
 0x369   : > { %v757_v58 = vmul.f32 %v1400_v20, %v1846_v7  ;;  %v1888_v59 = vpop.eup %1401  ;;  %v1340_v60 = vpop.permute.xlu2 %1339 }
 0x36a   : > { %v913_v61 = vsel %vm295_vm0, %v1888_v59, 0.0  ;;  %v1341_v10 = vunpack.i.l.bf16 %v1340_v60  ;;  %v1342_v1 = vunpack.i.h.bf16 %v1340_v60 }
 0x36b   : > { %1232 = vmatmul.msk.f32.vlgmr.msrb.gmra.mxu3 %vm295_vm0, %v757_v58 }
 0x36c   : > { %981 = vmatpush.msrb.mxu2 %v1341_v10  ;;  %1266 = vmatpush.msra.mxu3 %v1341_v10 }
 0x36e   : > { %982 = vmatpush.msrb.mxu2 %v1342_v1  ;;  %1267 = vmatpush.msra.mxu3 %v1342_v1 }
 0x370   : > { %983 = vmatpush.msrb.mxu2 %v1346_v5  ;;  %1268 = vmatpush.msra.mxu3 %v1346_v5 }
 0x372   : > { %984 = vmatpush.msrb.mxu2 %v1347_v6  ;;  %1269 = vmatpush.msra.mxu3 %v1347_v6 }
 0x377   : > { %914 = vadd.xlane.f32.xlu1 %v913_v61 }
 0x39c   : > { %v636_v7 = vpop.f32.mrf.mxu3 }
 0x39d   : > { %1004 = vrot.lane.b32.xlu0 %v636_v7, %s1457_s27 }
 0x39f   : > { %v746_v3 = vpop.xlane.xlu1 %745 }
 0x3a0   : > { %1403 = vrcp.f32 %v746_v3 }
 0x3a2   : > { %v752_v22 = vpop.xlane.xlu2 %751 }
 0x3a4   : > { %v639_v9 = vpop.f32.mrf.mxu3 }
 0x3a5   : > { %1006 = vrot.lane.b32.xlu2 %v639_v9, %s1457_s27 }
 0x3a6   : > { %v1404_v14 = vpop.eup %1403 }
 0x3a7   : > { %v749_v16 = vpop.xlane.xlu1 %748  ;;  %v758_v21 = vmul.f32 %v1404_v14, %v1867_v24 }
 0x3a8   : > { %1405 = vrcp.f32 %v749_v16 }
 0x3a9   : > { %1233 = vmatmul.msk.f32.gmra.mxu3 %vm295_vm0, %v758_v21  ;;  %1407 = vrcp.f32 %v752_v22 }
 0x3aa   : > { %v918_v30 = vpop.xlane.xlu2 %917  ;;  %1409 = vrcp.f32 %v909_v4 }
 0x3ab   : > { %1411 = vrcp.f32 %v918_v30 }
 0x3ac   : > { %v642_v23 = vpop.f32.mrf.mxu3  ;;  %1413 = vrcp.f32 %v912_v18 }
 0x3ad   : > { %1008 = vrot.lane.b32.xlu0 %v642_v23, %s1457_s27 }
 0x3ae   : > { %v1406_v12 = vpop.eup %1405 }
 0x3af   : > { %v759_v13 = vmul.f32 %v1406_v12, %v1396_v45  ;;  %v1408_v15 = vpop.eup %1407 }
 0x3b0   : > { %v760_v31 = vmul.f32 %v1408_v15, %v1870_v26  ;;  %v1410_v17 = vpop.eup %1409 }
 0x3b1   : > { %1234 = vmatmul.msk.f32.gmra.mxu3 %vm295_vm0, %v759_v13  ;;  %v1412_v33 = vpop.eup %1411  ;;  %v923_v25 = vmul.f32 %v1410_v17, %v1840_v56 }
 0x3b2   : > { %v926_v32 = vmul.f32 %v1412_v33, %v1879_v46  ;;  %v1414_v37 = vpop.eup %1413 }
 0x3b3   : > { %v924_v38 = vmul.f32 %v1414_v37, %v1851_v11 }
 0x3b4   : > { %v645_v29 = vpop.f32.mrf.mxu3 }
 0x3b5   : > { %1010 = vrot.lane.b32.xlu1 %v645_v29, %s1457_s27 }
 0x3b9   : > { %1235 = vmatmul.msk.f32.gmra.mxu3 %vm295_vm0, %v760_v31 }
 0x3bf   : > { %v1350_v19 = vpop.permute.xlu1 %1349 }
 0x3c0   : > { %v1351_v35 = vunpack.i.l.bf16 %v1350_v19  ;;  %v1352_v36 = vunpack.i.h.bf16 %v1350_v19 }
 0x3c2   : > { %985 = vmatpush.msrb.mxu2 %v1351_v35  ;;  %1270 = vmatpush.msra.mxu3 %v1351_v35 }
 0x3c4   : > { %986 = vmatpush.msrb.mxu2 %v1352_v36  ;;  %1271 = vmatpush.msra.mxu3 %v1352_v36 }
 0x3c5   : > { %1248 = vmatmul.msk.f32.vlgmr.msrb.gmra.mxu2 %vm295_vm0, %v923_v25  ;;  %1251 = vmatmul.msk.f32.vlgmr.msra.gmra.mxu3 %vm295_vm0, %v926_v32 }
 0x3cd   : > { %1249 = vmatmul.msk.f32.gmra.mxu2 %vm295_vm0, %v924_v38 }
 0x3ea   : > { %v915_v27 = vpop.xlane.xlu1 %914 }
 0x3eb   : > { %1415 = vrcp.f32 %v915_v27 }
 0x3ee   : > { %v790_v28 = vpop.f32.mrf.mxu3 }
 0x3f1   : > { %v1416_v39 = vpop.eup %1415 }
 0x3f2   : > { %v925_v34 = vmul.f32 %v1416_v39, %v1888_v59 }
 0x3f4   : > { %1250 = vmatmul.msk.f32.gmra.mxu2 %vm295_vm0, %v925_v34 }
 0x3ff   : > { %v1007_v56 = vpop.permute.xlu2 %1006 }
 0x400   : > { %v1033_v11 = vsel %vm295_vm0, %v1767_v53, %v1007_v56 }
 0x401   : > { %1042 = vst [vmem:[%s1914_s10 + $0x10] sm:$0xff] %v1033_v11 }
 0x40f   : > { %v1005_v40 = vpop.permute.xlu0 %1004 }
 0x410   : > { %v1032_v24 = vsel %vm295_vm0, %v1765_v52, %v1005_v40 }
 0x411   : > { %1040 = vst [vmem:[%s1914_s10] sm:$0xff] %v1032_v24 }
 0x41f   : > { %v1009_v41 = vpop.permute.xlu0 %1008 }
 0x420   : > { %v1034_v26 = vsel %vm295_vm0, %v1769_v54, %v1009_v41 }
 0x421   : > { %1044 = vst [vmem:[%s1914_s10 + $0x20] sm:$0xff] %v1034_v26 }
 0x427   : > { %v1011_v42 = vpop.permute.xlu1 %1010 }
 0x428   : > { %v1035_v43 = vsel %vm295_vm0, %v1771_v55, %v1011_v42 }
 0x429   : > { %1046 = vst [vmem:[%s1914_s10 + $0x30] sm:$0xff] %v1035_v43 }
 0x42c   : > { %v793_v8 = vpop.f32.mrf.mxu3 }
 0x434   : > { %v796_v53 = vpop.f32.mrf.mxu3 }
 0x43c   : > { %v799_v52 = vpop.f32.mrf.mxu3 }
 0x448   : > { %v988_v44 = vpop.f32.mrf.mxu2  ;;  %v997_v54 = vpop.f32.mrf.mxu3 }
 0x449   : > { %1020 = vrot.lane.b32.xlu0 %v988_v44, %s1457_s27 }
 0x450   : > { %v991_v45 = vpop.f32.mrf.mxu2 }
 0x451   : > { %1022 = vrot.lane.b32.xlu2 %v991_v45, %s1457_s27 }
 0x459   : > { %1026 = vrot.lane.b32.xlu2 %v997_v54, %s1457_s27 }
 0x477   : > { %v994_v46 = vpop.f32.mrf.mxu2 }
 0x478   : > { %1024 = vrot.lane.b32.xlu0 %v994_v46, %s1457_s27 }
 0x4ab   : > { %v1023_v55 = vpop.permute.xlu2 %1022 }
 0x4ac   : > { %v1037_v47 = vsel %vm295_vm0, %v793_v8, %v1023_v55 }
 0x4ad   : > { %1043 = vst [vmem:[%s1914_s10 + $0x18] sm:$0xff] %v1037_v47 }
 0x4b3   : > { %v1027_v48 = vpop.permute.xlu2 %1026 }
 0x4b4   : > { %v1039_v49 = vsel %vm295_vm0, %v799_v52, %v1027_v48 }
 0x4b5   : > { %1047 = vst [vmem:[%s1914_s10 + $0x38] sm:$0xff] %v1039_v49 }
 0x4bb   : > { %v1021_v50 = vpop.permute.xlu0 %1020 }
 0x4bc   : > { %v1036_v51 = vsel %vm295_vm0, %v790_v28, %v1021_v50 }
 0x4bd   : > { %1041 = vst [vmem:[%s1914_s10 + $0x8] sm:$0xff] %v1036_v51 }
 0x4ea   : > { %v1025_v20 = vpop.permute.xlu0 %1024 }
 0x4eb   : > { %v1038_v57 = vsel %vm295_vm0, %v796_v53, %v1025_v20 }
 0x4ec   : > { %1045 = vst [vmem:[%s1914_s10 + $0x28] sm:$0xff] %v1038_v57 }
 0x4ed PF: > { %s13_s16 = sadd.s32 1, %s1455_s16   ;;  %s1959_s12 = smov %s1447_s14 }
 0x4ee   : > { %p10_p7 = scmp.ge.s32.totalorder %s13_s16, 6   ;;  %s1960_s13 = smov %s1451_s15 }
 0x4ef   : > { %s1961_s14 = smov %s1964_s17  ;;  %s1962_s15 = smov %s1968_s18 }
 0x4f0   :  { %12 = sbr.rel (!%p10_p7) target bundleno = 3 (0x3), region = 68 }

// kernel: encoder_forward.12
= control target key start
LH: loop header
LB: loop body
LE: loop exit
PB: predicated region body
PF: predicated region fallthrough
CT: control target
= control target key end

     0   :  { %10 = vsyncpa [#allocation3], 0  ;;  %s1077_s18 = smov 0   ;;  %s1404_s0 = inlined_call_operand.vmem [shape: f32[128,256], index: 0, kind: input, shape index: {}]   ;;  %s1405_s1 = inlined_call_operand.vmem [shape: f32[128,256], index: 1, kind: input, shape index: {}]   ;;  %s1406_s2 = inlined_call_operand.hbm [shape: f32[256,256], index: 2, kind: input, shape index: {}]   ;;  %s1407_s3 = inlined_call_operand.vmem [shape: f32[1,256], index: 3, kind: input, shape index: {}]   ;;  %s1408_s4 = inlined_call_operand.vmem [shape: f32[1,256], index: 4, kind: input, shape index: {}]   ;;  %s1409_s5 = inlined_call_operand.vmem [shape: f32[128,256], index: 5, kind: output, shape index: {}]  }
   0x1 LB: > { %s173_s21 = sshll.u32 %s1406_s2, 4  ;;  %s924_s22 = sadd.s32 4294967295, %s1041_s18   ;;  %s1041_s18 = sphi %s1077_s18, %s16_s18   ;;  %s174_s21 = int_to_ptr.hbm [resolvable:$true] %s173_s21 }
   0x2   : > { %p926_p0 = scmp.ge.s32.totalorder %s1041_s18, 1  ;;  %p162_p1 = scmp.lt.s32.totalorder %s1041_s18, 3 }
   0x3   : > { %p953_p2 = scmp.eq.s32.totalorder %s924_s22, 0  ;;  %s1043_s23 = smov [#allocation2]  }
   0x4   : > { %p163_p3 = pnand %p926_p0, %p162_p1  ;;  %s175_s24 = sshll.u32 %s1043_s23, 4  ;;  %s176_s24 = int_to_ptr.vmem [resolvable:$true] %s175_s24 }
   0x5   : > { %s1044_s25 = smov 256   ;;  %s1045_s26 = smov 16  }
   0x6   : > { %p949_p4 = pneg %p163_p3  ;;  %217 = sbr.rel (%p163_p3) target bundleno = 517 (0x205), region = 40 }
   0x8   : > { %p950_p5 = pnand %p953_p2, %p949_p4 }
   0xa   : > { %952 = dma.hbm_to_vmem [thread:$0]  (!%p950_p5), %s174_s21, 8192, %s176_s24, [#allocation3], %s1044_s25, %s1044_s25, %s1045_s26  }
   0xb   : > { %1036 = dma.done.wait (%p953_p2), [#allocation3], 8192  }
   0xc   : > { %1038 = vsyncadd (%p953_p2), [#allocation3], 4294959104  ;;  %v322_v0 = vld [vmem:[#allocation2 + $0xf8] sm:$0xff]  ;;  %v320_v2 = vld [vmem:[#allocation2 + $0xe8] sm:$0xff]  ;;  %s1092_s27 = sshll.u32 %s924_s22, 3 }
   0xd   : > { %v354_v1 = vld [vmem:[#allocation2 + $0x1f8] sm:$0xff]  ;;  %437 = vmatpush.msra.mxu2 %v322_v0  ;;  %v352_v3 = vld [vmem:[#allocation2 + $0x1e8] sm:$0xff]  ;;  %v321_v6 = vld [vmem:[#allocation2 + $0xf0] sm:$0xff]  ;;  %p255_p6 = scmp.lt.s32.totalorder %s1092_s27, 15 }
   0xe   : > { %478 = vmatpush.msra.mxu3 %v354_v1  ;;  %v318_v4 = vld [vmem:[#allocation2 + $0xd8] sm:$0xff]  ;;  %v353_v7 = vld [vmem:[#allocation2 + $0x1f0] sm:$0xff]  ;;  %v319_v8 = vld [vmem:[#allocation2 + $0xe0] sm:$0xff]  ;;  %355 = vmatpush.msra.mxu0 %v321_v6 }
   0xf   : > { %v350_v5 = vld [vmem:[#allocation2 + $0x1d8] sm:$0xff]  ;;  %438 = vmatpush.msra.mxu2 %v320_v2  ;;  %v351_v9 = vld [vmem:[#allocation2 + $0x1e0] sm:$0xff]  ;;  %396 = vmatpush.msra.mxu1 %v353_v7  ;;  %v316_v10 = vld [vmem:[#allocation2 + $0xc8] sm:$0xff]  ;;  %s1411_s27 = smov (!%p255_p6, %s1092_s27), 15 }
  0x10   : > { %479 = vmatpush.msra.mxu3 %v352_v3  ;;  %v348_v11 = vld [vmem:[#allocation2 + $0x1c8] sm:$0xff]  ;;  %v317_v12 = vld [vmem:[#allocation2 + $0xd0] sm:$0xff]  ;;  %356 = vmatpush.msra.mxu0 %v319_v8  ;;  %v314_v14 = vld [vmem:[#allocation2 + $0xb8] sm:$0xff]  ;;  %s1098_s28 = sshll.u32 %s1411_s27, 4 }
  0x11   : > { %439 = vmatpush.msra.mxu2 %v318_v4  ;;  %v349_v13 = vld [vmem:[#allocation2 + $0x1d0] sm:$0xff]  ;;  %397 = vmatpush.msra.mxu1 %v351_v9  ;;  %v346_v15 = vld [vmem:[#allocation2 + $0x1b8] sm:$0xff]  ;;  %v315_v16 = vld [vmem:[#allocation2 + $0xc0] sm:$0xff]  ;;  %s1104_s6 = scalar_lea.vmem %s1404_s0, %s1098_s28  ;;  %s1126_s9 = scalar_lea.vmem %s1405_s1, %s1098_s28 }
  0x12   : > { %480 = vmatpush.msra.mxu3 %v350_v5  ;;  %v347_v17 = vld [vmem:[#allocation2 + $0x1c0] sm:$0xff]  ;;  %357 = vmatpush.msra.mxu0 %v317_v12  ;;  %v312_v18 = vld [vmem:[#allocation2 + $0xa8] sm:$0xff]  ;;  %v313_v20 = vld [vmem:[#allocation2 + $0xb0] sm:$0xff]  ;;  %s1303_s16 = scalar_lea.vmem %s1409_s5, %s1098_s28 }
  0x13   : > { %440 = vmatpush.msra.mxu2 %v316_v10  ;;  %398 = vmatpush.msra.mxu1 %v349_v13  ;;  %v344_v19 = vld [vmem:[#allocation2 + $0x1a8] sm:$0xff]  ;;  %v345_v21 = vld [vmem:[#allocation2 + $0x1b0] sm:$0xff]  ;;  %v310_v22 = vld [vmem:[#allocation2 + $0x98] sm:$0xff] }
  0x14   : > { %481 = vmatpush.msra.mxu3 %v348_v11  ;;  %358 = vmatpush.msra.mxu0 %v315_v16  ;;  %v342_v23 = vld [vmem:[#allocation2 + $0x198] sm:$0xff]  ;;  %v311_v24 = vld [vmem:[#allocation2 + $0xa0] sm:$0xff]  ;;  %v308_v26 = vld [vmem:[#allocation2 + $0x88] sm:$0xff] }
  0x15   : > { %441 = vmatpush.msra.mxu2 %v314_v14  ;;  %399 = vmatpush.msra.mxu1 %v347_v17  ;;  %v343_v25 = vld [vmem:[#allocation2 + $0x1a0] sm:$0xff]  ;;  %v340_v27 = vld [vmem:[#allocation2 + $0x188] sm:$0xff]  ;;  %v309_v28 = vld [vmem:[#allocation2 + $0x90] sm:$0xff] }
  0x16   : > { %482 = vmatpush.msra.mxu3 %v346_v15  ;;  %359 = vmatpush.msra.mxu0 %v313_v20  ;;  %v341_v29 = vld [vmem:[#allocation2 + $0x190] sm:$0xff]  ;;  %v306_v30 = vld [vmem:[#allocation2 + $0x78] sm:$0xff]  ;;  %v307_v32 = vld [vmem:[#allocation2 + $0x80] sm:$0xff] }
  0x17   : > { %442 = vmatpush.msra.mxu2 %v312_v18  ;;  %400 = vmatpush.msra.mxu1 %v345_v21  ;;  %v338_v31 = vld [vmem:[#allocation2 + $0x178] sm:$0xff]  ;;  %v339_v33 = vld [vmem:[#allocation2 + $0x180] sm:$0xff]  ;;  %v304_v34 = vld [vmem:[#allocation2 + $0x68] sm:$0xff] }
  0x18   : > { %483 = vmatpush.msra.mxu3 %v344_v19  ;;  %360 = vmatpush.msra.mxu0 %v311_v24  ;;  %v336_v35 = vld [vmem:[#allocation2 + $0x168] sm:$0xff]  ;;  %v305_v36 = vld [vmem:[#allocation2 + $0x70] sm:$0xff]  ;;  %v302_v38 = vld [vmem:[#allocation2 + $0x58] sm:$0xff] }
  0x19   : > { %443 = vmatpush.msra.mxu2 %v310_v22  ;;  %401 = vmatpush.msra.mxu1 %v343_v25  ;;  %v337_v37 = vld [vmem:[#allocation2 + $0x170] sm:$0xff]  ;;  %v334_v39 = vld [vmem:[#allocation2 + $0x158] sm:$0xff]  ;;  %v303_v40 = vld [vmem:[#allocation2 + $0x60] sm:$0xff] }
  0x1a   : > { %484 = vmatpush.msra.mxu3 %v342_v23  ;;  %361 = vmatpush.msra.mxu0 %v309_v28  ;;  %v335_v41 = vld [vmem:[#allocation2 + $0x160] sm:$0xff]  ;;  %v300_v42 = vld [vmem:[#allocation2 + $0x48] sm:$0xff]  ;;  %v301_v44 = vld [vmem:[#allocation2 + $0x50] sm:$0xff] }
  0x1b   : > { %444 = vmatpush.msra.mxu2 %v308_v26  ;;  %402 = vmatpush.msra.mxu1 %v341_v29  ;;  %v332_v43 = vld [vmem:[#allocation2 + $0x148] sm:$0xff]  ;;  %v333_v45 = vld [vmem:[#allocation2 + $0x150] sm:$0xff]  ;;  %v298_v46 = vld [vmem:[#allocation2 + $0x38] sm:$0xff] }
  0x1c   : > { %485 = vmatpush.msra.mxu3 %v340_v27  ;;  %362 = vmatpush.msra.mxu0 %v307_v32  ;;  %v330_v47 = vld [vmem:[#allocation2 + $0x138] sm:$0xff]  ;;  %v299_v48 = vld [vmem:[#allocation2 + $0x40] sm:$0xff]  ;;  %v296_v50 = vld [vmem:[#allocation2 + $0x28] sm:$0xff] }
  0x1d   : > { %445 = vmatpush.msra.mxu2 %v306_v30  ;;  %403 = vmatpush.msra.mxu1 %v339_v33  ;;  %v331_v49 = vld [vmem:[#allocation2 + $0x140] sm:$0xff]  ;;  %v328_v51 = vld [vmem:[#allocation2 + $0x128] sm:$0xff]  ;;  %v297_v52 = vld [vmem:[#allocation2 + $0x30] sm:$0xff] }
  0x1e   : > { %486 = vmatpush.msra.mxu3 %v338_v31  ;;  %363 = vmatpush.msra.mxu0 %v305_v36  ;;  %v329_v53 = vld [vmem:[#allocation2 + $0x130] sm:$0xff]  ;;  %v294_v54 = vld [vmem:[#allocation2 + $0x18] sm:$0xff]  ;;  %v295_v56 = vld [vmem:[#allocation2 + $0x20] sm:$0xff] }
  0x1f   : > { %446 = vmatpush.msra.mxu2 %v304_v34  ;;  %404 = vmatpush.msra.mxu1 %v337_v37  ;;  %v326_v55 = vld [vmem:[#allocation2 + $0x118] sm:$0xff]  ;;  %v327_v57 = vld [vmem:[#allocation2 + $0x120] sm:$0xff]  ;;  %v292_v58 = vld [vmem:[#allocation2 + $0x8] sm:$0xff] }
  0x20   : > { %487 = vmatpush.msra.mxu3 %v336_v35  ;;  %364 = vmatpush.msra.mxu0 %v303_v40  ;;  %v324_v59 = vld [vmem:[#allocation2 + $0x108] sm:$0xff]  ;;  %v275_v60 = vld [vmem:[%s1104_s6] sm:$0xff]  ;;  %v293_v62 = vld [vmem:[#allocation2 + $0x10] sm:$0xff] }
  0x21   : > { %447 = vmatpush.msra.mxu2 %v302_v38  ;;  %405 = vmatpush.msra.mxu1 %v335_v41  ;;  %v276_v61 = vld [vmem:[%s1104_s6 + $0x8] sm:$0xff]  ;;  %v325_v63 = vld [vmem:[#allocation2 + $0x110] sm:$0xff]  ;;  %v291_v0 = vld [vmem:[#allocation2] sm:$0xff] }
  0x22   : > { %488 = vmatpush.msra.mxu3 %v334_v39  ;;  %365 = vmatpush.msra.mxu0 %v301_v44  ;;  %v323_v1 = vld [vmem:[#allocation2 + $0x100] sm:$0xff]  ;;  %v277_v2 = vld [vmem:[%s1104_s6 + $0x10] sm:$0xff]  ;;  %v278_v3 = vld [vmem:[%s1104_s6 + $0x18] sm:$0xff] }
  0x23   : > { %448 = vmatpush.msra.mxu2 %v300_v42  ;;  %406 = vmatpush.msra.mxu1 %v333_v45  ;;  %v279_v4 = vld [vmem:[%s1104_s6 + $0x20] sm:$0xff]  ;;  %v280_v5 = vld [vmem:[%s1104_s6 + $0x28] sm:$0xff]  ;;  %v281_v6 = vld [vmem:[%s1104_s6 + $0x30] sm:$0xff] }
  0x24   : > { %489 = vmatpush.msra.mxu3 %v332_v43  ;;  %366 = vmatpush.msra.mxu0 %v299_v48  ;;  %v282_v7 = vld [vmem:[%s1104_s6 + $0x38] sm:$0xff]  ;;  %v283_v8 = vld [vmem:[%s1104_s6 + $0x40] sm:$0xff]  ;;  %v284_v9 = vld [vmem:[%s1104_s6 + $0x48] sm:$0xff] }
  0x25   : > { %449 = vmatpush.msra.mxu2 %v298_v46  ;;  %407 = vmatpush.msra.mxu1 %v331_v49  ;;  %v285_v10 = vld [vmem:[%s1104_s6 + $0x50] sm:$0xff]  ;;  %v286_v11 = vld [vmem:[%s1104_s6 + $0x58] sm:$0xff]  ;;  %v287_v12 = vld [vmem:[%s1104_s6 + $0x60] sm:$0xff] }
  0x26   : > { %490 = vmatpush.msra.mxu3 %v330_v47  ;;  %367 = vmatpush.msra.mxu0 %v297_v52  ;;  %v288_v13 = vld [vmem:[%s1104_s6 + $0x68] sm:$0xff]  ;;  %v289_v14 = vld [vmem:[%s1104_s6 + $0x70] sm:$0xff]  ;;  %v290_v15 = vld [vmem:[%s1104_s6 + $0x78] sm:$0xff] }
  0x27   : > { %450 = vmatpush.msra.mxu2 %v296_v50  ;;  %408 = vmatpush.msra.mxu1 %v329_v53  ;;  %v519_v18 = vld [vmem:[%s1126_s9] sm:$0xff]  ;;  %v520_v22 = vld [vmem:[%s1126_s9 + $0x8] sm:$0xff]  ;;  %v521_v29 = vld [vmem:[%s1126_s9 + $0x10] sm:$0xff] }
  0x28   : > { %491 = vmatpush.msra.mxu3 %v328_v51  ;;  %368 = vmatpush.msra.mxu0 %v295_v56  ;;  %v522_v33 = vld [vmem:[%s1126_s9 + $0x18] sm:$0xff]  ;;  %v523_v40 = vld [vmem:[%s1126_s9 + $0x20] sm:$0xff]  ;;  %v524_v44 = vld [vmem:[%s1126_s9 + $0x28] sm:$0xff] }
  0x29   : > { %451 = vmatpush.msra.mxu2 %v294_v54  ;;  %409 = vmatpush.msra.mxu1 %v327_v57  ;;  %v525_v51 = vld [vmem:[%s1126_s9 + $0x30] sm:$0xff] }
  0x2a   : > { %492 = vmatpush.msra.mxu3 %v326_v55  ;;  %369 = vmatpush.msra.mxu0 %v293_v62  ;;  %v526_v55 = vld [vmem:[%s1126_s9 + $0x38] sm:$0xff]  ;;  %v527_v62 = vld [vmem:[%s1126_s9 + $0x40] sm:$0xff] }
  0x2b   : > { %452 = vmatpush.msra.mxu2 %v292_v58  ;;  %410 = vmatpush.msra.mxu1 %v325_v63 }
  0x2c   : > { %493 = vmatpush.msra.mxu3 %v324_v59  ;;  %453 = vmatmul.f32.vlgmr.msra.gmra.mxu2 %v275_v60 }
  0x2d   : > { %494 = vmatmul.f32.vlgmr.msra.gmra.mxu3 %v276_v61  ;;  %370 = vmatpush.msra.mxu0 %v291_v0 }
  0x2e   : > { %411 = vmatpush.msra.mxu1 %v323_v1  ;;  %371 = vmatmul.f32.vlgmr.msra.gmra.mxu0 %v275_v60 }
  0x2f   : > { %412 = vmatmul.f32.vlgmr.msra.gmra.mxu1 %v276_v61 }
  0x34   : > { %456 = vmatmul.f32.gmra.mxu2 %v277_v2 }
  0x35   : > { %497 = vmatmul.f32.gmra.mxu3 %v278_v3 }
  0x36   : > { %374 = vmatmul.f32.gmra.mxu0 %v277_v2  ;;  %v528_v2 = vld [vmem:[%s1126_s9 + $0x48] sm:$0xff] }
  0x37   : > { %415 = vmatmul.f32.gmra.mxu1 %v278_v3 }
  0x3c   : > { %459 = vmatmul.f32.gmra.mxu2 %v279_v4 }
  0x3d   : > { %500 = vmatmul.f32.gmra.mxu3 %v280_v5 }
  0x3e   : > { %377 = vmatmul.f32.gmra.mxu0 %v279_v4 }
  0x3f   : > { %418 = vmatmul.f32.gmra.mxu1 %v280_v5 }
  0x44   : > { %462 = vmatmul.f32.gmra.mxu2 %v281_v6 }
  0x45   : > { %503 = vmatmul.f32.gmra.mxu3 %v282_v7 }
  0x46   : > { %380 = vmatmul.f32.gmra.mxu0 %v281_v6 }
  0x47   : > { %421 = vmatmul.f32.gmra.mxu1 %v282_v7 }
  0x4c   : > { %465 = vmatmul.f32.gmra.mxu2 %v283_v8 }
  0x4d   : > { %506 = vmatmul.f32.gmra.mxu3 %v284_v9 }
  0x4e   : > { %383 = vmatmul.f32.gmra.mxu0 %v283_v8 }
  0x4f   : > { %424 = vmatmul.f32.gmra.mxu1 %v284_v9  ;;  %v529_v9 = vld [vmem:[%s1126_s9 + $0x50] sm:$0xff] }
  0x54   : > { %468 = vmatmul.f32.gmra.mxu2 %v285_v10 }
  0x55   : > { %509 = vmatmul.f32.gmra.mxu3 %v286_v11 }
  0x56   : > { %386 = vmatmul.f32.gmra.mxu0 %v285_v10 }
  0x57   : > { %427 = vmatmul.f32.gmra.mxu1 %v286_v11 }
  0x5c   : > { %471 = vmatmul.f32.gmra.mxu2 %v287_v12 }
  0x5d   : > { %512 = vmatmul.f32.gmra.mxu3 %v288_v13 }
  0x5e   : > { %389 = vmatmul.f32.gmra.mxu0 %v287_v12 }
  0x5f   : > { %430 = vmatmul.f32.gmra.mxu1 %v288_v13  ;;  %v530_v13 = vld [vmem:[%s1126_s9 + $0x58] sm:$0xff] }
  0x64   : > { %474 = vmatmul.f32.gmra.mxu2 %v289_v14 }
  0x65   : > { %515 = vmatmul.f32.gmra.mxu3 %v290_v15 }
  0x66   : > { %392 = vmatmul.f32.gmra.mxu0 %v289_v14 }
  0x67   : > { %433 = vmatmul.f32.gmra.mxu1 %v290_v15 }
  0xab   : > { %v372_v16 = vpop.f32.mrf.mxu0 }
  0xac   : > { %v413_v17 = vpop.f32.mrf.mxu1 }
  0xad   : > { %v414_v19 = vadd.f32 %v413_v17, %v372_v16 }
  0xaf   : > { %v454_v20 = vpop.f32.mrf.mxu2  ;;  %v1130_v24 = vadd.f32 %v519_v18, %v414_v19 }
  0xb0   : > { %v495_v21 = vpop.f32.mrf.mxu3 }
  0xb1   : > { %v496_v23 = vadd.f32 %v495_v21, %v454_v20  ;;  %v531_v20 = vld [vmem:[%s1126_s9 + $0x60] sm:$0xff] }
  0xb3   : > { %v1132_v25 = vadd.f32 %v520_v22, %v496_v23  ;;  %v375_v27 = vpop.f32.mrf.mxu0 }
  0xb4   : > { %v416_v28 = vpop.f32.mrf.mxu1 }
  0xb5   : > { %v553_v26 = vadd.f32 %v1132_v25, %v1130_v24  ;;  %v417_v30 = vadd.f32 %v416_v28, %v375_v27 }
  0xb7   : > { %554 = vadd.xlane.f32.xlu0 %v553_v26  ;;  %v457_v31 = vpop.f32.mrf.mxu2  ;;  %v1138_v34 = vadd.f32 %v521_v29, %v417_v30  ;;  %v532_v26 = vld [vmem:[%s1126_s9 + $0x68] sm:$0xff] }
  0xb8   : > { %v498_v32 = vpop.f32.mrf.mxu3 }
  0xb9   : > { %v499_v35 = vadd.f32 %v498_v32, %v457_v31 }
  0xbb   : > { %v1140_v36 = vadd.f32 %v522_v33, %v499_v35  ;;  %v378_v38 = vpop.f32.mrf.mxu0  ;;  %v533_v33 = vld [vmem:[%s1126_s9 + $0x70] sm:$0xff] }
  0xbc   : > { %v419_v39 = vpop.f32.mrf.mxu1 }
  0xbd   : > { %v556_v37 = vadd.f32 %v1140_v36, %v1138_v34  ;;  %v420_v41 = vadd.f32 %v419_v39, %v378_v38  ;;  %v534_v39 = vld [vmem:[%s1126_s9 + $0x78] sm:$0xff] }
  0xbf   : > { %557 = vadd.xlane.f32.xlu0 %v556_v37  ;;  %v460_v42 = vpop.f32.mrf.mxu2  ;;  %v1146_v46 = vadd.f32 %v523_v40, %v420_v41 }
  0xc0   : > { %v501_v43 = vpop.f32.mrf.mxu3 }
  0xc1   : > { %v502_v45 = vadd.f32 %v501_v43, %v460_v42 }
  0xc3   : > { %v1148_v47 = vadd.f32 %v524_v44, %v502_v45  ;;  %v381_v49 = vpop.f32.mrf.mxu0  ;;  %v1046_v44 = vmov 256.0  }
  0xc4   : > { %v422_v50 = vpop.f32.mrf.mxu1  ;;  %967 = vrcp.f32 %v1046_v44 }
  0xc5   : > { %v559_v48 = vadd.f32 %v1148_v47, %v1146_v46  ;;  %v423_v52 = vadd.f32 %v422_v50, %v381_v49 }
  0xc7   : > { %560 = vadd.xlane.f32.xlu1 %v559_v48  ;;  %v463_v53 = vpop.f32.mrf.mxu2  ;;  %v1154_v56 = vadd.f32 %v525_v51, %v423_v52 }
  0xc8   : > { %v504_v54 = vpop.f32.mrf.mxu3 }
  0xc9   : > { %v505_v57 = vadd.f32 %v504_v54, %v463_v53 }
  0xca   : > { %v968_v45 = vpop.eup %967 }
  0xcb   : > { %v1156_v58 = vadd.f32 %v526_v55, %v505_v57  ;;  %v384_v60 = vpop.f32.mrf.mxu0  ;;  %v578_v48 = vmul.f32 256.0, %v968_v45  ;;  %vm582_vm0 = vweird.f32 %v968_v45 }
  0xcc   : > { %v425_v61 = vpop.f32.mrf.mxu1 }
  0xcd   : > { %v562_v59 = vadd.f32 %v1156_v58, %v1154_v56  ;;  %v426_v63 = vadd.f32 %v425_v61, %v384_v60  ;;  %v579_v49 = vsub.f32 1.0, %v578_v48 }
  0xcf   : > { %563 = vadd.xlane.f32.xlu1 %v562_v59  ;;  %v466_v0 = vpop.f32.mrf.mxu2  ;;  %v1162_v4 = vadd.f32 %v527_v62, %v426_v63  ;;  %v580_v50 = vmul.f32 %v968_v45, %v579_v49 }
  0xd0   : > { %v507_v1 = vpop.f32.mrf.mxu3 }
  0xd1   : > { %v508_v3 = vadd.f32 %v507_v1, %v466_v0  ;;  %v581_v51 = vadd.f32 %v968_v45, %v580_v50 }
  0xd3   : > { %v1164_v5 = vadd.f32 %v528_v2, %v508_v3  ;;  %v387_v7 = vpop.f32.mrf.mxu0  ;;  %v583_v52 = vsel %vm582_vm0, %v968_v45, %v581_v51 }
  0xd4   : > { %v428_v8 = vpop.f32.mrf.mxu1 }
  0xd5   : > { %v565_v6 = vadd.f32 %v1164_v5, %v1162_v4  ;;  %v429_v10 = vadd.f32 %v428_v8, %v387_v7 }
  0xd7   : > { %566 = vadd.xlane.f32.xlu2 %v565_v6  ;;  %v469_v11 = vpop.f32.mrf.mxu2  ;;  %v1170_v14 = vadd.f32 %v529_v9, %v429_v10 }
  0xd8   : > { %v510_v12 = vpop.f32.mrf.mxu3 }
  0xd9   : > { %v511_v15 = vadd.f32 %v510_v12, %v469_v11 }
  0xdb   : > { %v1172_v16 = vadd.f32 %v530_v13, %v511_v15  ;;  %v390_v18 = vpop.f32.mrf.mxu0 }
  0xdc   : > { %v431_v19 = vpop.f32.mrf.mxu1 }
  0xdd   : > { %v568_v17 = vadd.f32 %v1172_v16, %v1170_v14  ;;  %v432_v21 = vadd.f32 %v431_v19, %v390_v18 }
  0xdf   : > { %569 = vadd.xlane.f32.xlu2 %v568_v17  ;;  %v472_v22 = vpop.f32.mrf.mxu2  ;;  %v1178_v27 = vadd.f32 %v531_v20, %v432_v21 }
  0xe0   : > { %v513_v23 = vpop.f32.mrf.mxu3 }
  0xe1   : > { %v514_v28 = vadd.f32 %v513_v23, %v472_v22 }
  0xe3   : > { %v1180_v29 = vadd.f32 %v532_v26, %v514_v28  ;;  %v393_v31 = vpop.f32.mrf.mxu0 }
  0xe4   : > { %v434_v32 = vpop.f32.mrf.mxu1 }
  0xe5   : > { %v571_v30 = vadd.f32 %v1180_v29, %v1178_v27  ;;  %v435_v35 = vadd.f32 %v434_v32, %v393_v31 }
  0xe7   : > { %572 = vadd.xlane.f32.xlu0 %v571_v30  ;;  %v475_v37 = vpop.f32.mrf.mxu2  ;;  %v1186_v40 = vadd.f32 %v533_v33, %v435_v35 }
  0xe8   : > { %v516_v38 = vpop.f32.mrf.mxu3 }
  0xe9   : > { %v517_v41 = vadd.f32 %v516_v38, %v475_v37 }
  0xeb   : > { %v1188_v42 = vadd.f32 %v534_v39, %v517_v41 }
  0xed   : > { %v574_v43 = vadd.f32 %v1188_v42, %v1186_v40 }
  0xef   : > { %575 = vadd.xlane.f32.xlu1 %v574_v43 }
 0x12a   : > { %v555_v53 = vpop.xlane.xlu0 %554 }
 0x12b   : > { %v584_v54 = vmul.f32 %v583_v52, %v555_v53 }
 0x12d   : > { %v1193_v55 = vsub.f32 %v1130_v24, %v584_v54  ;;  %v1196_v57 = vsub.f32 %v1132_v25, %v584_v54 }
 0x12f   : > { %v608_v59 = vmul.f32 %v1193_v55, %v1193_v55  ;;  %v609_v60 = vmul.f32 %v1196_v57, %v1196_v57 }
 0x131   : > { %v624_v61 = vadd.f32 %v609_v60, %v608_v59 }
 0x132   : > { %v558_v62 = vpop.xlane.xlu0 %557 }
 0x133   : > { %v585_v63 = vmul.f32 %v583_v52, %v558_v62  ;;  %625 = vadd.xlane.f32.xlu2 %v624_v61 }
 0x135   : > { %v1203_v0 = vsub.f32 %v1138_v34, %v585_v63  ;;  %v1206_v1 = vsub.f32 %v1140_v36, %v585_v63 }
 0x137   : > { %v610_v24 = vmul.f32 %v1203_v0, %v1203_v0  ;;  %v611_v25 = vmul.f32 %v1206_v1, %v1206_v1 }
 0x139   : > { %v627_v2 = vadd.f32 %v611_v25, %v610_v24 }
 0x13a   : > { %v561_v3 = vpop.xlane.xlu1 %560 }
 0x13b   : > { %v586_v6 = vmul.f32 %v583_v52, %v561_v3  ;;  %628 = vadd.xlane.f32.xlu0 %v627_v2 }
 0x13d   : > { %v1213_v7 = vsub.f32 %v1146_v46, %v586_v6  ;;  %v1216_v8 = vsub.f32 %v1148_v47, %v586_v6  ;;  %v551_v6 = vld [vmem:[%s1407_s3] sm:$0x3] }
 0x13f   : > { %v612_v34 = vmul.f32 %v1213_v7, %v1213_v7  ;;  %v613_v36 = vmul.f32 %v1216_v8, %v1216_v8 }
 0x141   : > { %v630_v9 = vadd.f32 %v613_v36, %v612_v34 }
 0x142   : > { %v564_v10 = vpop.xlane.xlu1 %563 }
 0x143   : > { %v587_v11 = vmul.f32 %v583_v52, %v564_v10  ;;  %631 = vadd.xlane.f32.xlu1 %v630_v9 }
 0x145   : > { %v1223_v12 = vsub.f32 %v1154_v56, %v587_v11  ;;  %v1226_v13 = vsub.f32 %v1156_v58, %v587_v11 }
 0x147   : > { %v614_v46 = vmul.f32 %v1223_v12, %v1223_v12  ;;  %v615_v47 = vmul.f32 %v1226_v13, %v1226_v13 }
 0x149   : > { %v633_v15 = vadd.f32 %v615_v47, %v614_v46  ;;  %v1280_v47 = vperm.slane %v551_v6, 0 }
 0x14a   : > { %v567_v17 = vpop.xlane.xlu2 %566 }
 0x14b   : > { %v588_v18 = vmul.f32 %v583_v52, %v567_v17  ;;  %634 = vadd.xlane.f32.xlu2 %v633_v15 }
 0x14d   : > { %v1233_v19 = vsub.f32 %v1162_v4, %v588_v18  ;;  %v1236_v20 = vsub.f32 %v1164_v5, %v588_v18  ;;  %v1283_v18 = vperm.slane %v551_v6, 1 }
 0x14f   : > { %v616_v56 = vmul.f32 %v1233_v19, %v1233_v19  ;;  %v617_v58 = vmul.f32 %v1236_v20, %v1236_v20 }
 0x151   : > { %v636_v21 = vadd.f32 %v617_v58, %v616_v56  ;;  %v552_v56 = vld [vmem:[%s1408_s4] sm:$0x3] }
 0x152   : > { %v570_v22 = vpop.xlane.xlu2 %569 }
 0x153   : > { %v589_v23 = vmul.f32 %v583_v52, %v570_v22  ;;  %637 = vadd.xlane.f32.xlu0 %v636_v21 }
 0x155   : > { %v1243_v26 = vsub.f32 %v1170_v14, %v589_v23  ;;  %v1246_v28 = vsub.f32 %v1172_v16, %v589_v23  ;;  %v773_v23 = vmul.f32 %v1280_v47, %v1193_v55 }
 0x157   : > { %v618_v4 = vmul.f32 %v1243_v26, %v1243_v26  ;;  %v619_v5 = vmul.f32 %v1246_v28, %v1246_v28 }
 0x159   : > { %v639_v30 = vadd.f32 %v619_v5, %v618_v4 }
 0x15a   : > { %v573_v31 = vpop.xlane.xlu0 %572 }
 0x15b   : > { %v590_v32 = vmul.f32 %v583_v52, %v573_v31  ;;  %640 = vadd.xlane.f32.xlu1 %v639_v30  ;;  %v774_v30 = vmul.f32 %v1283_v18, %v1196_v57  ;;  %v1293_v31 = vperm.slane %v552_v56, 0 }
 0x15d   : > { %v1253_v33 = vsub.f32 %v1178_v27, %v590_v32  ;;  %v1256_v35 = vsub.f32 %v1180_v29, %v590_v32  ;;  %v1295_v32 = vperm.slane %v552_v56, 1  ;;  %v778_v56 = vmul.f32 %v1283_v18, %v1216_v8 }
 0x15f   : > { %v620_v14 = vmul.f32 %v1253_v33, %v1253_v33  ;;  %v621_v16 = vmul.f32 %v1256_v35, %v1256_v35 }
 0x161   : > { %v642_v37 = vadd.f32 %v621_v16, %v620_v14 }
 0x162   : > { %v576_v38 = vpop.xlane.xlu1 %575 }
 0x163   : > { %v591_v39 = vmul.f32 %v583_v52, %v576_v38  ;;  %643 = vadd.xlane.f32.xlu2 %v642_v37 }
 0x165   : > { %v1263_v41 = vsub.f32 %v1186_v40, %v591_v39  ;;  %v1266_v43 = vsub.f32 %v1188_v42, %v591_v39 }
 0x167   : > { %v622_v27 = vmul.f32 %v1263_v41, %v1263_v41  ;;  %v623_v29 = vmul.f32 %v1266_v43, %v1266_v43 }
 0x169   : > { %v645_v44 = vadd.f32 %v623_v29, %v622_v27 }
 0x16b   : > { %646 = vadd.xlane.f32.xlu0 %v645_v44 }
 0x1a6   : > { %v626_v45 = vpop.xlane.xlu2 %625 }
 0x1a7   : > { %v648_v48 = vmul.f32 0.003921569, %v626_v45 }
 0x1a9   : > { %969 = vrsqrt.f32 %v648_v48  ;;  %vm663_vm1 = vcmp.eq.f32.partialorder %v648_v48, inf  ;;  %v666_v25 = vand.u32 2147483648, %v648_v48  ;;  %vm665_vm2 = vcmp.eq.f32.partialorder %v648_v48, 0.0 }
 0x1ae   : > { %v629_v49 = vpop.xlane.xlu0 %628 }
 0x1af   : > { %v970_v50 = vpop.eup %969  ;;  %v649_v51 = vmul.f32 0.003921569, %v629_v49 }
 0x1b0   : > { %v657_v52 = vmul.f32 %v970_v50, %v648_v48 }
 0x1b1   : > { %971 = vrsqrt.f32 %v649_v51  ;;  %vm675_vm3 = vcmp.eq.f32.partialorder %v649_v51, inf  ;;  %v678_v22 = vand.u32 2147483648, %v649_v51  ;;  %vm677_vm4 = vcmp.eq.f32.partialorder %v649_v51, 0.0 }
 0x1b2   : > { %v658_v40 = vmul.f32 %v970_v50, %v657_v52 }
 0x1b4   : > { %v659_v53 = vmul.f32 0.5, %v658_v40 }
 0x1b6   : > { %v660_v42 = vsub.f32 1.5, %v659_v53  ;;  %v632_v54 = vpop.xlane.xlu1 %631 }
 0x1b7   : > { %v972_v59 = vpop.eup %971  ;;  %v1272_v60 = vmul.f32 0.003921569, %v632_v54  ;;  %v776_v54 = vmul.f32 %v1283_v18, %v1206_v1 }
 0x1b8   : > { %v661_v61 = vmul.f32 %v970_v50, %v660_v42  ;;  %v669_v62 = vmul.f32 %v972_v59, %v649_v51  ;;  %v775_v42 = vmul.f32 %v1280_v47, %v1203_v0 }
 0x1b9   : > { %973 = vrsqrt.f32 %v1272_v60  ;;  %vm687_vm5 = vcmp.eq.f32.partialorder %v1272_v60, inf  ;;  %v690_v52 = vand.u32 2147483648, %v1272_v60  ;;  %vm689_vm6 = vcmp.eq.f32.partialorder %v1272_v60, 0.0 }
 0x1ba   : > { %v662_v63 = vmul.f32 %v661_v61, %v648_v48  ;;  %v670_v24 = vmul.f32 %v972_v59, %v669_v62 }
 0x1bc   : > { %v664_v2 = vsel %vm663_vm1, %v648_v48, %v662_v63  ;;  %v671_v3 = vmul.f32 0.5, %v670_v24 }
 0x1bd   : > { %v667_v34 = vsel %vm665_vm2, %v666_v25, %v664_v2 }
 0x1be   : > { %v752_v36 = vadd.f32 1e-06, %v667_v34  ;;  %v672_v9 = vsub.f32 1.5, %v671_v3  ;;  %v635_v10 = vpop.xlane.xlu2 %634 }
 0x1bf   : > { %v974_v11 = vpop.eup %973  ;;  %v1278_v46 = vmul.f32 0.003921569, %v635_v10 }
 0x1c0   : > { %975 = vrcp.f32 %v752_v36  ;;  %v673_v15 = vmul.f32 %v972_v59, %v672_v9  ;;  %v681_v17 = vmul.f32 %v974_v11, %v1272_v60 }
 0x1c1   : > { %977 = vrsqrt.f32 %v1278_v46  ;;  %vm699_vm7 = vcmp.eq.f32.partialorder %v1278_v46, inf  ;;  %v702_v10 = vand.u32 2147483648, %v1278_v46  ;;  %vm701_vm8 = vcmp.eq.f32.partialorder %v1278_v46, 0.0 }
 0x1c2   : > { %v674_v58 = vmul.f32 %v673_v15, %v649_v51  ;;  %v682_v21 = vmul.f32 %v974_v11, %v681_v17  ;;  %v777_v17 = vmul.f32 %v1280_v47, %v1213_v7 }
 0x1c4   : > { %v676_v4 = vsel %vm675_vm3, %v649_v51, %v674_v58  ;;  %v683_v5 = vmul.f32 0.5, %v682_v21 }
 0x1c5   : > { %v679_v14 = vsel %vm677_vm4, %v678_v22, %v676_v4 }
 0x1c6   : > { %v976_v16 = vpop.eup %975  ;;  %v753_v37 = vadd.f32 1e-06, %v679_v14  ;;  %v684_v38 = vsub.f32 1.5, %v683_v5  ;;  %v638_v39 = vpop.xlane.xlu0 %637 }
 0x1c7   : > { %v978_v27 = vpop.eup %977  ;;  %v789_v29 = vmul.f32 %v976_v16, %v773_v23  ;;  %v790_v44 = vmul.f32 %v976_v16, %v774_v30  ;;  %v1297_v55 = vmul.f32 0.003921569, %v638_v39 }
 0x1c8   : > { %979 = vrcp.f32 %v753_v37  ;;  %v685_v57 = vmul.f32 %v974_v11, %v684_v38  ;;  %v693_v45 = vmul.f32 %v978_v27, %v1278_v46 }
 0x1c9   : > { %v810_v48 = vadd.f32 %v1293_v31, %v789_v29  ;;  %v811_v49 = vadd.f32 %v1295_v32, %v790_v44  ;;  %981 = vrsqrt.f32 %v1297_v55  ;;  %vm711_vm9 = vcmp.eq.f32.partialorder %v1297_v55, inf }
 0x1ca   : > { %v686_v50 = vmul.f32 %v685_v57, %v1272_v60  ;;  %v694_v51 = vmul.f32 %v978_v27, %v693_v45  ;;  %vm713_vm10 = vcmp.eq.f32.partialorder %v1297_v55, 0.0  ;;  %v779_v57 = vmul.f32 %v1280_v47, %v1223_v12 }
 0x1cb   : > { %826 = vst [vmem:[%s1303_s16] sm:$0xff] %v810_v48  ;;  %v780_v45 = vmul.f32 %v1283_v18, %v1226_v13 }
 0x1cc   : > { %827 = vst [vmem:[%s1303_s16 + $0x8] sm:$0xff] %v811_v49  ;;  %v688_v40 = vsel %vm687_vm5, %v1272_v60, %v686_v50  ;;  %v695_v53 = vmul.f32 0.5, %v694_v51 }
 0x1cd   : > { %v691_v59 = vsel %vm689_vm6, %v690_v52, %v688_v40 }
 0x1ce   : > { %v980_v61 = vpop.eup %979  ;;  %v754_v62 = vadd.f32 1e-06, %v691_v59  ;;  %v696_v63 = vsub.f32 1.5, %v695_v53  ;;  %v641_v24 = vpop.xlane.xlu1 %640 }
 0x1cf   : > { %v982_v25 = vpop.eup %981  ;;  %v791_v2 = vmul.f32 %v980_v61, %v775_v42  ;;  %v792_v3 = vmul.f32 %v980_v61, %v776_v54  ;;  %v1320_v6 = vmul.f32 0.003921569, %v641_v24 }
 0x1d0   : > { %983 = vrcp.f32 %v754_v62  ;;  %v697_v60 = vmul.f32 %v978_v27, %v696_v63  ;;  %v705_v34 = vmul.f32 %v982_v25, %v1297_v55  ;;  %v714_v27 = vand.u32 2147483648, %v1297_v55 }
 0x1d1   : > { %v812_v0 = vadd.f32 %v1293_v31, %v791_v2  ;;  %v813_v1 = vadd.f32 %v1295_v32, %v792_v3  ;;  %985 = vrsqrt.f32 %v1320_v6  ;;  %vm723_vm11 = vcmp.eq.f32.partialorder %v1320_v6, inf }
 0x1d2   : > { %v698_v36 = vmul.f32 %v697_v60, %v1278_v46  ;;  %v706_v9 = vmul.f32 %v982_v25, %v705_v34  ;;  %v726_v63 = vand.u32 2147483648, %v1320_v6  ;;  %vm725_vm12 = vcmp.eq.f32.partialorder %v1320_v6, 0.0 }
 0x1d3   : > { %828 = vst [vmem:[%s1303_s16 + $0x10] sm:$0xff] %v812_v0  ;;  %v781_v2 = vmul.f32 %v1280_v47, %v1233_v19  ;;  %v782_v3 = vmul.f32 %v1283_v18, %v1236_v20 }
 0x1d4   : > { %829 = vst [vmem:[%s1303_s16 + $0x18] sm:$0xff] %v813_v1  ;;  %v700_v11 = vsel %vm699_vm7, %v1278_v46, %v698_v36  ;;  %v707_v15 = vmul.f32 0.5, %v706_v9 }
 0x1d5   : > { %v703_v58 = vsel %vm701_vm8, %v702_v10, %v700_v11 }
 0x1d6   : > { %v984_v21 = vpop.eup %983  ;;  %v755_v22 = vadd.f32 1e-06, %v703_v58  ;;  %v708_v23 = vsub.f32 1.5, %v707_v15  ;;  %v644_v4 = vpop.xlane.xlu2 %643 }
 0x1d7   : > { %v986_v5 = vpop.eup %985  ;;  %v793_v30 = vmul.f32 %v984_v21, %v777_v17  ;;  %v794_v14 = vmul.f32 %v984_v21, %v778_v56  ;;  %v1337_v16 = vmul.f32 0.003921569, %v644_v4 }
 0x1d8   : > { %987 = vrcp.f32 %v755_v22  ;;  %v709_v46 = vmul.f32 %v982_v25, %v708_v23  ;;  %v717_v37 = vmul.f32 %v986_v5, %v1320_v6  ;;  %v783_v22 = vmul.f32 %v1280_v47, %v1243_v26 }
 0x1d9   : > { %v814_v7 = vadd.f32 %v1293_v31, %v793_v30  ;;  %v815_v8 = vadd.f32 %v1295_v32, %v794_v14  ;;  %989 = vrsqrt.f32 %v1337_v16  ;;  %vm735_vm13 = vcmp.eq.f32.partialorder %v1337_v16, inf }
 0x1da   : > { %v710_v38 = vmul.f32 %v709_v46, %v1297_v55  ;;  %v718_v39 = vmul.f32 %v986_v5, %v717_v37  ;;  %v738_v20 = vand.u32 2147483648, %v1337_v16  ;;  %vm737_vm14 = vcmp.eq.f32.partialorder %v1337_v16, 0.0 }
 0x1db   : > { %830 = vst [vmem:[%s1303_s16 + $0x20] sm:$0xff] %v814_v7  ;;  %v784_v23 = vmul.f32 %v1283_v18, %v1246_v28 }
 0x1dc   : > { %831 = vst [vmem:[%s1303_s16 + $0x28] sm:$0xff] %v815_v8  ;;  %v712_v29 = vsel %vm711_vm9, %v1297_v55, %v710_v38  ;;  %v719_v44 = vmul.f32 0.5, %v718_v39  ;;  %v785_v39 = vmul.f32 %v1280_v47, %v1253_v33  ;;  %v787_v33 = vmul.f32 %v1280_v47, %v1263_v41 }
 0x1dd   : > { %v715_v48 = vsel %vm713_vm10, %v714_v27, %v712_v29  ;;  %v786_v27 = vmul.f32 %v1283_v18, %v1256_v35  ;;  %v788_v35 = vmul.f32 %v1283_v18, %v1266_v43 }
 0x1de   : > { %v988_v49 = vpop.eup %987  ;;  %v756_v50 = vadd.f32 1e-06, %v715_v48  ;;  %v720_v51 = vsub.f32 1.5, %v719_v44  ;;  %v647_v52 = vpop.xlane.xlu0 %646 }
 0x1df   : > { %v990_v40 = vpop.eup %989  ;;  %v795_v53 = vmul.f32 %v988_v49, %v779_v57  ;;  %v796_v42 = vmul.f32 %v988_v49, %v780_v45  ;;  %v655_v54 = vmul.f32 0.003921569, %v647_v52 }
 0x1e0   : > { %991 = vrcp.f32 %v756_v50  ;;  %v721_v55 = vmul.f32 %v986_v5, %v720_v51  ;;  %v729_v59 = vmul.f32 %v990_v40, %v1337_v16 }
 0x1e1   : > { %v816_v12 = vadd.f32 %v1293_v31, %v795_v53  ;;  %v817_v61 = vadd.f32 %v1295_v32, %v796_v42  ;;  %993 = vrsqrt.f32 %v655_v54  ;;  %vm747_vm15 = vcmp.eq.f32.partialorder %v655_v54, inf }
 0x1e2   : > { %v722_v13 = vmul.f32 %v721_v55, %v1320_v6  ;;  %v730_v62 = vmul.f32 %v990_v40, %v729_v59  ;;  %v750_v26 = vand.u32 2147483648, %v655_v54  ;;  %vm749_vm0 = vcmp.eq.f32.partialorder %v655_v54, 0.0 }
 0x1e3   : > { %832 = vst [vmem:[%s1303_s16 + $0x30] sm:$0xff] %v816_v12 }
 0x1e4   : > { %833 = vst [vmem:[%s1303_s16 + $0x38] sm:$0xff] %v817_v61  ;;  %v724_v24 = vsel %vm723_vm11, %v1320_v6, %v722_v13  ;;  %v731_v25 = vmul.f32 0.5, %v730_v62 }
 0x1e5   : > { %v727_v60 = vsel %vm725_vm12, %v726_v63, %v724_v24 }
 0x1e6   : > { %v992_v34 = vpop.eup %991  ;;  %v757_v0 = vadd.f32 1e-06, %v727_v60  ;;  %v732_v1 = vsub.f32 1.5, %v731_v25 }
 0x1e7   : > { %v994_v36 = vpop.eup %993  ;;  %v797_v9 = vmul.f32 %v992_v34, %v781_v2  ;;  %v798_v10 = vmul.f32 %v992_v34, %v782_v3 }
 0x1e8   : > { %995 = vrcp.f32 %v757_v0  ;;  %v733_v11 = vmul.f32 %v990_v40, %v732_v1  ;;  %v741_v15 = vmul.f32 %v994_v36, %v655_v54 }
 0x1e9   : > { %v818_v6 = vadd.f32 %v1293_v31, %v797_v9  ;;  %v819_v17 = vadd.f32 %v1295_v32, %v798_v10 }
 0x1ea   : > { %v734_v19 = vmul.f32 %v733_v11, %v1337_v16  ;;  %v742_v56 = vmul.f32 %v994_v36, %v741_v15 }
 0x1eb   : > { %834 = vst [vmem:[%s1303_s16 + $0x40] sm:$0xff] %v818_v6 }
 0x1ec   : > { %835 = vst [vmem:[%s1303_s16 + $0x48] sm:$0xff] %v819_v17  ;;  %v736_v58 = vsel %vm735_vm13, %v1337_v16, %v734_v19  ;;  %v743_v21 = vmul.f32 0.5, %v742_v56 }
 0x1ed   : > { %v739_v4 = vsel %vm737_vm14, %v738_v20, %v736_v58 }
 0x1ee   : > { %v996_v5 = vpop.eup %995  ;;  %v758_v30 = vadd.f32 1e-06, %v739_v4  ;;  %v744_v14 = vsub.f32 1.5, %v743_v21 }
 0x1ef   : > { %v799_v46 = vmul.f32 %v996_v5, %v783_v22  ;;  %v800_v37 = vmul.f32 %v996_v5, %v784_v23 }
 0x1f0   : > { %997 = vrcp.f32 %v758_v30  ;;  %v745_v7 = vmul.f32 %v994_v36, %v744_v14 }
 0x1f1   : > { %v820_v8 = vadd.f32 %v1293_v31, %v799_v46  ;;  %v821_v16 = vadd.f32 %v1295_v32, %v800_v37 }
 0x1f2   : > { %v746_v38 = vmul.f32 %v745_v7, %v655_v54 }
 0x1f3   : > { %836 = vst [vmem:[%s1303_s16 + $0x50] sm:$0xff] %v820_v8 }
 0x1f4   : > { %837 = vst [vmem:[%s1303_s16 + $0x58] sm:$0xff] %v821_v16  ;;  %v748_v28 = vsel %vm747_vm15, %v655_v54, %v746_v38 }
 0x1f5   : > { %v751_v29 = vsel %vm749_vm0, %v750_v26, %v748_v28 }
 0x1f6   : > { %v998_v44 = vpop.eup %997  ;;  %v759_v57 = vadd.f32 1e-06, %v751_v29 }
 0x1f7   : > { %v801_v45 = vmul.f32 %v998_v44, %v785_v39  ;;  %v802_v48 = vmul.f32 %v998_v44, %v786_v27 }
 0x1f8   : > { %999 = vrcp.f32 %v759_v57 }
 0x1f9   : > { %v822_v49 = vadd.f32 %v1293_v31, %v801_v45  ;;  %v823_v50 = vadd.f32 %v1295_v32, %v802_v48 }
 0x1fb   : > { %838 = vst [vmem:[%s1303_s16 + $0x60] sm:$0xff] %v822_v49 }
 0x1fc   : > { %839 = vst [vmem:[%s1303_s16 + $0x68] sm:$0xff] %v823_v50 }
 0x1fe   : > { %v1000_v51 = vpop.eup %999 }
 0x1ff   : > { %v803_v52 = vmul.f32 %v1000_v51, %v787_v33  ;;  %v804_v40 = vmul.f32 %v1000_v51, %v788_v35 }
 0x201   : > { %v824_v53 = vadd.f32 %v1293_v31, %v803_v52  ;;  %v825_v42 = vadd.f32 %v1295_v32, %v804_v40 }
 0x203   : > { %840 = vst [vmem:[%s1303_s16 + $0x70] sm:$0xff] %v824_v53 }
 0x204   : > { %841 = vst [vmem:[%s1303_s16 + $0x78] sm:$0xff] %v825_v42 }
 0x205 PF: > { %s16_s18 = sadd.s32 1, %s1041_s18  }
 0x206   : > { %p13_p7 = scmp.ge.s32.totalorder %s16_s18, 4  }
 0x208   :  { %15 = sbr.rel (!%p13_p7) target bundleno = 1 (0x1), region = 78 }
 0x20d   :  { %866 = vsyncpa [#allocation3], 1 }
 0x20e   :  { %868 = vsyncpa [#allocation3 + $0x1], 1 }

// kernel: encoder_forward.13
= control target key start
LH: loop header
LB: loop body
LE: loop exit
PB: predicated region body
PF: predicated region fallthrough
CT: control target
= control target key end

     0   :  { %12 = vsyncpa [#allocation3], 0  ;;  %s2642_s0 = inlined_call_operand.vmem [shape: f32[128,256], index: 0, kind: input, shape index: {}]   ;;  %s2643_s1 = inlined_call_operand.hbm [shape: f32[256,512], index: 1, kind: input, shape index: {}]   ;;  %s2644_s2 = inlined_call_operand.vmem [shape: f32[1,512], index: 2, kind: input, shape index: {}]   ;;  %s2645_s3 = inlined_call_operand.hbm [shape: f32[512,256], index: 3, kind: input, shape index: {}]   ;;  %s2646_s4 = inlined_call_operand.vmem [shape: f32[1,256], index: 4, kind: input, shape index: {}]   ;;  %s2647_s5 = inlined_call_operand.vmem [shape: f32[1,256], index: 5, kind: input, shape index: {}]   ;;  %s2648_s6 = inlined_call_operand.vmem [shape: f32[1,256], index: 6, kind: input, shape index: {}]   ;;  %s2649_s7 = inlined_call_operand.vmem [shape: f32[128,256], index: 7, kind: output, shape index: {}]  }
   0x1   :  { %13 = vsyncpa [#allocation5], 0  ;;  %s1910_s24 = smov 0  }
   0x2 LB: > { %s213_s27 = sshll.u32 %s2643_s1, 4  ;;  %s1684_s28 = sadd.s32 4294967295, %s1861_s24   ;;  %s1861_s24 = sphi %s1910_s24, %s19_s24   ;;  %s214_s27 = int_to_ptr.hbm [resolvable:$true] %s213_s27 }
   0x3   : > { %p1686_p0 = scmp.ge.s32.totalorder %s1861_s24, 1  ;;  %p202_p1 = scmp.lt.s32.totalorder %s1861_s24, 3 }
   0x4   : > { %p1923_p2 = scmp.eq.s32.totalorder %s1684_s28, 0  ;;  %s1863_s8 = smov [#allocation2]  }
   0x5   : > { %p1927_p3 = pnand %p1686_p0, %p202_p1  ;;  %s215_s9 = sshll.u32 %s1863_s8, 4  ;;  %s216_s9 = int_to_ptr.vmem [resolvable:$true] %s215_s9 }
   0x6   : > { %s230_s12 = sshll.u32 %s2645_s3, 4  ;;  %s1864_s13 = smov [#allocation4]   ;;  %s231_s12 = int_to_ptr.hbm [resolvable:$true] %s230_s12 }
   0x7   : > { %p1711_p4 = pneg %p1927_p3  ;;  %s232_s14 = sshll.u32 %s1864_s13, 4  ;;  %s233_s14 = int_to_ptr.vmem [resolvable:$true] %s232_s14 }
   0x8   : > { %s1865_s15 = smov 512   ;;  %s1866_s16 = smov 32  }
   0x9   : > { %p1712_p5 = pnand %p1923_p2, %p1711_p4  ;;  %s1867_s17 = smov 256  }
   0xa   : > { %s1868_s18 = smov 16   ;;  %267 = sbr.rel (%p1927_p3) target bundleno = 790 (0x316), region = 48 }
   0xb   : > { %1714 = dma.hbm_to_vmem [thread:$0]  (!%p1712_p5), %s214_s27, 16384, %s216_s9, [#allocation3], %s1865_s15, %s1865_s15, %s1866_s16  }
   0xc   : > { %1717 = dma.hbm_to_vmem [thread:$0]  (!%p1712_p5), %s231_s12, 16384, %s233_s14, [#allocation5], %s1867_s17, %s1867_s17, %s1868_s18  }
   0xf   : > { %1852 = dma.done.wait (%p1923_p2), [#allocation3], 16384  }
  0x10   : > { %1854 = vsyncadd (%p1923_p2), [#allocation3], 4294950912 }
  0x11   : > { %1856 = dma.done.wait (%p1923_p2), [#allocation5], 16384  }
  0x12   : > { %1858 = vsyncadd (%p1923_p2), [#allocation5], 4294950912  ;;  %v397_v0 = vld [vmem:[#allocation2 + $0x1e0] sm:$0xff]  ;;  %v398_v1 = vld [vmem:[#allocation2 + $0x1e8] sm:$0xff]  ;;  %s1950_s19 = sshll.u32 %s1684_s28, 3 }
  0x13   : > { %v393_v2 = vld [vmem:[#allocation2 + $0x1c0] sm:$0xff]  ;;  %475 = vmatpush.msra.mxu0 %v397_v0  ;;  %557 = vmatpush.msra.mxu2 %v398_v1  ;;  %v394_v4 = vld [vmem:[#allocation2 + $0x1c8] sm:$0xff]  ;;  %p308_p6 = scmp.lt.s32.totalorder %s1950_s19, 15  ;;  %v400_v63 = vld [vmem:[#allocation2 + $0x1f8] sm:$0xff] }
  0x14   : > { %v461_v3 = vld [vmem:[#allocation2 + $0x3e0] sm:$0xff]  ;;  %v462_v5 = vld [vmem:[#allocation2 + $0x3e8] sm:$0xff] }
  0x15   : > { %516 = vmatpush.msra.mxu1 %v461_v3  ;;  %598 = vmatpush.msra.mxu3 %v462_v5  ;;  %v389_v6 = vld [vmem:[#allocation2 + $0x1a0] sm:$0xff]  ;;  %v390_v8 = vld [vmem:[#allocation2 + $0x1a8] sm:$0xff]  ;;  %s2653_s19 = smov (!%p308_p6, %s1950_s19), 15  ;;  %v399_v3 = vld [vmem:[#allocation2 + $0x1f0] sm:$0xff] }
  0x16   : > { %v457_v7 = vld [vmem:[#allocation2 + $0x3c0] sm:$0xff]  ;;  %476 = vmatpush.msra.mxu0 %v393_v2  ;;  %558 = vmatpush.msra.mxu2 %v394_v4  ;;  %v458_v9 = vld [vmem:[#allocation2 + $0x3c8] sm:$0xff]  ;;  %s1701_s20 = sshll.u32 %s2653_s19, 4  ;;  %v464_v4 = vld [vmem:[#allocation2 + $0x3f8] sm:$0xff] }
  0x17   : > { %v453_v10 = vld [vmem:[#allocation2 + $0x3a0] sm:$0xff]  ;;  %517 = vmatpush.msra.mxu1 %v457_v7  ;;  %599 = vmatpush.msra.mxu3 %v458_v9  ;;  %v386_v12 = vld [vmem:[#allocation2 + $0x188] sm:$0xff]  ;;  %s1964_s23 = scalar_lea.vmem %s2642_s0, %s1701_s20  ;;  %v396_v5 = vld [vmem:[#allocation2 + $0x1d8] sm:$0xff]  ;;  %s2541_s12 = scalar_lea.vmem %s2649_s7, %s1701_s20 }
  0x18   : > { %v385_v11 = vld [vmem:[#allocation2 + $0x180] sm:$0xff]  ;;  %v454_v13 = vld [vmem:[#allocation2 + $0x3a8] sm:$0xff]  ;;  %477 = vmatpush.msra.mxu0 %v389_v6  ;;  %559 = vmatpush.msra.mxu2 %v390_v8  ;;  %v463_v6 = vld [vmem:[#allocation2 + $0x3f0] sm:$0xff] }
  0x19   : > { %v449_v14 = vld [vmem:[#allocation2 + $0x380] sm:$0xff]  ;;  %v450_v15 = vld [vmem:[#allocation2 + $0x388] sm:$0xff]  ;;  %518 = vmatpush.msra.mxu1 %v453_v10  ;;  %600 = vmatpush.msra.mxu3 %v454_v13  ;;  %v395_v7 = vld [vmem:[#allocation2 + $0x1d0] sm:$0xff] }
  0x1a   : > { %v381_v16 = vld [vmem:[#allocation2 + $0x160] sm:$0xff]  ;;  %v382_v17 = vld [vmem:[#allocation2 + $0x168] sm:$0xff]  ;;  %478 = vmatpush.msra.mxu0 %v385_v11  ;;  %560 = vmatpush.msra.mxu2 %v386_v12  ;;  %v460_v8 = vld [vmem:[#allocation2 + $0x3d8] sm:$0xff] }
  0x1b   : > { %v445_v18 = vld [vmem:[#allocation2 + $0x360] sm:$0xff]  ;;  %v446_v19 = vld [vmem:[#allocation2 + $0x368] sm:$0xff]  ;;  %519 = vmatpush.msra.mxu1 %v449_v14  ;;  %601 = vmatpush.msra.mxu3 %v450_v15  ;;  %v392_v9 = vld [vmem:[#allocation2 + $0x1b8] sm:$0xff] }
  0x1c   : > { %v377_v20 = vld [vmem:[#allocation2 + $0x140] sm:$0xff]  ;;  %v378_v21 = vld [vmem:[#allocation2 + $0x148] sm:$0xff]  ;;  %479 = vmatpush.msra.mxu0 %v381_v16  ;;  %561 = vmatpush.msra.mxu2 %v382_v17  ;;  %v459_v10 = vld [vmem:[#allocation2 + $0x3d0] sm:$0xff] }
  0x1d   : > { %v441_v22 = vld [vmem:[#allocation2 + $0x340] sm:$0xff]  ;;  %v442_v23 = vld [vmem:[#allocation2 + $0x348] sm:$0xff]  ;;  %520 = vmatpush.msra.mxu1 %v445_v18  ;;  %602 = vmatpush.msra.mxu3 %v446_v19  ;;  %v391_v11 = vld [vmem:[#allocation2 + $0x1b0] sm:$0xff] }
  0x1e   : > { %v373_v24 = vld [vmem:[#allocation2 + $0x120] sm:$0xff]  ;;  %v374_v25 = vld [vmem:[#allocation2 + $0x128] sm:$0xff]  ;;  %480 = vmatpush.msra.mxu0 %v377_v20  ;;  %562 = vmatpush.msra.mxu2 %v378_v21  ;;  %v1977_v12 = vld [vmem:[%s1964_s23 + $0x10] sm:$0xff] }
  0x1f   : > { %v437_v26 = vld [vmem:[#allocation2 + $0x320] sm:$0xff]  ;;  %v438_v27 = vld [vmem:[#allocation2 + $0x328] sm:$0xff]  ;;  %521 = vmatpush.msra.mxu1 %v441_v22  ;;  %603 = vmatpush.msra.mxu3 %v442_v23  ;;  %v456_v13 = vld [vmem:[#allocation2 + $0x3b8] sm:$0xff] }
  0x20   : > { %v369_v28 = vld [vmem:[#allocation2 + $0x100] sm:$0xff]  ;;  %v370_v29 = vld [vmem:[#allocation2 + $0x108] sm:$0xff]  ;;  %481 = vmatpush.msra.mxu0 %v373_v24  ;;  %563 = vmatpush.msra.mxu2 %v374_v25  ;;  %v388_v14 = vld [vmem:[#allocation2 + $0x198] sm:$0xff] }
  0x21   : > { %v433_v30 = vld [vmem:[#allocation2 + $0x300] sm:$0xff]  ;;  %v434_v31 = vld [vmem:[#allocation2 + $0x308] sm:$0xff]  ;;  %522 = vmatpush.msra.mxu1 %v437_v26  ;;  %604 = vmatpush.msra.mxu3 %v438_v27  ;;  %v1980_v15 = vld [vmem:[%s1964_s23 + $0x18] sm:$0xff] }
  0x22   : > { %v365_v32 = vld [vmem:[#allocation2 + $0xe0] sm:$0xff]  ;;  %v366_v33 = vld [vmem:[#allocation2 + $0xe8] sm:$0xff]  ;;  %482 = vmatpush.msra.mxu0 %v369_v28  ;;  %564 = vmatpush.msra.mxu2 %v370_v29  ;;  %v387_v16 = vld [vmem:[#allocation2 + $0x190] sm:$0xff] }
  0x23   : > { %v429_v34 = vld [vmem:[#allocation2 + $0x2e0] sm:$0xff]  ;;  %v430_v35 = vld [vmem:[#allocation2 + $0x2e8] sm:$0xff]  ;;  %523 = vmatpush.msra.mxu1 %v433_v30  ;;  %605 = vmatpush.msra.mxu3 %v434_v31  ;;  %v455_v17 = vld [vmem:[#allocation2 + $0x3b0] sm:$0xff] }
  0x24   : > { %v361_v36 = vld [vmem:[#allocation2 + $0xc0] sm:$0xff]  ;;  %v362_v37 = vld [vmem:[#allocation2 + $0xc8] sm:$0xff]  ;;  %483 = vmatpush.msra.mxu0 %v365_v32  ;;  %565 = vmatpush.msra.mxu2 %v366_v33  ;;  %v452_v18 = vld [vmem:[#allocation2 + $0x398] sm:$0xff] }
  0x25   : > { %v425_v38 = vld [vmem:[#allocation2 + $0x2c0] sm:$0xff]  ;;  %v426_v39 = vld [vmem:[#allocation2 + $0x2c8] sm:$0xff]  ;;  %524 = vmatpush.msra.mxu1 %v429_v34  ;;  %606 = vmatpush.msra.mxu3 %v430_v35  ;;  %v384_v19 = vld [vmem:[#allocation2 + $0x178] sm:$0xff] }
  0x26   : > { %v357_v40 = vld [vmem:[#allocation2 + $0xa0] sm:$0xff]  ;;  %v358_v41 = vld [vmem:[#allocation2 + $0xa8] sm:$0xff]  ;;  %484 = vmatpush.msra.mxu0 %v361_v36  ;;  %566 = vmatpush.msra.mxu2 %v362_v37  ;;  %v451_v20 = vld [vmem:[#allocation2 + $0x390] sm:$0xff] }
  0x27   : > { %v421_v42 = vld [vmem:[#allocation2 + $0x2a0] sm:$0xff]  ;;  %v422_v43 = vld [vmem:[#allocation2 + $0x2a8] sm:$0xff]  ;;  %525 = vmatpush.msra.mxu1 %v425_v38  ;;  %607 = vmatpush.msra.mxu3 %v426_v39  ;;  %v383_v21 = vld [vmem:[#allocation2 + $0x170] sm:$0xff] }
  0x28   : > { %v353_v44 = vld [vmem:[#allocation2 + $0x80] sm:$0xff]  ;;  %v354_v45 = vld [vmem:[#allocation2 + $0x88] sm:$0xff]  ;;  %485 = vmatpush.msra.mxu0 %v357_v40  ;;  %567 = vmatpush.msra.mxu2 %v358_v41  ;;  %v448_v22 = vld [vmem:[#allocation2 + $0x378] sm:$0xff] }
  0x29   : > { %v417_v46 = vld [vmem:[#allocation2 + $0x280] sm:$0xff]  ;;  %v418_v47 = vld [vmem:[#allocation2 + $0x288] sm:$0xff]  ;;  %526 = vmatpush.msra.mxu1 %v421_v42  ;;  %608 = vmatpush.msra.mxu3 %v422_v43  ;;  %v380_v23 = vld [vmem:[#allocation2 + $0x158] sm:$0xff] }
  0x2a   : > { %v349_v48 = vld [vmem:[#allocation2 + $0x60] sm:$0xff]  ;;  %v350_v49 = vld [vmem:[#allocation2 + $0x68] sm:$0xff]  ;;  %486 = vmatpush.msra.mxu0 %v353_v44  ;;  %568 = vmatpush.msra.mxu2 %v354_v45  ;;  %v447_v24 = vld [vmem:[#allocation2 + $0x370] sm:$0xff] }
  0x2b   : > { %v413_v50 = vld [vmem:[#allocation2 + $0x260] sm:$0xff]  ;;  %v414_v51 = vld [vmem:[#allocation2 + $0x268] sm:$0xff]  ;;  %527 = vmatpush.msra.mxu1 %v417_v46  ;;  %609 = vmatpush.msra.mxu3 %v418_v47  ;;  %v379_v25 = vld [vmem:[#allocation2 + $0x150] sm:$0xff] }
  0x2c   : > { %v345_v52 = vld [vmem:[#allocation2 + $0x40] sm:$0xff]  ;;  %v346_v53 = vld [vmem:[#allocation2 + $0x48] sm:$0xff]  ;;  %487 = vmatpush.msra.mxu0 %v349_v48  ;;  %569 = vmatpush.msra.mxu2 %v350_v49  ;;  %v444_v27 = vld [vmem:[#allocation2 + $0x358] sm:$0xff] }
  0x2d   : > { %v409_v54 = vld [vmem:[#allocation2 + $0x240] sm:$0xff]  ;;  %v410_v55 = vld [vmem:[#allocation2 + $0x248] sm:$0xff]  ;;  %528 = vmatpush.msra.mxu1 %v413_v50  ;;  %610 = vmatpush.msra.mxu3 %v414_v51  ;;  %v376_v28 = vld [vmem:[#allocation2 + $0x138] sm:$0xff] }
  0x2e   : > { %v341_v56 = vld [vmem:[#allocation2 + $0x20] sm:$0xff]  ;;  %v342_v57 = vld [vmem:[#allocation2 + $0x28] sm:$0xff]  ;;  %488 = vmatpush.msra.mxu0 %v345_v52  ;;  %570 = vmatpush.msra.mxu2 %v346_v53  ;;  %v375_v30 = vld [vmem:[#allocation2 + $0x130] sm:$0xff] }
  0x2f   : > { %v405_v58 = vld [vmem:[#allocation2 + $0x220] sm:$0xff]  ;;  %v406_v59 = vld [vmem:[#allocation2 + $0x228] sm:$0xff]  ;;  %529 = vmatpush.msra.mxu1 %v409_v54  ;;  %611 = vmatpush.msra.mxu3 %v410_v55  ;;  %v443_v31 = vld [vmem:[#allocation2 + $0x350] sm:$0xff] }
  0x30   : > { %v337_v60 = vld [vmem:[#allocation2] sm:$0xff]  ;;  %v338_v61 = vld [vmem:[#allocation2 + $0x8] sm:$0xff]  ;;  %489 = vmatpush.msra.mxu0 %v341_v56  ;;  %571 = vmatpush.msra.mxu2 %v342_v57  ;;  %v440_v32 = vld [vmem:[#allocation2 + $0x338] sm:$0xff] }
  0x31   : > { %v1967_v62 = vld [vmem:[%s1964_s23] sm:$0xff]  ;;  %530 = vmatpush.msra.mxu1 %v405_v58  ;;  %612 = vmatpush.msra.mxu3 %v406_v59  ;;  %v402_v1 = vld [vmem:[#allocation2 + $0x208] sm:$0xff]  ;;  %v372_v33 = vld [vmem:[#allocation2 + $0x118] sm:$0xff] }
  0x32   : > { %v401_v0 = vld [vmem:[#allocation2 + $0x200] sm:$0xff]  ;;  %490 = vmatpush.msra.mxu0 %v337_v60  ;;  %572 = vmatpush.msra.mxu2 %v338_v61  ;;  %v1970_v2 = vld [vmem:[%s1964_s23 + $0x8] sm:$0xff]  ;;  %v439_v34 = vld [vmem:[#allocation2 + $0x330] sm:$0xff] }
  0x33   : > { %491 = vmatmul.f32.vlgmr.msra.gmra.mxu0 %v1967_v62  ;;  %573 = vmatmul.f32.vlgmr.msra.gmra.mxu2 %v1967_v62  ;;  %v1987_v26 = vld [vmem:[%s1964_s23 + $0x20] sm:$0xff]  ;;  %v1990_v29 = vld [vmem:[%s1964_s23 + $0x28] sm:$0xff]  ;;  %v371_v35 = vld [vmem:[#allocation2 + $0x110] sm:$0xff] }
  0x34   : > { %721 = vmatpush.msrb.mxu2 %v400_v63  ;;  %531 = vmatpush.msra.mxu1 %v401_v0  ;;  %v436_v36 = vld [vmem:[#allocation2 + $0x318] sm:$0xff]  ;;  %v435_v38 = vld [vmem:[#allocation2 + $0x310] sm:$0xff]  ;;  %v2007_v54 = vld [vmem:[%s1964_s23 + $0x40] sm:$0xff] }
  0x35   : > { %613 = vmatpush.msra.mxu3 %v402_v1  ;;  %532 = vmatmul.f32.vlgmr.msra.gmra.mxu1 %v1970_v2  ;;  %v368_v37 = vld [vmem:[#allocation2 + $0xf8] sm:$0xff]  ;;  %v367_v39 = vld [vmem:[#allocation2 + $0xf0] sm:$0xff]  ;;  %v2010_v57 = vld [vmem:[%s1964_s23 + $0x48] sm:$0xff] }
  0x36   : > { %614 = vmatmul.f32.vlgmr.msra.gmra.mxu3 %v1970_v2  ;;  %639 = vmatpush.msrb.mxu0 %v399_v3  ;;  %v1997_v40 = vld [vmem:[%s1964_s23 + $0x30] sm:$0xff]  ;;  %v432_v41 = vld [vmem:[#allocation2 + $0x2f8] sm:$0xff] }
  0x37   : > { %762 = vmatpush.msrb.mxu3 %v464_v4  ;;  %722 = vmatpush.msrb.mxu2 %v396_v5  ;;  %v364_v42 = vld [vmem:[#allocation2 + $0xd8] sm:$0xff]  ;;  %v363_v44 = vld [vmem:[#allocation2 + $0xd0] sm:$0xff] }
  0x38   : > { %680 = vmatpush.msrb.mxu1 %v463_v6  ;;  %640 = vmatpush.msrb.mxu0 %v395_v7  ;;  %v2000_v43 = vld [vmem:[%s1964_s23 + $0x38] sm:$0xff]  ;;  %v431_v45 = vld [vmem:[#allocation2 + $0x2f0] sm:$0xff] }
  0x39   : > { %763 = vmatpush.msrb.mxu3 %v460_v8  ;;  %723 = vmatpush.msrb.mxu2 %v392_v9  ;;  %v428_v46 = vld [vmem:[#allocation2 + $0x2d8] sm:$0xff]  ;;  %v427_v48 = vld [vmem:[#allocation2 + $0x2d0] sm:$0xff] }
  0x3a   : > { %681 = vmatpush.msrb.mxu1 %v459_v10  ;;  %641 = vmatpush.msrb.mxu0 %v391_v11  ;;  %v360_v47 = vld [vmem:[#allocation2 + $0xb8] sm:$0xff]  ;;  %v359_v49 = vld [vmem:[#allocation2 + $0xb0] sm:$0xff] }
  0x3b   : > { %494 = vmatmul.f32.gmra.mxu0 %v1977_v12  ;;  %576 = vmatmul.f32.gmra.mxu2 %v1977_v12  ;;  %v424_v50 = vld [vmem:[#allocation2 + $0x2b8] sm:$0xff]  ;;  %v423_v52 = vld [vmem:[#allocation2 + $0x2b0] sm:$0xff] }
  0x3c   : > { %764 = vmatpush.msrb.mxu3 %v456_v13  ;;  %724 = vmatpush.msrb.mxu2 %v388_v14  ;;  %v356_v51 = vld [vmem:[#allocation2 + $0x98] sm:$0xff]  ;;  %v355_v53 = vld [vmem:[#allocation2 + $0x90] sm:$0xff] }
  0x3d   : > { %535 = vmatmul.f32.gmra.mxu1 %v1980_v15  ;;  %642 = vmatpush.msrb.mxu0 %v387_v16  ;;  %v420_v55 = vld [vmem:[#allocation2 + $0x298] sm:$0xff]  ;;  %v351_v58 = vld [vmem:[#allocation2 + $0x70] sm:$0xff]  ;;  %v2027_v16 = vld [vmem:[%s1964_s23 + $0x60] sm:$0xff] }
  0x3e   : > { %617 = vmatmul.f32.gmra.mxu3 %v1980_v15  ;;  %682 = vmatpush.msrb.mxu1 %v455_v17  ;;  %v352_v56 = vld [vmem:[#allocation2 + $0x78] sm:$0xff]  ;;  %v419_v59 = vld [vmem:[#allocation2 + $0x290] sm:$0xff]  ;;  %v2030_v17 = vld [vmem:[%s1964_s23 + $0x68] sm:$0xff] }
  0x3f   : > { %765 = vmatpush.msrb.mxu3 %v452_v18  ;;  %725 = vmatpush.msrb.mxu2 %v384_v19  ;;  %v416_v60 = vld [vmem:[#allocation2 + $0x278] sm:$0xff]  ;;  %v415_v63 = vld [vmem:[#allocation2 + $0x270] sm:$0xff] }
  0x40   : > { %683 = vmatpush.msrb.mxu1 %v451_v20  ;;  %643 = vmatpush.msrb.mxu0 %v383_v21  ;;  %v348_v61 = vld [vmem:[#allocation2 + $0x58] sm:$0xff]  ;;  %v347_v0 = vld [vmem:[#allocation2 + $0x50] sm:$0xff]  ;;  %v863_v21 = vld [vmem:[#allocation4 + $0xe0] sm:$0xff] }
  0x41   : > { %766 = vmatpush.msrb.mxu3 %v448_v22  ;;  %726 = vmatpush.msrb.mxu2 %v380_v23  ;;  %v412_v1 = vld [vmem:[#allocation2 + $0x258] sm:$0xff]  ;;  %v411_v4 = vld [vmem:[#allocation2 + $0x250] sm:$0xff]  ;;  %v859_v23 = vld [vmem:[#allocation4 + $0xc0] sm:$0xff] }
  0x42   : > { %684 = vmatpush.msrb.mxu1 %v447_v24  ;;  %644 = vmatpush.msrb.mxu0 %v379_v25  ;;  %v344_v3 = vld [vmem:[#allocation2 + $0x38] sm:$0xff]  ;;  %v343_v5 = vld [vmem:[#allocation2 + $0x30] sm:$0xff]  ;;  %v855_v25 = vld [vmem:[#allocation4 + $0xa0] sm:$0xff] }
  0x43   : > { %497 = vmatmul.f32.gmra.mxu0 %v1987_v26  ;;  %579 = vmatmul.f32.gmra.mxu2 %v1987_v26  ;;  %v2017_v6 = vld [vmem:[%s1964_s23 + $0x50] sm:$0xff]  ;;  %v408_v7 = vld [vmem:[#allocation2 + $0x238] sm:$0xff] }
  0x44   : > { %767 = vmatpush.msrb.mxu3 %v444_v27  ;;  %727 = vmatpush.msrb.mxu2 %v376_v28  ;;  %v340_v8 = vld [vmem:[#allocation2 + $0x18] sm:$0xff]  ;;  %v339_v10 = vld [vmem:[#allocation2 + $0x10] sm:$0xff]  ;;  %v891_v28 = vld [vmem:[#allocation4 + $0x1c0] sm:$0xff] }
  0x45   : > { %538 = vmatmul.f32.gmra.mxu1 %v1990_v29  ;;  %645 = vmatpush.msrb.mxu0 %v375_v30  ;;  %v2020_v9 = vld [vmem:[%s1964_s23 + $0x58] sm:$0xff]  ;;  %v407_v11 = vld [vmem:[#allocation2 + $0x230] sm:$0xff] }
  0x46   : > { %620 = vmatmul.f32.gmra.mxu3 %v1990_v29  ;;  %685 = vmatpush.msrb.mxu1 %v443_v31  ;;  %v404_v13 = vld [vmem:[#allocation2 + $0x218] sm:$0xff]  ;;  %v403_v14 = vld [vmem:[#allocation2 + $0x210] sm:$0xff] }
  0x47   : > { %768 = vmatpush.msrb.mxu3 %v440_v32  ;;  %728 = vmatpush.msrb.mxu2 %v372_v33  ;;  %v2037_v18 = vld [vmem:[%s1964_s23 + $0x70] sm:$0xff]  ;;  %v2040_v19 = vld [vmem:[%s1964_s23 + $0x78] sm:$0xff]  ;;  %v887_v32 = vld [vmem:[#allocation4 + $0x1a0] sm:$0xff] }
  0x48   : > { %686 = vmatpush.msrb.mxu1 %v439_v34  ;;  %646 = vmatpush.msrb.mxu0 %v371_v35  ;;  %v865_v20 = vld [vmem:[#allocation4 + $0xf0] sm:$0xff]  ;;  %v847_v33 = vld [vmem:[#allocation4 + $0x60] sm:$0xff] }
  0x49   : > { %769 = vmatpush.msrb.mxu3 %v436_v36  ;;  %729 = vmatpush.msrb.mxu2 %v368_v37  ;;  %v861_v22 = vld [vmem:[#allocation4 + $0xd0] sm:$0xff]  ;;  %v843_v35 = vld [vmem:[#allocation4 + $0x40] sm:$0xff] }
  0x4a   : > { %687 = vmatpush.msrb.mxu1 %v435_v38  ;;  %647 = vmatpush.msrb.mxu0 %v367_v39  ;;  %v857_v24 = vld [vmem:[#allocation4 + $0xb0] sm:$0xff]  ;;  %v879_v38 = vld [vmem:[#allocation4 + $0x160] sm:$0xff] }
  0x4b   : > { %500 = vmatmul.f32.gmra.mxu0 %v1997_v40  ;;  %582 = vmatmul.f32.gmra.mxu2 %v1997_v40  ;;  %v893_v27 = vld [vmem:[#allocation4 + $0x1d0] sm:$0xff]  ;;  %v839_v39 = vld [vmem:[#allocation4 + $0x20] sm:$0xff] }
  0x4c   : > { %770 = vmatpush.msrb.mxu3 %v432_v41  ;;  %730 = vmatpush.msrb.mxu2 %v364_v42  ;;  %v889_v30 = vld [vmem:[#allocation4 + $0x1b0] sm:$0xff]  ;;  %v875_v42 = vld [vmem:[#allocation4 + $0x140] sm:$0xff] }
  0x4d   : > { %541 = vmatmul.f32.gmra.mxu1 %v2000_v43  ;;  %648 = vmatpush.msrb.mxu0 %v363_v44  ;;  %v849_v31 = vld [vmem:[#allocation4 + $0x70] sm:$0xff] }
  0x4e   : > { %623 = vmatmul.f32.gmra.mxu3 %v2000_v43  ;;  %688 = vmatpush.msrb.mxu1 %v431_v45  ;;  %v845_v34 = vld [vmem:[#allocation4 + $0x50] sm:$0xff]  ;;  %v871_v45 = vld [vmem:[#allocation4 + $0x120] sm:$0xff] }
  0x4f   : > { %771 = vmatpush.msrb.mxu3 %v428_v46  ;;  %731 = vmatpush.msrb.mxu2 %v360_v47  ;;  %v881_v36 = vld [vmem:[#allocation4 + $0x170] sm:$0xff] }
  0x50   : > { %689 = vmatpush.msrb.mxu1 %v427_v48  ;;  %649 = vmatpush.msrb.mxu0 %v359_v49  ;;  %v841_v37 = vld [vmem:[#allocation4 + $0x30] sm:$0xff]  ;;  %v867_v49 = vld [vmem:[#allocation4 + $0x100] sm:$0xff] }
  0x51   : > { %772 = vmatpush.msrb.mxu3 %v424_v50  ;;  %732 = vmatpush.msrb.mxu2 %v356_v51  ;;  %v837_v41 = vld [vmem:[#allocation4 + $0x10] sm:$0xff]  ;;  %v927_v50 = vld [vmem:[#allocation4 + $0x2e0] sm:$0xff] }
  0x52   : > { %690 = vmatpush.msrb.mxu1 %v423_v52  ;;  %650 = vmatpush.msrb.mxu0 %v355_v53  ;;  %v873_v44 = vld [vmem:[#allocation4 + $0x130] sm:$0xff]  ;;  %v959_v51 = vld [vmem:[#allocation4 + $0x3e0] sm:$0xff] }
  0x53   : > { %503 = vmatmul.f32.gmra.mxu0 %v2007_v54  ;;  %585 = vmatmul.f32.gmra.mxu2 %v2007_v54  ;;  %v929_v46 = vld [vmem:[#allocation4 + $0x2f0] sm:$0xff] }
  0x54   : > { %773 = vmatpush.msrb.mxu3 %v420_v55  ;;  %733 = vmatpush.msrb.mxu2 %v352_v56  ;;  %v869_v47 = vld [vmem:[#allocation4 + $0x110] sm:$0xff]  ;;  %v2077_v55 = vld [vmem:[%s2644_s2] sm:$0xf] }
  0x55   : > { %544 = vmatmul.f32.gmra.mxu1 %v2010_v57  ;;  %651 = vmatpush.msrb.mxu0 %v351_v58  ;;  %v961_v48 = vld [vmem:[#allocation4 + $0x3f0] sm:$0xff]  ;;  %v955_v56 = vld [vmem:[#allocation4 + $0x3c0] sm:$0xff]  ;;  %v2083_v58 = vperm.slane %v2077_v55, 0 }
  0x56   : > { %626 = vmatmul.f32.gmra.mxu3 %v2010_v57  ;;  %691 = vmatpush.msrb.mxu1 %v419_v59  ;;  %v925_v52 = vld [vmem:[#allocation4 + $0x2d0] sm:$0xff] }
  0x57   : > { %774 = vmatpush.msrb.mxu3 %v416_v60  ;;  %734 = vmatpush.msrb.mxu2 %v348_v61  ;;  %v957_v53 = vld [vmem:[#allocation4 + $0x3d0] sm:$0xff]  ;;  %v919_v60 = vld [vmem:[#allocation4 + $0x2a0] sm:$0xff] }
  0x58   : > { %692 = vmatpush.msrb.mxu1 %v415_v63  ;;  %652 = vmatpush.msrb.mxu0 %v347_v0  ;;  %v953_v59 = vld [vmem:[#allocation4 + $0x3b0] sm:$0xff] }
  0x59   : > { %775 = vmatpush.msrb.mxu3 %v412_v1  ;;  %735 = vmatpush.msrb.mxu2 %v344_v3  ;;  %v951_v1 = vld [vmem:[#allocation4 + $0x3a0] sm:$0xff] }
  0x5a   : > { %693 = vmatpush.msrb.mxu1 %v411_v4  ;;  %653 = vmatpush.msrb.mxu0 %v343_v5  ;;  %v2090_v4 = vperm.slane %v2077_v55, 1  ;;  %v917_v5 = vld [vmem:[#allocation4 + $0x290] sm:$0xff] }
  0x5b   : > { %506 = vmatmul.f32.gmra.mxu0 %v2017_v6  ;;  %588 = vmatmul.f32.gmra.mxu2 %v2017_v6 }
  0x5c   : > { %776 = vmatpush.msrb.mxu3 %v408_v7  ;;  %736 = vmatpush.msrb.mxu2 %v340_v8  ;;  %v949_v8 = vld [vmem:[#allocation4 + $0x390] sm:$0xff] }
  0x5d   : > { %547 = vmatmul.f32.gmra.mxu1 %v2020_v9  ;;  %654 = vmatpush.msrb.mxu0 %v339_v10  ;;  %v915_v10 = vld [vmem:[#allocation4 + $0x280] sm:$0xff] }
  0x5e   : > { %629 = vmatmul.f32.gmra.mxu3 %v2020_v9  ;;  %694 = vmatpush.msrb.mxu1 %v407_v11 }
  0x5f   : > { %777 = vmatpush.msrb.mxu3 %v404_v13  ;;  %969 = vmatpush.msra.mxu0 %v865_v20  ;;  %v866_v13 = vld [vmem:[#allocation4 + $0xf8] sm:$0xff]  ;;  %v864_v20 = vld [vmem:[#allocation4 + $0xe8] sm:$0xff] }
  0x60   : > { %695 = vmatpush.msrb.mxu1 %v403_v14  ;;  %1051 = vmatpush.msra.mxu2 %v929_v46  ;;  %v852_v46 = vld [vmem:[#allocation4 + $0x88] sm:$0xff] }
  0x61   : > { %970 = vmatpush.msra.mxu0 %v863_v21  ;;  %1092 = vmatpush.msra.mxu3 %v961_v48 }
  0x62   : > { %1052 = vmatpush.msra.mxu2 %v927_v50 }
  0x63   : > { %509 = vmatmul.f32.gmra.mxu0 %v2027_v16  ;;  %591 = vmatmul.f32.gmra.mxu2 %v2027_v16 }
  0x64   : > { %971 = vmatpush.msra.mxu0 %v861_v22  ;;  %1093 = vmatpush.msra.mxu3 %v959_v51  ;;  %v913_v22 = vld [vmem:[#allocation4 + $0x270] sm:$0xff]  ;;  %v850_v51 = vld [vmem:[#allocation4 + $0x78] sm:$0xff] }
  0x65   : > { %550 = vmatmul.f32.gmra.mxu1 %v2030_v17  ;;  %1053 = vmatpush.msra.mxu2 %v925_v52  ;;  %v888_v52 = vld [vmem:[#allocation4 + $0x1a8] sm:$0xff] }
  0x66   : > { %632 = vmatmul.f32.gmra.mxu3 %v2030_v17  ;;  %972 = vmatpush.msra.mxu0 %v859_v23  ;;  %v862_v23 = vld [vmem:[#allocation4 + $0xd8] sm:$0xff] }
  0x67   : > { %1094 = vmatpush.msra.mxu3 %v957_v53 }
  0x68   : > { %973 = vmatpush.msra.mxu0 %v857_v24 }
  0x69   : > { %1095 = vmatpush.msra.mxu3 %v955_v56 }
  0x6a   : > { %974 = vmatpush.msra.mxu0 %v855_v25  ;;  %v945_v25 = vld [vmem:[#allocation4 + $0x370] sm:$0xff] }
  0x6b   : > { %512 = vmatmul.f32.gmra.mxu0 %v2037_v18  ;;  %594 = vmatmul.f32.gmra.mxu2 %v2037_v18 }
  0x6c   : > { %1096 = vmatpush.msra.mxu3 %v953_v59  ;;  %v939_v59 = vld [vmem:[#allocation4 + $0x340] sm:$0xff] }
  0x6d   : > { %553 = vmatmul.f32.gmra.mxu1 %v2040_v19 }
  0x6e   : > { %635 = vmatmul.f32.gmra.mxu3 %v2040_v19 }
  0x6f   : > { %1097 = vmatpush.msra.mxu3 %v951_v1  ;;  %v846_v1 = vld [vmem:[#allocation4 + $0x58] sm:$0xff] }
  0x71   : > { %1098 = vmatpush.msra.mxu3 %v949_v8 }
  0x73   : > { %655 = vmatmul.f32.vlgmr.msrb.gmra.mxu0 %v1967_v62  ;;  %737 = vmatmul.f32.vlgmr.msrb.gmra.mxu2 %v1967_v62  ;;  %v897_v62 = vld [vmem:[#allocation4 + $0x1f0] sm:$0xff] }
  0x74   : > { %1010 = vmatpush.msra.mxu1 %v897_v62 }
  0x75   : > { %696 = vmatmul.f32.vlgmr.msrb.gmra.mxu1 %v1970_v2 }
  0x76   : > { %778 = vmatmul.f32.vlgmr.msrb.gmra.mxu3 %v1970_v2  ;;  %v895_v2 = vld [vmem:[#allocation4 + $0x1e0] sm:$0xff] }
  0x77   : > { %1011 = vmatpush.msra.mxu1 %v895_v2 }
  0x79   : > { %1012 = vmatpush.msra.mxu1 %v893_v27  ;;  %v860_v27 = vld [vmem:[#allocation4 + $0xc8] sm:$0xff] }
  0x7b   : > { %658 = vmatmul.f32.gmra.mxu0 %v1977_v12  ;;  %740 = vmatmul.f32.gmra.mxu2 %v1977_v12  ;;  %v853_v12 = vld [vmem:[#allocation4 + $0x90] sm:$0xff] }
  0x7c   : > { %975 = vmatpush.msra.mxu0 %v853_v12  ;;  %1013 = vmatpush.msra.mxu1 %v891_v28  ;;  %v898_v12 = vld [vmem:[#allocation4 + $0x1f8] sm:$0xff] }
  0x7d   : > { %699 = vmatmul.f32.gmra.mxu1 %v1980_v15 }
  0x7e   : > { %781 = vmatmul.f32.gmra.mxu3 %v1980_v15  ;;  %v851_v15 = vld [vmem:[#allocation4 + $0x80] sm:$0xff]  ;;  %1014 = vmatpush.msra.mxu1 %v889_v30 }
  0x7f   : > { %976 = vmatpush.msra.mxu0 %v851_v15  ;;  %v911_v15 = vld [vmem:[#allocation4 + $0x260] sm:$0xff] }
  0x80   : > { %1015 = vmatpush.msra.mxu1 %v887_v32  ;;  %v896_v32 = vld [vmem:[#allocation4 + $0x1e8] sm:$0xff] }
  0x81   : > { %977 = vmatpush.msra.mxu0 %v849_v31  ;;  %v858_v31 = vld [vmem:[#allocation4 + $0xb8] sm:$0xff] }
  0x83   : > { %661 = vmatmul.f32.gmra.mxu0 %v1987_v26  ;;  %743 = vmatmul.f32.gmra.mxu2 %v1987_v26  ;;  %v885_v26 = vld [vmem:[#allocation4 + $0x190] sm:$0xff] }
  0x84   : > { %978 = vmatpush.msra.mxu0 %v847_v33  ;;  %1016 = vmatpush.msra.mxu1 %v885_v26 }
  0x85   : > { %702 = vmatmul.f32.gmra.mxu1 %v1990_v29 }
  0x86   : > { %784 = vmatmul.f32.gmra.mxu3 %v1990_v29  ;;  %v883_v29 = vld [vmem:[#allocation4 + $0x180] sm:$0xff]  ;;  %979 = vmatpush.msra.mxu0 %v845_v34 }
  0x87   : > { %1017 = vmatpush.msra.mxu1 %v883_v29 }
  0x88   : > { %980 = vmatpush.msra.mxu0 %v843_v35  ;;  %v943_v35 = vld [vmem:[#allocation4 + $0x360] sm:$0xff] }
  0x89   : > { %1018 = vmatpush.msra.mxu1 %v881_v36  ;;  %v856_v36 = vld [vmem:[#allocation4 + $0xa8] sm:$0xff] }
  0x8a   : > { %981 = vmatpush.msra.mxu0 %v841_v37  ;;  %v894_v37 = vld [vmem:[#allocation4 + $0x1d8] sm:$0xff] }
  0x8b   : > { %664 = vmatmul.f32.gmra.mxu0 %v1997_v40  ;;  %746 = vmatmul.f32.gmra.mxu2 %v1997_v40  ;;  %v877_v40 = vld [vmem:[#allocation4 + $0x150] sm:$0xff] }
  0x8c   : > { %1019 = vmatpush.msra.mxu1 %v879_v38  ;;  %982 = vmatpush.msra.mxu0 %v839_v39  ;;  %v909_v39 = vld [vmem:[#allocation4 + $0x250] sm:$0xff] }
  0x8d   : > { %705 = vmatmul.f32.gmra.mxu1 %v2000_v43 }
  0x8e   : > { %787 = vmatmul.f32.gmra.mxu3 %v2000_v43  ;;  %1020 = vmatpush.msra.mxu1 %v877_v40  ;;  %v835_v43 = vld [vmem:[#allocation4] sm:$0xff]  ;;  %v854_v40 = vld [vmem:[#allocation4 + $0x98] sm:$0xff] }
  0x8f   : > { %983 = vmatpush.msra.mxu0 %v837_v41 }
  0x90   : > { %1021 = vmatpush.msra.mxu1 %v875_v42  ;;  %v892_v42 = vld [vmem:[#allocation4 + $0x1c8] sm:$0xff] }
  0x91   : > { %984 = vmatpush.msra.mxu0 %v835_v43 }
  0x92   : > { %1022 = vmatpush.msra.mxu1 %v873_v44 }
  0x93   : > { %667 = vmatmul.f32.gmra.mxu0 %v2007_v54  ;;  %749 = vmatmul.f32.gmra.mxu2 %v2007_v54  ;;  %v923_v54 = vld [vmem:[#allocation4 + $0x2c0] sm:$0xff] }
  0x94   : > { %1023 = vmatpush.msra.mxu1 %v871_v45  ;;  %1054 = vmatpush.msra.mxu2 %v923_v54  ;;  %v941_v45 = vld [vmem:[#allocation4 + $0x350] sm:$0xff] }
  0x95   : > { %708 = vmatmul.f32.gmra.mxu1 %v2010_v57  ;;  %1133 = vmatpush.msrb.mxu0 %v866_v13  ;;  %v882_v13 = vld [vmem:[#allocation4 + $0x178] sm:$0xff] }
  0x96   : > { %790 = vmatmul.f32.gmra.mxu3 %v2010_v57  ;;  %1024 = vmatpush.msra.mxu1 %v869_v47  ;;  %v921_v57 = vld [vmem:[#allocation4 + $0x2b0] sm:$0xff]  ;;  %v890_v47 = vld [vmem:[#allocation4 + $0x1b8] sm:$0xff] }
  0x97   : > { %1055 = vmatpush.msra.mxu2 %v921_v57  ;;  %1134 = vmatpush.msrb.mxu0 %v864_v20  ;;  %v880_v20 = vld [vmem:[#allocation4 + $0x168] sm:$0xff] }
  0x98   : > { %1025 = vmatpush.msra.mxu1 %v867_v49  ;;  %v907_v49 = vld [vmem:[#allocation4 + $0x240] sm:$0xff] }
  0x99   : > { %1056 = vmatpush.msra.mxu2 %v919_v60  ;;  %1135 = vmatpush.msrb.mxu0 %v862_v23  ;;  %v848_v60 = vld [vmem:[#allocation4 + $0x68] sm:$0xff] }
  0x9a   : > { %1174 = vmatpush.msrb.mxu1 %v898_v12  ;;  %v840_v12 = vld [vmem:[#allocation4 + $0x28] sm:$0xff] }
  0x9b   : > { %670 = vmatmul.f32.gmra.mxu0 %v2017_v6  ;;  %752 = vmatmul.f32.gmra.mxu2 %v2017_v6 }
  0x9c   : > { %1057 = vmatpush.msra.mxu2 %v917_v5  ;;  %1136 = vmatpush.msrb.mxu0 %v860_v27  ;;  %v935_v27 = vld [vmem:[#allocation4 + $0x320] sm:$0xff] }
  0x9d   : > { %711 = vmatmul.f32.gmra.mxu1 %v2020_v9 }
  0x9e   : > { %793 = vmatmul.f32.gmra.mxu3 %v2020_v9  ;;  %1058 = vmatpush.msra.mxu2 %v915_v10  ;;  %v937_v10 = vld [vmem:[#allocation4 + $0x330] sm:$0xff] }
  0x9f   : > { %1137 = vmatpush.msrb.mxu0 %v858_v31  ;;  %1175 = vmatpush.msrb.mxu1 %v896_v32  ;;  %v901_v31 = vld [vmem:[#allocation4 + $0x210] sm:$0xff]  ;;  %v838_v32 = vld [vmem:[#allocation4 + $0x18] sm:$0xff] }
  0xa0   : > { %1059 = vmatpush.msra.mxu2 %v913_v22 }
  0xa1   : > { %1138 = vmatpush.msrb.mxu0 %v856_v36  ;;  %1176 = vmatpush.msrb.mxu1 %v894_v37  ;;  %v899_v36 = vld [vmem:[#allocation4 + $0x200] sm:$0xff]  ;;  %v836_v37 = vld [vmem:[#allocation4 + $0x8] sm:$0xff] }
  0xa2   : > { %1060 = vmatpush.msra.mxu2 %v911_v15 }
  0xa3   : > { %673 = vmatmul.f32.gmra.mxu0 %v2027_v16  ;;  %755 = vmatmul.f32.gmra.mxu2 %v2027_v16 }
  0xa4   : > { %1061 = vmatpush.msra.mxu2 %v909_v39  ;;  %1139 = vmatpush.msrb.mxu0 %v854_v40  ;;  %v874_v40 = vld [vmem:[#allocation4 + $0x138] sm:$0xff] }
  0xa5   : > { %714 = vmatmul.f32.gmra.mxu1 %v2030_v17 }
  0xa6   : > { %796 = vmatmul.f32.gmra.mxu3 %v2030_v17  ;;  %1177 = vmatpush.msrb.mxu1 %v892_v42 }
  0xa7   : > { %1140 = vmatpush.msrb.mxu0 %v852_v46  ;;  %1062 = vmatpush.msra.mxu2 %v907_v49  ;;  %v870_v49 = vld [vmem:[#allocation4 + $0x118] sm:$0xff] }
  0xa8   : > { %1178 = vmatpush.msrb.mxu1 %v890_v47 }
  0xa9   : > { %1141 = vmatpush.msrb.mxu0 %v850_v51 }
  0xaa   : > { %1179 = vmatpush.msrb.mxu1 %v888_v52  ;;  %v931_v52 = vld [vmem:[#allocation4 + $0x300] sm:$0xff] }
  0xab   : > { %676 = vmatmul.f32.gmra.mxu0 %v2037_v18  ;;  %758 = vmatmul.f32.gmra.mxu2 %v2037_v18 }
  0xac   : > { %1142 = vmatpush.msrb.mxu0 %v848_v60  ;;  %v962_v60 = vld [vmem:[#allocation4 + $0x3f8] sm:$0xff] }
  0xad   : > { %717 = vmatmul.f32.gmra.mxu1 %v2040_v19 }
  0xae   : > { %799 = vmatmul.f32.gmra.mxu3 %v2040_v19  ;;  %v947_v19 = vld [vmem:[#allocation4 + $0x380] sm:$0xff]  ;;  %1143 = vmatpush.msrb.mxu0 %v846_v1 }
  0xaf   : > { %1099 = vmatpush.msra.mxu3 %v947_v19  ;;  %v842_v19 = vld [vmem:[#allocation4 + $0x38] sm:$0xff] }
  0xb0   : > { %v492_v61 = vpop.f32.mrf.mxu0 }
  0xb1   : > { %v493_v63 = vadd.f32 %v492_v61, %v2083_v58  ;;  %1100 = vmatpush.msra.mxu3 %v945_v25  ;;  %v886_v61 = vld [vmem:[#allocation4 + $0x198] sm:$0xff] }
  0xb2   : > { %v533_v0 = vpop.f32.mrf.mxu1  ;;  %1180 = vmatpush.msrb.mxu1 %v886_v61 }
  0xb3   : > { %v2087_v3 = vadd.f32 %v533_v0, %v493_v63  ;;  %1101 = vmatpush.msra.mxu3 %v943_v35  ;;  %v905_v0 = vld [vmem:[#allocation4 + $0x230] sm:$0xff] }
  0xb4   : > { %1063 = vmatpush.msra.mxu2 %v905_v0  ;;  %v933_v35 = vld [vmem:[#allocation4 + $0x310] sm:$0xff]  ;;  %v928_v0 = vld [vmem:[#allocation4 + $0x2e8] sm:$0xff] }
  0xb5   : > { %v803_v6 = vmax.f32 %v2087_v3, 0.0  ;;  %1102 = vmatpush.msra.mxu3 %v941_v45  ;;  %v914_v3 = vld [vmem:[#allocation4 + $0x278] sm:$0xff] }
  0xb6   : > { %v574_v7 = vpop.f32.mrf.mxu2 }
  0xb7   : > { %v575_v9 = vadd.f32 %v574_v7, %v2090_v4  ;;  %985 = vmatmul.f32.vlgmr.msra.gmra.mxu0 %v803_v6  ;;  %1103 = vmatpush.msra.mxu3 %v939_v59  ;;  %v884_v7 = vld [vmem:[#allocation4 + $0x188] sm:$0xff] }
  0xb8   : > { %v495_v11 = vpop.f32.mrf.mxu0  ;;  %1181 = vmatpush.msrb.mxu1 %v884_v7 }
  0xb9   : > { %v496_v14 = vadd.f32 %v495_v11, %v2083_v58  ;;  %v615_v16 = vpop.f32.mrf.mxu3  ;;  %v844_v11 = vld [vmem:[#allocation4 + $0x48] sm:$0xff]  ;;  %1104 = vmatpush.msra.mxu3 %v937_v10 }
  0xba   : > { %v2097_v17 = vadd.f32 %v615_v16, %v575_v9  ;;  %v536_v18 = vpop.f32.mrf.mxu1  ;;  %v903_v16 = vld [vmem:[#allocation4 + $0x220] sm:$0xff]  ;;  %1144 = vmatpush.msrb.mxu0 %v844_v11  ;;  %1182 = vmatpush.msrb.mxu1 %v882_v13 }
  0xbb   : > { %v2099_v21 = vadd.f32 %v536_v18, %v496_v14  ;;  %1064 = vmatpush.msra.mxu2 %v903_v16  ;;  %1105 = vmatpush.msra.mxu3 %v935_v27  ;;  %v960_v16 = vld [vmem:[#allocation4 + $0x3e8] sm:$0xff] }
  0xbc   : > { %v804_v62 = vmax.f32 %v2097_v17, 0.0  ;;  %1145 = vmatpush.msrb.mxu0 %v842_v19  ;;  %1183 = vmatpush.msrb.mxu1 %v880_v20  ;;  %v926_v19 = vld [vmem:[#allocation4 + $0x2d8] sm:$0xff] }
  0xbd   : > { %v807_v24 = vmax.f32 %v2099_v21, 0.0  ;;  %1065 = vmatpush.msra.mxu2 %v901_v31  ;;  %1106 = vmatpush.msra.mxu3 %v933_v35  ;;  %v956_v35 = vld [vmem:[#allocation4 + $0x3c8] sm:$0xff]  ;;  %v910_v21 = vld [vmem:[#allocation4 + $0x258] sm:$0xff] }
  0xbe   : > { %1026 = vmatmul.f32.vlgmr.msra.gmra.mxu1 %v804_v62  ;;  %v577_v2 = vpop.f32.mrf.mxu2  ;;  %1146 = vmatpush.msrb.mxu0 %v840_v12 }
  0xbf   : > { %v578_v28 = vadd.f32 %v577_v2, %v2090_v4  ;;  %988 = vmatmul.f32.gmra.mxu0 %v807_v24  ;;  %1066 = vmatpush.msra.mxu2 %v899_v36 }
  0xc0   : > { %v498_v30 = vpop.f32.mrf.mxu0  ;;  %1147 = vmatpush.msrb.mxu0 %v838_v32  ;;  %1107 = vmatpush.msra.mxu3 %v931_v52 }
  0xc1   : > { %v499_v33 = vadd.f32 %v498_v30, %v2083_v58  ;;  %v618_v26 = vpop.f32.mrf.mxu3 }
  0xc2   : > { %v2109_v34 = vadd.f32 %v618_v26, %v578_v28  ;;  %v539_v29 = vpop.f32.mrf.mxu1  ;;  %v878_v28 = vld [vmem:[#allocation4 + $0x158] sm:$0xff]  ;;  %1148 = vmatpush.msrb.mxu0 %v836_v37  ;;  %1256 = vmatpush.msrb.mxu3 %v962_v60  ;;  %v2176_v37 = vperm.slane %v2077_v55, 2 }
  0xc3   : > { %v2111_v38 = vadd.f32 %v539_v29, %v499_v33  ;;  %v876_v33 = vld [vmem:[#allocation4 + $0x148] sm:$0xff]  ;;  %1184 = vmatpush.msrb.mxu1 %v878_v28 }
  0xc4   : > { %v808_v41 = vmax.f32 %v2109_v34, 0.0  ;;  %1257 = vmatpush.msrb.mxu3 %v960_v16 }
  0xc5   : > { %v811_v43 = vmax.f32 %v2111_v38, 0.0  ;;  %1185 = vmatpush.msrb.mxu1 %v876_v33  ;;  %v906_v38 = vld [vmem:[#allocation4 + $0x238] sm:$0xff] }
  0xc6   : > { %1029 = vmatmul.f32.gmra.mxu1 %v808_v41  ;;  %v580_v44 = vpop.f32.mrf.mxu2 }
  0xc7   : > { %v581_v48 = vadd.f32 %v580_v44, %v2090_v4  ;;  %991 = vmatmul.f32.gmra.mxu0 %v811_v43  ;;  %v872_v44 = vld [vmem:[#allocation4 + $0x128] sm:$0xff]  ;;  %1186 = vmatpush.msrb.mxu1 %v874_v40  ;;  %v954_v40 = vld [vmem:[#allocation4 + $0x3b8] sm:$0xff] }
  0xc8   : > { %v501_v50 = vpop.f32.mrf.mxu0 }
  0xc9   : > { %v502_v53 = vadd.f32 %v501_v50, %v2083_v58  ;;  %v621_v54 = vpop.f32.mrf.mxu3  ;;  %1187 = vmatpush.msrb.mxu1 %v872_v44  ;;  %v920_v44 = vld [vmem:[#allocation4 + $0x2a8] sm:$0xff] }
  0xca   : > { %v2121_v56 = vadd.f32 %v621_v54, %v581_v48  ;;  %v542_v57 = vpop.f32.mrf.mxu1 }
  0xcb   : > { %v2123_v63 = vadd.f32 %v542_v57, %v502_v53  ;;  %v868_v53 = vld [vmem:[#allocation4 + $0x108] sm:$0xff]  ;;  %1188 = vmatpush.msrb.mxu1 %v870_v49  ;;  %v930_v57 = vld [vmem:[#allocation4 + $0x2f8] sm:$0xff] }
  0xcc   : > { %v812_v5 = vmax.f32 %v2121_v56, 0.0  ;;  %1215 = vmatpush.msrb.mxu2 %v930_v57  ;;  %v2189_v57 = vperm.slane %v2077_v55, 3  ;;  %v916_v55 = vld [vmem:[#allocation4 + $0x288] sm:$0xff] }
  0xcd   : > { %v815_v8 = vmax.f32 %v2123_v63, 0.0  ;;  %1189 = vmatpush.msrb.mxu1 %v868_v53 }
  0xce   : > { %1032 = vmatmul.f32.gmra.mxu1 %v812_v5  ;;  %v583_v9 = vpop.f32.mrf.mxu2  ;;  %1216 = vmatpush.msrb.mxu2 %v928_v0 }
  0xcf   : > { %v584_v14 = vadd.f32 %v583_v9, %v2090_v4  ;;  %994 = vmatmul.f32.gmra.mxu0 %v815_v8 }
  0xd0   : > { %v504_v18 = vpop.f32.mrf.mxu0  ;;  %1217 = vmatpush.msrb.mxu2 %v926_v19 }
  0xd1   : > { %v505_v22 = vadd.f32 %v504_v18, %v2083_v58  ;;  %v624_v23 = vpop.f32.mrf.mxu3 }
  0xd2   : > { %v2133_v2 = vadd.f32 %v624_v23, %v584_v14  ;;  %v545_v25 = vpop.f32.mrf.mxu1 }
  0xd3   : > { %v2135_v15 = vadd.f32 %v545_v25, %v505_v22  ;;  %v958_v22 = vld [vmem:[#allocation4 + $0x3d8] sm:$0xff]  ;;  %v924_v25 = vld [vmem:[#allocation4 + $0x2c8] sm:$0xff] }
  0xd4   : > { %v816_v30 = vmax.f32 %v2133_v2, 0.0  ;;  %1258 = vmatpush.msrb.mxu3 %v958_v22  ;;  %1218 = vmatpush.msrb.mxu2 %v924_v25  ;;  %v948_v25 = vld [vmem:[#allocation4 + $0x388] sm:$0xff] }
  0xd5   : > { %v819_v26 = vmax.f32 %v2135_v15, 0.0 }
  0xd6   : > { %1035 = vmatmul.f32.gmra.mxu1 %v816_v30  ;;  %v586_v29 = vpop.f32.mrf.mxu2  ;;  %1259 = vmatpush.msrb.mxu3 %v956_v35 }
  0xd7   : > { %v587_v39 = vadd.f32 %v586_v29, %v2090_v4  ;;  %997 = vmatmul.f32.gmra.mxu0 %v819_v26 }
  0xd8   : > { %v507_v42 = vpop.f32.mrf.mxu0  ;;  %1260 = vmatpush.msrb.mxu3 %v954_v40 }
  0xd9   : > { %v508_v45 = vadd.f32 %v507_v42, %v2083_v58  ;;  %v627_v46 = vpop.f32.mrf.mxu3 }
  0xda   : > { %v2145_v47 = vadd.f32 %v627_v46, %v587_v39  ;;  %v548_v48 = vpop.f32.mrf.mxu1  ;;  %v922_v39 = vld [vmem:[#allocation4 + $0x2b8] sm:$0xff] }
  0xdb   : > { %v2147_v50 = vadd.f32 %v548_v48, %v508_v45  ;;  %1219 = vmatpush.msrb.mxu2 %v922_v39 }
  0xdc   : > { %v820_v51 = vmax.f32 %v2145_v47, 0.0 }
  0xdd   : > { %v823_v54 = vmax.f32 %v2147_v50, 0.0  ;;  %1220 = vmatpush.msrb.mxu2 %v920_v44  ;;  %v944_v44 = vld [vmem:[#allocation4 + $0x368] sm:$0xff] }
  0xde   : > { %1038 = vmatmul.f32.gmra.mxu1 %v820_v51  ;;  %v589_v59 = vpop.f32.mrf.mxu2 }
  0xdf   : > { %v590_v61 = vadd.f32 %v589_v59, %v2090_v4  ;;  %1000 = vmatmul.f32.gmra.mxu0 %v823_v54  ;;  %v952_v59 = vld [vmem:[#allocation4 + $0x3a8] sm:$0xff] }
  0xe0   : > { %v510_v1 = vpop.f32.mrf.mxu0  ;;  %1261 = vmatpush.msrb.mxu3 %v952_v59 }
  0xe1   : > { %v511_v7 = vadd.f32 %v510_v1, %v2083_v58  ;;  %v630_v9 = vpop.f32.mrf.mxu3  ;;  %v950_v1 = vld [vmem:[#allocation4 + $0x398] sm:$0xff] }
  0xe2   : > { %v2157_v10 = vadd.f32 %v630_v9, %v590_v61  ;;  %v551_v11 = vpop.f32.mrf.mxu1  ;;  %v918_v61 = vld [vmem:[#allocation4 + $0x298] sm:$0xff]  ;;  %1262 = vmatpush.msrb.mxu3 %v950_v1 }
  0xe3   : > { %v2159_v13 = vadd.f32 %v551_v11, %v511_v7  ;;  %1221 = vmatpush.msrb.mxu2 %v918_v61 }
  0xe4   : > { %v824_v14 = vmax.f32 %v2157_v10, 0.0  ;;  %1263 = vmatpush.msrb.mxu3 %v948_v25 }
  0xe5   : > { %v827_v18 = vmax.f32 %v2159_v13, 0.0  ;;  %1222 = vmatpush.msrb.mxu2 %v916_v55  ;;  %v940_v55 = vld [vmem:[#allocation4 + $0x348] sm:$0xff] }
  0xe6   : > { %1041 = vmatmul.f32.gmra.mxu1 %v824_v14  ;;  %v592_v20 = vpop.f32.mrf.mxu2 }
  0xe7   : > { %v593_v23 = vadd.f32 %v592_v20, %v2090_v4  ;;  %1003 = vmatmul.f32.gmra.mxu0 %v827_v18  ;;  %1223 = vmatpush.msrb.mxu2 %v914_v3 }
  0xe8   : > { %v513_v27 = vpop.f32.mrf.mxu0 }
  0xe9   : > { %v514_v12 = vadd.f32 %v513_v27, %v2083_v58  ;;  %v633_v28 = vpop.f32.mrf.mxu3 }
  0xea   : > { %v2169_v31 = vadd.f32 %v633_v28, %v593_v23  ;;  %v554_v32 = vpop.f32.mrf.mxu1 }
  0xeb   : > { %v2171_v33 = vadd.f32 %v554_v32, %v514_v12  ;;  %v946_v12 = vld [vmem:[#allocation4 + $0x378] sm:$0xff]  ;;  %v912_v32 = vld [vmem:[#allocation4 + $0x268] sm:$0xff] }
  0xec   : > { %v828_v29 = vmax.f32 %v2169_v31, 0.0  ;;  %1264 = vmatpush.msrb.mxu3 %v946_v12  ;;  %1224 = vmatpush.msrb.mxu2 %v912_v32  ;;  %v936_v32 = vld [vmem:[#allocation4 + $0x328] sm:$0xff] }
  0xed   : > { %v831_v36 = vmax.f32 %v2171_v33, 0.0 }
  0xee   : > { %1044 = vmatmul.f32.gmra.mxu1 %v828_v29  ;;  %v595_v58 = vpop.f32.mrf.mxu2  ;;  %1265 = vmatpush.msrb.mxu3 %v944_v44  ;;  %v932_v44 = vld [vmem:[#allocation4 + $0x308] sm:$0xff] }
  0xef   : > { %v596_v42 = vadd.f32 %v595_v58, %v2090_v4  ;;  %1006 = vmatmul.f32.gmra.mxu0 %v831_v36  ;;  %1225 = vmatpush.msrb.mxu2 %v910_v21 }
  0xf0   : > { %v656_v45 = vpop.f32.mrf.mxu0 }
  0xf1   : > { %v636_v46 = vpop.f32.mrf.mxu3  ;;  %v657_v48 = vadd.f32 %v656_v45, %v2176_v37 }
  0xf2   : > { %v2184_v49 = vadd.f32 %v636_v46, %v596_v42  ;;  %v697_v52 = vpop.f32.mrf.mxu1  ;;  %v942_v46 = vld [vmem:[#allocation4 + $0x358] sm:$0xff] }
  0xf3   : > { %v2186_v53 = vadd.f32 %v697_v52, %v657_v48  ;;  %v908_v52 = vld [vmem:[#allocation4 + $0x248] sm:$0xff]  ;;  %1266 = vmatpush.msrb.mxu3 %v942_v46 }
  0xf4   : > { %v832_v4 = vmax.f32 %v2184_v49, 0.0  ;;  %1226 = vmatpush.msrb.mxu2 %v908_v52 }
  0xf5   : > { %v805_v60 = vmax.f32 %v2186_v53, 0.0  ;;  %1267 = vmatpush.msrb.mxu3 %v940_v55 }
  0xf6   : > { %1047 = vmatmul.f32.gmra.mxu1 %v832_v4  ;;  %v738_v0 = vpop.f32.mrf.mxu2  ;;  %1227 = vmatpush.msrb.mxu2 %v906_v38 }
  0xf7   : > { %v739_v7 = vadd.f32 %v738_v0, %v2189_v57  ;;  %1067 = vmatmul.f32.vlgmr.msra.gmra.mxu2 %v805_v60  ;;  %1149 = vmatmul.f32.vlgmr.msrb.gmra.mxu0 %v803_v6 }
  0xf8   : > { %v659_v9 = vpop.f32.mrf.mxu0 }
  0xf9   : > { %v660_v11 = vadd.f32 %v659_v9, %v2176_v37  ;;  %v779_v16 = vpop.f32.mrf.mxu3 }
  0xfa   : > { %v2201_v19 = vadd.f32 %v779_v16, %v739_v7  ;;  %v700_v20 = vpop.f32.mrf.mxu1 }
  0xfb   : > { %v2203_v22 = vadd.f32 %v700_v20, %v660_v11  ;;  %v938_v11 = vld [vmem:[#allocation4 + $0x338] sm:$0xff]  ;;  %v904_v20 = vld [vmem:[#allocation4 + $0x228] sm:$0xff] }
  0xfc   : > { %v806_v23 = vmax.f32 %v2201_v19, 0.0  ;;  %1268 = vmatpush.msrb.mxu3 %v938_v11  ;;  %1228 = vmatpush.msrb.mxu2 %v904_v20 }
  0xfd   : > { %v809_v27 = vmax.f32 %v2203_v22, 0.0 }
  0xfe   : > { %1108 = vmatmul.f32.vlgmr.msra.gmra.mxu3 %v806_v23  ;;  %1190 = vmatmul.f32.vlgmr.msrb.gmra.mxu1 %v804_v62  ;;  %v741_v6 = vpop.f32.mrf.mxu2 }
  0xff   : > { %v742_v28 = vadd.f32 %v741_v6, %v2189_v57  ;;  %1070 = vmatmul.f32.gmra.mxu2 %v809_v27  ;;  %1152 = vmatmul.f32.gmra.mxu0 %v807_v24 }
 0x100   : > { %v662_v35 = vpop.f32.mrf.mxu0  ;;  %1269 = vmatpush.msrb.mxu3 %v936_v32 }
 0x101   : > { %v663_v39 = vadd.f32 %v662_v35, %v2176_v37  ;;  %v782_v58 = vpop.f32.mrf.mxu3  ;;  %v902_v35 = vld [vmem:[#allocation4 + $0x218] sm:$0xff] }
 0x102   : > { %v2217_v40 = vadd.f32 %v782_v58, %v742_v28  ;;  %v703_v17 = vpop.f32.mrf.mxu1  ;;  %1229 = vmatpush.msrb.mxu2 %v902_v35  ;;  %v900_v58 = vld [vmem:[#allocation4 + $0x208] sm:$0xff] }
 0x103   : > { %v2219_v62 = vadd.f32 %v703_v17, %v663_v39  ;;  %v934_v39 = vld [vmem:[#allocation4 + $0x318] sm:$0xff] }
 0x104   : > { %v810_v42 = vmax.f32 %v2217_v40, 0.0  ;;  %1270 = vmatpush.msrb.mxu3 %v934_v39  ;;  %1230 = vmatpush.msrb.mxu2 %v900_v58 }
 0x105   : > { %v813_v45 = vmax.f32 %v2219_v62, 0.0 }
 0x106   : > { %1111 = vmatmul.f32.gmra.mxu3 %v810_v42  ;;  %1193 = vmatmul.f32.gmra.mxu1 %v808_v41  ;;  %v744_v24 = vpop.f32.mrf.mxu2 }
 0x107   : > { %v745_v48 = vadd.f32 %v744_v24, %v2189_v57  ;;  %1073 = vmatmul.f32.gmra.mxu2 %v813_v45  ;;  %1155 = vmatmul.f32.gmra.mxu0 %v811_v43 }
 0x108   : > { %v665_v59 = vpop.f32.mrf.mxu0  ;;  %1271 = vmatpush.msrb.mxu3 %v932_v44 }
 0x109   : > { %v666_v61 = vadd.f32 %v665_v59, %v2176_v37  ;;  %v785_v0 = vpop.f32.mrf.mxu3 }
 0x10a   : > { %v2233_v1 = vadd.f32 %v785_v0, %v745_v48  ;;  %v706_v34 = vpop.f32.mrf.mxu1 }
 0x10b   : > { %v2235_v41 = vadd.f32 %v706_v34, %v666_v61 }
 0x10c   : > { %v814_v7 = vmax.f32 %v2233_v1, 0.0 }
 0x10d   : > { %v817_v9 = vmax.f32 %v2235_v41, 0.0 }
 0x10e   : > { %1114 = vmatmul.f32.gmra.mxu3 %v814_v7  ;;  %1196 = vmatmul.f32.gmra.mxu1 %v812_v5  ;;  %v747_v43 = vpop.f32.mrf.mxu2 }
 0x10f   : > { %v748_v16 = vadd.f32 %v747_v43, %v2189_v57  ;;  %1076 = vmatmul.f32.gmra.mxu2 %v817_v9  ;;  %1158 = vmatmul.f32.gmra.mxu0 %v815_v8 }
 0x110   : > { %v668_v25 = vpop.f32.mrf.mxu0 }
 0x111   : > { %v669_v3 = vadd.f32 %v668_v25, %v2176_v37  ;;  %v788_v6 = vpop.f32.mrf.mxu3 }
 0x112   : > { %v2249_v12 = vadd.f32 %v788_v6, %v748_v16  ;;  %v709_v56 = vpop.f32.mrf.mxu1 }
 0x113   : > { %v2251_v5 = vadd.f32 %v709_v56, %v669_v3 }
 0x114   : > { %v818_v28 = vmax.f32 %v2249_v12, 0.0 }
 0x115   : > { %v821_v63 = vmax.f32 %v2251_v5, 0.0 }
 0x116   : > { %1117 = vmatmul.f32.gmra.mxu3 %v818_v28  ;;  %1199 = vmatmul.f32.gmra.mxu1 %v816_v30  ;;  %v750_v8 = vpop.f32.mrf.mxu2 }
 0x117   : > { %v751_v17 = vadd.f32 %v750_v8, %v2189_v57  ;;  %1079 = vmatmul.f32.gmra.mxu2 %v821_v63  ;;  %1161 = vmatmul.f32.gmra.mxu0 %v819_v26 }
 0x118   : > { %v671_v21 = vpop.f32.mrf.mxu0 }
 0x119   : > { %v672_v24 = vadd.f32 %v671_v21, %v2176_v37  ;;  %v791_v46 = vpop.f32.mrf.mxu3 }
 0x11a   : > { %v2265_v2 = vadd.f32 %v791_v46, %v751_v17  ;;  %v712_v30 = vpop.f32.mrf.mxu1 }
 0x11b   : > { %v2267_v48 = vadd.f32 %v712_v30, %v672_v24 }
 0x11c   : > { %v822_v52 = vmax.f32 %v2265_v2, 0.0 }
 0x11d   : > { %v825_v59 = vmax.f32 %v2267_v48, 0.0 }
 0x11e   : > { %1120 = vmatmul.f32.gmra.mxu3 %v822_v52  ;;  %1202 = vmatmul.f32.gmra.mxu1 %v820_v51  ;;  %v753_v15 = vpop.f32.mrf.mxu2 }
 0x11f   : > { %v754_v26 = vadd.f32 %v753_v15, %v2189_v57  ;;  %1082 = vmatmul.f32.gmra.mxu2 %v825_v59  ;;  %1164 = vmatmul.f32.gmra.mxu0 %v823_v54 }
 0x120   : > { %v674_v61 = vpop.f32.mrf.mxu0 }
 0x121   : > { %v675_v0 = vadd.f32 %v674_v61, %v2176_v37  ;;  %v794_v34 = vpop.f32.mrf.mxu3 }
 0x122   : > { %v2281_v55 = vadd.f32 %v794_v34, %v754_v26  ;;  %v715_v38 = vpop.f32.mrf.mxu1 }
 0x123   : > { %v2283_v43 = vadd.f32 %v715_v38, %v675_v0 }
 0x124   : > { %v826_v47 = vmax.f32 %v2281_v55, 0.0 }
 0x125   : > { %v829_v51 = vmax.f32 %v2283_v43, 0.0 }
 0x126   : > { %1123 = vmatmul.f32.gmra.mxu3 %v826_v47  ;;  %1205 = vmatmul.f32.gmra.mxu1 %v824_v14  ;;  %v756_v50 = vpop.f32.mrf.mxu2 }
 0x127   : > { %v757_v54 = vadd.f32 %v756_v50, %v2189_v57  ;;  %1085 = vmatmul.f32.gmra.mxu2 %v829_v51  ;;  %1167 = vmatmul.f32.gmra.mxu0 %v827_v18  ;;  %v2305_v18 = vld [vmem:[%s2646_s4] sm:$0x3] }
 0x128   : > { %v677_v11 = vpop.f32.mrf.mxu0  ;;  %v965_v8 = vperm.slane %v2305_v18, 0 }
 0x129   : > { %v678_v16 = vadd.f32 %v677_v11, %v2176_v37  ;;  %v797_v20 = vpop.f32.mrf.mxu3 }
 0x12a   : > { %v798_v25 = vadd.f32 %v797_v20, %v757_v54  ;;  %v718_v3 = vpop.f32.mrf.mxu1 }
 0x12b   : > { %v719_v6 = vadd.f32 %v718_v3, %v678_v16 }
 0x12c   : > { %v830_v56 = vmax.f32 %v798_v25, 0.0 }
 0x12d   : > { %v833_v32 = vmax.f32 %v719_v6, 0.0 }
 0x12e   : > { %1126 = vmatmul.f32.gmra.mxu3 %v830_v56  ;;  %1208 = vmatmul.f32.gmra.mxu1 %v828_v29  ;;  %v759_v10 = vpop.f32.mrf.mxu2 }
 0x12f   : > { %v760_v14 = vadd.f32 %v759_v10, %v2189_v57  ;;  %1088 = vmatmul.f32.gmra.mxu2 %v833_v32  ;;  %1170 = vmatmul.f32.gmra.mxu0 %v831_v36 }
 0x131   : > { %v800_v13 = vpop.f32.mrf.mxu3 }
 0x132   : > { %v801_v37 = vadd.f32 %v800_v13, %v760_v14 }
 0x134   : > { %v834_v35 = vmax.f32 %v801_v37, 0.0  ;;  %v986_v39 = vpop.f32.mrf.mxu0 }
 0x135   : > { %v987_v31 = vadd.f32 %v986_v39, %v965_v8 }
 0x136   : > { %1129 = vmatmul.f32.gmra.mxu3 %v834_v35  ;;  %1211 = vmatmul.f32.gmra.mxu1 %v832_v4 }
 0x137   : > { %1231 = vmatmul.f32.vlgmr.msrb.gmra.mxu2 %v805_v60 }
 0x13b   : > { %v1027_v33 = vpop.f32.mrf.mxu1 }
 0x13c   : > { %v1028_v29 = vadd.f32 %v1027_v33, %v987_v31  ;;  %v989_v36 = vpop.f32.mrf.mxu0 }
 0x13d   : > { %v990_v57 = vadd.f32 %v989_v36, %v965_v8 }
 0x13e   : > { %1272 = vmatmul.f32.vlgmr.msrb.gmra.mxu3 %v806_v23 }
 0x13f   : > { %1234 = vmatmul.f32.gmra.mxu2 %v809_v27 }
 0x143   : > { %v1030_v58 = vpop.f32.mrf.mxu1 }
 0x144   : > { %v1031_v17 = vadd.f32 %v1030_v58, %v990_v57  ;;  %v992_v44 = vpop.f32.mrf.mxu0 }
 0x145   : > { %v993_v49 = vadd.f32 %v992_v44, %v965_v8 }
 0x146   : > { %1275 = vmatmul.f32.gmra.mxu3 %v810_v42 }
 0x147   : > { %1237 = vmatmul.f32.gmra.mxu2 %v813_v45 }
 0x14b   : > { %v1033_v53 = vpop.f32.mrf.mxu1 }
 0x14c   : > { %v1034_v4 = vadd.f32 %v1033_v53, %v993_v49  ;;  %v995_v60 = vpop.f32.mrf.mxu0 }
 0x14d   : > { %v996_v19 = vadd.f32 %v995_v60, %v965_v8 }
 0x14e   : > { %1278 = vmatmul.f32.gmra.mxu3 %v814_v7 }
 0x14f   : > { %1240 = vmatmul.f32.gmra.mxu2 %v817_v9 }
 0x153   : > { %v1036_v22 = vpop.f32.mrf.mxu1 }
 0x154   : > { %v1037_v23 = vadd.f32 %v1036_v22, %v996_v19  ;;  %v998_v27 = vpop.f32.mrf.mxu0 }
 0x155   : > { %v999_v40 = vadd.f32 %v998_v27, %v965_v8  ;;  %v1771_v27 = vld [vmem:[%s1964_s23] sm:$0xff] }
 0x156   : > { %1281 = vmatmul.f32.gmra.mxu3 %v818_v28 }
 0x157   : > { %1243 = vmatmul.f32.gmra.mxu2 %v821_v63 }
 0x15b   : > { %v1039_v62 = vpop.f32.mrf.mxu1 }
 0x15c   : > { %v1040_v42 = vadd.f32 %v1039_v62, %v999_v40  ;;  %v1001_v45 = vpop.f32.mrf.mxu0  ;;  %v1772_v40 = vld [vmem:[%s1964_s23 + $0x8] sm:$0xff] }
 0x15d   : > { %v1002_v1 = vadd.f32 %v1001_v45, %v965_v8 }
 0x15e   : > { %1284 = vmatmul.f32.gmra.mxu3 %v822_v52 }
 0x15f   : > { %1246 = vmatmul.f32.gmra.mxu2 %v825_v59 }
 0x163   : > { %v1042_v41 = vpop.f32.mrf.mxu1 }
 0x164   : > { %v1043_v7 = vadd.f32 %v1042_v41, %v1002_v1  ;;  %v1004_v9 = vpop.f32.mrf.mxu0 }
 0x165   : > { %v1005_v12 = vadd.f32 %v1004_v9, %v965_v8 }
 0x166   : > { %1287 = vmatmul.f32.gmra.mxu3 %v826_v47 }
 0x167   : > { %1249 = vmatmul.f32.gmra.mxu2 %v829_v51 }
 0x16b   : > { %v1045_v5 = vpop.f32.mrf.mxu1 }
 0x16c   : > { %v1046_v28 = vadd.f32 %v1045_v5, %v1005_v12  ;;  %v1007_v63 = vpop.f32.mrf.mxu0 }
 0x16d   : > { %v1008_v21 = vadd.f32 %v1007_v63, %v965_v8  ;;  %v1773_v63 = vld [vmem:[%s1964_s23 + $0x10] sm:$0xff] }
 0x16e   : > { %1290 = vmatmul.f32.gmra.mxu3 %v830_v56 }
 0x16f   : > { %1252 = vmatmul.f32.gmra.mxu2 %v833_v32 }
 0x173   : > { %v1048_v24 = vpop.f32.mrf.mxu1 }
 0x174   : > { %v1049_v46 = vadd.f32 %v1048_v24, %v1008_v21  ;;  %v1150_v10 = vpop.f32.mrf.mxu0  ;;  %v1774_v24 = vld [vmem:[%s1964_s23 + $0x18] sm:$0xff] }
 0x176   : > { %1293 = vmatmul.f32.gmra.mxu3 %v834_v35 }
 0x17a   : > { %v1068_v2 = vpop.f32.mrf.mxu2 }
 0x17b   : > { %v1069_v30 = vadd.f32 %v1068_v2, %v1028_v29  ;;  %v1191_v13 = vpop.f32.mrf.mxu1  ;;  %v2347_v29 = vperm.slane %v2305_v18, 1 }
 0x17c   : > { %v1153_v31 = vpop.f32.mrf.mxu0 }
 0x181   : > { %v1109_v48 = vpop.f32.mrf.mxu3 }
 0x182   : > { %v1110_v52 = vadd.f32 %v1109_v48, %v1069_v30  ;;  %v1071_v59 = vpop.f32.mrf.mxu2 }
 0x183   : > { %v1072_v15 = vadd.f32 %v1071_v59, %v1031_v17  ;;  %v1194_v33 = vpop.f32.mrf.mxu1  ;;  %v1151_v17 = vadd.f32 %v1150_v10, %v2347_v29  ;;  %v1778_v10 = vld [vmem:[%s1964_s23 + $0x38] sm:$0xff] }
 0x184   : > { %v1156_v49 = vpop.f32.mrf.mxu0  ;;  %v2354_v18 = vadd.f32 %v1771_v27, %v1110_v52 }
 0x185   : > { %v1192_v44 = vadd.f32 %v1191_v13, %v1151_v17 }
 0x189   : > { %v1112_v26 = vpop.f32.mrf.mxu3 }
 0x18a   : > { %v1113_v61 = vadd.f32 %v1112_v26, %v1072_v15  ;;  %v1074_v0 = vpop.f32.mrf.mxu2 }
 0x18b   : > { %v1075_v34 = vadd.f32 %v1074_v0, %v1034_v4  ;;  %v1197_v4 = vpop.f32.mrf.mxu1 }
 0x18c   : > { %v1159_v41 = vpop.f32.mrf.mxu0  ;;  %v2363_v21 = vadd.f32 %v1773_v63, %v1113_v61 }
 0x18d   : > { %v1160_v0 = vadd.f32 %v1159_v41, %v2347_v29  ;;  %v1782_v41 = vld [vmem:[%s1964_s23 + $0x58] sm:$0xff] }
 0x191   : > { %v1115_v55 = vpop.f32.mrf.mxu3 }
 0x192   : > { %v2336_v38 = vadd.f32 %v1115_v55, %v1075_v34  ;;  %v1077_v43 = vpop.f32.mrf.mxu2  ;;  %v1775_v34 = vld [vmem:[%s1964_s23 + $0x20] sm:$0xff]  ;;  %v1776_v55 = vld [vmem:[%s1964_s23 + $0x28] sm:$0xff] }
 0x193   : > { %v1078_v47 = vadd.f32 %v1077_v43, %v1037_v23  ;;  %v1154_v23 = vadd.f32 %v1153_v31, %v2347_v29  ;;  %v1200_v5 = vpop.f32.mrf.mxu1 }
 0x194   : > { %v1162_v26 = vpop.f32.mrf.mxu0  ;;  %v2373_v61 = vadd.f32 %v1775_v34, %v2336_v38 }
 0x199   : > { %v1118_v51 = vpop.f32.mrf.mxu3 }
 0x19a   : > { %v2338_v50 = vadd.f32 %v1118_v51, %v1078_v47  ;;  %v1080_v54 = vpop.f32.mrf.mxu2  ;;  %v1201_v51 = vadd.f32 %v1200_v5, %v1160_v0 }
 0x19b   : > { %v1081_v11 = vadd.f32 %v1080_v54, %v1040_v42  ;;  %v1195_v42 = vadd.f32 %v1194_v33, %v1154_v23  ;;  %v1203_v47 = vpop.f32.mrf.mxu1 }
 0x19c   : > { %v1165_v13 = vpop.f32.mrf.mxu0 }
 0x19d   : > { %v1166_v17 = vadd.f32 %v1165_v13, %v2347_v29 }
 0x1a1   : > { %v1121_v16 = vpop.f32.mrf.mxu3 }
 0x1a2   : > { %v2340_v20 = vadd.f32 %v1121_v16, %v1081_v11  ;;  %v1083_v25 = vpop.f32.mrf.mxu2 }
 0x1a3   : > { %v1084_v3 = vadd.f32 %v1083_v25, %v1043_v7 }
 0x1a9   : > { %v1124_v6 = vpop.f32.mrf.mxu3 }
 0x1aa   : > { %v2342_v56 = vadd.f32 %v1124_v6, %v1084_v3  ;;  %v1086_v32 = vpop.f32.mrf.mxu2  ;;  %v1163_v6 = vadd.f32 %v1162_v26, %v2347_v29 }
 0x1ab   : > { %v1087_v14 = vadd.f32 %v1086_v32, %v1046_v28  ;;  %v1157_v28 = vadd.f32 %v1156_v49, %v2347_v29  ;;  %v1777_v32 = vld [vmem:[%s1964_s23 + $0x30] sm:$0xff]  ;;  %v1780_v49 = vld [vmem:[%s1964_s23 + $0x48] sm:$0xff] }
 0x1ac   : > { %v2383_v38 = vadd.f32 %v1777_v32, %v2338_v50 }
 0x1ad   : > { %v1198_v2 = vadd.f32 %v1197_v4, %v1157_v28 }
 0x1b1   : > { %v1127_v37 = vpop.f32.mrf.mxu3 }
 0x1b2   : > { %v2344_v35 = vadd.f32 %v1127_v37, %v1087_v14  ;;  %v1089_v8 = vpop.f32.mrf.mxu2  ;;  %v1204_v37 = vadd.f32 %v1203_v47, %v1163_v6 }
 0x1b3   : > { %v1090_v39 = vadd.f32 %v1089_v8, %v1049_v46 }
 0x1b9   : > { %v1130_v36 = vpop.f32.mrf.mxu3 }
 0x1ba   : > { %v2349_v57 = vadd.f32 %v1130_v36, %v1090_v39  ;;  %v1232_v58 = vpop.f32.mrf.mxu2  ;;  %v1206_v39 = vpop.f32.mrf.mxu1 }
 0x1bb   : > { %v1233_v53 = vadd.f32 %v1232_v58, %v1192_v44  ;;  %v1779_v44 = vld [vmem:[%s1964_s23 + $0x40] sm:$0xff]  ;;  %v1207_v4 = vadd.f32 %v1206_v39, %v1166_v17 }
 0x1bc   : > { %v2393_v50 = vadd.f32 %v1779_v44, %v2340_v20  ;;  %v1781_v20 = vld [vmem:[%s1964_s23 + $0x50] sm:$0xff] }
 0x1c1   : > { %v1273_v60 = vpop.f32.mrf.mxu3 }
 0x1c2   : > { %v1274_v19 = vadd.f32 %v1273_v60, %v1233_v53  ;;  %v1235_v22 = vpop.f32.mrf.mxu2  ;;  %v1209_v23 = vpop.f32.mrf.mxu1 }
 0x1c3   : > { %v1236_v1 = vadd.f32 %v1235_v22, %v1195_v42 }
 0x1c4   : > { %v2357_v62 = vadd.f32 %v1772_v40, %v1274_v19  ;;  %v1168_v19 = vpop.f32.mrf.mxu0 }
 0x1c6   : > { %v1315_v45 = vadd.f32 %v2357_v62, %v2354_v18 }
 0x1c8   : > { %1316 = vadd.xlane.f32.xlu0 %v1315_v45  ;;  %v1169_v45 = vadd.f32 %v1168_v19, %v2347_v29 }
 0x1c9   : > { %v1276_v7 = vpop.f32.mrf.mxu3 }
 0x1ca   : > { %v1277_v9 = vadd.f32 %v1276_v7, %v1236_v1  ;;  %v1238_v12 = vpop.f32.mrf.mxu2  ;;  %v2403_v1 = vadd.f32 %v1781_v20, %v2342_v56 }
 0x1cb   : > { %v1239_v48 = vadd.f32 %v1238_v12, %v1198_v2  ;;  %v1212_v2 = vpop.f32.mrf.mxu1 }
 0x1cc   : > { %v2366_v46 = vadd.f32 %v1774_v24, %v1277_v9  ;;  %v1210_v9 = vadd.f32 %v1209_v23, %v1169_v45  ;;  %v1171_v28 = vpop.f32.mrf.mxu0 }
 0x1ce   : > { %v1318_v30 = vadd.f32 %v2366_v46, %v2363_v21 }
 0x1d0   : > { %1319 = vadd.xlane.f32.xlu0 %v1318_v30  ;;  %v1172_v30 = vadd.f32 %v1171_v28, %v2347_v29  ;;  %v1786_v29 = vld [vmem:[%s1964_s23 + $0x78] sm:$0xff] }
 0x1d1   : > { %v1279_v52 = vpop.f32.mrf.mxu3 }
 0x1d2   : > { %v1280_v59 = vadd.f32 %v1279_v52, %v1239_v48  ;;  %v1241_v15 = vpop.f32.mrf.mxu2  ;;  %v1783_v48 = vld [vmem:[%s1964_s23 + $0x60] sm:$0xff]  ;;  %v1784_v52 = vld [vmem:[%s1964_s23 + $0x68] sm:$0xff]  ;;  %v1213_v26 = vadd.f32 %v1212_v2, %v1172_v30 }
 0x1d3   : > { %v1242_v11 = vadd.f32 %v1241_v15, %v1201_v51  ;;  %v2413_v56 = vadd.f32 %v1783_v48, %v2344_v35  ;;  %v1785_v51 = vld [vmem:[%s1964_s23 + $0x70] sm:$0xff] }
 0x1d4   : > { %v2376_v43 = vadd.f32 %v1776_v55, %v1280_v59 }
 0x1d6   : > { %v1321_v54 = vadd.f32 %v2376_v43, %v2373_v61 }
 0x1d8   : > { %1322 = vadd.xlane.f32.xlu1 %v1321_v54  ;;  %v2422_v54 = vadd.f32 %v1785_v51, %v2349_v57 }
 0x1d9   : > { %v1282_v16 = vpop.f32.mrf.mxu3 }
 0x1da   : > { %v1283_v25 = vadd.f32 %v1282_v16, %v1242_v11  ;;  %v1244_v3 = vpop.f32.mrf.mxu2  ;;  %v1869_v16 = vmov 256.0  }
 0x1db   : > { %v1245_v31 = vadd.f32 %v1244_v3, %v1204_v37  ;;  %1737 = vrcp.f32 %v1869_v16 }
 0x1dc   : > { %v2386_v14 = vadd.f32 %v1778_v10, %v1283_v25 }
 0x1de   : > { %v1324_v8 = vadd.f32 %v2386_v14, %v2383_v38 }
 0x1e0   : > { %1325 = vadd.xlane.f32.xlu1 %v1324_v8 }
 0x1e1   : > { %v1285_v33 = vpop.f32.mrf.mxu3  ;;  %v1738_v25 = vpop.eup %1737 }
 0x1e2   : > { %v1286_v36 = vadd.f32 %v1285_v33, %v1245_v31  ;;  %v1247_v58 = vpop.f32.mrf.mxu2  ;;  %v1340_v3 = vmul.f32 256.0, %v1738_v25  ;;  %vm1344_vm0 = vweird.f32 %v1738_v25 }
 0x1e3   : > { %v1248_v22 = vadd.f32 %v1247_v58, %v1207_v4 }
 0x1e4   : > { %v2396_v53 = vadd.f32 %v1780_v49, %v1286_v36  ;;  %v1341_v6 = vsub.f32 1.0, %v1340_v3 }
 0x1e6   : > { %v1327_v60 = vadd.f32 %v2396_v53, %v2393_v50  ;;  %v1342_v32 = vmul.f32 %v1738_v25, %v1341_v6 }
 0x1e8   : > { %1328 = vadd.xlane.f32.xlu2 %v1327_v60  ;;  %v1343_v10 = vadd.f32 %v1738_v25, %v1342_v32 }
 0x1e9   : > { %v1288_v27 = vpop.f32.mrf.mxu3 }
 0x1ea   : > { %v1289_v40 = vadd.f32 %v1288_v27, %v1248_v22  ;;  %v1250_v42 = vpop.f32.mrf.mxu2  ;;  %v1345_v13 = vsel %vm1344_vm0, %v1738_v25, %v1343_v10 }
 0x1eb   : > { %v1251_v5 = vadd.f32 %v1250_v42, %v1210_v9 }
 0x1ec   : > { %v2406_v7 = vadd.f32 %v1782_v41, %v1289_v40 }
 0x1ee   : > { %v1330_v12 = vadd.f32 %v2406_v7, %v2403_v1 }
 0x1f0   : > { %1331 = vadd.xlane.f32.xlu2 %v1330_v12 }
 0x1f1   : > { %v1291_v63 = vpop.f32.mrf.mxu3 }
 0x1f2   : > { %v1292_v24 = vadd.f32 %v1291_v63, %v1251_v5  ;;  %v1253_v15 = vpop.f32.mrf.mxu2 }
 0x1f3   : > { %v1254_v34 = vadd.f32 %v1253_v15, %v1213_v26 }
 0x1f4   : > { %v2416_v59 = vadd.f32 %v1784_v52, %v1292_v24 }
 0x1f6   : > { %v1333_v0 = vadd.f32 %v2416_v59, %v2413_v56 }
 0x1f8   : > { %1334 = vadd.xlane.f32.xlu0 %v1333_v0 }
 0x1f9   : > { %v1294_v55 = vpop.f32.mrf.mxu3 }
 0x1fa   : > { %v1295_v47 = vadd.f32 %v1294_v55, %v1254_v34 }
 0x1fc   : > { %v2425_v11 = vadd.f32 %v1786_v29, %v1295_v47 }
 0x1fe   : > { %v1336_v35 = vadd.f32 %v2425_v11, %v2422_v54 }
 0x200   : > { %1337 = vadd.xlane.f32.xlu1 %v1336_v35 }
 0x23b   : > { %v1317_v37 = vpop.xlane.xlu0 %1316 }
 0x23c   : > { %v1346_v8 = vmul.f32 %v1345_v13, %v1317_v37 }
 0x23e   : > { %v2430_v57 = vsub.f32 %v2354_v18, %v1346_v8  ;;  %v2433_v39 = vsub.f32 %v2357_v62, %v1346_v8 }
 0x240   : > { %v1370_v31 = vmul.f32 %v2430_v57, %v2430_v57  ;;  %v1371_v33 = vmul.f32 %v2433_v39, %v2433_v39 }
 0x242   : > { %v1386_v36 = vadd.f32 %v1371_v33, %v1370_v31 }
 0x243   : > { %v1320_v58 = vpop.xlane.xlu0 %1319 }
 0x244   : > { %v1347_v17 = vmul.f32 %v1345_v13, %v1320_v58  ;;  %1387 = vadd.xlane.f32.xlu2 %v1386_v36 }
 0x246   : > { %v2440_v44 = vsub.f32 %v2363_v21, %v1347_v17  ;;  %v2443_v49 = vsub.f32 %v2366_v46, %v1347_v17 }
 0x248   : > { %v1372_v18 = vmul.f32 %v2440_v44, %v2440_v44  ;;  %v1373_v62 = vmul.f32 %v2443_v49, %v2443_v49 }
 0x24a   : > { %v1389_v4 = vadd.f32 %v1373_v62, %v1372_v18 }
 0x24b   : > { %v1323_v60 = vpop.xlane.xlu1 %1322 }
 0x24c   : > { %v1348_v19 = vmul.f32 %v1345_v13, %v1323_v60  ;;  %1390 = vadd.xlane.f32.xlu0 %v1389_v4 }
 0x24e   : > { %v2450_v22 = vsub.f32 %v2373_v61, %v1348_v19  ;;  %v2453_v23 = vsub.f32 %v2376_v43, %v1348_v19  ;;  %v1313_v19 = vld [vmem:[%s2647_s5] sm:$0x3] }
 0x250   : > { %v1374_v21 = vmul.f32 %v2450_v22, %v2450_v22  ;;  %v1375_v46 = vmul.f32 %v2453_v23, %v2453_v23 }
 0x252   : > { %v1392_v27 = vadd.f32 %v1375_v46, %v1374_v21 }
 0x253   : > { %v1326_v40 = vpop.xlane.xlu1 %1325 }
 0x254   : > { %v1349_v42 = vmul.f32 %v1345_v13, %v1326_v40  ;;  %1393 = vadd.xlane.f32.xlu1 %v1392_v27 }
 0x256   : > { %v2460_v45 = vsub.f32 %v2383_v38, %v1349_v42  ;;  %v2463_v20 = vsub.f32 %v2386_v14, %v1349_v42 }
 0x258   : > { %v1376_v61 = vmul.f32 %v2460_v45, %v2460_v45  ;;  %v1377_v43 = vmul.f32 %v2463_v20, %v2463_v20 }
 0x25a   : > { %v1395_v41 = vadd.f32 %v1377_v43, %v1376_v61  ;;  %v2517_v43 = vperm.slane %v1313_v19, 0 }
 0x25b   : > { %v1329_v9 = vpop.xlane.xlu2 %1328 }
 0x25c   : > { %v1350_v12 = vmul.f32 %v1345_v13, %v1329_v9  ;;  %1396 = vadd.xlane.f32.xlu2 %v1395_v41 }
 0x25e   : > { %v2470_v5 = vsub.f32 %v2393_v50, %v1350_v12  ;;  %v2473_v28 = vsub.f32 %v2396_v53, %v1350_v12  ;;  %v2520_v12 = vperm.slane %v1313_v19, 1 }
 0x260   : > { %v1378_v38 = vmul.f32 %v2470_v5, %v2470_v5  ;;  %v1379_v14 = vmul.f32 %v2473_v28, %v2473_v28 }
 0x262   : > { %v1398_v63 = vadd.f32 %v1379_v14, %v1378_v38  ;;  %v1314_v38 = vld [vmem:[%s2648_s6] sm:$0x3] }
 0x263   : > { %v1332_v24 = vpop.xlane.xlu2 %1331 }
 0x264   : > { %v1351_v2 = vmul.f32 %v1345_v13, %v1332_v24  ;;  %1399 = vadd.xlane.f32.xlu0 %v1398_v63 }
 0x266   : > { %v2480_v30 = vsub.f32 %v2403_v1, %v1351_v2  ;;  %v2483_v48 = vsub.f32 %v2406_v7, %v1351_v2  ;;  %v1535_v2 = vmul.f32 %v2517_v43, %v2430_v57 }
 0x268   : > { %v1380_v50 = vmul.f32 %v2480_v30, %v2480_v30  ;;  %v1381_v53 = vmul.f32 %v2483_v48, %v2483_v48 }
 0x26a   : > { %v1401_v52 = vadd.f32 %v1381_v53, %v1380_v50 }
 0x26b   : > { %v1335_v15 = vpop.xlane.xlu0 %1334 }
 0x26c   : > { %v1352_v26 = vmul.f32 %v1345_v13, %v1335_v15  ;;  %1402 = vadd.xlane.f32.xlu1 %v1401_v52  ;;  %v1536_v52 = vmul.f32 %v2520_v12, %v2433_v39  ;;  %v2530_v15 = vperm.slane %v1314_v38, 0 }
 0x26e   : > { %v2490_v0 = vsub.f32 %v2413_v56, %v1352_v26  ;;  %v2493_v34 = vsub.f32 %v2416_v59, %v1352_v26  ;;  %v2532_v26 = vperm.slane %v1314_v38, 1  ;;  %v1540_v38 = vmul.f32 %v2520_v12, %v2453_v23 }
 0x270   : > { %v1382_v1 = vmul.f32 %v2490_v0, %v2490_v0  ;;  %v1383_v7 = vmul.f32 %v2493_v34, %v2493_v34 }
 0x272   : > { %v1404_v55 = vadd.f32 %v1383_v7, %v1382_v1 }
 0x273   : > { %v1338_v47 = vpop.xlane.xlu1 %1337 }
 0x274   : > { %v1353_v51 = vmul.f32 %v1345_v13, %v1338_v47  ;;  %1405 = vadd.xlane.f32.xlu2 %v1404_v55 }
 0x276   : > { %v2500_v29 = vsub.f32 %v2422_v54, %v1353_v51  ;;  %v2503_v35 = vsub.f32 %v2425_v11, %v1353_v51 }
 0x278   : > { %v1384_v56 = vmul.f32 %v2500_v29, %v2500_v29  ;;  %v1385_v59 = vmul.f32 %v2503_v35, %v2503_v35 }
 0x27a   : > { %v1407_v16 = vadd.f32 %v1385_v59, %v1384_v56 }
 0x27c   : > { %1408 = vadd.xlane.f32.xlu0 %v1407_v16 }
 0x2b7   : > { %v1388_v25 = vpop.xlane.xlu2 %1387 }
 0x2b8   : > { %v1410_v3 = vmul.f32 0.003921569, %v1388_v25 }
 0x2ba   : > { %1739 = vrsqrt.f32 %v1410_v3  ;;  %vm1425_vm1 = vcmp.eq.f32.partialorder %v1410_v3, inf  ;;  %v1428_v62 = vand.u32 2147483648, %v1410_v3  ;;  %vm1427_vm2 = vcmp.eq.f32.partialorder %v1410_v3, 0.0 }
 0x2bf   : > { %v1391_v6 = vpop.xlane.xlu0 %1390 }
 0x2c0   : > { %v1740_v32 = vpop.eup %1739  ;;  %v1411_v10 = vmul.f32 0.003921569, %v1391_v6 }
 0x2c1   : > { %v1419_v13 = vmul.f32 %v1740_v32, %v1410_v3 }
 0x2c2   : > { %1741 = vrsqrt.f32 %v1411_v10  ;;  %vm1437_vm3 = vcmp.eq.f32.partialorder %v1411_v10, inf  ;;  %v1440_v24 = vand.u32 2147483648, %v1411_v10  ;;  %vm1439_vm4 = vcmp.eq.f32.partialorder %v1411_v10, 0.0 }
 0x2c3   : > { %v1420_v54 = vmul.f32 %v1740_v32, %v1419_v13 }
 0x2c5   : > { %v1421_v37 = vmul.f32 0.5, %v1420_v54 }
 0x2c7   : > { %v1422_v11 = vsub.f32 1.5, %v1421_v37  ;;  %v1394_v8 = vpop.xlane.xlu1 %1393 }
 0x2c8   : > { %v1742_v31 = vpop.eup %1741  ;;  %v2509_v33 = vmul.f32 0.003921569, %v1394_v8  ;;  %v1538_v8 = vmul.f32 %v2520_v12, %v2443_v49 }
 0x2c9   : > { %v1423_v36 = vmul.f32 %v1740_v32, %v1422_v11  ;;  %v1431_v58 = vmul.f32 %v1742_v31, %v1411_v10  ;;  %v1537_v11 = vmul.f32 %v2517_v43, %v2440_v44 }
 0x2ca   : > { %1743 = vrsqrt.f32 %v2509_v33  ;;  %vm1449_vm5 = vcmp.eq.f32.partialorder %v2509_v33, inf  ;;  %v1452_v13 = vand.u32 2147483648, %v2509_v33  ;;  %vm1451_vm6 = vcmp.eq.f32.partialorder %v2509_v33, 0.0 }
 0x2cb   : > { %v1424_v17 = vmul.f32 %v1423_v36, %v1410_v3  ;;  %v1432_v18 = vmul.f32 %v1742_v31, %v1431_v58 }
 0x2cd   : > { %v1426_v4 = vsel %vm1425_vm1, %v1410_v3, %v1424_v17  ;;  %v1433_v60 = vmul.f32 0.5, %v1432_v18 }
 0x2ce   : > { %v1429_v21 = vsel %vm1427_vm2, %v1428_v62, %v1426_v4 }
 0x2cf   : > { %v1514_v46 = vadd.f32 1e-06, %v1429_v21  ;;  %v1434_v27 = vsub.f32 1.5, %v1433_v60  ;;  %v1397_v40 = vpop.xlane.xlu2 %1396 }
 0x2d0   : > { %v1744_v42 = vpop.eup %1743  ;;  %v2515_v61 = vmul.f32 0.003921569, %v1397_v40 }
 0x2d1   : > { %1745 = vrcp.f32 %v1514_v46  ;;  %v1435_v41 = vmul.f32 %v1742_v31, %v1434_v27  ;;  %v1443_v9 = vmul.f32 %v1744_v42, %v2509_v33 }
 0x2d2   : > { %1747 = vrsqrt.f32 %v2515_v61  ;;  %vm1461_vm7 = vcmp.eq.f32.partialorder %v2515_v61, inf  ;;  %v1464_v40 = vand.u32 2147483648, %v2515_v61  ;;  %vm1463_vm8 = vcmp.eq.f32.partialorder %v2515_v61, 0.0 }
 0x2d3   : > { %v1436_v14 = vmul.f32 %v1435_v41, %v1411_v10  ;;  %v1444_v63 = vmul.f32 %v1744_v42, %v1443_v9  ;;  %v1539_v9 = vmul.f32 %v2517_v43, %v2450_v22 }
 0x2d5   : > { %v1438_v50 = vsel %vm1437_vm3, %v1411_v10, %v1436_v14  ;;  %v1445_v53 = vmul.f32 0.5, %v1444_v63 }
 0x2d6   : > { %v1441_v1 = vsel %vm1439_vm4, %v1440_v24, %v1438_v50 }
 0x2d7   : > { %v1746_v7 = vpop.eup %1745  ;;  %v1515_v55 = vadd.f32 1e-06, %v1441_v1  ;;  %v1446_v47 = vsub.f32 1.5, %v1445_v53  ;;  %v1400_v51 = vpop.xlane.xlu0 %1399 }
 0x2d8   : > { %v1748_v56 = vpop.eup %1747  ;;  %v1551_v59 = vmul.f32 %v1746_v7, %v1535_v2  ;;  %v1552_v16 = vmul.f32 %v1746_v7, %v1536_v52  ;;  %v2534_v57 = vmul.f32 0.003921569, %v1400_v51 }
 0x2d9   : > { %1749 = vrcp.f32 %v1515_v55  ;;  %v1447_v39 = vmul.f32 %v1744_v42, %v1446_v47  ;;  %v1455_v25 = vmul.f32 %v1748_v56, %v2515_v61 }
 0x2da   : > { %v1572_v3 = vadd.f32 %v2530_v15, %v1551_v59  ;;  %v1573_v6 = vadd.f32 %v2532_v26, %v1552_v16  ;;  %1751 = vrsqrt.f32 %v2534_v57  ;;  %vm1473_vm9 = vcmp.eq.f32.partialorder %v2534_v57, inf }
 0x2db   : > { %v1448_v32 = vmul.f32 %v1447_v39, %v2509_v33  ;;  %v1456_v10 = vmul.f32 %v1748_v56, %v1455_v25  ;;  %vm1475_vm10 = vcmp.eq.f32.partialorder %v2534_v57, 0.0  ;;  %v1541_v39 = vmul.f32 %v2517_v43, %v2460_v45 }
 0x2dc   : > { %1588 = vst [vmem:[%s2541_s12] sm:$0xff] %v1572_v3  ;;  %v1542_v25 = vmul.f32 %v2520_v12, %v2463_v20 }
 0x2dd   : > { %1589 = vst [vmem:[%s2541_s12 + $0x8] sm:$0xff] %v1573_v6  ;;  %v1450_v54 = vsel %vm1449_vm5, %v2509_v33, %v1448_v32  ;;  %v1457_v37 = vmul.f32 0.5, %v1456_v10 }
 0x2de   : > { %v1453_v31 = vsel %vm1451_vm6, %v1452_v13, %v1450_v54 }
 0x2df   : > { %v1750_v36 = vpop.eup %1749  ;;  %v1516_v58 = vadd.f32 1e-06, %v1453_v31  ;;  %v1458_v17 = vsub.f32 1.5, %v1457_v37  ;;  %v1403_v18 = vpop.xlane.xlu1 %1402 }
 0x2e0   : > { %v1752_v62 = vpop.eup %1751  ;;  %v1553_v4 = vmul.f32 %v1750_v36, %v1537_v11  ;;  %v1554_v60 = vmul.f32 %v1750_v36, %v1538_v8  ;;  %v2558_v19 = vmul.f32 0.003921569, %v1403_v18 }
 0x2e1   : > { %1753 = vrcp.f32 %v1516_v58  ;;  %v1459_v33 = vmul.f32 %v1748_v56, %v1458_v17  ;;  %v1467_v21 = vmul.f32 %v1752_v62, %v2534_v57  ;;  %v1476_v56 = vand.u32 2147483648, %v2534_v57 }
 0x2e2   : > { %v1574_v44 = vadd.f32 %v2530_v15, %v1553_v4  ;;  %v1575_v49 = vadd.f32 %v2532_v26, %v1554_v60  ;;  %1755 = vrsqrt.f32 %v2558_v19  ;;  %vm1485_vm11 = vcmp.eq.f32.partialorder %v2558_v19, inf }
 0x2e3   : > { %v1460_v46 = vmul.f32 %v1459_v33, %v2515_v61  ;;  %v1468_v27 = vmul.f32 %v1752_v62, %v1467_v21  ;;  %v1488_v17 = vand.u32 2147483648, %v2558_v19  ;;  %vm1487_vm12 = vcmp.eq.f32.partialorder %v2558_v19, 0.0 }
 0x2e4   : > { %1590 = vst [vmem:[%s2541_s12 + $0x10] sm:$0xff] %v1574_v44  ;;  %v1543_v4 = vmul.f32 %v2517_v43, %v2470_v5  ;;  %v1544_v60 = vmul.f32 %v2520_v12, %v2473_v28 }
 0x2e5   : > { %1591 = vst [vmem:[%s2541_s12 + $0x18] sm:$0xff] %v1575_v49  ;;  %v1462_v42 = vsel %vm1461_vm7, %v2515_v61, %v1460_v46  ;;  %v1469_v41 = vmul.f32 0.5, %v1468_v27 }
 0x2e6   : > { %v1465_v14 = vsel %vm1463_vm8, %v1464_v40, %v1462_v42 }
 0x2e7   : > { %v1754_v63 = vpop.eup %1753  ;;  %v1517_v24 = vadd.f32 1e-06, %v1465_v14  ;;  %v1470_v2 = vsub.f32 1.5, %v1469_v41  ;;  %v1406_v50 = vpop.xlane.xlu2 %1405 }
 0x2e8   : > { %v1756_v53 = vpop.eup %1755  ;;  %v1555_v52 = vmul.f32 %v1754_v63, %v1539_v9  ;;  %v1556_v1 = vmul.f32 %v1754_v63, %v1540_v38  ;;  %v2575_v7 = vmul.f32 0.003921569, %v1406_v50 }
 0x2e9   : > { %1757 = vrcp.f32 %v1517_v24  ;;  %v1471_v61 = vmul.f32 %v1752_v62, %v1470_v2  ;;  %v1479_v55 = vmul.f32 %v1756_v53, %v2558_v19  ;;  %v1545_v24 = vmul.f32 %v2517_v43, %v2480_v30 }
 0x2ea   : > { %v1576_v22 = vadd.f32 %v2530_v15, %v1555_v52  ;;  %v1577_v23 = vadd.f32 %v2532_v26, %v1556_v1  ;;  %1759 = vrsqrt.f32 %v2575_v7  ;;  %vm1497_vm13 = vcmp.eq.f32.partialorder %v2575_v7, inf }
 0x2eb   : > { %v1472_v47 = vmul.f32 %v1471_v61, %v2534_v57  ;;  %v1480_v51 = vmul.f32 %v1756_v53, %v1479_v55  ;;  %v1500_v28 = vand.u32 2147483648, %v2575_v7  ;;  %vm1499_vm14 = vcmp.eq.f32.partialorder %v2575_v7, 0.0 }
 0x2ec   : > { %1592 = vst [vmem:[%s2541_s12 + $0x20] sm:$0xff] %v1576_v22  ;;  %v1546_v2 = vmul.f32 %v2520_v12, %v2483_v48 }
 0x2ed   : > { %1593 = vst [vmem:[%s2541_s12 + $0x28] sm:$0xff] %v1577_v23  ;;  %v1474_v59 = vsel %vm1473_vm9, %v2534_v57, %v1472_v47  ;;  %v1481_v16 = vmul.f32 0.5, %v1480_v51  ;;  %v1547_v51 = vmul.f32 %v2517_v43, %v2490_v0  ;;  %v1549_v0 = vmul.f32 %v2517_v43, %v2500_v29 }
 0x2ee   : > { %v1477_v3 = vsel %vm1475_vm10, %v1476_v56, %v1474_v59  ;;  %v1548_v56 = vmul.f32 %v2520_v12, %v2493_v34  ;;  %v1550_v34 = vmul.f32 %v2520_v12, %v2503_v35 }
 0x2ef   : > { %v1758_v6 = vpop.eup %1757  ;;  %v1518_v32 = vadd.f32 1e-06, %v1477_v3  ;;  %v1482_v10 = vsub.f32 1.5, %v1481_v16  ;;  %v1409_v13 = vpop.xlane.xlu0 %1408 }
 0x2f0   : > { %v1760_v54 = vpop.eup %1759  ;;  %v1557_v37 = vmul.f32 %v1758_v6, %v1541_v39  ;;  %v1558_v11 = vmul.f32 %v1758_v6, %v1542_v25  ;;  %v1417_v8 = vmul.f32 0.003921569, %v1409_v13 }
 0x2f1   : > { %1761 = vrcp.f32 %v1518_v32  ;;  %v1483_v57 = vmul.f32 %v1756_v53, %v1482_v10  ;;  %v1491_v31 = vmul.f32 %v1760_v54, %v2575_v7 }
 0x2f2   : > { %v1578_v45 = vadd.f32 %v2530_v15, %v1557_v37  ;;  %v1579_v36 = vadd.f32 %v2532_v26, %v1558_v11  ;;  %1763 = vrsqrt.f32 %v1417_v8  ;;  %vm1509_vm15 = vcmp.eq.f32.partialorder %v1417_v8, inf }
 0x2f3   : > { %v1484_v20 = vmul.f32 %v1483_v57, %v2558_v19  ;;  %v1492_v58 = vmul.f32 %v1760_v54, %v1491_v31  ;;  %v1512_v30 = vand.u32 2147483648, %v1417_v8  ;;  %vm1511_vm0 = vcmp.eq.f32.partialorder %v1417_v8, 0.0 }
 0x2f4   : > { %1594 = vst [vmem:[%s2541_s12 + $0x30] sm:$0xff] %v1578_v45 }
 0x2f5   : > { %1595 = vst [vmem:[%s2541_s12 + $0x38] sm:$0xff] %v1579_v36  ;;  %v1486_v18 = vsel %vm1485_vm11, %v2558_v19, %v1484_v20  ;;  %v1493_v62 = vmul.f32 0.5, %v1492_v58 }
 0x2f6   : > { %v1489_v33 = vsel %vm1487_vm12, %v1488_v17, %v1486_v18 }
 0x2f7   : > { %v1762_v21 = vpop.eup %1761  ;;  %v1519_v44 = vadd.f32 1e-06, %v1489_v33  ;;  %v1494_v49 = vsub.f32 1.5, %v1493_v62 }
 0x2f8   : > { %v1764_v46 = vpop.eup %1763  ;;  %v1559_v27 = vmul.f32 %v1762_v21, %v1543_v4  ;;  %v1560_v40 = vmul.f32 %v1762_v21, %v1544_v60 }
 0x2f9   : > { %1765 = vrcp.f32 %v1519_v44  ;;  %v1495_v42 = vmul.f32 %v1760_v54, %v1494_v49  ;;  %v1503_v41 = vmul.f32 %v1764_v46, %v1417_v8 }
 0x2fa   : > { %v1580_v19 = vadd.f32 %v2530_v15, %v1559_v27  ;;  %v1581_v9 = vadd.f32 %v2532_v26, %v1560_v40 }
 0x2fb   : > { %v1496_v5 = vmul.f32 %v1495_v42, %v2575_v7  ;;  %v1504_v38 = vmul.f32 %v1764_v46, %v1503_v41 }
 0x2fc   : > { %1596 = vst [vmem:[%s2541_s12 + $0x40] sm:$0xff] %v1580_v19 }
 0x2fd   : > { %1597 = vst [vmem:[%s2541_s12 + $0x48] sm:$0xff] %v1581_v9  ;;  %v1498_v14 = vsel %vm1497_vm13, %v2575_v7, %v1496_v5  ;;  %v1505_v63 = vmul.f32 0.5, %v1504_v38 }
 0x2fe   : > { %v1501_v50 = vsel %vm1499_vm14, %v1500_v28, %v1498_v14 }
 0x2ff   : > { %v1766_v53 = vpop.eup %1765  ;;  %v1520_v52 = vadd.f32 1e-06, %v1501_v50  ;;  %v1506_v1 = vsub.f32 1.5, %v1505_v63 }
 0x300   : > { %v1561_v61 = vmul.f32 %v1766_v53, %v1545_v24  ;;  %v1562_v55 = vmul.f32 %v1766_v53, %v1546_v2 }
 0x301   : > { %1767 = vrcp.f32 %v1520_v52  ;;  %v1507_v22 = vmul.f32 %v1764_v46, %v1506_v1 }
 0x302   : > { %v1582_v23 = vadd.f32 %v2530_v15, %v1561_v61  ;;  %v1583_v7 = vadd.f32 %v2532_v26, %v1562_v55 }
 0x303   : > { %v1508_v47 = vmul.f32 %v1507_v22, %v1417_v8 }
 0x304   : > { %1598 = vst [vmem:[%s2541_s12 + $0x50] sm:$0xff] %v1582_v23 }
 0x305   : > { %1599 = vst [vmem:[%s2541_s12 + $0x58] sm:$0xff] %v1583_v7  ;;  %v1510_v48 = vsel %vm1509_vm15, %v1417_v8, %v1508_v47 }
 0x306   : > { %v1513_v59 = vsel %vm1511_vm0, %v1512_v30, %v1510_v48 }
 0x307   : > { %v1768_v16 = vpop.eup %1767  ;;  %v1521_v39 = vadd.f32 1e-06, %v1513_v59 }
 0x308   : > { %v1563_v25 = vmul.f32 %v1768_v16, %v1547_v51  ;;  %v1564_v3 = vmul.f32 %v1768_v16, %v1548_v56 }
 0x309   : > { %1769 = vrcp.f32 %v1521_v39 }
 0x30a   : > { %v1584_v6 = vadd.f32 %v2530_v15, %v1563_v25  ;;  %v1585_v32 = vadd.f32 %v2532_v26, %v1564_v3 }
 0x30c   : > { %1600 = vst [vmem:[%s2541_s12 + $0x60] sm:$0xff] %v1584_v6 }
 0x30d   : > { %1601 = vst [vmem:[%s2541_s12 + $0x68] sm:$0xff] %v1585_v32 }
 0x30f   : > { %v1770_v10 = vpop.eup %1769 }
 0x310   : > { %v1565_v13 = vmul.f32 %v1770_v10, %v1549_v0  ;;  %v1566_v54 = vmul.f32 %v1770_v10, %v1550_v34 }
 0x312   : > { %v1586_v37 = vadd.f32 %v2530_v15, %v1565_v13  ;;  %v1587_v11 = vadd.f32 %v2532_v26, %v1566_v54 }
 0x314   : > { %1602 = vst [vmem:[%s2541_s12 + $0x70] sm:$0xff] %v1586_v37 }
 0x315   : > { %1603 = vst [vmem:[%s2541_s12 + $0x78] sm:$0xff] %v1587_v11 }
 0x316 PF: > { %s19_s24 = sadd.s32 1, %s1861_s24  }
 0x317   : > { %p16_p7 = scmp.ge.s32.totalorder %s19_s24, 4  }
 0x319   :  { %18 = sbr.rel (!%p16_p7) target bundleno = 2 (0x2), region = 87 }
 0x31e   :  { %1628 = vsyncpa [#allocation3], 1 }
 0x31f   :  { %1630 = vsyncpa [#allocation3 + $0x1], 1 }
 0x320   :  { %1631 = vsyncpa [#allocation5], 1 }

// kernel: encoder_forward.17
= control target key start
LH: loop header
LB: loop body
LE: loop exit
PB: predicated region body
PF: predicated region fallthrough
CT: control target
= control target key end

     0   :  { %12 = vsyncpa [#allocation3], 0  ;;  %s2817_s0 = inlined_call_operand.vmem [shape: f32[128,256], index: 0, kind: input, shape index: {}]   ;;  %s2818_s1 = inlined_call_operand.hbm [shape: f32[256,512], index: 1, kind: input, shape index: {}]   ;;  %s2819_s2 = inlined_call_operand.vmem [shape: f32[1,512], index: 2, kind: input, shape index: {}]   ;;  %s2820_s3 = inlined_call_operand.hbm [shape: f32[512,256], index: 3, kind: input, shape index: {}]   ;;  %s2821_s4 = inlined_call_operand.vmem [shape: f32[1,256], index: 4, kind: input, shape index: {}]   ;;  %s2822_s5 = inlined_call_operand.vmem [shape: f32[1,256], index: 5, kind: input, shape index: {}]   ;;  %s2823_s6 = inlined_call_operand.vmem [shape: f32[1,256], index: 6, kind: input, shape index: {}]   ;;  %s2824_s7 = inlined_call_operand.hbm [shape: f32[128,256], index: 7, kind: output, shape index: {}]  }
   0x1   :  { %13 = vsyncpa [#allocation6], 0 }
   0x2   :  { %14 = vsyncpa [#allocation4], 0 }
   0x3   :  { %16 = vsyncpa [#allocation4 + $0x1], 0  ;;  %s2020_s24 = smov 0   ;;  %s2022_s25 = smov 0  }
   0x4   :  { %s2024_s26 = smov 0   ;;  %s2026_s27 = smov 0  }
   0x5 LB: > { %s2041_s28 = sadd.s32 4294967295, %s1969_s27   ;;  %s1701_s29 = sadd.s32 4294967294, %s1969_s27   ;;  %s1969_s27 = sphi %s2026_s27, %s2832_s27   ;;  %s1965_s26 = sphi %s2024_s26, %s2831_s26   ;;  %s1961_s25 = sphi %s2022_s25, %s2830_s25   ;;  %s1957_s24 = sphi %s2020_s24, %s2829_s24  }
   0x6   : > { %s2045_s30 = sadd.s32 1, %s1969_s27   ;;  %s181_s8 = sadd.s32 1, %s1965_s26 }
   0x7   : > { %s178_s9 = ssub.s32 %s1969_s27, %s2045_s30  ;;  %p191_p0 = scmp.ne.s32.totalorder %s1965_s26, %s1961_s25 }
   0x8   : > { %p179_p1 = scmp.eq.s32.totalorder %s178_s9, 0  ;;  %p192_p2 = scmp.eq.s32.totalorder %s2041_s28, 1 }
   0x9   : > { %p197_p3 = scmp.ne.s32.totalorder %s1961_s25, %s1957_s24  ;;  %p198_p4 = scmp.eq.s32.totalorder %s1701_s29, 1 }
   0xa   : > { %s2056_s10 = scalar_select %p179_p1, %s1965_s26, %s181_s8  }
   0xb   : > { %p2058_p5 = por %p192_p2, %p191_p0  ;;  %p2062_p6 = por %p198_p4, %p197_p3 }
   0xc   : > { %p1702_p7 = scmp.ge.s32.totalorder %s1969_s27, 1  ;;  %p205_p8 = scmp.lt.s32.totalorder %s1969_s27, 3 }
   0xd   : > { %p1743_p9 = scmp.eq.s32.totalorder %s2041_s28, 0  ;;  %s216_s16 = sshll.u32 %s2818_s1, 4  ;;  %s217_s16 = int_to_ptr.hbm [resolvable:$true] %s216_s16 }
   0xe   : > { %p2069_p10 = pnand %p1702_p7, %p205_p8  ;;  %s1971_s17 = smov [#allocation2]  }
   0xf   : > { %s218_s18 = sshll.u32 %s1971_s17, 4  ;;  %s233_s21 = sshll.u32 %s2820_s3, 4  ;;  %s219_s18 = int_to_ptr.vmem [resolvable:$true] %s218_s18  ;;  %s234_s21 = int_to_ptr.hbm [resolvable:$true] %s233_s21 }
  0x10   : > { %p1732_p11 = pneg %p2069_p10  ;;  %s1972_s22 = smov 512  }
  0x11   : > { %s1973_s23 = smov 32   ;;  %s1974_s29 = smov [#allocation5]  }
  0x12   : > { %p1733_p12 = pnand %p1743_p9, %p1732_p11  ;;  %s235_s8 = sshll.u32 %s1974_s29, 4  ;;  %s236_s8 = int_to_ptr.vmem [resolvable:$true] %s235_s8 }
  0x13   : > { %s1975_s9 = smov 256   ;;  %s1976_s14 = smov 16  }
  0x14   : > { %1735 = dma.hbm_to_vmem [thread:$0]  (!%p1733_p12), %s217_s16, 16384, %s219_s18, [#allocation3], %s1972_s22, %s1972_s22, %s1973_s23  }
  0x15   : > { %1738 = dma.hbm_to_vmem [thread:$0]  (!%p1733_p12), %s234_s21, 16384, %s236_s8, [#allocation6], %s1975_s9, %s1975_s9, %s1976_s14  }
  0x16   : > { %270 = sbr.rel (%p2069_p10) target bundleno = 805 (0x325), region = 48 }
  0x1b   : > { %1944 = dma.done.wait (%p1743_p9), [#allocation3], 16384  }
  0x1c   : > { %1946 = vsyncadd (%p1743_p9), [#allocation3], 4294950912 }
  0x1d   : > { %1948 = dma.done.wait (%p1743_p9), [#allocation6], 16384  }
  0x1e   : > { %1950 = vsyncadd (%p1743_p9), [#allocation6], 4294950912  ;;  %v393_v0 = vld [vmem:[#allocation2 + $0x1e0] sm:$0xff]  ;;  %v394_v1 = vld [vmem:[#allocation2 + $0x1e8] sm:$0xff]  ;;  %s1710_s13 = sshll.u32 %s2041_s28, 3  ;;  %s306_s9 = sand.u32 1, %s1961_s25  }
  0x1f   : > { %v389_v2 = vld [vmem:[#allocation2 + $0x1c0] sm:$0xff]  ;;  %471 = vmatpush.msra.mxu0 %v393_v0  ;;  %553 = vmatpush.msra.mxu2 %v394_v1  ;;  %v390_v4 = vld [vmem:[#allocation2 + $0x1c8] sm:$0xff]  ;;  %p2096_p13 = scmp.lt.s32.totalorder %s1710_s13, 15  ;;  %v396_v63 = vld [vmem:[#allocation2 + $0x1f8] sm:$0xff]  ;;  %s1709_s15 = sshll.u32 %s306_s9, 7 }
  0x20   : > { %v457_v3 = vld [vmem:[#allocation2 + $0x3e0] sm:$0xff]  ;;  %v458_v5 = vld [vmem:[#allocation2 + $0x3e8] sm:$0xff]  ;;  %s1721_s17 = sshll.u32 %s2041_s28, 7  ;;  %s1601_s22 = scalar_lea.sflag [#allocation4], %s306_s9 }
  0x21   : > { %512 = vmatpush.msra.mxu1 %v457_v3  ;;  %594 = vmatpush.msra.mxu3 %v458_v5  ;;  %v385_v6 = vld [vmem:[#allocation2 + $0x1a0] sm:$0xff]  ;;  %v386_v8 = vld [vmem:[#allocation2 + $0x1a8] sm:$0xff]  ;;  %s2834_s13 = smov (!%p2096_p13, %s1710_s13), 15  ;;  %v395_v3 = vld [vmem:[#allocation2 + $0x1f0] sm:$0xff]  ;;  %s1613_s20 = scalar_lea.hbm %s2824_s7, %s1721_s17 }
  0x22   : > { %v453_v7 = vld [vmem:[#allocation2 + $0x3c0] sm:$0xff]  ;;  %472 = vmatpush.msra.mxu0 %v389_v2  ;;  %554 = vmatpush.msra.mxu2 %v390_v4  ;;  %v454_v9 = vld [vmem:[#allocation2 + $0x3c8] sm:$0xff]  ;;  %s1719_s16 = sshll.u32 %s2834_s13, 4  ;;  %v460_v4 = vld [vmem:[#allocation2 + $0x3f8] sm:$0xff]  ;;  %s1616_s21 = sshll.u32 %s1613_s20, 4  ;;  %s1617_s21 = int_to_ptr.hbm [resolvable:$true] %s1616_s21 }
  0x23   : > { %v449_v10 = vld [vmem:[#allocation2 + $0x3a0] sm:$0xff]  ;;  %513 = vmatpush.msra.mxu1 %v453_v7  ;;  %595 = vmatpush.msra.mxu3 %v454_v9  ;;  %v382_v12 = vld [vmem:[#allocation2 + $0x188] sm:$0xff]  ;;  %s2110_s19 = scalar_lea.vmem %s2817_s0, %s1719_s16  ;;  %v392_v5 = vld [vmem:[#allocation2 + $0x1d8] sm:$0xff]  ;;  %s2690_s16 = scalar_lea.vmem [#allocation7], %s1709_s15 }
  0x24   : > { %v381_v11 = vld [vmem:[#allocation2 + $0x180] sm:$0xff]  ;;  %v450_v13 = vld [vmem:[#allocation2 + $0x3a8] sm:$0xff]  ;;  %473 = vmatpush.msra.mxu0 %v385_v6  ;;  %555 = vmatpush.msra.mxu2 %v386_v8  ;;  %v459_v6 = vld [vmem:[#allocation2 + $0x3f0] sm:$0xff]  ;;  %s1614_s28 = sshll.u32 %s2690_s16, 4  ;;  %s1913_s23 = sshra.s32 %s1617_s21, 4  ;;  %s1615_s28 = int_to_ptr.vmem [resolvable:$true] %s1614_s28  ;;  %s1914_s23 = int_to_ptr.hbm [resolvable:$true] %s1913_s23 }
  0x25   : > { %v445_v14 = vld [vmem:[#allocation2 + $0x380] sm:$0xff]  ;;  %v446_v15 = vld [vmem:[#allocation2 + $0x388] sm:$0xff]  ;;  %514 = vmatpush.msra.mxu1 %v449_v10  ;;  %596 = vmatpush.msra.mxu3 %v450_v13  ;;  %v391_v7 = vld [vmem:[#allocation2 + $0x1d0] sm:$0xff]  ;;  %s1915_s29 = scalar_lea.hbm %s1914_s23, 128  ;;  %s1919_s13 = scalar_lea.hbm %s2824_s7, 256 }
  0x26   : > { %v377_v16 = vld [vmem:[#allocation2 + $0x160] sm:$0xff]  ;;  %v378_v17 = vld [vmem:[#allocation2 + $0x168] sm:$0xff]  ;;  %474 = vmatpush.msra.mxu0 %v381_v11  ;;  %556 = vmatpush.msra.mxu2 %v382_v12  ;;  %v456_v8 = vld [vmem:[#allocation2 + $0x3d8] sm:$0xff]  ;;  %p1916_p0 = scmp.ne.s32.totalorder %s1914_s23, %s1915_s29  ;;  %p1920_p3 = scmp.lt.s32.totalorder %s1914_s23, %s2824_s7 }
  0x27   : > { %v441_v18 = vld [vmem:[#allocation2 + $0x360] sm:$0xff]  ;;  %v442_v19 = vld [vmem:[#allocation2 + $0x368] sm:$0xff]  ;;  %515 = vmatpush.msra.mxu1 %v445_v14  ;;  %597 = vmatpush.msra.mxu3 %v446_v15  ;;  %v388_v9 = vld [vmem:[#allocation2 + $0x1b8] sm:$0xff]  ;;  %p1921_p4 = scmp.lt.s32.totalorder %s1919_s13, %s1915_s29 }
  0x28   : > { %v373_v20 = vld [vmem:[#allocation2 + $0x140] sm:$0xff]  ;;  %v374_v21 = vld [vmem:[#allocation2 + $0x148] sm:$0xff]  ;;  %475 = vmatpush.msra.mxu0 %v377_v16  ;;  %557 = vmatpush.msra.mxu2 %v378_v17  ;;  %v455_v10 = vld [vmem:[#allocation2 + $0x3d0] sm:$0xff]  ;;  %p1917_p1 = pnand %p1916_p0, %p2058_p5 }
  0x29   : > { %v437_v22 = vld [vmem:[#allocation2 + $0x340] sm:$0xff]  ;;  %v438_v23 = vld [vmem:[#allocation2 + $0x348] sm:$0xff]  ;;  %516 = vmatpush.msra.mxu1 %v441_v18  ;;  %598 = vmatpush.msra.mxu3 %v442_v19  ;;  %v387_v11 = vld [vmem:[#allocation2 + $0x1b0] sm:$0xff]  ;;  %p1922_p7 = por %p1921_p4, %p1920_p3 }
  0x2a   : > { %v369_v24 = vld [vmem:[#allocation2 + $0x120] sm:$0xff]  ;;  %v370_v25 = vld [vmem:[#allocation2 + $0x128] sm:$0xff]  ;;  %476 = vmatpush.msra.mxu0 %v373_v20  ;;  %558 = vmatpush.msra.mxu2 %v374_v21  ;;  %v2123_v12 = vld [vmem:[%s2110_s19 + $0x10] sm:$0xff]  ;;  %p1918_p2 = pneg %p1917_p1 }
  0x2b   : > { %v433_v26 = vld [vmem:[#allocation2 + $0x320] sm:$0xff]  ;;  %v434_v27 = vld [vmem:[#allocation2 + $0x328] sm:$0xff]  ;;  %517 = vmatpush.msra.mxu1 %v437_v22  ;;  %599 = vmatpush.msra.mxu3 %v438_v23  ;;  %v452_v13 = vld [vmem:[#allocation2 + $0x3b8] sm:$0xff] }
  0x2c   : > { %v365_v28 = vld [vmem:[#allocation2 + $0x100] sm:$0xff]  ;;  %v366_v29 = vld [vmem:[#allocation2 + $0x108] sm:$0xff]  ;;  %477 = vmatpush.msra.mxu0 %v369_v24  ;;  %559 = vmatpush.msra.mxu2 %v370_v25  ;;  %v384_v14 = vld [vmem:[#allocation2 + $0x198] sm:$0xff]  ;;  %p1923_p8 = pnand %p1922_p7, %p1918_p2 }
  0x2d   : > { %v429_v30 = vld [vmem:[#allocation2 + $0x300] sm:$0xff]  ;;  %v430_v31 = vld [vmem:[#allocation2 + $0x308] sm:$0xff]  ;;  %518 = vmatpush.msra.mxu1 %v433_v26  ;;  %600 = vmatpush.msra.mxu3 %v434_v27  ;;  %v2126_v15 = vld [vmem:[%s2110_s19 + $0x18] sm:$0xff] }
  0x2e   : > { %v361_v32 = vld [vmem:[#allocation2 + $0xe0] sm:$0xff]  ;;  %v362_v33 = vld [vmem:[#allocation2 + $0xe8] sm:$0xff]  ;;  %478 = vmatpush.msra.mxu0 %v365_v28  ;;  %560 = vmatpush.msra.mxu2 %v366_v29  ;;  %v383_v16 = vld [vmem:[#allocation2 + $0x190] sm:$0xff] }
  0x2f   : > { %v425_v34 = vld [vmem:[#allocation2 + $0x2e0] sm:$0xff]  ;;  %v426_v35 = vld [vmem:[#allocation2 + $0x2e8] sm:$0xff]  ;;  %519 = vmatpush.msra.mxu1 %v429_v30  ;;  %601 = vmatpush.msra.mxu3 %v430_v31  ;;  %v451_v17 = vld [vmem:[#allocation2 + $0x3b0] sm:$0xff] }
  0x30   : > { %v357_v36 = vld [vmem:[#allocation2 + $0xc0] sm:$0xff]  ;;  %v358_v37 = vld [vmem:[#allocation2 + $0xc8] sm:$0xff]  ;;  %479 = vmatpush.msra.mxu0 %v361_v32  ;;  %561 = vmatpush.msra.mxu2 %v362_v33  ;;  %v448_v18 = vld [vmem:[#allocation2 + $0x398] sm:$0xff] }
  0x31   : > { %v421_v38 = vld [vmem:[#allocation2 + $0x2c0] sm:$0xff]  ;;  %v422_v39 = vld [vmem:[#allocation2 + $0x2c8] sm:$0xff]  ;;  %520 = vmatpush.msra.mxu1 %v425_v34  ;;  %602 = vmatpush.msra.mxu3 %v426_v35  ;;  %v380_v19 = vld [vmem:[#allocation2 + $0x178] sm:$0xff] }
  0x32   : > { %v353_v40 = vld [vmem:[#allocation2 + $0xa0] sm:$0xff]  ;;  %v354_v41 = vld [vmem:[#allocation2 + $0xa8] sm:$0xff]  ;;  %480 = vmatpush.msra.mxu0 %v357_v36  ;;  %562 = vmatpush.msra.mxu2 %v358_v37  ;;  %v447_v20 = vld [vmem:[#allocation2 + $0x390] sm:$0xff] }
  0x33   : > { %v417_v42 = vld [vmem:[#allocation2 + $0x2a0] sm:$0xff]  ;;  %v418_v43 = vld [vmem:[#allocation2 + $0x2a8] sm:$0xff]  ;;  %521 = vmatpush.msra.mxu1 %v421_v38  ;;  %603 = vmatpush.msra.mxu3 %v422_v39  ;;  %v379_v21 = vld [vmem:[#allocation2 + $0x170] sm:$0xff] }
  0x34   : > { %v349_v44 = vld [vmem:[#allocation2 + $0x80] sm:$0xff]  ;;  %v350_v45 = vld [vmem:[#allocation2 + $0x88] sm:$0xff]  ;;  %481 = vmatpush.msra.mxu0 %v353_v40  ;;  %563 = vmatpush.msra.mxu2 %v354_v41  ;;  %v444_v22 = vld [vmem:[#allocation2 + $0x378] sm:$0xff] }
  0x35   : > { %v413_v46 = vld [vmem:[#allocation2 + $0x280] sm:$0xff]  ;;  %v414_v47 = vld [vmem:[#allocation2 + $0x288] sm:$0xff]  ;;  %522 = vmatpush.msra.mxu1 %v417_v42  ;;  %604 = vmatpush.msra.mxu3 %v418_v43  ;;  %v376_v23 = vld [vmem:[#allocation2 + $0x158] sm:$0xff] }
  0x36   : > { %v345_v48 = vld [vmem:[#allocation2 + $0x60] sm:$0xff]  ;;  %v346_v49 = vld [vmem:[#allocation2 + $0x68] sm:$0xff]  ;;  %482 = vmatpush.msra.mxu0 %v349_v44  ;;  %564 = vmatpush.msra.mxu2 %v350_v45  ;;  %v443_v24 = vld [vmem:[#allocation2 + $0x370] sm:$0xff] }
  0x37   : > { %v409_v50 = vld [vmem:[#allocation2 + $0x260] sm:$0xff]  ;;  %v410_v51 = vld [vmem:[#allocation2 + $0x268] sm:$0xff]  ;;  %523 = vmatpush.msra.mxu1 %v413_v46  ;;  %605 = vmatpush.msra.mxu3 %v414_v47  ;;  %v375_v25 = vld [vmem:[#allocation2 + $0x150] sm:$0xff] }
  0x38   : > { %v341_v52 = vld [vmem:[#allocation2 + $0x40] sm:$0xff]  ;;  %v342_v53 = vld [vmem:[#allocation2 + $0x48] sm:$0xff]  ;;  %483 = vmatpush.msra.mxu0 %v345_v48  ;;  %565 = vmatpush.msra.mxu2 %v346_v49  ;;  %v440_v27 = vld [vmem:[#allocation2 + $0x358] sm:$0xff] }
  0x39   : > { %v405_v54 = vld [vmem:[#allocation2 + $0x240] sm:$0xff]  ;;  %v406_v55 = vld [vmem:[#allocation2 + $0x248] sm:$0xff]  ;;  %524 = vmatpush.msra.mxu1 %v409_v50  ;;  %606 = vmatpush.msra.mxu3 %v410_v51  ;;  %v372_v28 = vld [vmem:[#allocation2 + $0x138] sm:$0xff] }
  0x3a   : > { %v337_v56 = vld [vmem:[#allocation2 + $0x20] sm:$0xff]  ;;  %v338_v57 = vld [vmem:[#allocation2 + $0x28] sm:$0xff]  ;;  %484 = vmatpush.msra.mxu0 %v341_v52  ;;  %566 = vmatpush.msra.mxu2 %v342_v53  ;;  %v371_v30 = vld [vmem:[#allocation2 + $0x130] sm:$0xff] }
  0x3b   : > { %v401_v58 = vld [vmem:[#allocation2 + $0x220] sm:$0xff]  ;;  %v402_v59 = vld [vmem:[#allocation2 + $0x228] sm:$0xff]  ;;  %525 = vmatpush.msra.mxu1 %v405_v54  ;;  %607 = vmatpush.msra.mxu3 %v406_v55  ;;  %v439_v31 = vld [vmem:[#allocation2 + $0x350] sm:$0xff] }
  0x3c   : > { %v333_v60 = vld [vmem:[#allocation2] sm:$0xff]  ;;  %v334_v61 = vld [vmem:[#allocation2 + $0x8] sm:$0xff]  ;;  %485 = vmatpush.msra.mxu0 %v337_v56  ;;  %567 = vmatpush.msra.mxu2 %v338_v57  ;;  %v436_v32 = vld [vmem:[#allocation2 + $0x338] sm:$0xff] }
  0x3d   : > { %v2113_v62 = vld [vmem:[%s2110_s19] sm:$0xff]  ;;  %526 = vmatpush.msra.mxu1 %v401_v58  ;;  %608 = vmatpush.msra.mxu3 %v402_v59  ;;  %v398_v1 = vld [vmem:[#allocation2 + $0x208] sm:$0xff]  ;;  %v368_v33 = vld [vmem:[#allocation2 + $0x118] sm:$0xff] }
  0x3e   : > { %v397_v0 = vld [vmem:[#allocation2 + $0x200] sm:$0xff]  ;;  %486 = vmatpush.msra.mxu0 %v333_v60  ;;  %568 = vmatpush.msra.mxu2 %v334_v61  ;;  %v2116_v2 = vld [vmem:[%s2110_s19 + $0x8] sm:$0xff]  ;;  %v435_v34 = vld [vmem:[#allocation2 + $0x330] sm:$0xff] }
  0x3f   : > { %487 = vmatmul.f32.vlgmr.msra.gmra.mxu0 %v2113_v62  ;;  %569 = vmatmul.f32.vlgmr.msra.gmra.mxu2 %v2113_v62  ;;  %v2133_v26 = vld [vmem:[%s2110_s19 + $0x20] sm:$0xff]  ;;  %v2136_v29 = vld [vmem:[%s2110_s19 + $0x28] sm:$0xff]  ;;  %v367_v35 = vld [vmem:[#allocation2 + $0x110] sm:$0xff] }
  0x40   : > { %717 = vmatpush.msrb.mxu2 %v396_v63  ;;  %527 = vmatpush.msra.mxu1 %v397_v0  ;;  %v432_v36 = vld [vmem:[#allocation2 + $0x318] sm:$0xff]  ;;  %v431_v38 = vld [vmem:[#allocation2 + $0x310] sm:$0xff]  ;;  %v2153_v54 = vld [vmem:[%s2110_s19 + $0x40] sm:$0xff] }
  0x41   : > { %609 = vmatpush.msra.mxu3 %v398_v1  ;;  %528 = vmatmul.f32.vlgmr.msra.gmra.mxu1 %v2116_v2  ;;  %v364_v37 = vld [vmem:[#allocation2 + $0xf8] sm:$0xff]  ;;  %v363_v39 = vld [vmem:[#allocation2 + $0xf0] sm:$0xff]  ;;  %v2156_v57 = vld [vmem:[%s2110_s19 + $0x48] sm:$0xff] }
  0x42   : > { %610 = vmatmul.f32.vlgmr.msra.gmra.mxu3 %v2116_v2  ;;  %635 = vmatpush.msrb.mxu0 %v395_v3  ;;  %v2143_v40 = vld [vmem:[%s2110_s19 + $0x30] sm:$0xff]  ;;  %v428_v41 = vld [vmem:[#allocation2 + $0x2f8] sm:$0xff] }
  0x43   : > { %758 = vmatpush.msrb.mxu3 %v460_v4  ;;  %718 = vmatpush.msrb.mxu2 %v392_v5  ;;  %v360_v42 = vld [vmem:[#allocation2 + $0xd8] sm:$0xff]  ;;  %v359_v44 = vld [vmem:[#allocation2 + $0xd0] sm:$0xff] }
  0x44   : > { %676 = vmatpush.msrb.mxu1 %v459_v6  ;;  %636 = vmatpush.msrb.mxu0 %v391_v7  ;;  %v2146_v43 = vld [vmem:[%s2110_s19 + $0x38] sm:$0xff]  ;;  %v427_v45 = vld [vmem:[#allocation2 + $0x2f0] sm:$0xff] }
  0x45   : > { %759 = vmatpush.msrb.mxu3 %v456_v8  ;;  %719 = vmatpush.msrb.mxu2 %v388_v9  ;;  %v424_v46 = vld [vmem:[#allocation2 + $0x2d8] sm:$0xff]  ;;  %v423_v48 = vld [vmem:[#allocation2 + $0x2d0] sm:$0xff] }
  0x46   : > { %677 = vmatpush.msrb.mxu1 %v455_v10  ;;  %637 = vmatpush.msrb.mxu0 %v387_v11  ;;  %v356_v47 = vld [vmem:[#allocation2 + $0xb8] sm:$0xff]  ;;  %v355_v49 = vld [vmem:[#allocation2 + $0xb0] sm:$0xff] }
  0x47   : > { %490 = vmatmul.f32.gmra.mxu0 %v2123_v12  ;;  %572 = vmatmul.f32.gmra.mxu2 %v2123_v12  ;;  %v420_v50 = vld [vmem:[#allocation2 + $0x2b8] sm:$0xff]  ;;  %v419_v52 = vld [vmem:[#allocation2 + $0x2b0] sm:$0xff] }
  0x48   : > { %760 = vmatpush.msrb.mxu3 %v452_v13  ;;  %720 = vmatpush.msrb.mxu2 %v384_v14  ;;  %v352_v51 = vld [vmem:[#allocation2 + $0x98] sm:$0xff]  ;;  %v351_v53 = vld [vmem:[#allocation2 + $0x90] sm:$0xff] }
  0x49   : > { %531 = vmatmul.f32.gmra.mxu1 %v2126_v15  ;;  %638 = vmatpush.msrb.mxu0 %v383_v16  ;;  %v416_v55 = vld [vmem:[#allocation2 + $0x298] sm:$0xff]  ;;  %v347_v58 = vld [vmem:[#allocation2 + $0x70] sm:$0xff]  ;;  %v2173_v16 = vld [vmem:[%s2110_s19 + $0x60] sm:$0xff] }
  0x4a   : > { %613 = vmatmul.f32.gmra.mxu3 %v2126_v15  ;;  %678 = vmatpush.msrb.mxu1 %v451_v17  ;;  %v348_v56 = vld [vmem:[#allocation2 + $0x78] sm:$0xff]  ;;  %v415_v59 = vld [vmem:[#allocation2 + $0x290] sm:$0xff]  ;;  %v2176_v17 = vld [vmem:[%s2110_s19 + $0x68] sm:$0xff] }
  0x4b   : > { %761 = vmatpush.msrb.mxu3 %v448_v18  ;;  %721 = vmatpush.msrb.mxu2 %v380_v19  ;;  %v412_v60 = vld [vmem:[#allocation2 + $0x278] sm:$0xff]  ;;  %v411_v63 = vld [vmem:[#allocation2 + $0x270] sm:$0xff] }
  0x4c   : > { %679 = vmatpush.msrb.mxu1 %v447_v20  ;;  %639 = vmatpush.msrb.mxu0 %v379_v21  ;;  %v344_v61 = vld [vmem:[#allocation2 + $0x58] sm:$0xff]  ;;  %v343_v0 = vld [vmem:[#allocation2 + $0x50] sm:$0xff]  ;;  %v859_v21 = vld [vmem:[#allocation5 + $0xe0] sm:$0xff] }
  0x4d   : > { %762 = vmatpush.msrb.mxu3 %v444_v22  ;;  %722 = vmatpush.msrb.mxu2 %v376_v23  ;;  %v408_v1 = vld [vmem:[#allocation2 + $0x258] sm:$0xff]  ;;  %v407_v4 = vld [vmem:[#allocation2 + $0x250] sm:$0xff]  ;;  %v855_v23 = vld [vmem:[#allocation5 + $0xc0] sm:$0xff] }
  0x4e   : > { %680 = vmatpush.msrb.mxu1 %v443_v24  ;;  %640 = vmatpush.msrb.mxu0 %v375_v25  ;;  %v340_v3 = vld [vmem:[#allocation2 + $0x38] sm:$0xff]  ;;  %v339_v5 = vld [vmem:[#allocation2 + $0x30] sm:$0xff]  ;;  %v851_v25 = vld [vmem:[#allocation5 + $0xa0] sm:$0xff] }
  0x4f   : > { %493 = vmatmul.f32.gmra.mxu0 %v2133_v26  ;;  %575 = vmatmul.f32.gmra.mxu2 %v2133_v26  ;;  %v2163_v6 = vld [vmem:[%s2110_s19 + $0x50] sm:$0xff]  ;;  %v404_v7 = vld [vmem:[#allocation2 + $0x238] sm:$0xff] }
  0x50   : > { %763 = vmatpush.msrb.mxu3 %v440_v27  ;;  %723 = vmatpush.msrb.mxu2 %v372_v28  ;;  %v336_v8 = vld [vmem:[#allocation2 + $0x18] sm:$0xff]  ;;  %v335_v10 = vld [vmem:[#allocation2 + $0x10] sm:$0xff]  ;;  %v887_v28 = vld [vmem:[#allocation5 + $0x1c0] sm:$0xff] }
  0x51   : > { %534 = vmatmul.f32.gmra.mxu1 %v2136_v29  ;;  %641 = vmatpush.msrb.mxu0 %v371_v30  ;;  %v2166_v9 = vld [vmem:[%s2110_s19 + $0x58] sm:$0xff]  ;;  %v403_v11 = vld [vmem:[#allocation2 + $0x230] sm:$0xff] }
  0x52   : > { %616 = vmatmul.f32.gmra.mxu3 %v2136_v29  ;;  %681 = vmatpush.msrb.mxu1 %v439_v31  ;;  %v400_v13 = vld [vmem:[#allocation2 + $0x218] sm:$0xff]  ;;  %v399_v14 = vld [vmem:[#allocation2 + $0x210] sm:$0xff] }
  0x53   : > { %764 = vmatpush.msrb.mxu3 %v436_v32  ;;  %724 = vmatpush.msrb.mxu2 %v368_v33  ;;  %v2183_v18 = vld [vmem:[%s2110_s19 + $0x70] sm:$0xff]  ;;  %v2186_v19 = vld [vmem:[%s2110_s19 + $0x78] sm:$0xff]  ;;  %v883_v32 = vld [vmem:[#allocation5 + $0x1a0] sm:$0xff] }
  0x54   : > { %682 = vmatpush.msrb.mxu1 %v435_v34  ;;  %642 = vmatpush.msrb.mxu0 %v367_v35  ;;  %v861_v20 = vld [vmem:[#allocation5 + $0xf0] sm:$0xff]  ;;  %v843_v33 = vld [vmem:[#allocation5 + $0x60] sm:$0xff] }
  0x55   : > { %765 = vmatpush.msrb.mxu3 %v432_v36  ;;  %725 = vmatpush.msrb.mxu2 %v364_v37  ;;  %v857_v22 = vld [vmem:[#allocation5 + $0xd0] sm:$0xff]  ;;  %v839_v35 = vld [vmem:[#allocation5 + $0x40] sm:$0xff] }
  0x56   : > { %683 = vmatpush.msrb.mxu1 %v431_v38  ;;  %643 = vmatpush.msrb.mxu0 %v363_v39  ;;  %v853_v24 = vld [vmem:[#allocation5 + $0xb0] sm:$0xff]  ;;  %v875_v38 = vld [vmem:[#allocation5 + $0x160] sm:$0xff] }
  0x57   : > { %496 = vmatmul.f32.gmra.mxu0 %v2143_v40  ;;  %578 = vmatmul.f32.gmra.mxu2 %v2143_v40  ;;  %v889_v27 = vld [vmem:[#allocation5 + $0x1d0] sm:$0xff]  ;;  %v835_v39 = vld [vmem:[#allocation5 + $0x20] sm:$0xff] }
  0x58   : > { %766 = vmatpush.msrb.mxu3 %v428_v41  ;;  %726 = vmatpush.msrb.mxu2 %v360_v42  ;;  %v885_v30 = vld [vmem:[#allocation5 + $0x1b0] sm:$0xff]  ;;  %v871_v42 = vld [vmem:[#allocation5 + $0x140] sm:$0xff] }
  0x59   : > { %537 = vmatmul.f32.gmra.mxu1 %v2146_v43  ;;  %644 = vmatpush.msrb.mxu0 %v359_v44  ;;  %v845_v31 = vld [vmem:[#allocation5 + $0x70] sm:$0xff] }
  0x5a   : > { %619 = vmatmul.f32.gmra.mxu3 %v2146_v43  ;;  %684 = vmatpush.msrb.mxu1 %v427_v45  ;;  %v841_v34 = vld [vmem:[#allocation5 + $0x50] sm:$0xff]  ;;  %v867_v45 = vld [vmem:[#allocation5 + $0x120] sm:$0xff] }
  0x5b   : > { %767 = vmatpush.msrb.mxu3 %v424_v46  ;;  %727 = vmatpush.msrb.mxu2 %v356_v47  ;;  %v877_v36 = vld [vmem:[#allocation5 + $0x170] sm:$0xff] }
  0x5c   : > { %685 = vmatpush.msrb.mxu1 %v423_v48  ;;  %645 = vmatpush.msrb.mxu0 %v355_v49  ;;  %v837_v37 = vld [vmem:[#allocation5 + $0x30] sm:$0xff]  ;;  %v863_v49 = vld [vmem:[#allocation5 + $0x100] sm:$0xff] }
  0x5d   : > { %768 = vmatpush.msrb.mxu3 %v420_v50  ;;  %728 = vmatpush.msrb.mxu2 %v352_v51  ;;  %v833_v41 = vld [vmem:[#allocation5 + $0x10] sm:$0xff]  ;;  %v923_v50 = vld [vmem:[#allocation5 + $0x2e0] sm:$0xff] }
  0x5e   : > { %686 = vmatpush.msrb.mxu1 %v419_v52  ;;  %646 = vmatpush.msrb.mxu0 %v351_v53  ;;  %v869_v44 = vld [vmem:[#allocation5 + $0x130] sm:$0xff]  ;;  %v955_v51 = vld [vmem:[#allocation5 + $0x3e0] sm:$0xff] }
  0x5f   : > { %499 = vmatmul.f32.gmra.mxu0 %v2153_v54  ;;  %581 = vmatmul.f32.gmra.mxu2 %v2153_v54  ;;  %v925_v46 = vld [vmem:[#allocation5 + $0x2f0] sm:$0xff] }
  0x60   : > { %769 = vmatpush.msrb.mxu3 %v416_v55  ;;  %729 = vmatpush.msrb.mxu2 %v348_v56  ;;  %v865_v47 = vld [vmem:[#allocation5 + $0x110] sm:$0xff]  ;;  %v2223_v55 = vld [vmem:[%s2819_s2] sm:$0xf] }
  0x61   : > { %540 = vmatmul.f32.gmra.mxu1 %v2156_v57  ;;  %647 = vmatpush.msrb.mxu0 %v347_v58  ;;  %v957_v48 = vld [vmem:[#allocation5 + $0x3f0] sm:$0xff]  ;;  %v951_v56 = vld [vmem:[#allocation5 + $0x3c0] sm:$0xff]  ;;  %v2229_v58 = vperm.slane %v2223_v55, 0 }
  0x62   : > { %622 = vmatmul.f32.gmra.mxu3 %v2156_v57  ;;  %687 = vmatpush.msrb.mxu1 %v415_v59  ;;  %v921_v52 = vld [vmem:[#allocation5 + $0x2d0] sm:$0xff] }
  0x63   : > { %770 = vmatpush.msrb.mxu3 %v412_v60  ;;  %730 = vmatpush.msrb.mxu2 %v344_v61  ;;  %v953_v53 = vld [vmem:[#allocation5 + $0x3d0] sm:$0xff]  ;;  %v915_v60 = vld [vmem:[#allocation5 + $0x2a0] sm:$0xff] }
  0x64   : > { %688 = vmatpush.msrb.mxu1 %v411_v63  ;;  %648 = vmatpush.msrb.mxu0 %v343_v0  ;;  %v949_v59 = vld [vmem:[#allocation5 + $0x3b0] sm:$0xff] }
  0x65   : > { %771 = vmatpush.msrb.mxu3 %v408_v1  ;;  %731 = vmatpush.msrb.mxu2 %v340_v3  ;;  %v947_v1 = vld [vmem:[#allocation5 + $0x3a0] sm:$0xff] }
  0x66   : > { %689 = vmatpush.msrb.mxu1 %v407_v4  ;;  %649 = vmatpush.msrb.mxu0 %v339_v5  ;;  %v2236_v4 = vperm.slane %v2223_v55, 1  ;;  %v913_v5 = vld [vmem:[#allocation5 + $0x290] sm:$0xff] }
  0x67   : > { %502 = vmatmul.f32.gmra.mxu0 %v2163_v6  ;;  %584 = vmatmul.f32.gmra.mxu2 %v2163_v6 }
  0x68   : > { %772 = vmatpush.msrb.mxu3 %v404_v7  ;;  %732 = vmatpush.msrb.mxu2 %v336_v8  ;;  %v945_v8 = vld [vmem:[#allocation5 + $0x390] sm:$0xff] }
  0x69   : > { %543 = vmatmul.f32.gmra.mxu1 %v2166_v9  ;;  %650 = vmatpush.msrb.mxu0 %v335_v10  ;;  %v911_v10 = vld [vmem:[#allocation5 + $0x280] sm:$0xff] }
  0x6a   : > { %625 = vmatmul.f32.gmra.mxu3 %v2166_v9  ;;  %690 = vmatpush.msrb.mxu1 %v403_v11 }
  0x6b   : > { %773 = vmatpush.msrb.mxu3 %v400_v13  ;;  %965 = vmatpush.msra.mxu0 %v861_v20  ;;  %v862_v13 = vld [vmem:[#allocation5 + $0xf8] sm:$0xff]  ;;  %v860_v20 = vld [vmem:[#allocation5 + $0xe8] sm:$0xff] }
  0x6c   : > { %691 = vmatpush.msrb.mxu1 %v399_v14  ;;  %1047 = vmatpush.msra.mxu2 %v925_v46  ;;  %v848_v46 = vld [vmem:[#allocation5 + $0x88] sm:$0xff] }
  0x6d   : > { %966 = vmatpush.msra.mxu0 %v859_v21  ;;  %1088 = vmatpush.msra.mxu3 %v957_v48 }
  0x6e   : > { %1048 = vmatpush.msra.mxu2 %v923_v50 }
  0x6f   : > { %505 = vmatmul.f32.gmra.mxu0 %v2173_v16  ;;  %587 = vmatmul.f32.gmra.mxu2 %v2173_v16 }
  0x70   : > { %967 = vmatpush.msra.mxu0 %v857_v22  ;;  %1089 = vmatpush.msra.mxu3 %v955_v51  ;;  %v909_v22 = vld [vmem:[#allocation5 + $0x270] sm:$0xff]  ;;  %v846_v51 = vld [vmem:[#allocation5 + $0x78] sm:$0xff] }
  0x71   : > { %546 = vmatmul.f32.gmra.mxu1 %v2176_v17  ;;  %1049 = vmatpush.msra.mxu2 %v921_v52  ;;  %v884_v52 = vld [vmem:[#allocation5 + $0x1a8] sm:$0xff] }
  0x72   : > { %628 = vmatmul.f32.gmra.mxu3 %v2176_v17  ;;  %968 = vmatpush.msra.mxu0 %v855_v23  ;;  %v858_v23 = vld [vmem:[#allocation5 + $0xd8] sm:$0xff] }
  0x73   : > { %1090 = vmatpush.msra.mxu3 %v953_v53 }
  0x74   : > { %969 = vmatpush.msra.mxu0 %v853_v24 }
  0x75   : > { %1091 = vmatpush.msra.mxu3 %v951_v56 }
  0x76   : > { %970 = vmatpush.msra.mxu0 %v851_v25  ;;  %v941_v25 = vld [vmem:[#allocation5 + $0x370] sm:$0xff] }
  0x77   : > { %508 = vmatmul.f32.gmra.mxu0 %v2183_v18  ;;  %590 = vmatmul.f32.gmra.mxu2 %v2183_v18 }
  0x78   : > { %1092 = vmatpush.msra.mxu3 %v949_v59  ;;  %v935_v59 = vld [vmem:[#allocation5 + $0x340] sm:$0xff] }
  0x79   : > { %549 = vmatmul.f32.gmra.mxu1 %v2186_v19 }
  0x7a   : > { %631 = vmatmul.f32.gmra.mxu3 %v2186_v19 }
  0x7b   : > { %1093 = vmatpush.msra.mxu3 %v947_v1  ;;  %v842_v1 = vld [vmem:[#allocation5 + $0x58] sm:$0xff] }
  0x7d   : > { %1094 = vmatpush.msra.mxu3 %v945_v8 }
  0x7f   : > { %651 = vmatmul.f32.vlgmr.msrb.gmra.mxu0 %v2113_v62  ;;  %733 = vmatmul.f32.vlgmr.msrb.gmra.mxu2 %v2113_v62  ;;  %v893_v62 = vld [vmem:[#allocation5 + $0x1f0] sm:$0xff] }
  0x80   : > { %1006 = vmatpush.msra.mxu1 %v893_v62 }
  0x81   : > { %692 = vmatmul.f32.vlgmr.msrb.gmra.mxu1 %v2116_v2 }
  0x82   : > { %774 = vmatmul.f32.vlgmr.msrb.gmra.mxu3 %v2116_v2  ;;  %v891_v2 = vld [vmem:[#allocation5 + $0x1e0] sm:$0xff] }
  0x83   : > { %1007 = vmatpush.msra.mxu1 %v891_v2 }
  0x85   : > { %1008 = vmatpush.msra.mxu1 %v889_v27  ;;  %v856_v27 = vld [vmem:[#allocation5 + $0xc8] sm:$0xff] }
  0x87   : > { %654 = vmatmul.f32.gmra.mxu0 %v2123_v12  ;;  %736 = vmatmul.f32.gmra.mxu2 %v2123_v12  ;;  %v849_v12 = vld [vmem:[#allocation5 + $0x90] sm:$0xff] }
  0x88   : > { %971 = vmatpush.msra.mxu0 %v849_v12  ;;  %1009 = vmatpush.msra.mxu1 %v887_v28  ;;  %v894_v12 = vld [vmem:[#allocation5 + $0x1f8] sm:$0xff] }
  0x89   : > { %695 = vmatmul.f32.gmra.mxu1 %v2126_v15 }
  0x8a   : > { %777 = vmatmul.f32.gmra.mxu3 %v2126_v15  ;;  %v847_v15 = vld [vmem:[#allocation5 + $0x80] sm:$0xff]  ;;  %1010 = vmatpush.msra.mxu1 %v885_v30 }
  0x8b   : > { %972 = vmatpush.msra.mxu0 %v847_v15  ;;  %v907_v15 = vld [vmem:[#allocation5 + $0x260] sm:$0xff] }
  0x8c   : > { %1011 = vmatpush.msra.mxu1 %v883_v32  ;;  %v892_v32 = vld [vmem:[#allocation5 + $0x1e8] sm:$0xff] }
  0x8d   : > { %973 = vmatpush.msra.mxu0 %v845_v31  ;;  %v854_v31 = vld [vmem:[#allocation5 + $0xb8] sm:$0xff] }
  0x8f   : > { %657 = vmatmul.f32.gmra.mxu0 %v2133_v26  ;;  %739 = vmatmul.f32.gmra.mxu2 %v2133_v26  ;;  %v881_v26 = vld [vmem:[#allocation5 + $0x190] sm:$0xff] }
  0x90   : > { %974 = vmatpush.msra.mxu0 %v843_v33  ;;  %1012 = vmatpush.msra.mxu1 %v881_v26 }
  0x91   : > { %698 = vmatmul.f32.gmra.mxu1 %v2136_v29 }
  0x92   : > { %780 = vmatmul.f32.gmra.mxu3 %v2136_v29  ;;  %v879_v29 = vld [vmem:[#allocation5 + $0x180] sm:$0xff]  ;;  %975 = vmatpush.msra.mxu0 %v841_v34 }
  0x93   : > { %1013 = vmatpush.msra.mxu1 %v879_v29 }
  0x94   : > { %976 = vmatpush.msra.mxu0 %v839_v35  ;;  %v939_v35 = vld [vmem:[#allocation5 + $0x360] sm:$0xff] }
  0x95   : > { %1014 = vmatpush.msra.mxu1 %v877_v36  ;;  %v852_v36 = vld [vmem:[#allocation5 + $0xa8] sm:$0xff] }
  0x96   : > { %977 = vmatpush.msra.mxu0 %v837_v37  ;;  %v890_v37 = vld [vmem:[#allocation5 + $0x1d8] sm:$0xff] }
  0x97   : > { %660 = vmatmul.f32.gmra.mxu0 %v2143_v40  ;;  %742 = vmatmul.f32.gmra.mxu2 %v2143_v40  ;;  %v873_v40 = vld [vmem:[#allocation5 + $0x150] sm:$0xff] }
  0x98   : > { %1015 = vmatpush.msra.mxu1 %v875_v38  ;;  %978 = vmatpush.msra.mxu0 %v835_v39  ;;  %v905_v39 = vld [vmem:[#allocation5 + $0x250] sm:$0xff] }
  0x99   : > { %701 = vmatmul.f32.gmra.mxu1 %v2146_v43 }
  0x9a   : > { %783 = vmatmul.f32.gmra.mxu3 %v2146_v43  ;;  %1016 = vmatpush.msra.mxu1 %v873_v40  ;;  %v831_v43 = vld [vmem:[#allocation5] sm:$0xff]  ;;  %v850_v40 = vld [vmem:[#allocation5 + $0x98] sm:$0xff] }
  0x9b   : > { %979 = vmatpush.msra.mxu0 %v833_v41 }
  0x9c   : > { %1017 = vmatpush.msra.mxu1 %v871_v42  ;;  %v888_v42 = vld [vmem:[#allocation5 + $0x1c8] sm:$0xff] }
  0x9d   : > { %980 = vmatpush.msra.mxu0 %v831_v43 }
  0x9e   : > { %1018 = vmatpush.msra.mxu1 %v869_v44 }
  0x9f   : > { %663 = vmatmul.f32.gmra.mxu0 %v2153_v54  ;;  %745 = vmatmul.f32.gmra.mxu2 %v2153_v54  ;;  %v919_v54 = vld [vmem:[#allocation5 + $0x2c0] sm:$0xff] }
  0xa0   : > { %1019 = vmatpush.msra.mxu1 %v867_v45  ;;  %1050 = vmatpush.msra.mxu2 %v919_v54  ;;  %v937_v45 = vld [vmem:[#allocation5 + $0x350] sm:$0xff] }
  0xa1   : > { %704 = vmatmul.f32.gmra.mxu1 %v2156_v57  ;;  %1129 = vmatpush.msrb.mxu0 %v862_v13  ;;  %v878_v13 = vld [vmem:[#allocation5 + $0x178] sm:$0xff] }
  0xa2   : > { %786 = vmatmul.f32.gmra.mxu3 %v2156_v57  ;;  %1020 = vmatpush.msra.mxu1 %v865_v47  ;;  %v917_v57 = vld [vmem:[#allocation5 + $0x2b0] sm:$0xff]  ;;  %v886_v47 = vld [vmem:[#allocation5 + $0x1b8] sm:$0xff] }
  0xa3   : > { %1051 = vmatpush.msra.mxu2 %v917_v57  ;;  %1130 = vmatpush.msrb.mxu0 %v860_v20  ;;  %v876_v20 = vld [vmem:[#allocation5 + $0x168] sm:$0xff] }
  0xa4   : > { %1021 = vmatpush.msra.mxu1 %v863_v49  ;;  %v903_v49 = vld [vmem:[#allocation5 + $0x240] sm:$0xff] }
  0xa5   : > { %1052 = vmatpush.msra.mxu2 %v915_v60  ;;  %1131 = vmatpush.msrb.mxu0 %v858_v23  ;;  %v844_v60 = vld [vmem:[#allocation5 + $0x68] sm:$0xff] }
  0xa6   : > { %1170 = vmatpush.msrb.mxu1 %v894_v12  ;;  %v836_v12 = vld [vmem:[#allocation5 + $0x28] sm:$0xff] }
  0xa7   : > { %666 = vmatmul.f32.gmra.mxu0 %v2163_v6  ;;  %748 = vmatmul.f32.gmra.mxu2 %v2163_v6 }
  0xa8   : > { %1053 = vmatpush.msra.mxu2 %v913_v5  ;;  %1132 = vmatpush.msrb.mxu0 %v856_v27  ;;  %v931_v27 = vld [vmem:[#allocation5 + $0x320] sm:$0xff] }
  0xa9   : > { %707 = vmatmul.f32.gmra.mxu1 %v2166_v9 }
  0xaa   : > { %789 = vmatmul.f32.gmra.mxu3 %v2166_v9  ;;  %1054 = vmatpush.msra.mxu2 %v911_v10  ;;  %v933_v10 = vld [vmem:[#allocation5 + $0x330] sm:$0xff] }
  0xab   : > { %1133 = vmatpush.msrb.mxu0 %v854_v31  ;;  %1171 = vmatpush.msrb.mxu1 %v892_v32  ;;  %v897_v31 = vld [vmem:[#allocation5 + $0x210] sm:$0xff]  ;;  %v834_v32 = vld [vmem:[#allocation5 + $0x18] sm:$0xff] }
  0xac   : > { %1055 = vmatpush.msra.mxu2 %v909_v22 }
  0xad   : > { %1134 = vmatpush.msrb.mxu0 %v852_v36  ;;  %1172 = vmatpush.msrb.mxu1 %v890_v37  ;;  %v895_v36 = vld [vmem:[#allocation5 + $0x200] sm:$0xff]  ;;  %v832_v37 = vld [vmem:[#allocation5 + $0x8] sm:$0xff] }
  0xae   : > { %1056 = vmatpush.msra.mxu2 %v907_v15 }
  0xaf   : > { %669 = vmatmul.f32.gmra.mxu0 %v2173_v16  ;;  %751 = vmatmul.f32.gmra.mxu2 %v2173_v16 }
  0xb0   : > { %1057 = vmatpush.msra.mxu2 %v905_v39  ;;  %1135 = vmatpush.msrb.mxu0 %v850_v40  ;;  %v870_v40 = vld [vmem:[#allocation5 + $0x138] sm:$0xff] }
  0xb1   : > { %710 = vmatmul.f32.gmra.mxu1 %v2176_v17 }
  0xb2   : > { %792 = vmatmul.f32.gmra.mxu3 %v2176_v17  ;;  %1173 = vmatpush.msrb.mxu1 %v888_v42 }
  0xb3   : > { %1136 = vmatpush.msrb.mxu0 %v848_v46  ;;  %1058 = vmatpush.msra.mxu2 %v903_v49  ;;  %v866_v49 = vld [vmem:[#allocation5 + $0x118] sm:$0xff] }
  0xb4   : > { %1174 = vmatpush.msrb.mxu1 %v886_v47 }
  0xb5   : > { %1137 = vmatpush.msrb.mxu0 %v846_v51 }
  0xb6   : > { %1175 = vmatpush.msrb.mxu1 %v884_v52  ;;  %v927_v52 = vld [vmem:[#allocation5 + $0x300] sm:$0xff] }
  0xb7   : > { %672 = vmatmul.f32.gmra.mxu0 %v2183_v18  ;;  %754 = vmatmul.f32.gmra.mxu2 %v2183_v18 }
  0xb8   : > { %1138 = vmatpush.msrb.mxu0 %v844_v60  ;;  %v958_v60 = vld [vmem:[#allocation5 + $0x3f8] sm:$0xff] }
  0xb9   : > { %713 = vmatmul.f32.gmra.mxu1 %v2186_v19 }
  0xba   : > { %795 = vmatmul.f32.gmra.mxu3 %v2186_v19  ;;  %v943_v19 = vld [vmem:[#allocation5 + $0x380] sm:$0xff]  ;;  %1139 = vmatpush.msrb.mxu0 %v842_v1 }
  0xbb   : > { %1095 = vmatpush.msra.mxu3 %v943_v19  ;;  %v838_v19 = vld [vmem:[#allocation5 + $0x38] sm:$0xff] }
  0xbc   : > { %v488_v61 = vpop.f32.mrf.mxu0 }
  0xbd   : > { %v489_v63 = vadd.f32 %v488_v61, %v2229_v58  ;;  %1096 = vmatpush.msra.mxu3 %v941_v25  ;;  %v882_v61 = vld [vmem:[#allocation5 + $0x198] sm:$0xff] }
  0xbe   : > { %v529_v0 = vpop.f32.mrf.mxu1  ;;  %1176 = vmatpush.msrb.mxu1 %v882_v61 }
  0xbf   : > { %v2233_v3 = vadd.f32 %v529_v0, %v489_v63  ;;  %1097 = vmatpush.msra.mxu3 %v939_v35  ;;  %v901_v0 = vld [vmem:[#allocation5 + $0x230] sm:$0xff] }
  0xc0   : > { %1059 = vmatpush.msra.mxu2 %v901_v0  ;;  %v929_v35 = vld [vmem:[#allocation5 + $0x310] sm:$0xff]  ;;  %v924_v0 = vld [vmem:[#allocation5 + $0x2e8] sm:$0xff] }
  0xc1   : > { %v799_v6 = vmax.f32 %v2233_v3, 0.0  ;;  %1098 = vmatpush.msra.mxu3 %v937_v45  ;;  %v910_v3 = vld [vmem:[#allocation5 + $0x278] sm:$0xff] }
  0xc2   : > { %v570_v7 = vpop.f32.mrf.mxu2 }
  0xc3   : > { %v571_v9 = vadd.f32 %v570_v7, %v2236_v4  ;;  %981 = vmatmul.f32.vlgmr.msra.gmra.mxu0 %v799_v6  ;;  %1099 = vmatpush.msra.mxu3 %v935_v59  ;;  %v880_v7 = vld [vmem:[#allocation5 + $0x188] sm:$0xff] }
  0xc4   : > { %v491_v11 = vpop.f32.mrf.mxu0  ;;  %1177 = vmatpush.msrb.mxu1 %v880_v7 }
  0xc5   : > { %v492_v14 = vadd.f32 %v491_v11, %v2229_v58  ;;  %v611_v16 = vpop.f32.mrf.mxu3  ;;  %v840_v11 = vld [vmem:[#allocation5 + $0x48] sm:$0xff]  ;;  %1100 = vmatpush.msra.mxu3 %v933_v10 }
  0xc6   : > { %v2243_v17 = vadd.f32 %v611_v16, %v571_v9  ;;  %v532_v18 = vpop.f32.mrf.mxu1  ;;  %v899_v16 = vld [vmem:[#allocation5 + $0x220] sm:$0xff]  ;;  %1140 = vmatpush.msrb.mxu0 %v840_v11  ;;  %1178 = vmatpush.msrb.mxu1 %v878_v13 }
  0xc7   : > { %v2245_v21 = vadd.f32 %v532_v18, %v492_v14  ;;  %1060 = vmatpush.msra.mxu2 %v899_v16  ;;  %1101 = vmatpush.msra.mxu3 %v931_v27  ;;  %v956_v16 = vld [vmem:[#allocation5 + $0x3e8] sm:$0xff] }
  0xc8   : > { %v800_v62 = vmax.f32 %v2243_v17, 0.0  ;;  %1141 = vmatpush.msrb.mxu0 %v838_v19  ;;  %1179 = vmatpush.msrb.mxu1 %v876_v20  ;;  %v922_v19 = vld [vmem:[#allocation5 + $0x2d8] sm:$0xff] }
  0xc9   : > { %v803_v24 = vmax.f32 %v2245_v21, 0.0  ;;  %1061 = vmatpush.msra.mxu2 %v897_v31  ;;  %1102 = vmatpush.msra.mxu3 %v929_v35  ;;  %v952_v35 = vld [vmem:[#allocation5 + $0x3c8] sm:$0xff]  ;;  %v906_v21 = vld [vmem:[#allocation5 + $0x258] sm:$0xff] }
  0xca   : > { %1022 = vmatmul.f32.vlgmr.msra.gmra.mxu1 %v800_v62  ;;  %v573_v2 = vpop.f32.mrf.mxu2  ;;  %1142 = vmatpush.msrb.mxu0 %v836_v12 }
  0xcb   : > { %v574_v28 = vadd.f32 %v573_v2, %v2236_v4  ;;  %984 = vmatmul.f32.gmra.mxu0 %v803_v24  ;;  %1062 = vmatpush.msra.mxu2 %v895_v36 }
  0xcc   : > { %v494_v30 = vpop.f32.mrf.mxu0  ;;  %1143 = vmatpush.msrb.mxu0 %v834_v32  ;;  %1103 = vmatpush.msra.mxu3 %v927_v52 }
  0xcd   : > { %v495_v33 = vadd.f32 %v494_v30, %v2229_v58  ;;  %v614_v26 = vpop.f32.mrf.mxu3 }
  0xce   : > { %v2255_v34 = vadd.f32 %v614_v26, %v574_v28  ;;  %v535_v29 = vpop.f32.mrf.mxu1  ;;  %v874_v28 = vld [vmem:[#allocation5 + $0x158] sm:$0xff]  ;;  %1144 = vmatpush.msrb.mxu0 %v832_v37  ;;  %1252 = vmatpush.msrb.mxu3 %v958_v60  ;;  %v2322_v37 = vperm.slane %v2223_v55, 2 }
  0xcf   : > { %v2257_v38 = vadd.f32 %v535_v29, %v495_v33  ;;  %v872_v33 = vld [vmem:[#allocation5 + $0x148] sm:$0xff]  ;;  %1180 = vmatpush.msrb.mxu1 %v874_v28 }
  0xd0   : > { %v804_v41 = vmax.f32 %v2255_v34, 0.0  ;;  %1253 = vmatpush.msrb.mxu3 %v956_v16 }
  0xd1   : > { %v807_v43 = vmax.f32 %v2257_v38, 0.0  ;;  %1181 = vmatpush.msrb.mxu1 %v872_v33  ;;  %v902_v38 = vld [vmem:[#allocation5 + $0x238] sm:$0xff] }
  0xd2   : > { %1025 = vmatmul.f32.gmra.mxu1 %v804_v41  ;;  %v576_v44 = vpop.f32.mrf.mxu2 }
  0xd3   : > { %v577_v48 = vadd.f32 %v576_v44, %v2236_v4  ;;  %987 = vmatmul.f32.gmra.mxu0 %v807_v43  ;;  %v868_v44 = vld [vmem:[#allocation5 + $0x128] sm:$0xff]  ;;  %1182 = vmatpush.msrb.mxu1 %v870_v40  ;;  %v950_v40 = vld [vmem:[#allocation5 + $0x3b8] sm:$0xff] }
  0xd4   : > { %v497_v50 = vpop.f32.mrf.mxu0 }
  0xd5   : > { %v498_v53 = vadd.f32 %v497_v50, %v2229_v58  ;;  %v617_v54 = vpop.f32.mrf.mxu3  ;;  %1183 = vmatpush.msrb.mxu1 %v868_v44  ;;  %v916_v44 = vld [vmem:[#allocation5 + $0x2a8] sm:$0xff] }
  0xd6   : > { %v2267_v56 = vadd.f32 %v617_v54, %v577_v48  ;;  %v538_v57 = vpop.f32.mrf.mxu1 }
  0xd7   : > { %v2269_v63 = vadd.f32 %v538_v57, %v498_v53  ;;  %v864_v53 = vld [vmem:[#allocation5 + $0x108] sm:$0xff]  ;;  %1184 = vmatpush.msrb.mxu1 %v866_v49  ;;  %v926_v57 = vld [vmem:[#allocation5 + $0x2f8] sm:$0xff] }
  0xd8   : > { %v808_v5 = vmax.f32 %v2267_v56, 0.0  ;;  %1211 = vmatpush.msrb.mxu2 %v926_v57  ;;  %v2335_v57 = vperm.slane %v2223_v55, 3  ;;  %v912_v55 = vld [vmem:[#allocation5 + $0x288] sm:$0xff] }
  0xd9   : > { %v811_v8 = vmax.f32 %v2269_v63, 0.0  ;;  %1185 = vmatpush.msrb.mxu1 %v864_v53 }
  0xda   : > { %1028 = vmatmul.f32.gmra.mxu1 %v808_v5  ;;  %v579_v9 = vpop.f32.mrf.mxu2  ;;  %1212 = vmatpush.msrb.mxu2 %v924_v0 }
  0xdb   : > { %v580_v14 = vadd.f32 %v579_v9, %v2236_v4  ;;  %990 = vmatmul.f32.gmra.mxu0 %v811_v8 }
  0xdc   : > { %v500_v18 = vpop.f32.mrf.mxu0  ;;  %1213 = vmatpush.msrb.mxu2 %v922_v19 }
  0xdd   : > { %v501_v22 = vadd.f32 %v500_v18, %v2229_v58  ;;  %v620_v23 = vpop.f32.mrf.mxu3 }
  0xde   : > { %v2279_v2 = vadd.f32 %v620_v23, %v580_v14  ;;  %v541_v25 = vpop.f32.mrf.mxu1 }
  0xdf   : > { %v2281_v15 = vadd.f32 %v541_v25, %v501_v22  ;;  %v954_v22 = vld [vmem:[#allocation5 + $0x3d8] sm:$0xff]  ;;  %v920_v25 = vld [vmem:[#allocation5 + $0x2c8] sm:$0xff] }
  0xe0   : > { %v812_v30 = vmax.f32 %v2279_v2, 0.0  ;;  %1254 = vmatpush.msrb.mxu3 %v954_v22  ;;  %1214 = vmatpush.msrb.mxu2 %v920_v25  ;;  %v944_v25 = vld [vmem:[#allocation5 + $0x388] sm:$0xff] }
  0xe1   : > { %v815_v26 = vmax.f32 %v2281_v15, 0.0 }
  0xe2   : > { %1031 = vmatmul.f32.gmra.mxu1 %v812_v30  ;;  %v582_v29 = vpop.f32.mrf.mxu2  ;;  %1255 = vmatpush.msrb.mxu3 %v952_v35 }
  0xe3   : > { %v583_v39 = vadd.f32 %v582_v29, %v2236_v4  ;;  %993 = vmatmul.f32.gmra.mxu0 %v815_v26 }
  0xe4   : > { %v503_v42 = vpop.f32.mrf.mxu0  ;;  %1256 = vmatpush.msrb.mxu3 %v950_v40 }
  0xe5   : > { %v504_v45 = vadd.f32 %v503_v42, %v2229_v58  ;;  %v623_v46 = vpop.f32.mrf.mxu3 }
  0xe6   : > { %v2291_v47 = vadd.f32 %v623_v46, %v583_v39  ;;  %v544_v48 = vpop.f32.mrf.mxu1  ;;  %v918_v39 = vld [vmem:[#allocation5 + $0x2b8] sm:$0xff] }
  0xe7   : > { %v2293_v50 = vadd.f32 %v544_v48, %v504_v45  ;;  %1215 = vmatpush.msrb.mxu2 %v918_v39 }
  0xe8   : > { %v816_v51 = vmax.f32 %v2291_v47, 0.0 }
  0xe9   : > { %v819_v54 = vmax.f32 %v2293_v50, 0.0  ;;  %1216 = vmatpush.msrb.mxu2 %v916_v44  ;;  %v940_v44 = vld [vmem:[#allocation5 + $0x368] sm:$0xff] }
  0xea   : > { %1034 = vmatmul.f32.gmra.mxu1 %v816_v51  ;;  %v585_v59 = vpop.f32.mrf.mxu2 }
  0xeb   : > { %v586_v61 = vadd.f32 %v585_v59, %v2236_v4  ;;  %996 = vmatmul.f32.gmra.mxu0 %v819_v54  ;;  %v948_v59 = vld [vmem:[#allocation5 + $0x3a8] sm:$0xff] }
  0xec   : > { %v506_v1 = vpop.f32.mrf.mxu0  ;;  %1257 = vmatpush.msrb.mxu3 %v948_v59 }
  0xed   : > { %v507_v7 = vadd.f32 %v506_v1, %v2229_v58  ;;  %v626_v9 = vpop.f32.mrf.mxu3  ;;  %v946_v1 = vld [vmem:[#allocation5 + $0x398] sm:$0xff] }
  0xee   : > { %v2303_v10 = vadd.f32 %v626_v9, %v586_v61  ;;  %v547_v11 = vpop.f32.mrf.mxu1  ;;  %v914_v61 = vld [vmem:[#allocation5 + $0x298] sm:$0xff]  ;;  %1258 = vmatpush.msrb.mxu3 %v946_v1 }
  0xef   : > { %v2305_v13 = vadd.f32 %v547_v11, %v507_v7  ;;  %1217 = vmatpush.msrb.mxu2 %v914_v61 }
  0xf0   : > { %v820_v14 = vmax.f32 %v2303_v10, 0.0  ;;  %1259 = vmatpush.msrb.mxu3 %v944_v25 }
  0xf1   : > { %v823_v18 = vmax.f32 %v2305_v13, 0.0  ;;  %1218 = vmatpush.msrb.mxu2 %v912_v55  ;;  %v936_v55 = vld [vmem:[#allocation5 + $0x348] sm:$0xff] }
  0xf2   : > { %1037 = vmatmul.f32.gmra.mxu1 %v820_v14  ;;  %v588_v20 = vpop.f32.mrf.mxu2 }
  0xf3   : > { %v589_v23 = vadd.f32 %v588_v20, %v2236_v4  ;;  %999 = vmatmul.f32.gmra.mxu0 %v823_v18  ;;  %1219 = vmatpush.msrb.mxu2 %v910_v3 }
  0xf4   : > { %v509_v27 = vpop.f32.mrf.mxu0 }
  0xf5   : > { %v510_v12 = vadd.f32 %v509_v27, %v2229_v58  ;;  %v629_v28 = vpop.f32.mrf.mxu3 }
  0xf6   : > { %v2315_v31 = vadd.f32 %v629_v28, %v589_v23  ;;  %v550_v32 = vpop.f32.mrf.mxu1 }
  0xf7   : > { %v2317_v33 = vadd.f32 %v550_v32, %v510_v12  ;;  %v942_v12 = vld [vmem:[#allocation5 + $0x378] sm:$0xff]  ;;  %v908_v32 = vld [vmem:[#allocation5 + $0x268] sm:$0xff] }
  0xf8   : > { %v824_v29 = vmax.f32 %v2315_v31, 0.0  ;;  %1260 = vmatpush.msrb.mxu3 %v942_v12  ;;  %1220 = vmatpush.msrb.mxu2 %v908_v32  ;;  %v932_v32 = vld [vmem:[#allocation5 + $0x328] sm:$0xff] }
  0xf9   : > { %v827_v36 = vmax.f32 %v2317_v33, 0.0 }
  0xfa   : > { %1040 = vmatmul.f32.gmra.mxu1 %v824_v29  ;;  %v591_v58 = vpop.f32.mrf.mxu2  ;;  %1261 = vmatpush.msrb.mxu3 %v940_v44  ;;  %v928_v44 = vld [vmem:[#allocation5 + $0x308] sm:$0xff] }
  0xfb   : > { %v592_v42 = vadd.f32 %v591_v58, %v2236_v4  ;;  %1002 = vmatmul.f32.gmra.mxu0 %v827_v36  ;;  %1221 = vmatpush.msrb.mxu2 %v906_v21 }
  0xfc   : > { %v652_v45 = vpop.f32.mrf.mxu0 }
  0xfd   : > { %v632_v46 = vpop.f32.mrf.mxu3  ;;  %v653_v48 = vadd.f32 %v652_v45, %v2322_v37 }
  0xfe   : > { %v2330_v49 = vadd.f32 %v632_v46, %v592_v42  ;;  %v693_v52 = vpop.f32.mrf.mxu1  ;;  %v938_v46 = vld [vmem:[#allocation5 + $0x358] sm:$0xff] }
  0xff   : > { %v2332_v53 = vadd.f32 %v693_v52, %v653_v48  ;;  %v904_v52 = vld [vmem:[#allocation5 + $0x248] sm:$0xff]  ;;  %1262 = vmatpush.msrb.mxu3 %v938_v46 }
 0x100   : > { %v828_v4 = vmax.f32 %v2330_v49, 0.0  ;;  %1222 = vmatpush.msrb.mxu2 %v904_v52 }
 0x101   : > { %v801_v60 = vmax.f32 %v2332_v53, 0.0  ;;  %1263 = vmatpush.msrb.mxu3 %v936_v55 }
 0x102   : > { %1043 = vmatmul.f32.gmra.mxu1 %v828_v4  ;;  %v734_v0 = vpop.f32.mrf.mxu2  ;;  %1223 = vmatpush.msrb.mxu2 %v902_v38 }
 0x103   : > { %v735_v7 = vadd.f32 %v734_v0, %v2335_v57  ;;  %1063 = vmatmul.f32.vlgmr.msra.gmra.mxu2 %v801_v60  ;;  %1145 = vmatmul.f32.vlgmr.msrb.gmra.mxu0 %v799_v6 }
 0x104   : > { %v655_v9 = vpop.f32.mrf.mxu0 }
 0x105   : > { %v656_v11 = vadd.f32 %v655_v9, %v2322_v37  ;;  %v775_v16 = vpop.f32.mrf.mxu3 }
 0x106   : > { %v2347_v19 = vadd.f32 %v775_v16, %v735_v7  ;;  %v696_v20 = vpop.f32.mrf.mxu1 }
 0x107   : > { %v2349_v22 = vadd.f32 %v696_v20, %v656_v11  ;;  %v934_v11 = vld [vmem:[#allocation5 + $0x338] sm:$0xff]  ;;  %v900_v20 = vld [vmem:[#allocation5 + $0x228] sm:$0xff] }
 0x108   : > { %v802_v23 = vmax.f32 %v2347_v19, 0.0  ;;  %1264 = vmatpush.msrb.mxu3 %v934_v11  ;;  %1224 = vmatpush.msrb.mxu2 %v900_v20 }
 0x109   : > { %v805_v27 = vmax.f32 %v2349_v22, 0.0 }
 0x10a   : > { %1104 = vmatmul.f32.vlgmr.msra.gmra.mxu3 %v802_v23  ;;  %1186 = vmatmul.f32.vlgmr.msrb.gmra.mxu1 %v800_v62  ;;  %v737_v6 = vpop.f32.mrf.mxu2 }
 0x10b   : > { %v738_v28 = vadd.f32 %v737_v6, %v2335_v57  ;;  %1066 = vmatmul.f32.gmra.mxu2 %v805_v27  ;;  %1148 = vmatmul.f32.gmra.mxu0 %v803_v24 }
 0x10c   : > { %v658_v35 = vpop.f32.mrf.mxu0  ;;  %1265 = vmatpush.msrb.mxu3 %v932_v32 }
 0x10d   : > { %v659_v39 = vadd.f32 %v658_v35, %v2322_v37  ;;  %v778_v58 = vpop.f32.mrf.mxu3  ;;  %v898_v35 = vld [vmem:[#allocation5 + $0x218] sm:$0xff] }
 0x10e   : > { %v2363_v40 = vadd.f32 %v778_v58, %v738_v28  ;;  %v699_v17 = vpop.f32.mrf.mxu1  ;;  %1225 = vmatpush.msrb.mxu2 %v898_v35  ;;  %v896_v58 = vld [vmem:[#allocation5 + $0x208] sm:$0xff] }
 0x10f   : > { %v2365_v62 = vadd.f32 %v699_v17, %v659_v39  ;;  %v930_v39 = vld [vmem:[#allocation5 + $0x318] sm:$0xff] }
 0x110   : > { %v806_v42 = vmax.f32 %v2363_v40, 0.0  ;;  %1266 = vmatpush.msrb.mxu3 %v930_v39  ;;  %1226 = vmatpush.msrb.mxu2 %v896_v58 }
 0x111   : > { %v809_v45 = vmax.f32 %v2365_v62, 0.0 }
 0x112   : > { %1107 = vmatmul.f32.gmra.mxu3 %v806_v42  ;;  %1189 = vmatmul.f32.gmra.mxu1 %v804_v41  ;;  %v740_v24 = vpop.f32.mrf.mxu2 }
 0x113   : > { %v741_v48 = vadd.f32 %v740_v24, %v2335_v57  ;;  %1069 = vmatmul.f32.gmra.mxu2 %v809_v45  ;;  %1151 = vmatmul.f32.gmra.mxu0 %v807_v43 }
 0x114   : > { %v661_v59 = vpop.f32.mrf.mxu0  ;;  %1267 = vmatpush.msrb.mxu3 %v928_v44 }
 0x115   : > { %v662_v61 = vadd.f32 %v661_v59, %v2322_v37  ;;  %v781_v0 = vpop.f32.mrf.mxu3 }
 0x116   : > { %v2379_v1 = vadd.f32 %v781_v0, %v741_v48  ;;  %v702_v34 = vpop.f32.mrf.mxu1 }
 0x117   : > { %v2381_v41 = vadd.f32 %v702_v34, %v662_v61 }
 0x118   : > { %v810_v7 = vmax.f32 %v2379_v1, 0.0 }
 0x119   : > { %v813_v9 = vmax.f32 %v2381_v41, 0.0 }
 0x11a   : > { %1110 = vmatmul.f32.gmra.mxu3 %v810_v7  ;;  %1192 = vmatmul.f32.gmra.mxu1 %v808_v5  ;;  %v743_v43 = vpop.f32.mrf.mxu2 }
 0x11b   : > { %v744_v16 = vadd.f32 %v743_v43, %v2335_v57  ;;  %1072 = vmatmul.f32.gmra.mxu2 %v813_v9  ;;  %1154 = vmatmul.f32.gmra.mxu0 %v811_v8 }
 0x11c   : > { %v664_v25 = vpop.f32.mrf.mxu0 }
 0x11d   : > { %v665_v3 = vadd.f32 %v664_v25, %v2322_v37  ;;  %v784_v6 = vpop.f32.mrf.mxu3 }
 0x11e   : > { %v2395_v12 = vadd.f32 %v784_v6, %v744_v16  ;;  %v705_v56 = vpop.f32.mrf.mxu1 }
 0x11f   : > { %v2397_v5 = vadd.f32 %v705_v56, %v665_v3 }
 0x120   : > { %v814_v28 = vmax.f32 %v2395_v12, 0.0 }
 0x121   : > { %v817_v63 = vmax.f32 %v2397_v5, 0.0 }
 0x122   : > { %1113 = vmatmul.f32.gmra.mxu3 %v814_v28  ;;  %1195 = vmatmul.f32.gmra.mxu1 %v812_v30  ;;  %v746_v8 = vpop.f32.mrf.mxu2 }
 0x123   : > { %v747_v17 = vadd.f32 %v746_v8, %v2335_v57  ;;  %1075 = vmatmul.f32.gmra.mxu2 %v817_v63  ;;  %1157 = vmatmul.f32.gmra.mxu0 %v815_v26 }
 0x124   : > { %v667_v21 = vpop.f32.mrf.mxu0 }
 0x125   : > { %v668_v24 = vadd.f32 %v667_v21, %v2322_v37  ;;  %v787_v46 = vpop.f32.mrf.mxu3 }
 0x126   : > { %v2411_v2 = vadd.f32 %v787_v46, %v747_v17  ;;  %v708_v30 = vpop.f32.mrf.mxu1 }
 0x127   : > { %v2413_v48 = vadd.f32 %v708_v30, %v668_v24 }
 0x128   : > { %v818_v52 = vmax.f32 %v2411_v2, 0.0 }
 0x129   : > { %v821_v59 = vmax.f32 %v2413_v48, 0.0 }
 0x12a   : > { %1116 = vmatmul.f32.gmra.mxu3 %v818_v52  ;;  %1198 = vmatmul.f32.gmra.mxu1 %v816_v51  ;;  %v749_v15 = vpop.f32.mrf.mxu2 }
 0x12b   : > { %v750_v26 = vadd.f32 %v749_v15, %v2335_v57  ;;  %1078 = vmatmul.f32.gmra.mxu2 %v821_v59  ;;  %1160 = vmatmul.f32.gmra.mxu0 %v819_v54 }
 0x12c   : > { %v670_v61 = vpop.f32.mrf.mxu0 }
 0x12d   : > { %v671_v0 = vadd.f32 %v670_v61, %v2322_v37  ;;  %v790_v34 = vpop.f32.mrf.mxu3 }
 0x12e   : > { %v2427_v55 = vadd.f32 %v790_v34, %v750_v26  ;;  %v711_v38 = vpop.f32.mrf.mxu1 }
 0x12f   : > { %v2429_v43 = vadd.f32 %v711_v38, %v671_v0 }
 0x130   : > { %v822_v47 = vmax.f32 %v2427_v55, 0.0 }
 0x131   : > { %v825_v51 = vmax.f32 %v2429_v43, 0.0 }
 0x132   : > { %1119 = vmatmul.f32.gmra.mxu3 %v822_v47  ;;  %1201 = vmatmul.f32.gmra.mxu1 %v820_v14  ;;  %v752_v50 = vpop.f32.mrf.mxu2 }
 0x133   : > { %v753_v54 = vadd.f32 %v752_v50, %v2335_v57  ;;  %1081 = vmatmul.f32.gmra.mxu2 %v825_v51  ;;  %1163 = vmatmul.f32.gmra.mxu0 %v823_v18  ;;  %v2451_v18 = vld [vmem:[%s2821_s4] sm:$0x3] }
 0x134   : > { %v673_v11 = vpop.f32.mrf.mxu0  ;;  %v961_v8 = vperm.slane %v2451_v18, 0 }
 0x135   : > { %v674_v16 = vadd.f32 %v673_v11, %v2322_v37  ;;  %v793_v20 = vpop.f32.mrf.mxu3 }
 0x136   : > { %v794_v25 = vadd.f32 %v793_v20, %v753_v54  ;;  %v714_v3 = vpop.f32.mrf.mxu1 }
 0x137   : > { %v715_v6 = vadd.f32 %v714_v3, %v674_v16 }
 0x138   : > { %v826_v56 = vmax.f32 %v794_v25, 0.0 }
 0x139   : > { %v829_v32 = vmax.f32 %v715_v6, 0.0 }
 0x13a   : > { %1122 = vmatmul.f32.gmra.mxu3 %v826_v56  ;;  %1204 = vmatmul.f32.gmra.mxu1 %v824_v29  ;;  %v755_v10 = vpop.f32.mrf.mxu2 }
 0x13b   : > { %v756_v14 = vadd.f32 %v755_v10, %v2335_v57  ;;  %1084 = vmatmul.f32.gmra.mxu2 %v829_v32  ;;  %1166 = vmatmul.f32.gmra.mxu0 %v827_v36 }
 0x13d   : > { %v796_v13 = vpop.f32.mrf.mxu3 }
 0x13e   : > { %v797_v37 = vadd.f32 %v796_v13, %v756_v14 }
 0x140   : > { %v830_v35 = vmax.f32 %v797_v37, 0.0  ;;  %v982_v39 = vpop.f32.mrf.mxu0 }
 0x141   : > { %v983_v31 = vadd.f32 %v982_v39, %v961_v8 }
 0x142   : > { %1125 = vmatmul.f32.gmra.mxu3 %v830_v35  ;;  %1207 = vmatmul.f32.gmra.mxu1 %v828_v4 }
 0x143   : > { %1227 = vmatmul.f32.vlgmr.msrb.gmra.mxu2 %v801_v60 }
 0x147   : > { %v1023_v33 = vpop.f32.mrf.mxu1 }
 0x148   : > { %v1024_v29 = vadd.f32 %v1023_v33, %v983_v31  ;;  %v985_v36 = vpop.f32.mrf.mxu0 }
 0x149   : > { %v986_v57 = vadd.f32 %v985_v36, %v961_v8 }
 0x14a   : > { %1268 = vmatmul.f32.vlgmr.msrb.gmra.mxu3 %v802_v23 }
 0x14b   : > { %1230 = vmatmul.f32.gmra.mxu2 %v805_v27 }
 0x14f   : > { %v1026_v58 = vpop.f32.mrf.mxu1 }
 0x150   : > { %v1027_v17 = vadd.f32 %v1026_v58, %v986_v57  ;;  %v988_v44 = vpop.f32.mrf.mxu0 }
 0x151   : > { %v989_v49 = vadd.f32 %v988_v44, %v961_v8 }
 0x152   : > { %1271 = vmatmul.f32.gmra.mxu3 %v806_v42 }
 0x153   : > { %1233 = vmatmul.f32.gmra.mxu2 %v809_v45 }
 0x157   : > { %v1029_v53 = vpop.f32.mrf.mxu1 }
 0x158   : > { %v1030_v4 = vadd.f32 %v1029_v53, %v989_v49  ;;  %v991_v60 = vpop.f32.mrf.mxu0 }
 0x159   : > { %v992_v19 = vadd.f32 %v991_v60, %v961_v8 }
 0x15a   : > { %1274 = vmatmul.f32.gmra.mxu3 %v810_v7 }
 0x15b   : > { %1236 = vmatmul.f32.gmra.mxu2 %v813_v9 }
 0x15f   : > { %v1032_v22 = vpop.f32.mrf.mxu1 }
 0x160   : > { %v1033_v23 = vadd.f32 %v1032_v22, %v992_v19  ;;  %v994_v27 = vpop.f32.mrf.mxu0 }
 0x161   : > { %v995_v40 = vadd.f32 %v994_v27, %v961_v8  ;;  %v1823_v27 = vld [vmem:[%s2110_s19] sm:$0xff] }
 0x162   : > { %1277 = vmatmul.f32.gmra.mxu3 %v814_v28 }
 0x163   : > { %1239 = vmatmul.f32.gmra.mxu2 %v817_v63 }
 0x167   : > { %v1035_v62 = vpop.f32.mrf.mxu1 }
 0x168   : > { %v1036_v42 = vadd.f32 %v1035_v62, %v995_v40  ;;  %v997_v45 = vpop.f32.mrf.mxu0  ;;  %v1824_v40 = vld [vmem:[%s2110_s19 + $0x8] sm:$0xff] }
 0x169   : > { %v998_v1 = vadd.f32 %v997_v45, %v961_v8 }
 0x16a   : > { %1280 = vmatmul.f32.gmra.mxu3 %v818_v52 }
 0x16b   : > { %1242 = vmatmul.f32.gmra.mxu2 %v821_v59 }
 0x16f   : > { %v1038_v41 = vpop.f32.mrf.mxu1 }
 0x170   : > { %v1039_v7 = vadd.f32 %v1038_v41, %v998_v1  ;;  %v1000_v9 = vpop.f32.mrf.mxu0 }
 0x171   : > { %v1001_v12 = vadd.f32 %v1000_v9, %v961_v8 }
 0x172   : > { %1283 = vmatmul.f32.gmra.mxu3 %v822_v47 }
 0x173   : > { %1245 = vmatmul.f32.gmra.mxu2 %v825_v51 }
 0x177   : > { %v1041_v5 = vpop.f32.mrf.mxu1 }
 0x178   : > { %v1042_v28 = vadd.f32 %v1041_v5, %v1001_v12  ;;  %v1003_v63 = vpop.f32.mrf.mxu0 }
 0x179   : > { %v1004_v21 = vadd.f32 %v1003_v63, %v961_v8  ;;  %v1825_v63 = vld [vmem:[%s2110_s19 + $0x10] sm:$0xff] }
 0x17a   : > { %1286 = vmatmul.f32.gmra.mxu3 %v826_v56 }
 0x17b   : > { %1248 = vmatmul.f32.gmra.mxu2 %v829_v32 }
 0x17f   : > { %v1044_v24 = vpop.f32.mrf.mxu1 }
 0x180   : > { %v1045_v46 = vadd.f32 %v1044_v24, %v1004_v21  ;;  %v1146_v10 = vpop.f32.mrf.mxu0  ;;  %v1826_v24 = vld [vmem:[%s2110_s19 + $0x18] sm:$0xff] }
 0x182   : > { %1289 = vmatmul.f32.gmra.mxu3 %v830_v35 }
 0x186   : > { %v1064_v2 = vpop.f32.mrf.mxu2 }
 0x187   : > { %v1065_v30 = vadd.f32 %v1064_v2, %v1024_v29  ;;  %v1187_v13 = vpop.f32.mrf.mxu1  ;;  %v2493_v29 = vperm.slane %v2451_v18, 1 }
 0x188   : > { %v1149_v31 = vpop.f32.mrf.mxu0 }
 0x18d   : > { %v1105_v48 = vpop.f32.mrf.mxu3 }
 0x18e   : > { %v1106_v52 = vadd.f32 %v1105_v48, %v1065_v30  ;;  %v1067_v59 = vpop.f32.mrf.mxu2 }
 0x18f   : > { %v1068_v15 = vadd.f32 %v1067_v59, %v1027_v17  ;;  %v1190_v33 = vpop.f32.mrf.mxu1  ;;  %v1147_v17 = vadd.f32 %v1146_v10, %v2493_v29  ;;  %v1830_v10 = vld [vmem:[%s2110_s19 + $0x38] sm:$0xff] }
 0x190   : > { %v1152_v49 = vpop.f32.mrf.mxu0  ;;  %v2500_v18 = vadd.f32 %v1823_v27, %v1106_v52 }
 0x191   : > { %v1188_v44 = vadd.f32 %v1187_v13, %v1147_v17 }
 0x195   : > { %v1108_v26 = vpop.f32.mrf.mxu3 }
 0x196   : > { %v1109_v61 = vadd.f32 %v1108_v26, %v1068_v15  ;;  %v1070_v0 = vpop.f32.mrf.mxu2 }
 0x197   : > { %v1071_v34 = vadd.f32 %v1070_v0, %v1030_v4  ;;  %v1193_v4 = vpop.f32.mrf.mxu1 }
 0x198   : > { %v1155_v41 = vpop.f32.mrf.mxu0  ;;  %v2509_v21 = vadd.f32 %v1825_v63, %v1109_v61 }
 0x199   : > { %v1156_v0 = vadd.f32 %v1155_v41, %v2493_v29  ;;  %v1834_v41 = vld [vmem:[%s2110_s19 + $0x58] sm:$0xff] }
 0x19d   : > { %v1111_v55 = vpop.f32.mrf.mxu3 }
 0x19e   : > { %v2482_v38 = vadd.f32 %v1111_v55, %v1071_v34  ;;  %v1073_v43 = vpop.f32.mrf.mxu2  ;;  %v1827_v34 = vld [vmem:[%s2110_s19 + $0x20] sm:$0xff]  ;;  %v1828_v55 = vld [vmem:[%s2110_s19 + $0x28] sm:$0xff] }
 0x19f   : > { %v1074_v47 = vadd.f32 %v1073_v43, %v1033_v23  ;;  %v1150_v23 = vadd.f32 %v1149_v31, %v2493_v29  ;;  %v1196_v5 = vpop.f32.mrf.mxu1 }
 0x1a0   : > { %v1158_v26 = vpop.f32.mrf.mxu0  ;;  %v2519_v61 = vadd.f32 %v1827_v34, %v2482_v38 }
 0x1a5   : > { %v1114_v51 = vpop.f32.mrf.mxu3 }
 0x1a6   : > { %v2484_v50 = vadd.f32 %v1114_v51, %v1074_v47  ;;  %v1076_v54 = vpop.f32.mrf.mxu2  ;;  %v1197_v51 = vadd.f32 %v1196_v5, %v1156_v0 }
 0x1a7   : > { %v1077_v11 = vadd.f32 %v1076_v54, %v1036_v42  ;;  %v1191_v42 = vadd.f32 %v1190_v33, %v1150_v23  ;;  %v1199_v47 = vpop.f32.mrf.mxu1 }
 0x1a8   : > { %v1161_v13 = vpop.f32.mrf.mxu0 }
 0x1a9   : > { %v1162_v17 = vadd.f32 %v1161_v13, %v2493_v29 }
 0x1ad   : > { %v1117_v16 = vpop.f32.mrf.mxu3 }
 0x1ae   : > { %v2486_v20 = vadd.f32 %v1117_v16, %v1077_v11  ;;  %v1079_v25 = vpop.f32.mrf.mxu2 }
 0x1af   : > { %v1080_v3 = vadd.f32 %v1079_v25, %v1039_v7 }
 0x1b5   : > { %v1120_v6 = vpop.f32.mrf.mxu3 }
 0x1b6   : > { %v2488_v56 = vadd.f32 %v1120_v6, %v1080_v3  ;;  %v1082_v32 = vpop.f32.mrf.mxu2  ;;  %v1159_v6 = vadd.f32 %v1158_v26, %v2493_v29 }
 0x1b7   : > { %v1083_v14 = vadd.f32 %v1082_v32, %v1042_v28  ;;  %v1153_v28 = vadd.f32 %v1152_v49, %v2493_v29  ;;  %v1829_v32 = vld [vmem:[%s2110_s19 + $0x30] sm:$0xff]  ;;  %v1832_v49 = vld [vmem:[%s2110_s19 + $0x48] sm:$0xff] }
 0x1b8   : > { %v2529_v38 = vadd.f32 %v1829_v32, %v2484_v50 }
 0x1b9   : > { %v1194_v2 = vadd.f32 %v1193_v4, %v1153_v28 }
 0x1bd   : > { %v1123_v37 = vpop.f32.mrf.mxu3 }
 0x1be   : > { %v2490_v35 = vadd.f32 %v1123_v37, %v1083_v14  ;;  %v1085_v8 = vpop.f32.mrf.mxu2  ;;  %v1200_v37 = vadd.f32 %v1199_v47, %v1159_v6 }
 0x1bf   : > { %v1086_v39 = vadd.f32 %v1085_v8, %v1045_v46 }
 0x1c5   : > { %v1126_v36 = vpop.f32.mrf.mxu3 }
 0x1c6   : > { %v2495_v57 = vadd.f32 %v1126_v36, %v1086_v39  ;;  %v1228_v58 = vpop.f32.mrf.mxu2  ;;  %v1202_v39 = vpop.f32.mrf.mxu1 }
 0x1c7   : > { %v1229_v53 = vadd.f32 %v1228_v58, %v1188_v44  ;;  %v1831_v44 = vld [vmem:[%s2110_s19 + $0x40] sm:$0xff]  ;;  %v1203_v4 = vadd.f32 %v1202_v39, %v1162_v17 }
 0x1c8   : > { %v2539_v50 = vadd.f32 %v1831_v44, %v2486_v20  ;;  %v1833_v20 = vld [vmem:[%s2110_s19 + $0x50] sm:$0xff] }
 0x1cd   : > { %v1269_v60 = vpop.f32.mrf.mxu3 }
 0x1ce   : > { %v1270_v19 = vadd.f32 %v1269_v60, %v1229_v53  ;;  %v1231_v22 = vpop.f32.mrf.mxu2  ;;  %v1205_v23 = vpop.f32.mrf.mxu1 }
 0x1cf   : > { %v1232_v1 = vadd.f32 %v1231_v22, %v1191_v42 }
 0x1d0   : > { %v2503_v62 = vadd.f32 %v1824_v40, %v1270_v19  ;;  %v1164_v19 = vpop.f32.mrf.mxu0 }
 0x1d2   : > { %v1311_v45 = vadd.f32 %v2503_v62, %v2500_v18 }
 0x1d4   : > { %1312 = vadd.xlane.f32.xlu0 %v1311_v45  ;;  %v1165_v45 = vadd.f32 %v1164_v19, %v2493_v29 }
 0x1d5   : > { %v1272_v7 = vpop.f32.mrf.mxu3 }
 0x1d6   : > { %v1273_v9 = vadd.f32 %v1272_v7, %v1232_v1  ;;  %v1234_v12 = vpop.f32.mrf.mxu2  ;;  %v2549_v1 = vadd.f32 %v1833_v20, %v2488_v56 }
 0x1d7   : > { %v1235_v48 = vadd.f32 %v1234_v12, %v1194_v2  ;;  %v1208_v2 = vpop.f32.mrf.mxu1 }
 0x1d8   : > { %v2512_v46 = vadd.f32 %v1826_v24, %v1273_v9  ;;  %v1206_v9 = vadd.f32 %v1205_v23, %v1165_v45  ;;  %v1167_v28 = vpop.f32.mrf.mxu0 }
 0x1da   : > { %v1314_v30 = vadd.f32 %v2512_v46, %v2509_v21 }
 0x1dc   : > { %1315 = vadd.xlane.f32.xlu0 %v1314_v30  ;;  %v1168_v30 = vadd.f32 %v1167_v28, %v2493_v29  ;;  %v1838_v29 = vld [vmem:[%s2110_s19 + $0x78] sm:$0xff] }
 0x1dd   : > { %v1275_v52 = vpop.f32.mrf.mxu3 }
 0x1de   : > { %v1276_v59 = vadd.f32 %v1275_v52, %v1235_v48  ;;  %v1237_v15 = vpop.f32.mrf.mxu2  ;;  %v1835_v48 = vld [vmem:[%s2110_s19 + $0x60] sm:$0xff]  ;;  %v1836_v52 = vld [vmem:[%s2110_s19 + $0x68] sm:$0xff]  ;;  %v1209_v26 = vadd.f32 %v1208_v2, %v1168_v30 }
 0x1df   : > { %v1238_v11 = vadd.f32 %v1237_v15, %v1197_v51  ;;  %v2559_v56 = vadd.f32 %v1835_v48, %v2490_v35  ;;  %v1837_v51 = vld [vmem:[%s2110_s19 + $0x70] sm:$0xff] }
 0x1e0   : > { %v2522_v43 = vadd.f32 %v1828_v55, %v1276_v59 }
 0x1e2   : > { %v1317_v54 = vadd.f32 %v2522_v43, %v2519_v61 }
 0x1e4   : > { %1318 = vadd.xlane.f32.xlu1 %v1317_v54  ;;  %v2568_v54 = vadd.f32 %v1837_v51, %v2495_v57 }
 0x1e5   : > { %v1278_v16 = vpop.f32.mrf.mxu3 }
 0x1e6   : > { %v1279_v25 = vadd.f32 %v1278_v16, %v1238_v11  ;;  %v1240_v3 = vpop.f32.mrf.mxu2  ;;  %v1977_v16 = vmov 256.0  }
 0x1e7   : > { %v1241_v31 = vadd.f32 %v1240_v3, %v1200_v37  ;;  %1789 = vrcp.f32 %v1977_v16 }
 0x1e8   : > { %v2532_v14 = vadd.f32 %v1830_v10, %v1279_v25 }
 0x1ea   : > { %v1320_v8 = vadd.f32 %v2532_v14, %v2529_v38 }
 0x1ec   : > { %1321 = vadd.xlane.f32.xlu1 %v1320_v8 }
 0x1ed   : > { %v1281_v33 = vpop.f32.mrf.mxu3  ;;  %v1790_v25 = vpop.eup %1789 }
 0x1ee   : > { %v1282_v36 = vadd.f32 %v1281_v33, %v1241_v31  ;;  %v1243_v58 = vpop.f32.mrf.mxu2  ;;  %v1336_v3 = vmul.f32 256.0, %v1790_v25  ;;  %vm1340_vm0 = vweird.f32 %v1790_v25 }
 0x1ef   : > { %v1244_v22 = vadd.f32 %v1243_v58, %v1203_v4 }
 0x1f0   : > { %v2542_v53 = vadd.f32 %v1832_v49, %v1282_v36  ;;  %v1337_v6 = vsub.f32 1.0, %v1336_v3 }
 0x1f2   : > { %v1323_v60 = vadd.f32 %v2542_v53, %v2539_v50  ;;  %v1338_v32 = vmul.f32 %v1790_v25, %v1337_v6 }
 0x1f4   : > { %1324 = vadd.xlane.f32.xlu2 %v1323_v60  ;;  %v1339_v10 = vadd.f32 %v1790_v25, %v1338_v32 }
 0x1f5   : > { %v1284_v27 = vpop.f32.mrf.mxu3 }
 0x1f6   : > { %v1285_v40 = vadd.f32 %v1284_v27, %v1244_v22  ;;  %v1246_v42 = vpop.f32.mrf.mxu2  ;;  %v1341_v13 = vsel %vm1340_vm0, %v1790_v25, %v1339_v10 }
 0x1f7   : > { %v1247_v5 = vadd.f32 %v1246_v42, %v1206_v9 }
 0x1f8   : > { %v2552_v7 = vadd.f32 %v1834_v41, %v1285_v40 }
 0x1fa   : > { %v1326_v12 = vadd.f32 %v2552_v7, %v2549_v1 }
 0x1fc   : > { %1327 = vadd.xlane.f32.xlu2 %v1326_v12 }
 0x1fd   : > { %v1287_v63 = vpop.f32.mrf.mxu3 }
 0x1fe   : > { %v1288_v24 = vadd.f32 %v1287_v63, %v1247_v5  ;;  %v1249_v15 = vpop.f32.mrf.mxu2 }
 0x1ff   : > { %v1250_v34 = vadd.f32 %v1249_v15, %v1209_v26 }
 0x200   : > { %v2562_v59 = vadd.f32 %v1836_v52, %v1288_v24 }
 0x202   : > { %v1329_v0 = vadd.f32 %v2562_v59, %v2559_v56 }
 0x204   : > { %1330 = vadd.xlane.f32.xlu0 %v1329_v0 }
 0x205   : > { %v1290_v55 = vpop.f32.mrf.mxu3 }
 0x206   : > { %v1291_v47 = vadd.f32 %v1290_v55, %v1250_v34 }
 0x208   : > { %v2571_v11 = vadd.f32 %v1838_v29, %v1291_v47 }
 0x20a   : > { %v1332_v35 = vadd.f32 %v2571_v11, %v2568_v54 }
 0x20c   : > { %1333 = vadd.xlane.f32.xlu1 %v1332_v35 }
 0x247   : > { %v1313_v37 = vpop.xlane.xlu0 %1312 }
 0x248   : > { %v1342_v8 = vmul.f32 %v1341_v13, %v1313_v37 }
 0x24a   : > { %v2576_v57 = vsub.f32 %v2500_v18, %v1342_v8  ;;  %v2579_v39 = vsub.f32 %v2503_v62, %v1342_v8 }
 0x24c   : > { %v1366_v31 = vmul.f32 %v2576_v57, %v2576_v57  ;;  %v1367_v33 = vmul.f32 %v2579_v39, %v2579_v39 }
 0x24e   : > { %v1382_v36 = vadd.f32 %v1367_v33, %v1366_v31 }
 0x24f   : > { %v1316_v58 = vpop.xlane.xlu0 %1315 }
 0x250   : > { %v1343_v17 = vmul.f32 %v1341_v13, %v1316_v58  ;;  %1383 = vadd.xlane.f32.xlu2 %v1382_v36 }
 0x252   : > { %v2586_v44 = vsub.f32 %v2509_v21, %v1343_v17  ;;  %v2589_v49 = vsub.f32 %v2512_v46, %v1343_v17 }
 0x254   : > { %v1368_v18 = vmul.f32 %v2586_v44, %v2586_v44  ;;  %v1369_v62 = vmul.f32 %v2589_v49, %v2589_v49 }
 0x256   : > { %v1385_v4 = vadd.f32 %v1369_v62, %v1368_v18 }
 0x257   : > { %v1319_v60 = vpop.xlane.xlu1 %1318 }
 0x258   : > { %v1344_v19 = vmul.f32 %v1341_v13, %v1319_v60  ;;  %1386 = vadd.xlane.f32.xlu0 %v1385_v4 }
 0x25a   : > { %v2596_v22 = vsub.f32 %v2519_v61, %v1344_v19  ;;  %v2599_v23 = vsub.f32 %v2522_v43, %v1344_v19  ;;  %v1309_v19 = vld [vmem:[%s2822_s5] sm:$0x3] }
 0x25c   : > { %v1370_v21 = vmul.f32 %v2596_v22, %v2596_v22  ;;  %v1371_v46 = vmul.f32 %v2599_v23, %v2599_v23 }
 0x25e   : > { %v1388_v27 = vadd.f32 %v1371_v46, %v1370_v21 }
 0x25f   : > { %v1322_v40 = vpop.xlane.xlu1 %1321 }
 0x260   : > { %v1345_v42 = vmul.f32 %v1341_v13, %v1322_v40  ;;  %1389 = vadd.xlane.f32.xlu1 %v1388_v27 }
 0x262   : > { %v2606_v45 = vsub.f32 %v2529_v38, %v1345_v42  ;;  %v2609_v20 = vsub.f32 %v2532_v14, %v1345_v42 }
 0x264   : > { %v1372_v61 = vmul.f32 %v2606_v45, %v2606_v45  ;;  %v1373_v43 = vmul.f32 %v2609_v20, %v2609_v20 }
 0x266   : > { %v1391_v41 = vadd.f32 %v1373_v43, %v1372_v61  ;;  %v2663_v43 = vperm.slane %v1309_v19, 0 }
 0x267   : > { %v1325_v9 = vpop.xlane.xlu2 %1324 }
 0x268   : > { %v1346_v12 = vmul.f32 %v1341_v13, %v1325_v9  ;;  %1392 = vadd.xlane.f32.xlu2 %v1391_v41 }
 0x26a   : > { %v2616_v5 = vsub.f32 %v2539_v50, %v1346_v12  ;;  %v2619_v28 = vsub.f32 %v2542_v53, %v1346_v12  ;;  %v2666_v12 = vperm.slane %v1309_v19, 1 }
 0x26c   : > { %v1374_v38 = vmul.f32 %v2616_v5, %v2616_v5  ;;  %v1375_v14 = vmul.f32 %v2619_v28, %v2619_v28 }
 0x26e   : > { %v1394_v63 = vadd.f32 %v1375_v14, %v1374_v38  ;;  %v1310_v38 = vld [vmem:[%s2823_s6] sm:$0x3] }
 0x26f   : > { %v1328_v24 = vpop.xlane.xlu2 %1327 }
 0x270   : > { %v1347_v2 = vmul.f32 %v1341_v13, %v1328_v24  ;;  %1395 = vadd.xlane.f32.xlu0 %v1394_v63 }
 0x272   : > { %v2626_v30 = vsub.f32 %v2549_v1, %v1347_v2  ;;  %v2629_v48 = vsub.f32 %v2552_v7, %v1347_v2  ;;  %v1531_v2 = vmul.f32 %v2663_v43, %v2576_v57 }
 0x274   : > { %v1376_v50 = vmul.f32 %v2626_v30, %v2626_v30  ;;  %v1377_v53 = vmul.f32 %v2629_v48, %v2629_v48 }
 0x276   : > { %v1397_v52 = vadd.f32 %v1377_v53, %v1376_v50 }
 0x277   : > { %v1331_v15 = vpop.xlane.xlu0 %1330 }
 0x278   : > { %v1348_v26 = vmul.f32 %v1341_v13, %v1331_v15  ;;  %1398 = vadd.xlane.f32.xlu1 %v1397_v52  ;;  %v1532_v52 = vmul.f32 %v2666_v12, %v2579_v39  ;;  %v2679_v15 = vperm.slane %v1310_v38, 0 }
 0x27a   : > { %v2636_v0 = vsub.f32 %v2559_v56, %v1348_v26  ;;  %v2639_v34 = vsub.f32 %v2562_v59, %v1348_v26  ;;  %v2681_v26 = vperm.slane %v1310_v38, 1  ;;  %v1536_v38 = vmul.f32 %v2666_v12, %v2599_v23 }
 0x27c   : > { %v1378_v1 = vmul.f32 %v2636_v0, %v2636_v0  ;;  %v1379_v7 = vmul.f32 %v2639_v34, %v2639_v34 }
 0x27e   : > { %v1400_v55 = vadd.f32 %v1379_v7, %v1378_v1 }
 0x27f   : > { %v1334_v47 = vpop.xlane.xlu1 %1333 }
 0x280   : > { %v1349_v51 = vmul.f32 %v1341_v13, %v1334_v47  ;;  %1401 = vadd.xlane.f32.xlu2 %v1400_v55 }
 0x282   : > { %v2646_v29 = vsub.f32 %v2568_v54, %v1349_v51  ;;  %v2649_v35 = vsub.f32 %v2571_v11, %v1349_v51 }
 0x284   : > { %v1380_v56 = vmul.f32 %v2646_v29, %v2646_v29  ;;  %v1381_v59 = vmul.f32 %v2649_v35, %v2649_v35 }
 0x286   : > { %v1403_v16 = vadd.f32 %v1381_v59, %v1380_v56 }
 0x288   : > { %1404 = vadd.xlane.f32.xlu0 %v1403_v16 }
 0x2c3   : > { %v1384_v25 = vpop.xlane.xlu2 %1383 }
 0x2c4   : > { %v1406_v3 = vmul.f32 0.003921569, %v1384_v25 }
 0x2c6   : > { %1791 = vrsqrt.f32 %v1406_v3  ;;  %vm1421_vm1 = vcmp.eq.f32.partialorder %v1406_v3, inf  ;;  %v1424_v62 = vand.u32 2147483648, %v1406_v3  ;;  %vm1423_vm2 = vcmp.eq.f32.partialorder %v1406_v3, 0.0 }
 0x2cb   : > { %v1387_v6 = vpop.xlane.xlu0 %1386 }
 0x2cc   : > { %v1792_v32 = vpop.eup %1791  ;;  %v1407_v10 = vmul.f32 0.003921569, %v1387_v6 }
 0x2cd   : > { %v1415_v13 = vmul.f32 %v1792_v32, %v1406_v3 }
 0x2ce   : > { %1793 = vrsqrt.f32 %v1407_v10  ;;  %vm1433_vm3 = vcmp.eq.f32.partialorder %v1407_v10, inf  ;;  %v1436_v24 = vand.u32 2147483648, %v1407_v10  ;;  %vm1435_vm4 = vcmp.eq.f32.partialorder %v1407_v10, 0.0 }
 0x2cf   : > { %v1416_v54 = vmul.f32 %v1792_v32, %v1415_v13 }
 0x2d1   : > { %v1417_v37 = vmul.f32 0.5, %v1416_v54 }
 0x2d3   : > { %v1418_v11 = vsub.f32 1.5, %v1417_v37  ;;  %v1390_v8 = vpop.xlane.xlu1 %1389 }
 0x2d4   : > { %v1794_v31 = vpop.eup %1793  ;;  %v2655_v33 = vmul.f32 0.003921569, %v1390_v8  ;;  %v1534_v8 = vmul.f32 %v2666_v12, %v2589_v49 }
 0x2d5   : > { %v1419_v36 = vmul.f32 %v1792_v32, %v1418_v11  ;;  %v1427_v58 = vmul.f32 %v1794_v31, %v1407_v10  ;;  %v1533_v11 = vmul.f32 %v2663_v43, %v2586_v44 }
 0x2d6   : > { %1795 = vrsqrt.f32 %v2655_v33  ;;  %vm1445_vm5 = vcmp.eq.f32.partialorder %v2655_v33, inf  ;;  %v1448_v13 = vand.u32 2147483648, %v2655_v33  ;;  %vm1447_vm6 = vcmp.eq.f32.partialorder %v2655_v33, 0.0 }
 0x2d7   : > { %v1420_v17 = vmul.f32 %v1419_v36, %v1406_v3  ;;  %v1428_v18 = vmul.f32 %v1794_v31, %v1427_v58 }
 0x2d9   : > { %v1422_v4 = vsel %vm1421_vm1, %v1406_v3, %v1420_v17  ;;  %v1429_v60 = vmul.f32 0.5, %v1428_v18 }
 0x2da   : > { %v1425_v21 = vsel %vm1423_vm2, %v1424_v62, %v1422_v4 }
 0x2db   : > { %v1510_v46 = vadd.f32 1e-06, %v1425_v21  ;;  %v1430_v27 = vsub.f32 1.5, %v1429_v60  ;;  %v1393_v40 = vpop.xlane.xlu2 %1392 }
 0x2dc   : > { %v1796_v42 = vpop.eup %1795  ;;  %v2661_v61 = vmul.f32 0.003921569, %v1393_v40 }
 0x2dd   : > { %1797 = vrcp.f32 %v1510_v46  ;;  %v1431_v41 = vmul.f32 %v1794_v31, %v1430_v27  ;;  %v1439_v9 = vmul.f32 %v1796_v42, %v2655_v33 }
 0x2de   : > { %1799 = vrsqrt.f32 %v2661_v61  ;;  %vm1457_vm7 = vcmp.eq.f32.partialorder %v2661_v61, inf  ;;  %v1460_v40 = vand.u32 2147483648, %v2661_v61  ;;  %vm1459_vm8 = vcmp.eq.f32.partialorder %v2661_v61, 0.0 }
 0x2df   : > { %v1432_v14 = vmul.f32 %v1431_v41, %v1407_v10  ;;  %v1440_v63 = vmul.f32 %v1796_v42, %v1439_v9  ;;  %v1535_v9 = vmul.f32 %v2663_v43, %v2596_v22 }
 0x2e1   : > { %v1434_v50 = vsel %vm1433_vm3, %v1407_v10, %v1432_v14  ;;  %v1441_v53 = vmul.f32 0.5, %v1440_v63 }
 0x2e2   : > { %v1437_v1 = vsel %vm1435_vm4, %v1436_v24, %v1434_v50 }
 0x2e3   : > { %v1798_v7 = vpop.eup %1797  ;;  %v1511_v55 = vadd.f32 1e-06, %v1437_v1  ;;  %v1442_v47 = vsub.f32 1.5, %v1441_v53  ;;  %v1396_v51 = vpop.xlane.xlu0 %1395 }
 0x2e4   : > { %v1800_v56 = vpop.eup %1799  ;;  %v1547_v59 = vmul.f32 %v1798_v7, %v1531_v2  ;;  %v1548_v57 = vmul.f32 %v1798_v7, %v1532_v52  ;;  %v2683_v16 = vmul.f32 0.003921569, %v1396_v51 }
 0x2e5   : > { %1801 = vrcp.f32 %v1511_v55  ;;  %v1443_v25 = vmul.f32 %v1796_v42, %v1442_v47  ;;  %v1451_v39 = vmul.f32 %v1800_v56, %v2661_v61 }
 0x2e6   : > { %v1568_v3 = vadd.f32 %v2679_v15, %v1547_v59  ;;  %v1569_v6 = vadd.f32 %v2681_v26, %v1548_v57  ;;  %1803 = vrsqrt.f32 %v2683_v16  ;;  %vm1469_vm9 = vcmp.eq.f32.partialorder %v2683_v16, inf }
 0x2e7   : > { %v1444_v32 = vmul.f32 %v1443_v25, %v2655_v33  ;;  %v1452_v10 = vmul.f32 %v1800_v56, %v1451_v39  ;;  %vm1471_vm10 = vcmp.eq.f32.partialorder %v2683_v16, 0.0  ;;  %v1537_v25 = vmul.f32 %v2663_v43, %v2606_v45 }
 0x2e8   : > { %1584 = vst [vmem:[%s2690_s16] sm:$0xff] %v1568_v3  ;;  %v1538_v39 = vmul.f32 %v2666_v12, %v2609_v20 }
 0x2e9   : > { %1585 = vst [vmem:[%s2690_s16 + $0x8] sm:$0xff] %v1569_v6  ;;  %v1446_v54 = vsel %vm1445_vm5, %v2655_v33, %v1444_v32  ;;  %v1453_v37 = vmul.f32 0.5, %v1452_v10 }
 0x2ea   : > { %v1449_v31 = vsel %vm1447_vm6, %v1448_v13, %v1446_v54 }
 0x2eb   : > { %v1802_v36 = vpop.eup %1801  ;;  %v1512_v58 = vadd.f32 1e-06, %v1449_v31  ;;  %v1454_v17 = vsub.f32 1.5, %v1453_v37  ;;  %v1399_v18 = vpop.xlane.xlu1 %1398 }
 0x2ec   : > { %v1804_v62 = vpop.eup %1803  ;;  %v1549_v4 = vmul.f32 %v1802_v36, %v1533_v11  ;;  %v1550_v60 = vmul.f32 %v1802_v36, %v1534_v8  ;;  %v2702_v19 = vmul.f32 0.003921569, %v1399_v18 }
 0x2ed   : > { %1805 = vrcp.f32 %v1512_v58  ;;  %v1455_v33 = vmul.f32 %v1800_v56, %v1454_v17  ;;  %v1463_v21 = vmul.f32 %v1804_v62, %v2683_v16  ;;  %v1472_v56 = vand.u32 2147483648, %v2683_v16 }
 0x2ee   : > { %v1570_v44 = vadd.f32 %v2679_v15, %v1549_v4  ;;  %v1571_v49 = vadd.f32 %v2681_v26, %v1550_v60  ;;  %1807 = vrsqrt.f32 %v2702_v19  ;;  %vm1481_vm11 = vcmp.eq.f32.partialorder %v2702_v19, inf }
 0x2ef   : > { %v1456_v46 = vmul.f32 %v1455_v33, %v2661_v61  ;;  %v1464_v27 = vmul.f32 %v1804_v62, %v1463_v21  ;;  %v1484_v17 = vand.u32 2147483648, %v2702_v19  ;;  %vm1483_vm12 = vcmp.eq.f32.partialorder %v2702_v19, 0.0 }
 0x2f0   : > { %1586 = vst [vmem:[%s2690_s16 + $0x10] sm:$0xff] %v1570_v44  ;;  %v1539_v4 = vmul.f32 %v2663_v43, %v2616_v5  ;;  %v1540_v60 = vmul.f32 %v2666_v12, %v2619_v28 }
 0x2f1   : > { %1587 = vst [vmem:[%s2690_s16 + $0x18] sm:$0xff] %v1571_v49  ;;  %v1458_v42 = vsel %vm1457_vm7, %v2661_v61, %v1456_v46  ;;  %v1465_v41 = vmul.f32 0.5, %v1464_v27 }
 0x2f2   : > { %v1461_v14 = vsel %vm1459_vm8, %v1460_v40, %v1458_v42 }
 0x2f3   : > { %v1806_v63 = vpop.eup %1805  ;;  %v1513_v24 = vadd.f32 1e-06, %v1461_v14  ;;  %v1466_v2 = vsub.f32 1.5, %v1465_v41  ;;  %v1402_v50 = vpop.xlane.xlu2 %1401 }
 0x2f4   : > { %v1808_v53 = vpop.eup %1807  ;;  %v1551_v52 = vmul.f32 %v1806_v63, %v1535_v9  ;;  %v1552_v1 = vmul.f32 %v1806_v63, %v1536_v38  ;;  %v2719_v7 = vmul.f32 0.003921569, %v1402_v50 }
 0x2f5   : > { %1809 = vrcp.f32 %v1513_v24  ;;  %v1467_v61 = vmul.f32 %v1804_v62, %v1466_v2  ;;  %v1475_v55 = vmul.f32 %v1808_v53, %v2702_v19  ;;  %v1541_v24 = vmul.f32 %v2663_v43, %v2626_v30 }
 0x2f6   : > { %v1572_v22 = vadd.f32 %v2679_v15, %v1551_v52  ;;  %v1573_v23 = vadd.f32 %v2681_v26, %v1552_v1  ;;  %1811 = vrsqrt.f32 %v2719_v7  ;;  %vm1493_vm13 = vcmp.eq.f32.partialorder %v2719_v7, inf }
 0x2f7   : > { %v1468_v47 = vmul.f32 %v1467_v61, %v2683_v16  ;;  %v1476_v51 = vmul.f32 %v1808_v53, %v1475_v55  ;;  %v1496_v28 = vand.u32 2147483648, %v2719_v7  ;;  %vm1495_vm14 = vcmp.eq.f32.partialorder %v2719_v7, 0.0 }
 0x2f8   : > { %1588 = vst [vmem:[%s2690_s16 + $0x20] sm:$0xff] %v1572_v22  ;;  %v1542_v2 = vmul.f32 %v2666_v12, %v2629_v48 }
 0x2f9   : > { %1589 = vst [vmem:[%s2690_s16 + $0x28] sm:$0xff] %v1573_v23  ;;  %v1470_v59 = vsel %vm1469_vm9, %v2683_v16, %v1468_v47  ;;  %v1477_v57 = vmul.f32 0.5, %v1476_v51  ;;  %v1543_v51 = vmul.f32 %v2663_v43, %v2636_v0  ;;  %v1545_v0 = vmul.f32 %v2663_v43, %v2646_v29 }
 0x2fa   : > { %v1473_v3 = vsel %vm1471_vm10, %v1472_v56, %v1470_v59  ;;  %v1544_v56 = vmul.f32 %v2666_v12, %v2639_v34  ;;  %v1546_v34 = vmul.f32 %v2666_v12, %v2649_v35 }
 0x2fb   : > { %v1810_v6 = vpop.eup %1809  ;;  %v1514_v32 = vadd.f32 1e-06, %v1473_v3  ;;  %v1478_v10 = vsub.f32 1.5, %v1477_v57  ;;  %v1405_v13 = vpop.xlane.xlu0 %1404 }
 0x2fc   : > { %v1812_v54 = vpop.eup %1811  ;;  %v1553_v37 = vmul.f32 %v1810_v6, %v1537_v25  ;;  %v1554_v11 = vmul.f32 %v1810_v6, %v1538_v39  ;;  %v1413_v8 = vmul.f32 0.003921569, %v1405_v13 }
 0x2fd   : > { %1813 = vrcp.f32 %v1514_v32  ;;  %v1479_v16 = vmul.f32 %v1808_v53, %v1478_v10  ;;  %v1487_v31 = vmul.f32 %v1812_v54, %v2719_v7 }
 0x2fe   : > { %v1574_v45 = vadd.f32 %v2679_v15, %v1553_v37  ;;  %v1575_v36 = vadd.f32 %v2681_v26, %v1554_v11  ;;  %1815 = vrsqrt.f32 %v1413_v8  ;;  %vm1505_vm15 = vcmp.eq.f32.partialorder %v1413_v8, inf }
 0x2ff   : > { %v1480_v20 = vmul.f32 %v1479_v16, %v2702_v19  ;;  %v1488_v58 = vmul.f32 %v1812_v54, %v1487_v31  ;;  %v1508_v30 = vand.u32 2147483648, %v1413_v8  ;;  %vm1507_vm0 = vcmp.eq.f32.partialorder %v1413_v8, 0.0 }
 0x300   : > { %1590 = vst [vmem:[%s2690_s16 + $0x30] sm:$0xff] %v1574_v45 }
 0x301   : > { %1591 = vst [vmem:[%s2690_s16 + $0x38] sm:$0xff] %v1575_v36  ;;  %v1482_v18 = vsel %vm1481_vm11, %v2702_v19, %v1480_v20  ;;  %v1489_v62 = vmul.f32 0.5, %v1488_v58 }
 0x302   : > { %v1485_v33 = vsel %vm1483_vm12, %v1484_v17, %v1482_v18 }
 0x303   : > { %v1814_v21 = vpop.eup %1813  ;;  %v1515_v44 = vadd.f32 1e-06, %v1485_v33  ;;  %v1490_v49 = vsub.f32 1.5, %v1489_v62 }
 0x304   : > { %v1816_v46 = vpop.eup %1815  ;;  %v1555_v27 = vmul.f32 %v1814_v21, %v1539_v4  ;;  %v1556_v40 = vmul.f32 %v1814_v21, %v1540_v60 }
 0x305   : > { %1817 = vrcp.f32 %v1515_v44  ;;  %v1491_v42 = vmul.f32 %v1812_v54, %v1490_v49  ;;  %v1499_v41 = vmul.f32 %v1816_v46, %v1413_v8 }
 0x306   : > { %v1576_v19 = vadd.f32 %v2679_v15, %v1555_v27  ;;  %v1577_v9 = vadd.f32 %v2681_v26, %v1556_v40 }
 0x307   : > { %v1492_v5 = vmul.f32 %v1491_v42, %v2719_v7  ;;  %v1500_v38 = vmul.f32 %v1816_v46, %v1499_v41 }
 0x308   : > { %1592 = vst [vmem:[%s2690_s16 + $0x40] sm:$0xff] %v1576_v19 }
 0x309   : > { %1593 = vst [vmem:[%s2690_s16 + $0x48] sm:$0xff] %v1577_v9  ;;  %v1494_v14 = vsel %vm1493_vm13, %v2719_v7, %v1492_v5  ;;  %v1501_v63 = vmul.f32 0.5, %v1500_v38 }
 0x30a   : > { %v1497_v50 = vsel %vm1495_vm14, %v1496_v28, %v1494_v14 }
 0x30b   : > { %v1818_v53 = vpop.eup %1817  ;;  %v1516_v52 = vadd.f32 1e-06, %v1497_v50  ;;  %v1502_v1 = vsub.f32 1.5, %v1501_v63 }
 0x30c   : > { %v1557_v61 = vmul.f32 %v1818_v53, %v1541_v24  ;;  %v1558_v55 = vmul.f32 %v1818_v53, %v1542_v2 }
 0x30d   : > { %1819 = vrcp.f32 %v1516_v52  ;;  %v1503_v22 = vmul.f32 %v1816_v46, %v1502_v1 }
 0x30e   : > { %v1578_v23 = vadd.f32 %v2679_v15, %v1557_v61  ;;  %v1579_v7 = vadd.f32 %v2681_v26, %v1558_v55 }
 0x30f   : > { %v1504_v47 = vmul.f32 %v1503_v22, %v1413_v8 }
 0x310   : > { %1594 = vst [vmem:[%s2690_s16 + $0x50] sm:$0xff] %v1578_v23 }
 0x311   : > { %1595 = vst [vmem:[%s2690_s16 + $0x58] sm:$0xff] %v1579_v7  ;;  %v1506_v48 = vsel %vm1505_vm15, %v1413_v8, %v1504_v47 }
 0x312   : > { %v1509_v59 = vsel %vm1507_vm0, %v1508_v30, %v1506_v48 }
 0x313   : > { %v1820_v57 = vpop.eup %1819  ;;  %v1517_v25 = vadd.f32 1e-06, %v1509_v59 }
 0x314   : > { %v1559_v39 = vmul.f32 %v1820_v57, %v1543_v51  ;;  %v1560_v3 = vmul.f32 %v1820_v57, %v1544_v56 }
 0x315   : > { %1821 = vrcp.f32 %v1517_v25 }
 0x316   : > { %v1580_v6 = vadd.f32 %v2679_v15, %v1559_v39  ;;  %v1581_v32 = vadd.f32 %v2681_v26, %v1560_v3 }
 0x318   : > { %1596 = vst [vmem:[%s2690_s16 + $0x60] sm:$0xff] %v1580_v6 }
 0x319   : > { %1597 = vst [vmem:[%s2690_s16 + $0x68] sm:$0xff] %v1581_v32 }
 0x31b   : > { %v1822_v10 = vpop.eup %1821 }
 0x31c   : > { %v1561_v13 = vmul.f32 %v1822_v10, %v1545_v0  ;;  %v1562_v54 = vmul.f32 %v1822_v10, %v1546_v34 }
 0x31e   : > { %v1582_v37 = vadd.f32 %v2679_v15, %v1561_v13  ;;  %v1583_v11 = vadd.f32 %v2681_v26, %v1562_v54 }
 0x320   : > { %1598 = vst [vmem:[%s2690_s16 + $0x70] sm:$0xff] %v1582_v37 }
 0x321   : > { %1599 = vst [vmem:[%s2690_s16 + $0x78] sm:$0xff] %v1583_v11 }
 0x322   : > { %1926 = shalt.err (!%p1923_p8)
}
 0x323   : > { %s1978_s9 = smov 256   ;;  %s1979_s16 = smov 16  }
 0x324   : > { %1730 = dma.vmem_to_hbm [thread:$0]  (%p2058_p5), %s1615_s28, 2048, %s1617_s21, %s1601_s22, %s1978_s9, %s1978_s9, %s1979_s16  }
 0x325 PF: > { %p1747_p9 = scmp.ge.s32.totalorder %s1969_s27, 2  ;;  %s1631_s18 = sand.u32 1, %s1957_s24  }
 0x326   : > { %s1632_s19 = scalar_lea.sflag [#allocation4], %s1631_s18 }
 0x327   : > { %p1740_p10 = pnand %p1747_p9, %p2062_p6 }
 0x329   : > { %p1741_p11 = pneg %p1740_p10 }
 0x32b   : > { %1952 = dma.done.wait (%p1741_p11), %s1632_s19, 2048  }
 0x32c   : > { %1954 = vsyncadd (%p1741_p11), %s1632_s19, 4294965248  ;;  %p19_p12 = scmp.ge.s32.totalorder %s2045_s30, 4   ;;  %s2829_s24 = smov %s1961_s25 }
 0x32d   : > { %s2830_s25 = smov %s1965_s26  ;;  %s2831_s26 = smov %s2056_s10 }
 0x32e   : > { %s2832_s27 = smov %s2045_s30  ;;  %21 = sbr.rel (!%p19_p12) target bundleno = 5 (0x5), region = 92 }
 0x333   :  { %1638 = vsyncpa [#allocation3], 1 }
 0x334   :  { %1640 = vsyncpa [#allocation3 + $0x1], 1 }
 0x335   :  { %1641 = vsyncpa [#allocation6], 1 }
 0x336   :  { %1642 = vsyncpa [#allocation4], 1 }
 0x337   :  { %1644 = vsyncpa [#allocation4 + $0x1], 1 }

</bundles_post_ra>
